<compile_context>
chip_gen: v6e
topology: v6e:2x2x1
jax: 0.10.0
libtpu: 0.0.40
codegen_flags: <defaults>
</compile_context>

<pallas_src>
import jax
import jax.numpy as jnp
from jax.experimental import pallas as pl
from jax.experimental.pallas import tpu as pltpu


# ------------------------------ fused forward kernel ------------------------------
def _make_text_rnn_kernel(n_layers, T, B, H, O):
    """Builds the fused forward kernel as a closure over the static sizes."""
    H4 = 4 * H

    def lstm_gates(pre, c_prev):
        # gate order i | f | g | o along the 4H axis (PyTorch convention); f32 math
        i = jax.nn.sigmoid(pre[:, 0 * H:1 * H])
        f = jax.nn.sigmoid(pre[:, 1 * H:2 * H])
        g = jnp.tanh(pre[:, 2 * H:3 * H])
        o = jax.nn.sigmoid(pre[:, 3 * H:4 * H])
        c = f * c_prev + i * g
        h = o * jnp.tanh(c)
        return h, c

    def kernel(*refs):
        # refs = (x, [wih, b, whh_f, whh_b] * n_layers, fc_w, fc_b, out, xp_scr, h_scr)
        x_ref = refs[0]
        layer_refs = [refs[1 + 4 * l: 1 + 4 * (l + 1)] for l in range(n_layers)]
        fcw_ref = refs[1 + 4 * n_layers]
        fcb_ref = refs[2 + 4 * n_layers]
        out_ref = refs[3 + 4 * n_layers]
        xp_scr = refs[4 + 4 * n_layers]   # (T*B, 8H) f32, reused by every layer
        h_scr = refs[5 + 4 * n_layers]    # (T*B, 2H) f32, time-major layer output

        for l in range(n_layers):
            wih_ref, b_ref, whhf_ref, whhb_ref = layer_refs[l]

            # ---- hoisted input projection for BOTH directions: one big MXU matmul ----
            # rows are time-major (row = t*B + b); columns [0:4H]=fwd, [4H:8H]=bwd
            layer_in = x_ref[...] if l == 0 else h_scr[...]
            xp_scr[...] = (
                jnp.dot(layer_in.astype(jnp.bfloat16), wih_ref[...],
                        preferred_element_type=jnp.float32)
                + b_ref[...])

            # ---- interleaved fwd/bwd recurrence: fully unrolled, static indices,
            #      h/c carried in vregs ----
            hf = jnp.zeros((B, H), jnp.float32)
            cf = jnp.zeros((B, H), jnp.float32)
            hb = jnp.zeros((B, H), jnp.float32)
            cb = jnp.zeros((B, H), jnp.float32)
            for s in range(T):
                t_f = s            # forward walks t = 0 .. T-1
                t_b = T - 1 - s    # backward walks t = T-1 .. 0
                pre_f = (xp_scr[t_f * B:(t_f + 1) * B, 0:H4]
                         + jnp.dot(hf.astype(jnp.bfloat16), whhf_ref[...],
                                   preferred_element_type=jnp.float32))
                pre_b = (xp_scr[t_b * B:(t_b + 1) * B, H4:2 * H4]
                         + jnp.dot(hb.astype(jnp.bfloat16), whhb_ref[...],
                                   preferred_element_type=jnp.float32))
                hf, cf = lstm_gates(pre_f, cf)
                hb, cb = lstm_gates(pre_b, cb)
                # layer output, time-major rows: [:, :H] = forward, [:, H:] = backward
                h_scr[t_f * B:(t_f + 1) * B, 0:H] = hf
                h_scr[t_b * B:(t_b + 1) * B, H:2 * H] = hb
            # inter-layer dropout == identity in eval mode

        # ---- final fc: one lane-dense matmul + full (T*B, O) unmasked store ----
        out_ref[...] = (
            jnp.dot(h_scr[...].astype(jnp.bfloat16), fcw_ref[...],
                    preferred_element_type=jnp.float32)
            + fcb_ref[...]).astype(out_ref.dtype)

    return kernel


# --------------------------------- parameters ---------------------------------
def init_params(key, input_size, hidden_size, output_size, n_layers):
    """Synthetic params, uniform(-1/sqrt(H), 1/sqrt(H)) like PyTorch.

    Stored pre-transposed, gate-fused, matmul operands cast to bf16 (f32 accumulation
    in-kernel):
      wih_cat: (d_in, 8H) bf16 = [W_ih_fwd | W_ih_bwd], gate order i|f|g|o in each 4H
      b_cat  : (1, 8H) f32     = [b_fwd | b_bwd]  (each = b_ih + b_hh)
      whh_f, whh_b : (H, 4H) bf16
      fc_w   : (2H, O) bf16,  fc_b: (1, O) f32
    """
    H = hidden_size
    params = {"layers": []}
    k = 1.0 / (H ** 0.5)
    for layer in range(n_layers):
        d_in = input_size if layer == 0 else 2 * H
        key, k1, k2, k3, k4, k5, k6 = jax.random.split(key, 7)
        wih_f = jax.random.uniform(k1, (d_in, 4 * H), jnp.float32, -k, k)
        wih_b = jax.random.uniform(k2, (d_in, 4 * H), jnp.float32, -k, k)
        whh_f = jax.random.uniform(k3, (H, 4 * H), jnp.float32, -k, k)
        whh_b = jax.random.uniform(k4, (H, 4 * H), jnp.float32, -k, k)
        b_f = jax.random.uniform(k5, (1, 4 * H), jnp.float32, -k, k)
        b_b = jax.random.uniform(k6, (1, 4 * H), jnp.float32, -k, k)
        params["layers"].append(dict(
            wih_cat=jnp.concatenate([wih_f, wih_b], axis=1).astype(jnp.bfloat16),
            b_cat=jnp.concatenate([b_f, b_b], axis=1),
            whh_f=whh_f.astype(jnp.bfloat16),
            whh_b=whh_b.astype(jnp.bfloat16),
        ))
    key, k1, k2 = jax.random.split(key, 3)
    kf = 1.0 / ((2 * H) ** 0.5)
    params["fc_w"] = jax.random.uniform(
        k1, (2 * H, output_size), jnp.float32, -kf, kf).astype(jnp.bfloat16)
    params["fc_b"] = jax.random.uniform(k2, (1, output_size), jnp.float32, -kf, kf)
    return params


# ----------------------------------- forward -----------------------------------
@jax.jit
def text_rnn_forward(params, x):
    """x: (B, T, input_size) -> (B, T, output_size). Matches TextRNN.forward (eval)."""
    B, T, D = x.shape
    layers = params["layers"]
    n_layers = len(layers)
    H = layers[0]["whh_f"].shape[0]
    O = params["fc_w"].shape[1]
    assert H % 128 == 0, "hidden_size must be a multiple of 128 for lane-aligned gate slices"

    # dropout(input_ids) == identity in eval mode.
    # Single input relayout to time-major rows (row index = t*B + b).
    x_tm = jnp.transpose(x, (1, 0, 2)).reshape(T * B, D)

    args = [x_tm]
    for lp in layers:
        args += [lp["wih_cat"], lp["b_cat"], lp["whh_f"], lp["whh_b"]]
    args += [params["fc_w"], params["fc_b"]]

    kernel = _make_text_rnn_kernel(n_layers, T, B, H, O)
    out_tm = pl.pallas_call(
        kernel,
        out_shape=jax.ShapeDtypeStruct((T * B, O), jnp.float32),
        in_specs=[pl.BlockSpec(memory_space=pltpu.MemorySpace.VMEM) for _ in args],
        out_specs=pl.BlockSpec(memory_space=pltpu.MemorySpace.VMEM),
        scratch_shapes=[
            pltpu.VMEM((T * B, 8 * H), jnp.float32),   # fused pre-activations (reused per layer)
            pltpu.VMEM((T * B, 2 * H), jnp.float32),   # time-major layer output
        ],
    )(*args)

    # TODO(synk): fold this tiny (T,B,O)->(B,T,O) relayout into the kernel (per-batch
    #             strided reads + out_ref[b] full-sublane stores) once validated.
    return jnp.transpose(out_tm.reshape(T, B, O), (1, 0, 2))


if __name__ == "__main__":
    # Module defaults: input_size=256, hidden_size=128, output_size=768, n_layers=2.
    B, T = 2, 8
    input_size, hidden_size, output_size, n_layers = 256, 128, 768, 2

    key = jax.random.PRNGKey(0)
    kx, kp = jax.random.split(key)
    x = jax.random.normal(kx, (B, T, input_size), dtype=jnp.float32)
    params = init_params(kp, input_size, hidden_size, output_size, n_layers)

    out = text_rnn_forward(params, x)
    jax.block_until_ready(out)
    assert out.shape == (B, T, output_size), out.shape
    assert out.dtype == jnp.float32
    assert bool(jnp.all(jnp.isfinite(out)))
    print("KERNEL_OK")
</pallas_src>

<mosaic_0001>
module attributes {stable_mosaic.version = 11 : i64} {
  func.func @kernel(%arg0: memref<16x256xf32, #tpu.memory_space<vmem>>, %arg1: memref<256x1024xbf16, #tpu.memory_space<vmem>>, %arg2: memref<1x1024xf32, #tpu.memory_space<vmem>>, %arg3: memref<128x512xbf16, #tpu.memory_space<vmem>>, %arg4: memref<128x512xbf16, #tpu.memory_space<vmem>>, %arg5: memref<256x1024xbf16, #tpu.memory_space<vmem>>, %arg6: memref<1x1024xf32, #tpu.memory_space<vmem>>, %arg7: memref<128x512xbf16, #tpu.memory_space<vmem>>, %arg8: memref<128x512xbf16, #tpu.memory_space<vmem>>, %arg9: memref<256x768xbf16, #tpu.memory_space<vmem>>, %arg10: memref<1x768xf32, #tpu.memory_space<vmem>>, %arg11: memref<16x768xf32, #tpu.memory_space<vmem>>, %arg12: memref<16x1024xf32, #tpu.memory_space<vmem>>, %arg13: memref<16x256xf32, #tpu.memory_space<vmem>>) attributes {dimension_semantics = [], scalar_prefetch = 0 : i64, scratch_operands = 2 : i64, tpu.core_type = #tpu.core_type<tc>} {
    %c0 = arith.constant 0 : index
    %c0_0 = arith.constant 0 : index
    %0 = vector.load %arg0[%c0, %c0_0] : memref<16x256xf32, #tpu.memory_space<vmem>>, vector<16x256xf32>
    %1 = arith.truncf %0 : vector<16x256xf32> to vector<16x256xbf16>
    %c0_1 = arith.constant 0 : index
    %c0_2 = arith.constant 0 : index
    %2 = vector.load %arg1[%c0_1, %c0_2] : memref<256x1024xbf16, #tpu.memory_space<vmem>>, vector<256x1024xbf16>
    %cst = arith.constant dense<0.000000e+00> : vector<16x1024xf32>
    %3 = tpu.matmul %1, %2, %cst {dimension_numbers = #tpu.dot_dimension_numbers<[1], [0], [0], [1], [0, 0, 1, 1], [], []>} : vector<16x256xbf16>, vector<256x1024xbf16>, vector<16x1024xf32> -> vector<16x1024xf32>
    %c0_3 = arith.constant 0 : index
    %c0_4 = arith.constant 0 : index
    %4 = vector.load %arg2[%c0_3, %c0_4] : memref<1x1024xf32, #tpu.memory_space<vmem>>, vector<1x1024xf32>
    %5 = vector.broadcast %4 : vector<1x1024xf32> to vector<16x1024xf32>
    %6 = arith.addf %3, %5 : vector<16x1024xf32>
    %c0_5 = arith.constant 0 : index
    %c0_6 = arith.constant 0 : index
    %7 = vector.load %arg12[%c0_5, %c0_6] : memref<16x1024xf32, #tpu.memory_space<vmem>>, vector<16x1024xf32>
    tpu.vector_store %arg12[%c0_5, %c0_6], %6 {strides = array<i32>} : memref<16x1024xf32, #tpu.memory_space<vmem>>, vector<16x1024xf32>,
    %cst_7 = arith.constant 0.000000e+00 : f32
    %8 = vector.broadcast %cst_7 : f32 to vector<2x128xf32>
    %cst_8 = arith.constant 0.000000e+00 : f32
    %9 = vector.broadcast %cst_8 : f32 to vector<2x128xf32>
    %cst_9 = arith.constant 0.000000e+00 : f32
    %10 = vector.broadcast %cst_9 : f32 to vector<2x128xf32>
    %cst_10 = arith.constant 0.000000e+00 : f32
    %11 = vector.broadcast %cst_10 : f32 to vector<2x128xf32>
    %c0_11 = arith.constant 0 : index
    %c0_12 = arith.constant 0 : index
    %12 = vector.load %arg12[%c0_11, %c0_12] : memref<16x1024xf32, #tpu.memory_space<vmem>>, vector<2x512xf32>
    %13 = arith.truncf %8 : vector<2x128xf32> to vector<2x128xbf16>
    %c0_13 = arith.constant 0 : index
    %c0_14 = arith.constant 0 : index
    %14 = vector.load %arg3[%c0_13, %c0_14] : memref<128x512xbf16, #tpu.memory_space<vmem>>, vector<128x512xbf16>
    %cst_15 = arith.constant dense<0.000000e+00> : vector<2x512xf32>
    %15 = tpu.matmul %13, %14, %cst_15 {dimension_numbers = #tpu.dot_dimension_numbers<[1], [0], [0], [1], [0, 0, 1, 1], [], []>} : vector<2x128xbf16>, vector<128x512xbf16>, vector<2x512xf32> -> vector<2x512xf32>
    %16 = arith.addf %12, %15 : vector<2x512xf32>
    %c14 = arith.constant 14 : index
    %c512 = arith.constant 512 : index
    %17 = vector.load %arg12[%c14, %c512] : memref<16x1024xf32, #tpu.memory_space<vmem>>, vector<2x512xf32>
    %18 = arith.truncf %10 : vector<2x128xf32> to vector<2x128xbf16>
    %c0_16 = arith.constant 0 : index
    %c0_17 = arith.constant 0 : index
    %19 = vector.load %arg4[%c0_16, %c0_17] : memref<128x512xbf16, #tpu.memory_space<vmem>>, vector<128x512xbf16>
    %cst_18 = arith.constant dense<0.000000e+00> : vector<2x512xf32>
    %20 = tpu.matmul %18, %19, %cst_18 {dimension_numbers = #tpu.dot_dimension_numbers<[1], [0], [0], [1], [0, 0, 1, 1], [], []>} : vector<2x128xbf16>, vector<128x512xbf16>, vector<2x512xf32> -> vector<2x512xf32>
    %21 = arith.addf %17, %20 : vector<2x512xf32>
    %22 = vector.extract_strided_slice %16 {offsets = [0, 0], sizes = [2, 128], strides = [1, 1]} : vector<2x512xf32> to vector<2x128xf32>
    %23 = arith.negf %22 : vector<2x128xf32>
    %24 = math.exp %23 : vector<2x128xf32>
    %cst_19 = arith.constant 1.000000e+00 : f32
    %25 = vector.broadcast %cst_19 : f32 to vector<2x128xf32>
    %26 = arith.addf %25, %24 : vector<2x128xf32>
    %27 = arith.divf %25, %26 : vector<2x128xf32>
    %28 = vector.extract_strided_slice %16 {offsets = [0, 128], sizes = [2, 128], strides = [1, 1]} : vector<2x512xf32> to vector<2x128xf32>
    %29 = arith.negf %28 : vector<2x128xf32>
    %30 = math.exp %29 : vector<2x128xf32>
    %cst_20 = arith.constant 1.000000e+00 : f32
    %31 = vector.broadcast %cst_20 : f32 to vector<2x128xf32>
    %32 = arith.addf %31, %30 : vector<2x128xf32>
    %33 = arith.divf %31, %32 : vector<2x128xf32>
    %34 = vector.extract_strided_slice %16 {offsets = [0, 256], sizes = [2, 128], strides = [1, 1]} : vector<2x512xf32> to vector<2x128xf32>
    %35 = math.tanh %34 : vector<2x128xf32>
    %36 = vector.extract_strided_slice %16 {offsets = [0, 384], sizes = [2, 128], strides = [1, 1]} : vector<2x512xf32> to vector<2x128xf32>
    %37 = arith.negf %36 : vector<2x128xf32>
    %38 = math.exp %37 : vector<2x128xf32>
    %cst_21 = arith.constant 1.000000e+00 : f32
    %39 = vector.broadcast %cst_21 : f32 to vector<2x128xf32>
    %40 = arith.addf %39, %38 : vector<2x128xf32>
    %41 = arith.divf %39, %40 : vector<2x128xf32>
    %42 = arith.mulf %33, %9 : vector<2x128xf32>
    %43 = arith.mulf %27, %35 : vector<2x128xf32>
    %44 = arith.addf %42, %43 : vector<2x128xf32>
    %45 = math.tanh %44 : vector<2x128xf32>
    %46 = arith.mulf %41, %45 : vector<2x128xf32>
    %47 = vector.extract_strided_slice %21 {offsets = [0, 0], sizes = [2, 128], strides = [1, 1]} : vector<2x512xf32> to vector<2x128xf32>
    %48 = arith.negf %47 : vector<2x128xf32>
    %49 = math.exp %48 : vector<2x128xf32>
    %cst_22 = arith.constant 1.000000e+00 : f32
    %50 = vector.broadcast %cst_22 : f32 to vector<2x128xf32>
    %51 = arith.addf %50, %49 : vector<2x128xf32>
    %52 = arith.divf %50, %51 : vector<2x128xf32>
    %53 = vector.extract_strided_slice %21 {offsets = [0, 128], sizes = [2, 128], strides = [1, 1]} : vector<2x512xf32> to vector<2x128xf32>
    %54 = arith.negf %53 : vector<2x128xf32>
    %55 = math.exp %54 : vector<2x128xf32>
    %cst_23 = arith.constant 1.000000e+00 : f32
    %56 = vector.broadcast %cst_23 : f32 to vector<2x128xf32>
    %57 = arith.addf %56, %55 : vector<2x128xf32>
    %58 = arith.divf %56, %57 : vector<2x128xf32>
    %59 = vector.extract_strided_slice %21 {offsets = [0, 256], sizes = [2, 128], strides = [1, 1]} : vector<2x512xf32> to vector<2x128xf32>
    %60 = math.tanh %59 : vector<2x128xf32>
    %61 = vector.extract_strided_slice %21 {offsets = [0, 384], sizes = [2, 128], strides = [1, 1]} : vector<2x512xf32> to vector<2x128xf32>
    %62 = arith.negf %61 : vector<2x128xf32>
    %63 = math.exp %62 : vector<2x128xf32>
    %cst_24 = arith.constant 1.000000e+00 : f32
    %64 = vector.broadcast %cst_24 : f32 to vector<2x128xf32>
    %65 = arith.addf %64, %63 : vector<2x128xf32>
    %66 = arith.divf %64, %65 : vector<2x128xf32>
    %67 = arith.mulf %58, %11 : vector<2x128xf32>
    %68 = arith.mulf %52, %60 : vector<2x128xf32>
    %69 = arith.addf %67, %68 : vector<2x128xf32>
    %70 = math.tanh %69 : vector<2x128xf32>
    %71 = arith.mulf %66, %70 : vector<2x128xf32>
    %c0_25 = arith.constant 0 : index
    %c0_26 = arith.constant 0 : index
    %72 = vector.load %arg13[%c0_25, %c0_26] : memref<16x256xf32, #tpu.memory_space<vmem>>, vector<2x128xf32>
    tpu.vector_store %arg13[%c0_25, %c0_26], %46 {strides = array<i32>} : memref<16x256xf32, #tpu.memory_space<vmem>>, vector<2x128xf32>,
    %c14_27 = arith.constant 14 : index
    %c128 = arith.constant 128 : index
    %73 = vector.load %arg13[%c14_27, %c128] : memref<16x256xf32, #tpu.memory_space<vmem>>, vector<2x128xf32>
    tpu.vector_store %arg13[%c14_27, %c128], %71 {strides = array<i32>} : memref<16x256xf32, #tpu.memory_space<vmem>>, vector<2x128xf32>,
    %c2 = arith.constant 2 : index
    %c0_28 = arith.constant 0 : index
    %74 = vector.load %arg12[%c2, %c0_28] : memref<16x1024xf32, #tpu.memory_space<vmem>>, vector<2x512xf32>
    %75 = arith.truncf %46 : vector<2x128xf32> to vector<2x128xbf16>
    %c0_29 = arith.constant 0 : index
    %c0_30 = arith.constant 0 : index
    %76 = vector.load %arg3[%c0_29, %c0_30] : memref<128x512xbf16, #tpu.memory_space<vmem>>, vector<128x512xbf16>
    %cst_31 = arith.constant dense<0.000000e+00> : vector<2x512xf32>
    %77 = tpu.matmul %75, %76, %cst_31 {dimension_numbers = #tpu.dot_dimension_numbers<[1], [0], [0], [1], [0, 0, 1, 1], [], []>} : vector<2x128xbf16>, vector<128x512xbf16>, vector<2x512xf32> -> vector<2x512xf32>
    %78 = arith.addf %74, %77 : vector<2x512xf32>
    %c12 = arith.constant 12 : index
    %c512_32 = arith.constant 512 : index
    %79 = vector.load %arg12[%c12, %c512_32] : memref<16x1024xf32, #tpu.memory_space<vmem>>, vector<2x512xf32>
    %80 = arith.truncf %71 : vector<2x128xf32> to vector<2x128xbf16>
    %c0_33 = arith.constant 0 : index
    %c0_34 = arith.constant 0 : index
    %81 = vector.load %arg4[%c0_33, %c0_34] : memref<128x512xbf16, #tpu.memory_space<vmem>>, vector<128x512xbf16>
    %cst_35 = arith.constant dense<0.000000e+00> : vector<2x512xf32>
    %82 = tpu.matmul %80, %81, %cst_35 {dimension_numbers = #tpu.dot_dimension_numbers<[1], [0], [0], [1], [0, 0, 1, 1], [], []>} : vector<2x128xbf16>, vector<128x512xbf16>, vector<2x512xf32> -> vector<2x512xf32>
    %83 = arith.addf %79, %82 : vector<2x512xf32>
    %84 = vector.extract_strided_slice %78 {offsets = [0, 0], sizes = [2, 128], strides = [1, 1]} : vector<2x512xf32> to vector<2x128xf32>
    %85 = arith.negf %84 : vector<2x128xf32>
    %86 = math.exp %85 : vector<2x128xf32>
    %cst_36 = arith.constant 1.000000e+00 : f32
    %87 = vector.broadcast %cst_36 : f32 to vector<2x128xf32>
    %88 = arith.addf %87, %86 : vector<2x128xf32>
    %89 = arith.divf %87, %88 : vector<2x128xf32>
    %90 = vector.extract_strided_slice %78 {offsets = [0, 128], sizes = [2, 128], strides = [1, 1]} : vector<2x512xf32> to vector<2x128xf32>
    %91 = arith.negf %90 : vector<2x128xf32>
    %92 = math.exp %91 : vector<2x128xf32>
    %cst_37 = arith.constant 1.000000e+00 : f32
    %93 = vector.broadcast %cst_37 : f32 to vector<2x128xf32>
    %94 = arith.addf %93, %92 : vector<2x128xf32>
    %95 = arith.divf %93, %94 : vector<2x128xf32>
    %96 = vector.extract_strided_slice %78 {offsets = [0, 256], sizes = [2, 128], strides = [1, 1]} : vector<2x512xf32> to vector<2x128xf32>
    %97 = math.tanh %96 : vector<2x128xf32>
    %98 = vector.extract_strided_slice %78 {offsets = [0, 384], sizes = [2, 128], strides = [1, 1]} : vector<2x512xf32> to vector<2x128xf32>
    %99 = arith.negf %98 : vector<2x128xf32>
    %100 = math.exp %99 : vector<2x128xf32>
    %cst_38 = arith.constant 1.000000e+00 : f32
    %101 = vector.broadcast %cst_38 : f32 to vector<2x128xf32>
    %102 = arith.addf %101, %100 : vector<2x128xf32>
    %103 = arith.divf %101, %102 : vector<2x128xf32>
    %104 = arith.mulf %95, %44 : vector<2x128xf32>
    %105 = arith.mulf %89, %97 : vector<2x128xf32>
    %106 = arith.addf %104, %105 : vector<2x128xf32>
    %107 = math.tanh %106 : vector<2x128xf32>
    %108 = arith.mulf %103, %107 : vector<2x128xf32>
    %109 = vector.extract_strided_slice %83 {offsets = [0, 0], sizes = [2, 128], strides = [1, 1]} : vector<2x512xf32> to vector<2x128xf32>
    %110 = arith.negf %109 : vector<2x128xf32>
    %111 = math.exp %110 : vector<2x128xf32>
    %cst_39 = arith.constant 1.000000e+00 : f32
    %112 = vector.broadcast %cst_39 : f32 to vector<2x128xf32>
    %113 = arith.addf %112, %111 : vector<2x128xf32>
    %114 = arith.divf %112, %113 : vector<2x128xf32>
    %115 = vector.extract_strided_slice %83 {offsets = [0, 128], sizes = [2, 128], strides = [1, 1]} : vector<2x512xf32> to vector<2x128xf32>
    %116 = arith.negf %115 : vector<2x128xf32>
    %117 = math.exp %116 : vector<2x128xf32>
    %cst_40 = arith.constant 1.000000e+00 : f32
    %118 = vector.broadcast %cst_40 : f32 to vector<2x128xf32>
    %119 = arith.addf %118, %117 : vector<2x128xf32>
    %120 = arith.divf %118, %119 : vector<2x128xf32>
    %121 = vector.extract_strided_slice %83 {offsets = [0, 256], sizes = [2, 128], strides = [1, 1]} : vector<2x512xf32> to vector<2x128xf32>
    %122 = math.tanh %121 : vector<2x128xf32>
    %123 = vector.extract_strided_slice %83 {offsets = [0, 384], sizes = [2, 128], strides = [1, 1]} : vector<2x512xf32> to vector<2x128xf32>
    %124 = arith.negf %123 : vector<2x128xf32>
    %125 = math.exp %124 : vector<2x128xf32>
    %cst_41 = arith.constant 1.000000e+00 : f32
    %126 = vector.broadcast %cst_41 : f32 to vector<2x128xf32>
    %127 = arith.addf %126, %125 : vector<2x128xf32>
    %128 = arith.divf %126, %127 : vector<2x128xf32>
    %129 = arith.mulf %120, %69 : vector<2x128xf32>
    %130 = arith.mulf %114, %122 : vector<2x128xf32>
    %131 = arith.addf %129, %130 : vector<2x128xf32>
    %132 = math.tanh %131 : vector<2x128xf32>
    %133 = arith.mulf %128, %132 : vector<2x128xf32>
    %c2_42 = arith.constant 2 : index
    %c0_43 = arith.constant 0 : index
    %134 = vector.load %arg13[%c2_42, %c0_43] : memref<16x256xf32, #tpu.memory_space<vmem>>, vector<2x128xf32>
    tpu.vector_store %arg13[%c2_42, %c0_43], %108 {strides = array<i32>} : memref<16x256xf32, #tpu.memory_space<vmem>>, vector<2x128xf32>,
    %c12_44 = arith.constant 12 : index
    %c128_45 = arith.constant 128 : index
    %135 = vector.load %arg13[%c12_44, %c128_45] : memref<16x256xf32, #tpu.memory_space<vmem>>, vector<2x128xf32>
    tpu.vector_store %arg13[%c12_44, %c128_45], %133 {strides = array<i32>} : memref<16x256xf32, #tpu.memory_space<vmem>>, vector<2x128xf32>,
    %c4 = arith.constant 4 : index
    %c0_46 = arith.constant 0 : index
    %136 = vector.load %arg12[%c4, %c0_46] : memref<16x1024xf32, #tpu.memory_space<vmem>>, vector<2x512xf32>
    %137 = arith.truncf %108 : vector<2x128xf32> to vector<2x128xbf16>
    %c0_47 = arith.constant 0 : index
    %c0_48 = arith.constant 0 : index
    %138 = vector.load %arg3[%c0_47, %c0_48] : memref<128x512xbf16, #tpu.memory_space<vmem>>, vector<128x512xbf16>
    %cst_49 = arith.constant dense<0.000000e+00> : vector<2x512xf32>
    %139 = tpu.matmul %137, %138, %cst_49 {dimension_numbers = #tpu.dot_dimension_numbers<[1], [0], [0], [1], [0, 0, 1, 1], [], []>} : vector<2x128xbf16>, vector<128x512xbf16>, vector<2x512xf32> -> vector<2x512xf32>
    %140 = arith.addf %136, %139 : vector<2x512xf32>
    %c10 = arith.constant 10 : index
    %c512_50 = arith.constant 512 : index
    %141 = vector.load %arg12[%c10, %c512_50] : memref<16x1024xf32, #tpu.memory_space<vmem>>, vector<2x512xf32>
    %142 = arith.truncf %133 : vector<2x128xf32> to vector<2x128xbf16>
    %c0_51 = arith.constant 0 : index
    %c0_52 = arith.constant 0 : index
    %143 = vector.load %arg4[%c0_51, %c0_52] : memref<128x512xbf16, #tpu.memory_space<vmem>>, vector<128x512xbf16>
    %cst_53 = arith.constant dense<0.000000e+00> : vector<2x512xf32>
    %144 = tpu.matmul %142, %143, %cst_53 {dimension_numbers = #tpu.dot_dimension_numbers<[1], [0], [0], [1], [0, 0, 1, 1], [], []>} : vector<2x128xbf16>, vector<128x512xbf16>, vector<2x512xf32> -> vector<2x512xf32>
    %145 = arith.addf %141, %144 : vector<2x512xf32>
    %146 = vector.extract_strided_slice %140 {offsets = [0, 0], sizes = [2, 128], strides = [1, 1]} : vector<2x512xf32> to vector<2x128xf32>
    %147 = arith.negf %146 : vector<2x128xf32>
    %148 = math.exp %147 : vector<2x128xf32>
    %cst_54 = arith.constant 1.000000e+00 : f32
    %149 = vector.broadcast %cst_54 : f32 to vector<2x128xf32>
    %150 = arith.addf %149, %148 : vector<2x128xf32>
    %151 = arith.divf %149, %150 : vector<2x128xf32>
    %152 = vector.extract_strided_slice %140 {offsets = [0, 128], sizes = [2, 128], strides = [1, 1]} : vector<2x512xf32> to vector<2x128xf32>
    %153 = arith.negf %152 : vector<2x128xf32>
    %154 = math.exp %153 : vector<2x128xf32>
    %cst_55 = arith.constant 1.000000e+00 : f32
    %155 = vector.broadcast %cst_55 : f32 to vector<2x128xf32>
    %156 = arith.addf %155, %154 : vector<2x128xf32>
    %157 = arith.divf %155, %156 : vector<2x128xf32>
    %158 = vector.extract_strided_slice %140 {offsets = [0, 256], sizes = [2, 128], strides = [1, 1]} : vector<2x512xf32> to vector<2x128xf32>
    %159 = math.tanh %158 : vector<2x128xf32>
    %160 = vector.extract_strided_slice %140 {offsets = [0, 384], sizes = [2, 128], strides = [1, 1]} : vector<2x512xf32> to vector<2x128xf32>
    %161 = arith.negf %160 : vector<2x128xf32>
    %162 = math.exp %161 : vector<2x128xf32>
    %cst_56 = arith.constant 1.000000e+00 : f32
    %163 = vector.broadcast %cst_56 : f32 to vector<2x128xf32>
    %164 = arith.addf %163, %162 : vector<2x128xf32>
    %165 = arith.divf %163, %164 : vector<2x128xf32>
    %166 = arith.mulf %157, %106 : vector<2x128xf32>
    %167 = arith.mulf %151, %159 : vector<2x128xf32>
    %168 = arith.addf %166, %167 : vector<2x128xf32>
    %169 = math.tanh %168 : vector<2x128xf32>
    %170 = arith.mulf %165, %169 : vector<2x128xf32>
    %171 = vector.extract_strided_slice %145 {offsets = [0, 0], sizes = [2, 128], strides = [1, 1]} : vector<2x512xf32> to vector<2x128xf32>
    %172 = arith.negf %171 : vector<2x128xf32>
    %173 = math.exp %172 : vector<2x128xf32>
    %cst_57 = arith.constant 1.000000e+00 : f32
    %174 = vector.broadcast %cst_57 : f32 to vector<2x128xf32>
    %175 = arith.addf %174, %173 : vector<2x128xf32>
    %176 = arith.divf %174, %175 : vector<2x128xf32>
    %177 = vector.extract_strided_slice %145 {offsets = [0, 128], sizes = [2, 128], strides = [1, 1]} : vector<2x512xf32> to vector<2x128xf32>
    %178 = arith.negf %177 : vector<2x128xf32>
    %179 = math.exp %178 : vector<2x128xf32>
    %cst_58 = arith.constant 1.000000e+00 : f32
    %180 = vector.broadcast %cst_58 : f32 to vector<2x128xf32>
    %181 = arith.addf %180, %179 : vector<2x128xf32>
    %182 = arith.divf %180, %181 : vector<2x128xf32>
    %183 = vector.extract_strided_slice %145 {offsets = [0, 256], sizes = [2, 128], strides = [1, 1]} : vector<2x512xf32> to vector<2x128xf32>
    %184 = math.tanh %183 : vector<2x128xf32>
    %185 = vector.extract_strided_slice %145 {offsets = [0, 384], sizes = [2, 128], strides = [1, 1]} : vector<2x512xf32> to vector<2x128xf32>
    %186 = arith.negf %185 : vector<2x128xf32>
    %187 = math.exp %186 : vector<2x128xf32>
    %cst_59 = arith.constant 1.000000e+00 : f32
    %188 = vector.broadcast %cst_59 : f32 to vector<2x128xf32>
    %189 = arith.addf %188, %187 : vector<2x128xf32>
    %190 = arith.divf %188, %189 : vector<2x128xf32>
    %191 = arith.mulf %182, %131 : vector<2x128xf32>
    %192 = arith.mulf %176, %184 : vector<2x128xf32>
    %193 = arith.addf %191, %192 : vector<2x128xf32>
    %194 = math.tanh %193 : vector<2x128xf32>
    %195 = arith.mulf %190, %194 : vector<2x128xf32>
    %c4_60 = arith.constant 4 : index
    %c0_61 = arith.constant 0 : index
    %196 = vector.load %arg13[%c4_60, %c0_61] : memref<16x256xf32, #tpu.memory_space<vmem>>, vector<2x128xf32>
    tpu.vector_store %arg13[%c4_60, %c0_61], %170 {strides = array<i32>} : memref<16x256xf32, #tpu.memory_space<vmem>>, vector<2x128xf32>,
    %c10_62 = arith.constant 10 : index
    %c128_63 = arith.constant 128 : index
    %197 = vector.load %arg13[%c10_62, %c128_63] : memref<16x256xf32, #tpu.memory_space<vmem>>, vector<2x128xf32>
    tpu.vector_store %arg13[%c10_62, %c128_63], %195 {strides = array<i32>} : memref<16x256xf32, #tpu.memory_space<vmem>>, vector<2x128xf32>,
    %c6 = arith.constant 6 : index
    %c0_64 = arith.constant 0 : index
    %198 = vector.load %arg12[%c6, %c0_64] : memref<16x1024xf32, #tpu.memory_space<vmem>>, vector<2x512xf32>
    %199 = arith.truncf %170 : vector<2x128xf32> to vector<2x128xbf16>
    %c0_65 = arith.constant 0 : index
    %c0_66 = arith.constant 0 : index
    %200 = vector.load %arg3[%c0_65, %c0_66] : memref<128x512xbf16, #tpu.memory_space<vmem>>, vector<128x512xbf16>
    %cst_67 = arith.constant dense<0.000000e+00> : vector<2x512xf32>
    %201 = tpu.matmul %199, %200, %cst_67 {dimension_numbers = #tpu.dot_dimension_numbers<[1], [0], [0], [1], [0, 0, 1, 1], [], []>} : vector<2x128xbf16>, vector<128x512xbf16>, vector<2x512xf32> -> vector<2x512xf32>
    %202 = arith.addf %198, %201 : vector<2x512xf32>
    %c8 = arith.constant 8 : index
    %c512_68 = arith.constant 512 : index
    %203 = vector.load %arg12[%c8, %c512_68] : memref<16x1024xf32, #tpu.memory_space<vmem>>, vector<2x512xf32>
    %204 = arith.truncf %195 : vector<2x128xf32> to vector<2x128xbf16>
    %c0_69 = arith.constant 0 : index
    %c0_70 = arith.constant 0 : index
    %205 = vector.load %arg4[%c0_69, %c0_70] : memref<128x512xbf16, #tpu.memory_space<vmem>>, vector<128x512xbf16>
    %cst_71 = arith.constant dense<0.000000e+00> : vector<2x512xf32>
    %206 = tpu.matmul %204, %205, %cst_71 {dimension_numbers = #tpu.dot_dimension_numbers<[1], [0], [0], [1], [0, 0, 1, 1], [], []>} : vector<2x128xbf16>, vector<128x512xbf16>, vector<2x512xf32> -> vector<2x512xf32>
    %207 = arith.addf %203, %206 : vector<2x512xf32>
    %208 = vector.extract_strided_slice %202 {offsets = [0, 0], sizes = [2, 128], strides = [1, 1]} : vector<2x512xf32> to vector<2x128xf32>
    %209 = arith.negf %208 : vector<2x128xf32>
    %210 = math.exp %209 : vector<2x128xf32>
    %cst_72 = arith.constant 1.000000e+00 : f32
    %211 = vector.broadcast %cst_72 : f32 to vector<2x128xf32>
    %212 = arith.addf %211, %210 : vector<2x128xf32>
    %213 = arith.divf %211, %212 : vector<2x128xf32>
    %214 = vector.extract_strided_slice %202 {offsets = [0, 128], sizes = [2, 128], strides = [1, 1]} : vector<2x512xf32> to vector<2x128xf32>
    %215 = arith.negf %214 : vector<2x128xf32>
    %216 = math.exp %215 : vector<2x128xf32>
    %cst_73 = arith.constant 1.000000e+00 : f32
    %217 = vector.broadcast %cst_73 : f32 to vector<2x128xf32>
    %218 = arith.addf %217, %216 : vector<2x128xf32>
    %219 = arith.divf %217, %218 : vector<2x128xf32>
    %220 = vector.extract_strided_slice %202 {offsets = [0, 256], sizes = [2, 128], strides = [1, 1]} : vector<2x512xf32> to vector<2x128xf32>
    %221 = math.tanh %220 : vector<2x128xf32>
    %222 = vector.extract_strided_slice %202 {offsets = [0, 384], sizes = [2, 128], strides = [1, 1]} : vector<2x512xf32> to vector<2x128xf32>
    %223 = arith.negf %222 : vector<2x128xf32>
    %224 = math.exp %223 : vector<2x128xf32>
    %cst_74 = arith.constant 1.000000e+00 : f32
    %225 = vector.broadcast %cst_74 : f32 to vector<2x128xf32>
    %226 = arith.addf %225, %224 : vector<2x128xf32>
    %227 = arith.divf %225, %226 : vector<2x128xf32>
    %228 = arith.mulf %219, %168 : vector<2x128xf32>
    %229 = arith.mulf %213, %221 : vector<2x128xf32>
    %230 = arith.addf %228, %229 : vector<2x128xf32>
    %231 = math.tanh %230 : vector<2x128xf32>
    %232 = arith.mulf %227, %231 : vector<2x128xf32>
    %233 = vector.extract_strided_slice %207 {offsets = [0, 0], sizes = [2, 128], strides = [1, 1]} : vector<2x512xf32> to vector<2x128xf32>
    %234 = arith.negf %233 : vector<2x128xf32>
    %235 = math.exp %234 : vector<2x128xf32>
    %cst_75 = arith.constant 1.000000e+00 : f32
    %236 = vector.broadcast %cst_75 : f32 to vector<2x128xf32>
    %237 = arith.addf %236, %235 : vector<2x128xf32>
    %238 = arith.divf %236, %237 : vector<2x128xf32>
    %239 = vector.extract_strided_slice %207 {offsets = [0, 128], sizes = [2, 128], strides = [1, 1]} : vector<2x512xf32> to vector<2x128xf32>
    %240 = arith.negf %239 : vector<2x128xf32>
    %241 = math.exp %240 : vector<2x128xf32>
    %cst_76 = arith.constant 1.000000e+00 : f32
    %242 = vector.broadcast %cst_76 : f32 to vector<2x128xf32>
    %243 = arith.addf %242, %241 : vector<2x128xf32>
    %244 = arith.divf %242, %243 : vector<2x128xf32>
    %245 = vector.extract_strided_slice %207 {offsets = [0, 256], sizes = [2, 128], strides = [1, 1]} : vector<2x512xf32> to vector<2x128xf32>
    %246 = math.tanh %245 : vector<2x128xf32>
    %247 = vector.extract_strided_slice %207 {offsets = [0, 384], sizes = [2, 128], strides = [1, 1]} : vector<2x512xf32> to vector<2x128xf32>
    %248 = arith.negf %247 : vector<2x128xf32>
    %249 = math.exp %248 : vector<2x128xf32>
    %cst_77 = arith.constant 1.000000e+00 : f32
    %250 = vector.broadcast %cst_77 : f32 to vector<2x128xf32>
    %251 = arith.addf %250, %249 : vector<2x128xf32>
    %252 = arith.divf %250, %251 : vector<2x128xf32>
    %253 = arith.mulf %244, %193 : vector<2x128xf32>
    %254 = arith.mulf %238, %246 : vector<2x128xf32>
    %255 = arith.addf %253, %254 : vector<2x128xf32>
    %256 = math.tanh %255 : vector<2x128xf32>
    %257 = arith.mulf %252, %256 : vector<2x128xf32>
    %c6_78 = arith.constant 6 : index
    %c0_79 = arith.constant 0 : index
    %258 = vector.load %arg13[%c6_78, %c0_79] : memref<16x256xf32, #tpu.memory_space<vmem>>, vector<2x128xf32>
    tpu.vector_store %arg13[%c6_78, %c0_79], %232 {strides = array<i32>} : memref<16x256xf32, #tpu.memory_space<vmem>>, vector<2x128xf32>,
    %c8_80 = arith.constant 8 : index
    %c128_81 = arith.constant 128 : index
    %259 = vector.load %arg13[%c8_80, %c128_81] : memref<16x256xf32, #tpu.memory_space<vmem>>, vector<2x128xf32>
    tpu.vector_store %arg13[%c8_80, %c128_81], %257 {strides = array<i32>} : memref<16x256xf32, #tpu.memory_space<vmem>>, vector<2x128xf32>,
    %c8_82 = arith.constant 8 : index
    %c0_83 = arith.constant 0 : index
    %260 = vector.load %arg12[%c8_82, %c0_83] : memref<16x1024xf32, #tpu.memory_space<vmem>>, vector<2x512xf32>
    %261 = arith.truncf %232 : vector<2x128xf32> to vector<2x128xbf16>
    %c0_84 = arith.constant 0 : index
    %c0_85 = arith.constant 0 : index
    %262 = vector.load %arg3[%c0_84, %c0_85] : memref<128x512xbf16, #tpu.memory_space<vmem>>, vector<128x512xbf16>
    %cst_86 = arith.constant dense<0.000000e+00> : vector<2x512xf32>
    %263 = tpu.matmul %261, %262, %cst_86 {dimension_numbers = #tpu.dot_dimension_numbers<[1], [0], [0], [1], [0, 0, 1, 1], [], []>} : vector<2x128xbf16>, vector<128x512xbf16>, vector<2x512xf32> -> vector<2x512xf32>
    %264 = arith.addf %260, %263 : vector<2x512xf32>
    %c6_87 = arith.constant 6 : index
    %c512_88 = arith.constant 512 : index
    %265 = vector.load %arg12[%c6_87, %c512_88] : memref<16x1024xf32, #tpu.memory_space<vmem>>, vector<2x512xf32>
    %266 = arith.truncf %257 : vector<2x128xf32> to vector<2x128xbf16>
    %c0_89 = arith.constant 0 : index
    %c0_90 = arith.constant 0 : index
    %267 = vector.load %arg4[%c0_89, %c0_90] : memref<128x512xbf16, #tpu.memory_space<vmem>>, vector<128x512xbf16>
    %cst_91 = arith.constant dense<0.000000e+00> : vector<2x512xf32>
    %268 = tpu.matmul %266, %267, %cst_91 {dimension_numbers = #tpu.dot_dimension_numbers<[1], [0], [0], [1], [0, 0, 1, 1], [], []>} : vector<2x128xbf16>, vector<128x512xbf16>, vector<2x512xf32> -> vector<2x512xf32>
    %269 = arith.addf %265, %268 : vector<2x512xf32>
    %270 = vector.extract_strided_slice %264 {offsets = [0, 0], sizes = [2, 128], strides = [1, 1]} : vector<2x512xf32> to vector<2x128xf32>
    %271 = arith.negf %270 : vector<2x128xf32>
    %272 = math.exp %271 : vector<2x128xf32>
    %cst_92 = arith.constant 1.000000e+00 : f32
    %273 = vector.broadcast %cst_92 : f32 to vector<2x128xf32>
    %274 = arith.addf %273, %272 : vector<2x128xf32>
    %275 = arith.divf %273, %274 : vector<2x128xf32>
    %276 = vector.extract_strided_slice %264 {offsets = [0, 128], sizes = [2, 128], strides = [1, 1]} : vector<2x512xf32> to vector<2x128xf32>
    %277 = arith.negf %276 : vector<2x128xf32>
    %278 = math.exp %277 : vector<2x128xf32>
    %cst_93 = arith.constant 1.000000e+00 : f32
    %279 = vector.broadcast %cst_93 : f32 to vector<2x128xf32>
    %280 = arith.addf %279, %278 : vector<2x128xf32>
    %281 = arith.divf %279, %280 : vector<2x128xf32>
    %282 = vector.extract_strided_slice %264 {offsets = [0, 256], sizes = [2, 128], strides = [1, 1]} : vector<2x512xf32> to vector<2x128xf32>
    %283 = math.tanh %282 : vector<2x128xf32>
    %284 = vector.extract_strided_slice %264 {offsets = [0, 384], sizes = [2, 128], strides = [1, 1]} : vector<2x512xf32> to vector<2x128xf32>
    %285 = arith.negf %284 : vector<2x128xf32>
    %286 = math.exp %285 : vector<2x128xf32>
    %cst_94 = arith.constant 1.000000e+00 : f32
    %287 = vector.broadcast %cst_94 : f32 to vector<2x128xf32>
    %288 = arith.addf %287, %286 : vector<2x128xf32>
    %289 = arith.divf %287, %288 : vector<2x128xf32>
    %290 = arith.mulf %281, %230 : vector<2x128xf32>
    %291 = arith.mulf %275, %283 : vector<2x128xf32>
    %292 = arith.addf %290, %291 : vector<2x128xf32>
    %293 = math.tanh %292 : vector<2x128xf32>
    %294 = arith.mulf %289, %293 : vector<2x128xf32>
    %295 = vector.extract_strided_slice %269 {offsets = [0, 0], sizes = [2, 128], strides = [1, 1]} : vector<2x512xf32> to vector<2x128xf32>
    %296 = arith.negf %295 : vector<2x128xf32>
    %297 = math.exp %296 : vector<2x128xf32>
    %cst_95 = arith.constant 1.000000e+00 : f32
    %298 = vector.broadcast %cst_95 : f32 to vector<2x128xf32>
    %299 = arith.addf %298, %297 : vector<2x128xf32>
    %300 = arith.divf %298, %299 : vector<2x128xf32>
    %301 = vector.extract_strided_slice %269 {offsets = [0, 128], sizes = [2, 128], strides = [1, 1]} : vector<2x512xf32> to vector<2x128xf32>
    %302 = arith.negf %301 : vector<2x128xf32>
    %303 = math.exp %302 : vector<2x128xf32>
    %cst_96 = arith.constant 1.000000e+00 : f32
    %304 = vector.broadcast %cst_96 : f32 to vector<2x128xf32>
    %305 = arith.addf %304, %303 : vector<2x128xf32>
    %306 = arith.divf %304, %305 : vector<2x128xf32>
    %307 = vector.extract_strided_slice %269 {offsets = [0, 256], sizes = [2, 128], strides = [1, 1]} : vector<2x512xf32> to vector<2x128xf32>
    %308 = math.tanh %307 : vector<2x128xf32>
    %309 = vector.extract_strided_slice %269 {offsets = [0, 384], sizes = [2, 128], strides = [1, 1]} : vector<2x512xf32> to vector<2x128xf32>
    %310 = arith.negf %309 : vector<2x128xf32>
    %311 = math.exp %310 : vector<2x128xf32>
    %cst_97 = arith.constant 1.000000e+00 : f32
    %312 = vector.broadcast %cst_97 : f32 to vector<2x128xf32>
    %313 = arith.addf %312, %311 : vector<2x128xf32>
    %314 = arith.divf %312, %313 : vector<2x128xf32>
    %315 = arith.mulf %306, %255 : vector<2x128xf32>
    %316 = arith.mulf %300, %308 : vector<2x128xf32>
    %317 = arith.addf %315, %316 : vector<2x128xf32>
    %318 = math.tanh %317 : vector<2x128xf32>
    %319 = arith.mulf %314, %318 : vector<2x128xf32>
    %c8_98 = arith.constant 8 : index
    %c0_99 = arith.constant 0 : index
    %320 = vector.load %arg13[%c8_98, %c0_99] : memref<16x256xf32, #tpu.memory_space<vmem>>, vector<2x128xf32>
    tpu.vector_store %arg13[%c8_98, %c0_99], %294 {strides = array<i32>} : memref<16x256xf32, #tpu.memory_space<vmem>>, vector<2x128xf32>,
    %c6_100 = arith.constant 6 : index
    %c128_101 = arith.constant 128 : index
    %321 = vector.load %arg13[%c6_100, %c128_101] : memref<16x256xf32, #tpu.memory_space<vmem>>, vector<2x128xf32>
    tpu.vector_store %arg13[%c6_100, %c128_101], %319 {strides = array<i32>} : memref<16x256xf32, #tpu.memory_space<vmem>>, vector<2x128xf32>,
    %c10_102 = arith.constant 10 : index
    %c0_103 = arith.constant 0 : index
    %322 = vector.load %arg12[%c10_102, %c0_103] : memref<16x1024xf32, #tpu.memory_space<vmem>>, vector<2x512xf32>
    %323 = arith.truncf %294 : vector<2x128xf32> to vector<2x128xbf16>
    %c0_104 = arith.constant 0 : index
    %c0_105 = arith.constant 0 : index
    %324 = vector.load %arg3[%c0_104, %c0_105] : memref<128x512xbf16, #tpu.memory_space<vmem>>, vector<128x512xbf16>
    %cst_106 = arith.constant dense<0.000000e+00> : vector<2x512xf32>
    %325 = tpu.matmul %323, %324, %cst_106 {dimension_numbers = #tpu.dot_dimension_numbers<[1], [0], [0], [1], [0, 0, 1, 1], [], []>} : vector<2x128xbf16>, vector<128x512xbf16>, vector<2x512xf32> -> vector<2x512xf32>
    %326 = arith.addf %322, %325 : vector<2x512xf32>
    %c4_107 = arith.constant 4 : index
    %c512_108 = arith.constant 512 : index
    %327 = vector.load %arg12[%c4_107, %c512_108] : memref<16x1024xf32, #tpu.memory_space<vmem>>, vector<2x512xf32>
    %328 = arith.truncf %319 : vector<2x128xf32> to vector<2x128xbf16>
    %c0_109 = arith.constant 0 : index
    %c0_110 = arith.constant 0 : index
    %329 = vector.load %arg4[%c0_109, %c0_110] : memref<128x512xbf16, #tpu.memory_space<vmem>>, vector<128x512xbf16>
    %cst_111 = arith.constant dense<0.000000e+00> : vector<2x512xf32>
    %330 = tpu.matmul %328, %329, %cst_111 {dimension_numbers = #tpu.dot_dimension_numbers<[1], [0], [0], [1], [0, 0, 1, 1], [], []>} : vector<2x128xbf16>, vector<128x512xbf16>, vector<2x512xf32> -> vector<2x512xf32>
    %331 = arith.addf %327, %330 : vector<2x512xf32>
    %332 = vector.extract_strided_slice %326 {offsets = [0, 0], sizes = [2, 128], strides = [1, 1]} : vector<2x512xf32> to vector<2x128xf32>
    %333 = arith.negf %332 : vector<2x128xf32>
    %334 = math.exp %333 : vector<2x128xf32>
    %cst_112 = arith.constant 1.000000e+00 : f32
    %335 = vector.broadcast %cst_112 : f32 to vector<2x128xf32>
    %336 = arith.addf %335, %334 : vector<2x128xf32>
    %337 = arith.divf %335, %336 : vector<2x128xf32>
    %338 = vector.extract_strided_slice %326 {offsets = [0, 128], sizes = [2, 128], strides = [1, 1]} : vector<2x512xf32> to vector<2x128xf32>
    %339 = arith.negf %338 : vector<2x128xf32>
    %340 = math.exp %339 : vector<2x128xf32>
    %cst_113 = arith.constant 1.000000e+00 : f32
    %341 = vector.broadcast %cst_113 : f32 to vector<2x128xf32>
    %342 = arith.addf %341, %340 : vector<2x128xf32>
    %343 = arith.divf %341, %342 : vector<2x128xf32>
    %344 = vector.extract_strided_slice %326 {offsets = [0, 256], sizes = [2, 128], strides = [1, 1]} : vector<2x512xf32> to vector<2x128xf32>
    %345 = math.tanh %344 : vector<2x128xf32>
    %346 = vector.extract_strided_slice %326 {offsets = [0, 384], sizes = [2, 128], strides = [1, 1]} : vector<2x512xf32> to vector<2x128xf32>
    %347 = arith.negf %346 : vector<2x128xf32>
    %348 = math.exp %347 : vector<2x128xf32>
    %cst_114 = arith.constant 1.000000e+00 : f32
    %349 = vector.broadcast %cst_114 : f32 to vector<2x128xf32>
    %350 = arith.addf %349, %348 : vector<2x128xf32>
    %351 = arith.divf %349, %350 : vector<2x128xf32>
    %352 = arith.mulf %343, %292 : vector<2x128xf32>
    %353 = arith.mulf %337, %345 : vector<2x128xf32>
    %354 = arith.addf %352, %353 : vector<2x128xf32>
    %355 = math.tanh %354 : vector<2x128xf32>
    %356 = arith.mulf %351, %355 : vector<2x128xf32>
    %357 = vector.extract_strided_slice %331 {offsets = [0, 0], sizes = [2, 128], strides = [1, 1]} : vector<2x512xf32> to vector<2x128xf32>
    %358 = arith.negf %357 : vector<2x128xf32>
    %359 = math.exp %358 : vector<2x128xf32>
    %cst_115 = arith.constant 1.000000e+00 : f32
    %360 = vector.broadcast %cst_115 : f32 to vector<2x128xf32>
    %361 = arith.addf %360, %359 : vector<2x128xf32>
    %362 = arith.divf %360, %361 : vector<2x128xf32>
    %363 = vector.extract_strided_slice %331 {offsets = [0, 128], sizes = [2, 128], strides = [1, 1]} : vector<2x512xf32> to vector<2x128xf32>
    %364 = arith.negf %363 : vector<2x128xf32>
    %365 = math.exp %364 : vector<2x128xf32>
    %cst_116 = arith.constant 1.000000e+00 : f32
    %366 = vector.broadcast %cst_116 : f32 to vector<2x128xf32>
    %367 = arith.addf %366, %365 : vector<2x128xf32>
    %368 = arith.divf %366, %367 : vector<2x128xf32>
    %369 = vector.extract_strided_slice %331 {offsets = [0, 256], sizes = [2, 128], strides = [1, 1]} : vector<2x512xf32> to vector<2x128xf32>
    %370 = math.tanh %369 : vector<2x128xf32>
    %371 = vector.extract_strided_slice %331 {offsets = [0, 384], sizes = [2, 128], strides = [1, 1]} : vector<2x512xf32> to vector<2x128xf32>
    %372 = arith.negf %371 : vector<2x128xf32>
    %373 = math.exp %372 : vector<2x128xf32>
    %cst_117 = arith.constant 1.000000e+00 : f32
    %374 = vector.broadcast %cst_117 : f32 to vector<2x128xf32>
    %375 = arith.addf %374, %373 : vector<2x128xf32>
    %376 = arith.divf %374, %375 : vector<2x128xf32>
    %377 = arith.mulf %368, %317 : vector<2x128xf32>
    %378 = arith.mulf %362, %370 : vector<2x128xf32>
    %379 = arith.addf %377, %378 : vector<2x128xf32>
    %380 = math.tanh %379 : vector<2x128xf32>
    %381 = arith.mulf %376, %380 : vector<2x128xf32>
    %c10_118 = arith.constant 10 : index
    %c0_119 = arith.constant 0 : index
    %382 = vector.load %arg13[%c10_118, %c0_119] : memref<16x256xf32, #tpu.memory_space<vmem>>, vector<2x128xf32>
    tpu.vector_store %arg13[%c10_118, %c0_119], %356 {strides = array<i32>} : memref<16x256xf32, #tpu.memory_space<vmem>>, vector<2x128xf32>,
    %c4_120 = arith.constant 4 : index
    %c128_121 = arith.constant 128 : index
    %383 = vector.load %arg13[%c4_120, %c128_121] : memref<16x256xf32, #tpu.memory_space<vmem>>, vector<2x128xf32>
    tpu.vector_store %arg13[%c4_120, %c128_121], %381 {strides = array<i32>} : memref<16x256xf32, #tpu.memory_space<vmem>>, vector<2x128xf32>,
    %c12_122 = arith.constant 12 : index
    %c0_123 = arith.constant 0 : index
    %384 = vector.load %arg12[%c12_122, %c0_123] : memref<16x1024xf32, #tpu.memory_space<vmem>>, vector<2x512xf32>
    %385 = arith.truncf %356 : vector<2x128xf32> to vector<2x128xbf16>
    %c0_124 = arith.constant 0 : index
    %c0_125 = arith.constant 0 : index
    %386 = vector.load %arg3[%c0_124, %c0_125] : memref<128x512xbf16, #tpu.memory_space<vmem>>, vector<128x512xbf16>
    %cst_126 = arith.constant dense<0.000000e+00> : vector<2x512xf32>
    %387 = tpu.matmul %385, %386, %cst_126 {dimension_numbers = #tpu.dot_dimension_numbers<[1], [0], [0], [1], [0, 0, 1, 1], [], []>} : vector<2x128xbf16>, vector<128x512xbf16>, vector<2x512xf32> -> vector<2x512xf32>
    %388 = arith.addf %384, %387 : vector<2x512xf32>
    %c2_127 = arith.constant 2 : index
    %c512_128 = arith.constant 512 : index
    %389 = vector.load %arg12[%c2_127, %c512_128] : memref<16x1024xf32, #tpu.memory_space<vmem>>, vector<2x512xf32>
    %390 = arith.truncf %381 : vector<2x128xf32> to vector<2x128xbf16>
    %c0_129 = arith.constant 0 : index
    %c0_130 = arith.constant 0 : index
    %391 = vector.load %arg4[%c0_129, %c0_130] : memref<128x512xbf16, #tpu.memory_space<vmem>>, vector<128x512xbf16>
    %cst_131 = arith.constant dense<0.000000e+00> : vector<2x512xf32>
    %392 = tpu.matmul %390, %391, %cst_131 {dimension_numbers = #tpu.dot_dimension_numbers<[1], [0], [0], [1], [0, 0, 1, 1], [], []>} : vector<2x128xbf16>, vector<128x512xbf16>, vector<2x512xf32> -> vector<2x512xf32>
    %393 = arith.addf %389, %392 : vector<2x512xf32>
    %394 = vector.extract_strided_slice %388 {offsets = [0, 0], sizes = [2, 128], strides = [1, 1]} : vector<2x512xf32> to vector<2x128xf32>
    %395 = arith.negf %394 : vector<2x128xf32>
    %396 = math.exp %395 : vector<2x128xf32>
    %cst_132 = arith.constant 1.000000e+00 : f32
    %397 = vector.broadcast %cst_132 : f32 to vector<2x128xf32>
    %398 = arith.addf %397, %396 : vector<2x128xf32>
    %399 = arith.divf %397, %398 : vector<2x128xf32>
    %400 = vector.extract_strided_slice %388 {offsets = [0, 128], sizes = [2, 128], strides = [1, 1]} : vector<2x512xf32> to vector<2x128xf32>
    %401 = arith.negf %400 : vector<2x128xf32>
    %402 = math.exp %401 : vector<2x128xf32>
    %cst_133 = arith.constant 1.000000e+00 : f32
    %403 = vector.broadcast %cst_133 : f32 to vector<2x128xf32>
    %404 = arith.addf %403, %402 : vector<2x128xf32>
    %405 = arith.divf %403, %404 : vector<2x128xf32>
    %406 = vector.extract_strided_slice %388 {offsets = [0, 256], sizes = [2, 128], strides = [1, 1]} : vector<2x512xf32> to vector<2x128xf32>
    %407 = math.tanh %406 : vector<2x128xf32>
    %408 = vector.extract_strided_slice %388 {offsets = [0, 384], sizes = [2, 128], strides = [1, 1]} : vector<2x512xf32> to vector<2x128xf32>
    %409 = arith.negf %408 : vector<2x128xf32>
    %410 = math.exp %409 : vector<2x128xf32>
    %cst_134 = arith.constant 1.000000e+00 : f32
    %411 = vector.broadcast %cst_134 : f32 to vector<2x128xf32>
    %412 = arith.addf %411, %410 : vector<2x128xf32>
    %413 = arith.divf %411, %412 : vector<2x128xf32>
    %414 = arith.mulf %405, %354 : vector<2x128xf32>
    %415 = arith.mulf %399, %407 : vector<2x128xf32>
    %416 = arith.addf %414, %415 : vector<2x128xf32>
    %417 = math.tanh %416 : vector<2x128xf32>
    %418 = arith.mulf %413, %417 : vector<2x128xf32>
    %419 = vector.extract_strided_slice %393 {offsets = [0, 0], sizes = [2, 128], strides = [1, 1]} : vector<2x512xf32> to vector<2x128xf32>
    %420 = arith.negf %419 : vector<2x128xf32>
    %421 = math.exp %420 : vector<2x128xf32>
    %cst_135 = arith.constant 1.000000e+00 : f32
    %422 = vector.broadcast %cst_135 : f32 to vector<2x128xf32>
    %423 = arith.addf %422, %421 : vector<2x128xf32>
    %424 = arith.divf %422, %423 : vector<2x128xf32>
    %425 = vector.extract_strided_slice %393 {offsets = [0, 128], sizes = [2, 128], strides = [1, 1]} : vector<2x512xf32> to vector<2x128xf32>
    %426 = arith.negf %425 : vector<2x128xf32>
    %427 = math.exp %426 : vector<2x128xf32>
    %cst_136 = arith.constant 1.000000e+00 : f32
    %428 = vector.broadcast %cst_136 : f32 to vector<2x128xf32>
    %429 = arith.addf %428, %427 : vector<2x128xf32>
    %430 = arith.divf %428, %429 : vector<2x128xf32>
    %431 = vector.extract_strided_slice %393 {offsets = [0, 256], sizes = [2, 128], strides = [1, 1]} : vector<2x512xf32> to vector<2x128xf32>
    %432 = math.tanh %431 : vector<2x128xf32>
    %433 = vector.extract_strided_slice %393 {offsets = [0, 384], sizes = [2, 128], strides = [1, 1]} : vector<2x512xf32> to vector<2x128xf32>
    %434 = arith.negf %433 : vector<2x128xf32>
    %435 = math.exp %434 : vector<2x128xf32>
    %cst_137 = arith.constant 1.000000e+00 : f32
    %436 = vector.broadcast %cst_137 : f32 to vector<2x128xf32>
    %437 = arith.addf %436, %435 : vector<2x128xf32>
    %438 = arith.divf %436, %437 : vector<2x128xf32>
    %439 = arith.mulf %430, %379 : vector<2x128xf32>
    %440 = arith.mulf %424, %432 : vector<2x128xf32>
    %441 = arith.addf %439, %440 : vector<2x128xf32>
    %442 = math.tanh %441 : vector<2x128xf32>
    %443 = arith.mulf %438, %442 : vector<2x128xf32>
    %c12_138 = arith.constant 12 : index
    %c0_139 = arith.constant 0 : index
    %444 = vector.load %arg13[%c12_138, %c0_139] : memref<16x256xf32, #tpu.memory_space<vmem>>, vector<2x128xf32>
    tpu.vector_store %arg13[%c12_138, %c0_139], %418 {strides = array<i32>} : memref<16x256xf32, #tpu.memory_space<vmem>>, vector<2x128xf32>,
    %c2_140 = arith.constant 2 : index
    %c128_141 = arith.constant 128 : index
    %445 = vector.load %arg13[%c2_140, %c128_141] : memref<16x256xf32, #tpu.memory_space<vmem>>, vector<2x128xf32>
    tpu.vector_store %arg13[%c2_140, %c128_141], %443 {strides = array<i32>} : memref<16x256xf32, #tpu.memory_space<vmem>>, vector<2x128xf32>,
    %c14_142 = arith.constant 14 : index
    %c0_143 = arith.constant 0 : index
    %446 = vector.load %arg12[%c14_142, %c0_143] : memref<16x1024xf32, #tpu.memory_space<vmem>>, vector<2x512xf32>
    %447 = arith.truncf %418 : vector<2x128xf32> to vector<2x128xbf16>
    %c0_144 = arith.constant 0 : index
    %c0_145 = arith.constant 0 : index
    %448 = vector.load %arg3[%c0_144, %c0_145] : memref<128x512xbf16, #tpu.memory_space<vmem>>, vector<128x512xbf16>
    %cst_146 = arith.constant dense<0.000000e+00> : vector<2x512xf32>
    %449 = tpu.matmul %447, %448, %cst_146 {dimension_numbers = #tpu.dot_dimension_numbers<[1], [0], [0], [1], [0, 0, 1, 1], [], []>} : vector<2x128xbf16>, vector<128x512xbf16>, vector<2x512xf32> -> vector<2x512xf32>
    %450 = arith.addf %446, %449 : vector<2x512xf32>
    %c0_147 = arith.constant 0 : index
    %c512_148 = arith.constant 512 : index
    %451 = vector.load %arg12[%c0_147, %c512_148] : memref<16x1024xf32, #tpu.memory_space<vmem>>, vector<2x512xf32>
    %452 = arith.truncf %443 : vector<2x128xf32> to vector<2x128xbf16>
    %c0_149 = arith.constant 0 : index
    %c0_150 = arith.constant 0 : index
    %453 = vector.load %arg4[%c0_149, %c0_150] : memref<128x512xbf16, #tpu.memory_space<vmem>>, vector<128x512xbf16>
    %cst_151 = arith.constant dense<0.000000e+00> : vector<2x512xf32>
    %454 = tpu.matmul %452, %453, %cst_151 {dimension_numbers = #tpu.dot_dimension_numbers<[1], [0], [0], [1], [0, 0, 1, 1], [], []>} : vector<2x128xbf16>, vector<128x512xbf16>, vector<2x512xf32> -> vector<2x512xf32>
    %455 = arith.addf %451, %454 : vector<2x512xf32>
    %456 = vector.extract_strided_slice %450 {offsets = [0, 0], sizes = [2, 128], strides = [1, 1]} : vector<2x512xf32> to vector<2x128xf32>
    %457 = arith.negf %456 : vector<2x128xf32>
    %458 = math.exp %457 : vector<2x128xf32>
    %cst_152 = arith.constant 1.000000e+00 : f32
    %459 = vector.broadcast %cst_152 : f32 to vector<2x128xf32>
    %460 = arith.addf %459, %458 : vector<2x128xf32>
    %461 = arith.divf %459, %460 : vector<2x128xf32>
    %462 = vector.extract_strided_slice %450 {offsets = [0, 128], sizes = [2, 128], strides = [1, 1]} : vector<2x512xf32> to vector<2x128xf32>
    %463 = arith.negf %462 : vector<2x128xf32>
    %464 = math.exp %463 : vector<2x128xf32>
    %cst_153 = arith.constant 1.000000e+00 : f32
    %465 = vector.broadcast %cst_153 : f32 to vector<2x128xf32>
    %466 = arith.addf %465, %464 : vector<2x128xf32>
    %467 = arith.divf %465, %466 : vector<2x128xf32>
    %468 = vector.extract_strided_slice %450 {offsets = [0, 256], sizes = [2, 128], strides = [1, 1]} : vector<2x512xf32> to vector<2x128xf32>
    %469 = math.tanh %468 : vector<2x128xf32>
    %470 = vector.extract_strided_slice %450 {offsets = [0, 384], sizes = [2, 128], strides = [1, 1]} : vector<2x512xf32> to vector<2x128xf32>
    %471 = arith.negf %470 : vector<2x128xf32>
    %472 = math.exp %471 : vector<2x128xf32>
    %cst_154 = arith.constant 1.000000e+00 : f32
    %473 = vector.broadcast %cst_154 : f32 to vector<2x128xf32>
    %474 = arith.addf %473, %472 : vector<2x128xf32>
    %475 = arith.divf %473, %474 : vector<2x128xf32>
    %476 = arith.mulf %467, %416 : vector<2x128xf32>
    %477 = arith.mulf %461, %469 : vector<2x128xf32>
    %478 = arith.addf %476, %477 : vector<2x128xf32>
    %479 = math.tanh %478 : vector<2x128xf32>
    %480 = arith.mulf %475, %479 : vector<2x128xf32>
    %481 = vector.extract_strided_slice %455 {offsets = [0, 0], sizes = [2, 128], strides = [1, 1]} : vector<2x512xf32> to vector<2x128xf32>
    %482 = arith.negf %481 : vector<2x128xf32>
    %483 = math.exp %482 : vector<2x128xf32>
    %cst_155 = arith.constant 1.000000e+00 : f32
    %484 = vector.broadcast %cst_155 : f32 to vector<2x128xf32>
    %485 = arith.addf %484, %483 : vector<2x128xf32>
    %486 = arith.divf %484, %485 : vector<2x128xf32>
    %487 = vector.extract_strided_slice %455 {offsets = [0, 128], sizes = [2, 128], strides = [1, 1]} : vector<2x512xf32> to vector<2x128xf32>
    %488 = arith.negf %487 : vector<2x128xf32>
    %489 = math.exp %488 : vector<2x128xf32>
    %cst_156 = arith.constant 1.000000e+00 : f32
    %490 = vector.broadcast %cst_156 : f32 to vector<2x128xf32>
    %491 = arith.addf %490, %489 : vector<2x128xf32>
    %492 = arith.divf %490, %491 : vector<2x128xf32>
    %493 = vector.extract_strided_slice %455 {offsets = [0, 256], sizes = [2, 128], strides = [1, 1]} : vector<2x512xf32> to vector<2x128xf32>
    %494 = math.tanh %493 : vector<2x128xf32>
    %495 = vector.extract_strided_slice %455 {offsets = [0, 384], sizes = [2, 128], strides = [1, 1]} : vector<2x512xf32> to vector<2x128xf32>
    %496 = arith.negf %495 : vector<2x128xf32>
    %497 = math.exp %496 : vector<2x128xf32>
    %cst_157 = arith.constant 1.000000e+00 : f32
    %498 = vector.broadcast %cst_157 : f32 to vector<2x128xf32>
    %499 = arith.addf %498, %497 : vector<2x128xf32>
    %500 = arith.divf %498, %499 : vector<2x128xf32>
    %501 = arith.mulf %492, %441 : vector<2x128xf32>
    %502 = arith.mulf %486, %494 : vector<2x128xf32>
    %503 = arith.addf %501, %502 : vector<2x128xf32>
    %504 = math.tanh %503 : vector<2x128xf32>
    %505 = arith.mulf %500, %504 : vector<2x128xf32>
    %c14_158 = arith.constant 14 : index
    %c0_159 = arith.constant 0 : index
    %506 = vector.load %arg13[%c14_158, %c0_159] : memref<16x256xf32, #tpu.memory_space<vmem>>, vector<2x128xf32>
    tpu.vector_store %arg13[%c14_158, %c0_159], %480 {strides = array<i32>} : memref<16x256xf32, #tpu.memory_space<vmem>>, vector<2x128xf32>,
    %c0_160 = arith.constant 0 : index
    %c128_161 = arith.constant 128 : index
    %507 = vector.load %arg13[%c0_160, %c128_161] : memref<16x256xf32, #tpu.memory_space<vmem>>, vector<2x128xf32>
    tpu.vector_store %arg13[%c0_160, %c128_161], %505 {strides = array<i32>} : memref<16x256xf32, #tpu.memory_space<vmem>>, vector<2x128xf32>,
    %c0_162 = arith.constant 0 : index
    %c0_163 = arith.constant 0 : index
    %508 = vector.load %arg13[%c0_162, %c0_163] : memref<16x256xf32, #tpu.memory_space<vmem>>, vector<16x256xf32>
    %509 = arith.truncf %508 : vector<16x256xf32> to vector<16x256xbf16>
    %c0_164 = arith.constant 0 : index
    %c0_165 = arith.constant 0 : index
    %510 = vector.load %arg5[%c0_164, %c0_165] : memref<256x1024xbf16, #tpu.memory_space<vmem>>, vector<256x1024xbf16>
    %cst_166 = arith.constant dense<0.000000e+00> : vector<16x1024xf32>
    %511 = tpu.matmul %509, %510, %cst_166 {dimension_numbers = #tpu.dot_dimension_numbers<[1], [0], [0], [1], [0, 0, 1, 1], [], []>} : vector<16x256xbf16>, vector<256x1024xbf16>, vector<16x1024xf32> -> vector<16x1024xf32>
    %c0_167 = arith.constant 0 : index
    %c0_168 = arith.constant 0 : index
    %512 = vector.load %arg6[%c0_167, %c0_168] : memref<1x1024xf32, #tpu.memory_space<vmem>>, vector<1x1024xf32>
    %513 = vector.broadcast %512 : vector<1x1024xf32> to vector<16x1024xf32>
    %514 = arith.addf %511, %513 : vector<16x1024xf32>
    %c0_169 = arith.constant 0 : index
    %c0_170 = arith.constant 0 : index
    %515 = vector.load %arg12[%c0_169, %c0_170] : memref<16x1024xf32, #tpu.memory_space<vmem>>, vector<16x1024xf32>
    tpu.vector_store %arg12[%c0_169, %c0_170], %514 {strides = array<i32>} : memref<16x1024xf32, #tpu.memory_space<vmem>>, vector<16x1024xf32>,
    %cst_171 = arith.constant 0.000000e+00 : f32
    %516 = vector.broadcast %cst_171 : f32 to vector<2x128xf32>
    %cst_172 = arith.constant 0.000000e+00 : f32
    %517 = vector.broadcast %cst_172 : f32 to vector<2x128xf32>
    %cst_173 = arith.constant 0.000000e+00 : f32
    %518 = vector.broadcast %cst_173 : f32 to vector<2x128xf32>
    %cst_174 = arith.constant 0.000000e+00 : f32
    %519 = vector.broadcast %cst_174 : f32 to vector<2x128xf32>
    %c0_175 = arith.constant 0 : index
    %c0_176 = arith.constant 0 : index
    %520 = vector.load %arg12[%c0_175, %c0_176] : memref<16x1024xf32, #tpu.memory_space<vmem>>, vector<2x512xf32>
    %521 = arith.truncf %516 : vector<2x128xf32> to vector<2x128xbf16>
    %c0_177 = arith.constant 0 : index
    %c0_178 = arith.constant 0 : index
    %522 = vector.load %arg7[%c0_177, %c0_178] : memref<128x512xbf16, #tpu.memory_space<vmem>>, vector<128x512xbf16>
    %cst_179 = arith.constant dense<0.000000e+00> : vector<2x512xf32>
    %523 = tpu.matmul %521, %522, %cst_179 {dimension_numbers = #tpu.dot_dimension_numbers<[1], [0], [0], [1], [0, 0, 1, 1], [], []>} : vector<2x128xbf16>, vector<128x512xbf16>, vector<2x512xf32> -> vector<2x512xf32>
    %524 = arith.addf %520, %523 : vector<2x512xf32>
    %c14_180 = arith.constant 14 : index
    %c512_181 = arith.constant 512 : index
    %525 = vector.load %arg12[%c14_180, %c512_181] : memref<16x1024xf32, #tpu.memory_space<vmem>>, vector<2x512xf32>
    %526 = arith.truncf %518 : vector<2x128xf32> to vector<2x128xbf16>
    %c0_182 = arith.constant 0 : index
    %c0_183 = arith.constant 0 : index
    %527 = vector.load %arg8[%c0_182, %c0_183] : memref<128x512xbf16, #tpu.memory_space<vmem>>, vector<128x512xbf16>
    %cst_184 = arith.constant dense<0.000000e+00> : vector<2x512xf32>
    %528 = tpu.matmul %526, %527, %cst_184 {dimension_numbers = #tpu.dot_dimension_numbers<[1], [0], [0], [1], [0, 0, 1, 1], [], []>} : vector<2x128xbf16>, vector<128x512xbf16>, vector<2x512xf32> -> vector<2x512xf32>
    %529 = arith.addf %525, %528 : vector<2x512xf32>
    %530 = vector.extract_strided_slice %524 {offsets = [0, 0], sizes = [2, 128], strides = [1, 1]} : vector<2x512xf32> to vector<2x128xf32>
    %531 = arith.negf %530 : vector<2x128xf32>
    %532 = math.exp %531 : vector<2x128xf32>
    %cst_185 = arith.constant 1.000000e+00 : f32
    %533 = vector.broadcast %cst_185 : f32 to vector<2x128xf32>
    %534 = arith.addf %533, %532 : vector<2x128xf32>
    %535 = arith.divf %533, %534 : vector<2x128xf32>
    %536 = vector.extract_strided_slice %524 {offsets = [0, 128], sizes = [2, 128], strides = [1, 1]} : vector<2x512xf32> to vector<2x128xf32>
    %537 = arith.negf %536 : vector<2x128xf32>
    %538 = math.exp %537 : vector<2x128xf32>
    %cst_186 = arith.constant 1.000000e+00 : f32
    %539 = vector.broadcast %cst_186 : f32 to vector<2x128xf32>
    %540 = arith.addf %539, %538 : vector<2x128xf32>
    %541 = arith.divf %539, %540 : vector<2x128xf32>
    %542 = vector.extract_strided_slice %524 {offsets = [0, 256], sizes = [2, 128], strides = [1, 1]} : vector<2x512xf32> to vector<2x128xf32>
    %543 = math.tanh %542 : vector<2x128xf32>
    %544 = vector.extract_strided_slice %524 {offsets = [0, 384], sizes = [2, 128], strides = [1, 1]} : vector<2x512xf32> to vector<2x128xf32>
    %545 = arith.negf %544 : vector<2x128xf32>
    %546 = math.exp %545 : vector<2x128xf32>
    %cst_187 = arith.constant 1.000000e+00 : f32
    %547 = vector.broadcast %cst_187 : f32 to vector<2x128xf32>
    %548 = arith.addf %547, %546 : vector<2x128xf32>
    %549 = arith.divf %547, %548 : vector<2x128xf32>
    %550 = arith.mulf %541, %517 : vector<2x128xf32>
    %551 = arith.mulf %535, %543 : vector<2x128xf32>
    %552 = arith.addf %550, %551 : vector<2x128xf32>
    %553 = math.tanh %552 : vector<2x128xf32>
    %554 = arith.mulf %549, %553 : vector<2x128xf32>
    %555 = vector.extract_strided_slice %529 {offsets = [0, 0], sizes = [2, 128], strides = [1, 1]} : vector<2x512xf32> to vector<2x128xf32>
    %556 = arith.negf %555 : vector<2x128xf32>
    %557 = math.exp %556 : vector<2x128xf32>
    %cst_188 = arith.constant 1.000000e+00 : f32
    %558 = vector.broadcast %cst_188 : f32 to vector<2x128xf32>
    %559 = arith.addf %558, %557 : vector<2x128xf32>
    %560 = arith.divf %558, %559 : vector<2x128xf32>
    %561 = vector.extract_strided_slice %529 {offsets = [0, 128], sizes = [2, 128], strides = [1, 1]} : vector<2x512xf32> to vector<2x128xf32>
    %562 = arith.negf %561 : vector<2x128xf32>
    %563 = math.exp %562 : vector<2x128xf32>
    %cst_189 = arith.constant 1.000000e+00 : f32
    %564 = vector.broadcast %cst_189 : f32 to vector<2x128xf32>
    %565 = arith.addf %564, %563 : vector<2x128xf32>
    %566 = arith.divf %564, %565 : vector<2x128xf32>
    %567 = vector.extract_strided_slice %529 {offsets = [0, 256], sizes = [2, 128], strides = [1, 1]} : vector<2x512xf32> to vector<2x128xf32>
    %568 = math.tanh %567 : vector<2x128xf32>
    %569 = vector.extract_strided_slice %529 {offsets = [0, 384], sizes = [2, 128], strides = [1, 1]} : vector<2x512xf32> to vector<2x128xf32>
    %570 = arith.negf %569 : vector<2x128xf32>
    %571 = math.exp %570 : vector<2x128xf32>
    %cst_190 = arith.constant 1.000000e+00 : f32
    %572 = vector.broadcast %cst_190 : f32 to vector<2x128xf32>
    %573 = arith.addf %572, %571 : vector<2x128xf32>
    %574 = arith.divf %572, %573 : vector<2x128xf32>
    %575 = arith.mulf %566, %519 : vector<2x128xf32>
    %576 = arith.mulf %560, %568 : vector<2x128xf32>
    %577 = arith.addf %575, %576 : vector<2x128xf32>
    %578 = math.tanh %577 : vector<2x128xf32>
    %579 = arith.mulf %574, %578 : vector<2x128xf32>
    %c0_191 = arith.constant 0 : index
    %c0_192 = arith.constant 0 : index
    %580 = vector.load %arg13[%c0_191, %c0_192] : memref<16x256xf32, #tpu.memory_space<vmem>>, vector<2x128xf32>
    tpu.vector_store %arg13[%c0_191, %c0_192], %554 {strides = array<i32>} : memref<16x256xf32, #tpu.memory_space<vmem>>, vector<2x128xf32>,
    %c14_193 = arith.constant 14 : index
    %c128_194 = arith.constant 128 : index
    %581 = vector.load %arg13[%c14_193, %c128_194] : memref<16x256xf32, #tpu.memory_space<vmem>>, vector<2x128xf32>
    tpu.vector_store %arg13[%c14_193, %c128_194], %579 {strides = array<i32>} : memref<16x256xf32, #tpu.memory_space<vmem>>, vector<2x128xf32>,
    %c2_195 = arith.constant 2 : index
    %c0_196 = arith.constant 0 : index
    %582 = vector.load %arg12[%c2_195, %c0_196] : memref<16x1024xf32, #tpu.memory_space<vmem>>, vector<2x512xf32>
    %583 = arith.truncf %554 : vector<2x128xf32> to vector<2x128xbf16>
    %c0_197 = arith.constant 0 : index
    %c0_198 = arith.constant 0 : index
    %584 = vector.load %arg7[%c0_197, %c0_198] : memref<128x512xbf16, #tpu.memory_space<vmem>>, vector<128x512xbf16>
    %cst_199 = arith.constant dense<0.000000e+00> : vector<2x512xf32>
    %585 = tpu.matmul %583, %584, %cst_199 {dimension_numbers = #tpu.dot_dimension_numbers<[1], [0], [0], [1], [0, 0, 1, 1], [], []>} : vector<2x128xbf16>, vector<128x512xbf16>, vector<2x512xf32> -> vector<2x512xf32>
    %586 = arith.addf %582, %585 : vector<2x512xf32>
    %c12_200 = arith.constant 12 : index
    %c512_201 = arith.constant 512 : index
    %587 = vector.load %arg12[%c12_200, %c512_201] : memref<16x1024xf32, #tpu.memory_space<vmem>>, vector<2x512xf32>
    %588 = arith.truncf %579 : vector<2x128xf32> to vector<2x128xbf16>
    %c0_202 = arith.constant 0 : index
    %c0_203 = arith.constant 0 : index
    %589 = vector.load %arg8[%c0_202, %c0_203] : memref<128x512xbf16, #tpu.memory_space<vmem>>, vector<128x512xbf16>
    %cst_204 = arith.constant dense<0.000000e+00> : vector<2x512xf32>
    %590 = tpu.matmul %588, %589, %cst_204 {dimension_numbers = #tpu.dot_dimension_numbers<[1], [0], [0], [1], [0, 0, 1, 1], [], []>} : vector<2x128xbf16>, vector<128x512xbf16>, vector<2x512xf32> -> vector<2x512xf32>
    %591 = arith.addf %587, %590 : vector<2x512xf32>
    %592 = vector.extract_strided_slice %586 {offsets = [0, 0], sizes = [2, 128], strides = [1, 1]} : vector<2x512xf32> to vector<2x128xf32>
    %593 = arith.negf %592 : vector<2x128xf32>
    %594 = math.exp %593 : vector<2x128xf32>
    %cst_205 = arith.constant 1.000000e+00 : f32
    %595 = vector.broadcast %cst_205 : f32 to vector<2x128xf32>
    %596 = arith.addf %595, %594 : vector<2x128xf32>
    %597 = arith.divf %595, %596 : vector<2x128xf32>
    %598 = vector.extract_strided_slice %586 {offsets = [0, 128], sizes = [2, 128], strides = [1, 1]} : vector<2x512xf32> to vector<2x128xf32>
    %599 = arith.negf %598 : vector<2x128xf32>
    %600 = math.exp %599 : vector<2x128xf32>
    %cst_206 = arith.constant 1.000000e+00 : f32
    %601 = vector.broadcast %cst_206 : f32 to vector<2x128xf32>
    %602 = arith.addf %601, %600 : vector<2x128xf32>
    %603 = arith.divf %601, %602 : vector<2x128xf32>
    %604 = vector.extract_strided_slice %586 {offsets = [0, 256], sizes = [2, 128], strides = [1, 1]} : vector<2x512xf32> to vector<2x128xf32>
    %605 = math.tanh %604 : vector<2x128xf32>
    %606 = vector.extract_strided_slice %586 {offsets = [0, 384], sizes = [2, 128], strides = [1, 1]} : vector<2x512xf32> to vector<2x128xf32>
    %607 = arith.negf %606 : vector<2x128xf32>
    %608 = math.exp %607 : vector<2x128xf32>
    %cst_207 = arith.constant 1.000000e+00 : f32
    %609 = vector.broadcast %cst_207 : f32 to vector<2x128xf32>
    %610 = arith.addf %609, %608 : vector<2x128xf32>
    %611 = arith.divf %609, %610 : vector<2x128xf32>
    %612 = arith.mulf %603, %552 : vector<2x128xf32>
    %613 = arith.mulf %597, %605 : vector<2x128xf32>
    %614 = arith.addf %612, %613 : vector<2x128xf32>
    %615 = math.tanh %614 : vector<2x128xf32>
    %616 = arith.mulf %611, %615 : vector<2x128xf32>
    %617 = vector.extract_strided_slice %591 {offsets = [0, 0], sizes = [2, 128], strides = [1, 1]} : vector<2x512xf32> to vector<2x128xf32>
    %618 = arith.negf %617 : vector<2x128xf32>
    %619 = math.exp %618 : vector<2x128xf32>
    %cst_208 = arith.constant 1.000000e+00 : f32
    %620 = vector.broadcast %cst_208 : f32 to vector<2x128xf32>
    %621 = arith.addf %620, %619 : vector<2x128xf32>
    %622 = arith.divf %620, %621 : vector<2x128xf32>
    %623 = vector.extract_strided_slice %591 {offsets = [0, 128], sizes = [2, 128], strides = [1, 1]} : vector<2x512xf32> to vector<2x128xf32>
    %624 = arith.negf %623 : vector<2x128xf32>
    %625 = math.exp %624 : vector<2x128xf32>
    %cst_209 = arith.constant 1.000000e+00 : f32
    %626 = vector.broadcast %cst_209 : f32 to vector<2x128xf32>
    %627 = arith.addf %626, %625 : vector<2x128xf32>
    %628 = arith.divf %626, %627 : vector<2x128xf32>
    %629 = vector.extract_strided_slice %591 {offsets = [0, 256], sizes = [2, 128], strides = [1, 1]} : vector<2x512xf32> to vector<2x128xf32>
    %630 = math.tanh %629 : vector<2x128xf32>
    %631 = vector.extract_strided_slice %591 {offsets = [0, 384], sizes = [2, 128], strides = [1, 1]} : vector<2x512xf32> to vector<2x128xf32>
    %632 = arith.negf %631 : vector<2x128xf32>
    %633 = math.exp %632 : vector<2x128xf32>
    %cst_210 = arith.constant 1.000000e+00 : f32
    %634 = vector.broadcast %cst_210 : f32 to vector<2x128xf32>
    %635 = arith.addf %634, %633 : vector<2x128xf32>
    %636 = arith.divf %634, %635 : vector<2x128xf32>
    %637 = arith.mulf %628, %577 : vector<2x128xf32>
    %638 = arith.mulf %622, %630 : vector<2x128xf32>
    %639 = arith.addf %637, %638 : vector<2x128xf32>
    %640 = math.tanh %639 : vector<2x128xf32>
    %641 = arith.mulf %636, %640 : vector<2x128xf32>
    %c2_211 = arith.constant 2 : index
    %c0_212 = arith.constant 0 : index
    %642 = vector.load %arg13[%c2_211, %c0_212] : memref<16x256xf32, #tpu.memory_space<vmem>>, vector<2x128xf32>
    tpu.vector_store %arg13[%c2_211, %c0_212], %616 {strides = array<i32>} : memref<16x256xf32, #tpu.memory_space<vmem>>, vector<2x128xf32>,
    %c12_213 = arith.constant 12 : index
    %c128_214 = arith.constant 128 : index
    %643 = vector.load %arg13[%c12_213, %c128_214] : memref<16x256xf32, #tpu.memory_space<vmem>>, vector<2x128xf32>
    tpu.vector_store %arg13[%c12_213, %c128_214], %641 {strides = array<i32>} : memref<16x256xf32, #tpu.memory_space<vmem>>, vector<2x128xf32>,
    %c4_215 = arith.constant 4 : index
    %c0_216 = arith.constant 0 : index
    %644 = vector.load %arg12[%c4_215, %c0_216] : memref<16x1024xf32, #tpu.memory_space<vmem>>, vector<2x512xf32>
    %645 = arith.truncf %616 : vector<2x128xf32> to vector<2x128xbf16>
    %c0_217 = arith.constant 0 : index
    %c0_218 = arith.constant 0 : index
    %646 = vector.load %arg7[%c0_217, %c0_218] : memref<128x512xbf16, #tpu.memory_space<vmem>>, vector<128x512xbf16>
    %cst_219 = arith.constant dense<0.000000e+00> : vector<2x512xf32>
    %647 = tpu.matmul %645, %646, %cst_219 {dimension_numbers = #tpu.dot_dimension_numbers<[1], [0], [0], [1], [0, 0, 1, 1], [], []>} : vector<2x128xbf16>, vector<128x512xbf16>, vector<2x512xf32> -> vector<2x512xf32>
    %648 = arith.addf %644, %647 : vector<2x512xf32>
    %c10_220 = arith.constant 10 : index
    %c512_221 = arith.constant 512 : index
    %649 = vector.load %arg12[%c10_220, %c512_221] : memref<16x1024xf32, #tpu.memory_space<vmem>>, vector<2x512xf32>
    %650 = arith.truncf %641 : vector<2x128xf32> to vector<2x128xbf16>
    %c0_222 = arith.constant 0 : index
    %c0_223 = arith.constant 0 : index
    %651 = vector.load %arg8[%c0_222, %c0_223] : memref<128x512xbf16, #tpu.memory_space<vmem>>, vector<128x512xbf16>
    %cst_224 = arith.constant dense<0.000000e+00> : vector<2x512xf32>
    %652 = tpu.matmul %650, %651, %cst_224 {dimension_numbers = #tpu.dot_dimension_numbers<[1], [0], [0], [1], [0, 0, 1, 1], [], []>} : vector<2x128xbf16>, vector<128x512xbf16>, vector<2x512xf32> -> vector<2x512xf32>
    %653 = arith.addf %649, %652 : vector<2x512xf32>
    %654 = vector.extract_strided_slice %648 {offsets = [0, 0], sizes = [2, 128], strides = [1, 1]} : vector<2x512xf32> to vector<2x128xf32>
    %655 = arith.negf %654 : vector<2x128xf32>
    %656 = math.exp %655 : vector<2x128xf32>
    %cst_225 = arith.constant 1.000000e+00 : f32
    %657 = vector.broadcast %cst_225 : f32 to vector<2x128xf32>
    %658 = arith.addf %657, %656 : vector<2x128xf32>
    %659 = arith.divf %657, %658 : vector<2x128xf32>
    %660 = vector.extract_strided_slice %648 {offsets = [0, 128], sizes = [2, 128], strides = [1, 1]} : vector<2x512xf32> to vector<2x128xf32>
    %661 = arith.negf %660 : vector<2x128xf32>
    %662 = math.exp %661 : vector<2x128xf32>
    %cst_226 = arith.constant 1.000000e+00 : f32
    %663 = vector.broadcast %cst_226 : f32 to vector<2x128xf32>
    %664 = arith.addf %663, %662 : vector<2x128xf32>
    %665 = arith.divf %663, %664 : vector<2x128xf32>
    %666 = vector.extract_strided_slice %648 {offsets = [0, 256], sizes = [2, 128], strides = [1, 1]} : vector<2x512xf32> to vector<2x128xf32>
    %667 = math.tanh %666 : vector<2x128xf32>
    %668 = vector.extract_strided_slice %648 {offsets = [0, 384], sizes = [2, 128], strides = [1, 1]} : vector<2x512xf32> to vector<2x128xf32>
    %669 = arith.negf %668 : vector<2x128xf32>
    %670 = math.exp %669 : vector<2x128xf32>
    %cst_227 = arith.constant 1.000000e+00 : f32
    %671 = vector.broadcast %cst_227 : f32 to vector<2x128xf32>
    %672 = arith.addf %671, %670 : vector<2x128xf32>
    %673 = arith.divf %671, %672 : vector<2x128xf32>
    %674 = arith.mulf %665, %614 : vector<2x128xf32>
    %675 = arith.mulf %659, %667 : vector<2x128xf32>
    %676 = arith.addf %674, %675 : vector<2x128xf32>
    %677 = math.tanh %676 : vector<2x128xf32>
    %678 = arith.mulf %673, %677 : vector<2x128xf32>
    %679 = vector.extract_strided_slice %653 {offsets = [0, 0], sizes = [2, 128], strides = [1, 1]} : vector<2x512xf32> to vector<2x128xf32>
    %680 = arith.negf %679 : vector<2x128xf32>
    %681 = math.exp %680 : vector<2x128xf32>
    %cst_228 = arith.constant 1.000000e+00 : f32
    %682 = vector.broadcast %cst_228 : f32 to vector<2x128xf32>
    %683 = arith.addf %682, %681 : vector<2x128xf32>
    %684 = arith.divf %682, %683 : vector<2x128xf32>
    %685 = vector.extract_strided_slice %653 {offsets = [0, 128], sizes = [2, 128], strides = [1, 1]} : vector<2x512xf32> to vector<2x128xf32>
    %686 = arith.negf %685 : vector<2x128xf32>
    %687 = math.exp %686 : vector<2x128xf32>
    %cst_229 = arith.constant 1.000000e+00 : f32
    %688 = vector.broadcast %cst_229 : f32 to vector<2x128xf32>
    %689 = arith.addf %688, %687 : vector<2x128xf32>
    %690 = arith.divf %688, %689 : vector<2x128xf32>
    %691 = vector.extract_strided_slice %653 {offsets = [0, 256], sizes = [2, 128], strides = [1, 1]} : vector<2x512xf32> to vector<2x128xf32>
    %692 = math.tanh %691 : vector<2x128xf32>
    %693 = vector.extract_strided_slice %653 {offsets = [0, 384], sizes = [2, 128], strides = [1, 1]} : vector<2x512xf32> to vector<2x128xf32>
    %694 = arith.negf %693 : vector<2x128xf32>
    %695 = math.exp %694 : vector<2x128xf32>
    %cst_230 = arith.constant 1.000000e+00 : f32
    %696 = vector.broadcast %cst_230 : f32 to vector<2x128xf32>
    %697 = arith.addf %696, %695 : vector<2x128xf32>
    %698 = arith.divf %696, %697 : vector<2x128xf32>
    %699 = arith.mulf %690, %639 : vector<2x128xf32>
    %700 = arith.mulf %684, %692 : vector<2x128xf32>
    %701 = arith.addf %699, %700 : vector<2x128xf32>
    %702 = math.tanh %701 : vector<2x128xf32>
    %703 = arith.mulf %698, %702 : vector<2x128xf32>
    %c4_231 = arith.constant 4 : index
    %c0_232 = arith.constant 0 : index
    %704 = vector.load %arg13[%c4_231, %c0_232] : memref<16x256xf32, #tpu.memory_space<vmem>>, vector<2x128xf32>
    tpu.vector_store %arg13[%c4_231, %c0_232], %678 {strides = array<i32>} : memref<16x256xf32, #tpu.memory_space<vmem>>, vector<2x128xf32>,
    %c10_233 = arith.constant 10 : index
    %c128_234 = arith.constant 128 : index
    %705 = vector.load %arg13[%c10_233, %c128_234] : memref<16x256xf32, #tpu.memory_space<vmem>>, vector<2x128xf32>
    tpu.vector_store %arg13[%c10_233, %c128_234], %703 {strides = array<i32>} : memref<16x256xf32, #tpu.memory_space<vmem>>, vector<2x128xf32>,
    %c6_235 = arith.constant 6 : index
    %c0_236 = arith.constant 0 : index
    %706 = vector.load %arg12[%c6_235, %c0_236] : memref<16x1024xf32, #tpu.memory_space<vmem>>, vector<2x512xf32>
    %707 = arith.truncf %678 : vector<2x128xf32> to vector<2x128xbf16>
    %c0_237 = arith.constant 0 : index
    %c0_238 = arith.constant 0 : index
    %708 = vector.load %arg7[%c0_237, %c0_238] : memref<128x512xbf16, #tpu.memory_space<vmem>>, vector<128x512xbf16>
    %cst_239 = arith.constant dense<0.000000e+00> : vector<2x512xf32>
    %709 = tpu.matmul %707, %708, %cst_239 {dimension_numbers = #tpu.dot_dimension_numbers<[1], [0], [0], [1], [0, 0, 1, 1], [], []>} : vector<2x128xbf16>, vector<128x512xbf16>, vector<2x512xf32> -> vector<2x512xf32>
    %710 = arith.addf %706, %709 : vector<2x512xf32>
    %c8_240 = arith.constant 8 : index
    %c512_241 = arith.constant 512 : index
    %711 = vector.load %arg12[%c8_240, %c512_241] : memref<16x1024xf32, #tpu.memory_space<vmem>>, vector<2x512xf32>
    %712 = arith.truncf %703 : vector<2x128xf32> to vector<2x128xbf16>
    %c0_242 = arith.constant 0 : index
    %c0_243 = arith.constant 0 : index
    %713 = vector.load %arg8[%c0_242, %c0_243] : memref<128x512xbf16, #tpu.memory_space<vmem>>, vector<128x512xbf16>
    %cst_244 = arith.constant dense<0.000000e+00> : vector<2x512xf32>
    %714 = tpu.matmul %712, %713, %cst_244 {dimension_numbers = #tpu.dot_dimension_numbers<[1], [0], [0], [1], [0, 0, 1, 1], [], []>} : vector<2x128xbf16>, vector<128x512xbf16>, vector<2x512xf32> -> vector<2x512xf32>
    %715 = arith.addf %711, %714 : vector<2x512xf32>
    %716 = vector.extract_strided_slice %710 {offsets = [0, 0], sizes = [2, 128], strides = [1, 1]} : vector<2x512xf32> to vector<2x128xf32>
    %717 = arith.negf %716 : vector<2x128xf32>
    %718 = math.exp %717 : vector<2x128xf32>
    %cst_245 = arith.constant 1.000000e+00 : f32
    %719 = vector.broadcast %cst_245 : f32 to vector<2x128xf32>
    %720 = arith.addf %719, %718 : vector<2x128xf32>
    %721 = arith.divf %719, %720 : vector<2x128xf32>
    %722 = vector.extract_strided_slice %710 {offsets = [0, 128], sizes = [2, 128], strides = [1, 1]} : vector<2x512xf32> to vector<2x128xf32>
    %723 = arith.negf %722 : vector<2x128xf32>
    %724 = math.exp %723 : vector<2x128xf32>
    %cst_246 = arith.constant 1.000000e+00 : f32
    %725 = vector.broadcast %cst_246 : f32 to vector<2x128xf32>
    %726 = arith.addf %725, %724 : vector<2x128xf32>
    %727 = arith.divf %725, %726 : vector<2x128xf32>
    %728 = vector.extract_strided_slice %710 {offsets = [0, 256], sizes = [2, 128], strides = [1, 1]} : vector<2x512xf32> to vector<2x128xf32>
    %729 = math.tanh %728 : vector<2x128xf32>
    %730 = vector.extract_strided_slice %710 {offsets = [0, 384], sizes = [2, 128], strides = [1, 1]} : vector<2x512xf32> to vector<2x128xf32>
    %731 = arith.negf %730 : vector<2x128xf32>
    %732 = math.exp %731 : vector<2x128xf32>
    %cst_247 = arith.constant 1.000000e+00 : f32
    %733 = vector.broadcast %cst_247 : f32 to vector<2x128xf32>
    %734 = arith.addf %733, %732 : vector<2x128xf32>
    %735 = arith.divf %733, %734 : vector<2x128xf32>
    %736 = arith.mulf %727, %676 : vector<2x128xf32>
    %737 = arith.mulf %721, %729 : vector<2x128xf32>
    %738 = arith.addf %736, %737 : vector<2x128xf32>
    %739 = math.tanh %738 : vector<2x128xf32>
    %740 = arith.mulf %735, %739 : vector<2x128xf32>
    %741 = vector.extract_strided_slice %715 {offsets = [0, 0], sizes = [2, 128], strides = [1, 1]} : vector<2x512xf32> to vector<2x128xf32>
    %742 = arith.negf %741 : vector<2x128xf32>
    %743 = math.exp %742 : vector<2x128xf32>
    %cst_248 = arith.constant 1.000000e+00 : f32
    %744 = vector.broadcast %cst_248 : f32 to vector<2x128xf32>
    %745 = arith.addf %744, %743 : vector<2x128xf32>
    %746 = arith.divf %744, %745 : vector<2x128xf32>
    %747 = vector.extract_strided_slice %715 {offsets = [0, 128], sizes = [2, 128], strides = [1, 1]} : vector<2x512xf32> to vector<2x128xf32>
    %748 = arith.negf %747 : vector<2x128xf32>
    %749 = math.exp %748 : vector<2x128xf32>
    %cst_249 = arith.constant 1.000000e+00 : f32
    %750 = vector.broadcast %cst_249 : f32 to vector<2x128xf32>
    %751 = arith.addf %750, %749 : vector<2x128xf32>
    %752 = arith.divf %750, %751 : vector<2x128xf32>
    %753 = vector.extract_strided_slice %715 {offsets = [0, 256], sizes = [2, 128], strides = [1, 1]} : vector<2x512xf32> to vector<2x128xf32>
    %754 = math.tanh %753 : vector<2x128xf32>
    %755 = vector.extract_strided_slice %715 {offsets = [0, 384], sizes = [2, 128], strides = [1, 1]} : vector<2x512xf32> to vector<2x128xf32>
    %756 = arith.negf %755 : vector<2x128xf32>
    %757 = math.exp %756 : vector<2x128xf32>
    %cst_250 = arith.constant 1.000000e+00 : f32
    %758 = vector.broadcast %cst_250 : f32 to vector<2x128xf32>
    %759 = arith.addf %758, %757 : vector<2x128xf32>
    %760 = arith.divf %758, %759 : vector<2x128xf32>
    %761 = arith.mulf %752, %701 : vector<2x128xf32>
    %762 = arith.mulf %746, %754 : vector<2x128xf32>
    %763 = arith.addf %761, %762 : vector<2x128xf32>
    %764 = math.tanh %763 : vector<2x128xf32>
    %765 = arith.mulf %760, %764 : vector<2x128xf32>
    %c6_251 = arith.constant 6 : index
    %c0_252 = arith.constant 0 : index
    %766 = vector.load %arg13[%c6_251, %c0_252] : memref<16x256xf32, #tpu.memory_space<vmem>>, vector<2x128xf32>
    tpu.vector_store %arg13[%c6_251, %c0_252], %740 {strides = array<i32>} : memref<16x256xf32, #tpu.memory_space<vmem>>, vector<2x128xf32>,
    %c8_253 = arith.constant 8 : index
    %c128_254 = arith.constant 128 : index
    %767 = vector.load %arg13[%c8_253, %c128_254] : memref<16x256xf32, #tpu.memory_space<vmem>>, vector<2x128xf32>
    tpu.vector_store %arg13[%c8_253, %c128_254], %765 {strides = array<i32>} : memref<16x256xf32, #tpu.memory_space<vmem>>, vector<2x128xf32>,
    %c8_255 = arith.constant 8 : index
    %c0_256 = arith.constant 0 : index
    %768 = vector.load %arg12[%c8_255, %c0_256] : memref<16x1024xf32, #tpu.memory_space<vmem>>, vector<2x512xf32>
    %769 = arith.truncf %740 : vector<2x128xf32> to vector<2x128xbf16>
    %c0_257 = arith.constant 0 : index
    %c0_258 = arith.constant 0 : index
    %770 = vector.load %arg7[%c0_257, %c0_258] : memref<128x512xbf16, #tpu.memory_space<vmem>>, vector<128x512xbf16>
    %cst_259 = arith.constant dense<0.000000e+00> : vector<2x512xf32>
    %771 = tpu.matmul %769, %770, %cst_259 {dimension_numbers = #tpu.dot_dimension_numbers<[1], [0], [0], [1], [0, 0, 1, 1], [], []>} : vector<2x128xbf16>, vector<128x512xbf16>, vector<2x512xf32> -> vector<2x512xf32>
    %772 = arith.addf %768, %771 : vector<2x512xf32>
    %c6_260 = arith.constant 6 : index
    %c512_261 = arith.constant 512 : index
    %773 = vector.load %arg12[%c6_260, %c512_261] : memref<16x1024xf32, #tpu.memory_space<vmem>>, vector<2x512xf32>
    %774 = arith.truncf %765 : vector<2x128xf32> to vector<2x128xbf16>
    %c0_262 = arith.constant 0 : index
    %c0_263 = arith.constant 0 : index
    %775 = vector.load %arg8[%c0_262, %c0_263] : memref<128x512xbf16, #tpu.memory_space<vmem>>, vector<128x512xbf16>
    %cst_264 = arith.constant dense<0.000000e+00> : vector<2x512xf32>
    %776 = tpu.matmul %774, %775, %cst_264 {dimension_numbers = #tpu.dot_dimension_numbers<[1], [0], [0], [1], [0, 0, 1, 1], [], []>} : vector<2x128xbf16>, vector<128x512xbf16>, vector<2x512xf32> -> vector<2x512xf32>
    %777 = arith.addf %773, %776 : vector<2x512xf32>
    %778 = vector.extract_strided_slice %772 {offsets = [0, 0], sizes = [2, 128], strides = [1, 1]} : vector<2x512xf32> to vector<2x128xf32>
    %779 = arith.negf %778 : vector<2x128xf32>
    %780 = math.exp %779 : vector<2x128xf32>
    %cst_265 = arith.constant 1.000000e+00 : f32
    %781 = vector.broadcast %cst_265 : f32 to vector<2x128xf32>
    %782 = arith.addf %781, %780 : vector<2x128xf32>
    %783 = arith.divf %781, %782 : vector<2x128xf32>
    %784 = vector.extract_strided_slice %772 {offsets = [0, 128], sizes = [2, 128], strides = [1, 1]} : vector<2x512xf32> to vector<2x128xf32>
    %785 = arith.negf %784 : vector<2x128xf32>
    %786 = math.exp %785 : vector<2x128xf32>
    %cst_266 = arith.constant 1.000000e+00 : f32
    %787 = vector.broadcast %cst_266 : f32 to vector<2x128xf32>
    %788 = arith.addf %787, %786 : vector<2x128xf32>
    %789 = arith.divf %787, %788 : vector<2x128xf32>
    %790 = vector.extract_strided_slice %772 {offsets = [0, 256], sizes = [2, 128], strides = [1, 1]} : vector<2x512xf32> to vector<2x128xf32>
    %791 = math.tanh %790 : vector<2x128xf32>
    %792 = vector.extract_strided_slice %772 {offsets = [0, 384], sizes = [2, 128], strides = [1, 1]} : vector<2x512xf32> to vector<2x128xf32>
    %793 = arith.negf %792 : vector<2x128xf32>
    %794 = math.exp %793 : vector<2x128xf32>
    %cst_267 = arith.constant 1.000000e+00 : f32
    %795 = vector.broadcast %cst_267 : f32 to vector<2x128xf32>
    %796 = arith.addf %795, %794 : vector<2x128xf32>
    %797 = arith.divf %795, %796 : vector<2x128xf32>
    %798 = arith.mulf %789, %738 : vector<2x128xf32>
    %799 = arith.mulf %783, %791 : vector<2x128xf32>
    %800 = arith.addf %798, %799 : vector<2x128xf32>
    %801 = math.tanh %800 : vector<2x128xf32>
    %802 = arith.mulf %797, %801 : vector<2x128xf32>
    %803 = vector.extract_strided_slice %777 {offsets = [0, 0], sizes = [2, 128], strides = [1, 1]} : vector<2x512xf32> to vector<2x128xf32>
    %804 = arith.negf %803 : vector<2x128xf32>
    %805 = math.exp %804 : vector<2x128xf32>
    %cst_268 = arith.constant 1.000000e+00 : f32
    %806 = vector.broadcast %cst_268 : f32 to vector<2x128xf32>
    %807 = arith.addf %806, %805 : vector<2x128xf32>
    %808 = arith.divf %806, %807 : vector<2x128xf32>
    %809 = vector.extract_strided_slice %777 {offsets = [0, 128], sizes = [2, 128], strides = [1, 1]} : vector<2x512xf32> to vector<2x128xf32>
    %810 = arith.negf %809 : vector<2x128xf32>
    %811 = math.exp %810 : vector<2x128xf32>
    %cst_269 = arith.constant 1.000000e+00 : f32
    %812 = vector.broadcast %cst_269 : f32 to vector<2x128xf32>
    %813 = arith.addf %812, %811 : vector<2x128xf32>
    %814 = arith.divf %812, %813 : vector<2x128xf32>
    %815 = vector.extract_strided_slice %777 {offsets = [0, 256], sizes = [2, 128], strides = [1, 1]} : vector<2x512xf32> to vector<2x128xf32>
    %816 = math.tanh %815 : vector<2x128xf32>
    %817 = vector.extract_strided_slice %777 {offsets = [0, 384], sizes = [2, 128], strides = [1, 1]} : vector<2x512xf32> to vector<2x128xf32>
    %818 = arith.negf %817 : vector<2x128xf32>
    %819 = math.exp %818 : vector<2x128xf32>
    %cst_270 = arith.constant 1.000000e+00 : f32
    %820 = vector.broadcast %cst_270 : f32 to vector<2x128xf32>
    %821 = arith.addf %820, %819 : vector<2x128xf32>
    %822 = arith.divf %820, %821 : vector<2x128xf32>
    %823 = arith.mulf %814, %763 : vector<2x128xf32>
    %824 = arith.mulf %808, %816 : vector<2x128xf32>
    %825 = arith.addf %823, %824 : vector<2x128xf32>
    %826 = math.tanh %825 : vector<2x128xf32>
    %827 = arith.mulf %822, %826 : vector<2x128xf32>
    %c8_271 = arith.constant 8 : index
    %c0_272 = arith.constant 0 : index
    %828 = vector.load %arg13[%c8_271, %c0_272] : memref<16x256xf32, #tpu.memory_space<vmem>>, vector<2x128xf32>
    tpu.vector_store %arg13[%c8_271, %c0_272], %802 {strides = array<i32>} : memref<16x256xf32, #tpu.memory_space<vmem>>, vector<2x128xf32>,
    %c6_273 = arith.constant 6 : index
    %c128_274 = arith.constant 128 : index
    %829 = vector.load %arg13[%c6_273, %c128_274] : memref<16x256xf32, #tpu.memory_space<vmem>>, vector<2x128xf32>
    tpu.vector_store %arg13[%c6_273, %c128_274], %827 {strides = array<i32>} : memref<16x256xf32, #tpu.memory_space<vmem>>, vector<2x128xf32>,
    %c10_275 = arith.constant 10 : index
    %c0_276 = arith.constant 0 : index
    %830 = vector.load %arg12[%c10_275, %c0_276] : memref<16x1024xf32, #tpu.memory_space<vmem>>, vector<2x512xf32>
    %831 = arith.truncf %802 : vector<2x128xf32> to vector<2x128xbf16>
    %c0_277 = arith.constant 0 : index
    %c0_278 = arith.constant 0 : index
    %832 = vector.load %arg7[%c0_277, %c0_278] : memref<128x512xbf16, #tpu.memory_space<vmem>>, vector<128x512xbf16>
    %cst_279 = arith.constant dense<0.000000e+00> : vector<2x512xf32>
    %833 = tpu.matmul %831, %832, %cst_279 {dimension_numbers = #tpu.dot_dimension_numbers<[1], [0], [0], [1], [0, 0, 1, 1], [], []>} : vector<2x128xbf16>, vector<128x512xbf16>, vector<2x512xf32> -> vector<2x512xf32>
    %834 = arith.addf %830, %833 : vector<2x512xf32>
    %c4_280 = arith.constant 4 : index
    %c512_281 = arith.constant 512 : index
    %835 = vector.load %arg12[%c4_280, %c512_281] : memref<16x1024xf32, #tpu.memory_space<vmem>>, vector<2x512xf32>
    %836 = arith.truncf %827 : vector<2x128xf32> to vector<2x128xbf16>
    %c0_282 = arith.constant 0 : index
    %c0_283 = arith.constant 0 : index
    %837 = vector.load %arg8[%c0_282, %c0_283] : memref<128x512xbf16, #tpu.memory_space<vmem>>, vector<128x512xbf16>
    %cst_284 = arith.constant dense<0.000000e+00> : vector<2x512xf32>
    %838 = tpu.matmul %836, %837, %cst_284 {dimension_numbers = #tpu.dot_dimension_numbers<[1], [0], [0], [1], [0, 0, 1, 1], [], []>} : vector<2x128xbf16>, vector<128x512xbf16>, vector<2x512xf32> -> vector<2x512xf32>
    %839 = arith.addf %835, %838 : vector<2x512xf32>
    %840 = vector.extract_strided_slice %834 {offsets = [0, 0], sizes = [2, 128], strides = [1, 1]} : vector<2x512xf32> to vector<2x128xf32>
    %841 = arith.negf %840 : vector<2x128xf32>
    %842 = math.exp %841 : vector<2x128xf32>
    %cst_285 = arith.constant 1.000000e+00 : f32
    %843 = vector.broadcast %cst_285 : f32 to vector<2x128xf32>
    %844 = arith.addf %843, %842 : vector<2x128xf32>
    %845 = arith.divf %843, %844 : vector<2x128xf32>
    %846 = vector.extract_strided_slice %834 {offsets = [0, 128], sizes = [2, 128], strides = [1, 1]} : vector<2x512xf32> to vector<2x128xf32>
    %847 = arith.negf %846 : vector<2x128xf32>
    %848 = math.exp %847 : vector<2x128xf32>
    %cst_286 = arith.constant 1.000000e+00 : f32
    %849 = vector.broadcast %cst_286 : f32 to vector<2x128xf32>
    %850 = arith.addf %849, %848 : vector<2x128xf32>
    %851 = arith.divf %849, %850 : vector<2x128xf32>
    %852 = vector.extract_strided_slice %834 {offsets = [0, 256], sizes = [2, 128], strides = [1, 1]} : vector<2x512xf32> to vector<2x128xf32>
    %853 = math.tanh %852 : vector<2x128xf32>
    %854 = vector.extract_strided_slice %834 {offsets = [0, 384], sizes = [2, 128], strides = [1, 1]} : vector<2x512xf32> to vector<2x128xf32>
    %855 = arith.negf %854 : vector<2x128xf32>
    %856 = math.exp %855 : vector<2x128xf32>
    %cst_287 = arith.constant 1.000000e+00 : f32
    %857 = vector.broadcast %cst_287 : f32 to vector<2x128xf32>
    %858 = arith.addf %857, %856 : vector<2x128xf32>
    %859 = arith.divf %857, %858 : vector<2x128xf32>
    %860 = arith.mulf %851, %800 : vector<2x128xf32>
    %861 = arith.mulf %845, %853 : vector<2x128xf32>
    %862 = arith.addf %860, %861 : vector<2x128xf32>
    %863 = math.tanh %862 : vector<2x128xf32>
    %864 = arith.mulf %859, %863 : vector<2x128xf32>
    %865 = vector.extract_strided_slice %839 {offsets = [0, 0], sizes = [2, 128], strides = [1, 1]} : vector<2x512xf32> to vector<2x128xf32>
    %866 = arith.negf %865 : vector<2x128xf32>
    %867 = math.exp %866 : vector<2x128xf32>
    %cst_288 = arith.constant 1.000000e+00 : f32
    %868 = vector.broadcast %cst_288 : f32 to vector<2x128xf32>
    %869 = arith.addf %868, %867 : vector<2x128xf32>
    %870 = arith.divf %868, %869 : vector<2x128xf32>
    %871 = vector.extract_strided_slice %839 {offsets = [0, 128], sizes = [2, 128], strides = [1, 1]} : vector<2x512xf32> to vector<2x128xf32>
    %872 = arith.negf %871 : vector<2x128xf32>
    %873 = math.exp %872 : vector<2x128xf32>
    %cst_289 = arith.constant 1.000000e+00 : f32
    %874 = vector.broadcast %cst_289 : f32 to vector<2x128xf32>
    %875 = arith.addf %874, %873 : vector<2x128xf32>
    %876 = arith.divf %874, %875 : vector<2x128xf32>
    %877 = vector.extract_strided_slice %839 {offsets = [0, 256], sizes = [2, 128], strides = [1, 1]} : vector<2x512xf32> to vector<2x128xf32>
    %878 = math.tanh %877 : vector<2x128xf32>
    %879 = vector.extract_strided_slice %839 {offsets = [0, 384], sizes = [2, 128], strides = [1, 1]} : vector<2x512xf32> to vector<2x128xf32>
    %880 = arith.negf %879 : vector<2x128xf32>
    %881 = math.exp %880 : vector<2x128xf32>
    %cst_290 = arith.constant 1.000000e+00 : f32
    %882 = vector.broadcast %cst_290 : f32 to vector<2x128xf32>
    %883 = arith.addf %882, %881 : vector<2x128xf32>
    %884 = arith.divf %882, %883 : vector<2x128xf32>
    %885 = arith.mulf %876, %825 : vector<2x128xf32>
    %886 = arith.mulf %870, %878 : vector<2x128xf32>
    %887 = arith.addf %885, %886 : vector<2x128xf32>
    %888 = math.tanh %887 : vector<2x128xf32>
    %889 = arith.mulf %884, %888 : vector<2x128xf32>
    %c10_291 = arith.constant 10 : index
    %c0_292 = arith.constant 0 : index
    %890 = vector.load %arg13[%c10_291, %c0_292] : memref<16x256xf32, #tpu.memory_space<vmem>>, vector<2x128xf32>
    tpu.vector_store %arg13[%c10_291, %c0_292], %864 {strides = array<i32>} : memref<16x256xf32, #tpu.memory_space<vmem>>, vector<2x128xf32>,
    %c4_293 = arith.constant 4 : index
    %c128_294 = arith.constant 128 : index
    %891 = vector.load %arg13[%c4_293, %c128_294] : memref<16x256xf32, #tpu.memory_space<vmem>>, vector<2x128xf32>
    tpu.vector_store %arg13[%c4_293, %c128_294], %889 {strides = array<i32>} : memref<16x256xf32, #tpu.memory_space<vmem>>, vector<2x128xf32>,
    %c12_295 = arith.constant 12 : index
    %c0_296 = arith.constant 0 : index
    %892 = vector.load %arg12[%c12_295, %c0_296] : memref<16x1024xf32, #tpu.memory_space<vmem>>, vector<2x512xf32>
    %893 = arith.truncf %864 : vector<2x128xf32> to vector<2x128xbf16>
    %c0_297 = arith.constant 0 : index
    %c0_298 = arith.constant 0 : index
    %894 = vector.load %arg7[%c0_297, %c0_298] : memref<128x512xbf16, #tpu.memory_space<vmem>>, vector<128x512xbf16>
    %cst_299 = arith.constant dense<0.000000e+00> : vector<2x512xf32>
    %895 = tpu.matmul %893, %894, %cst_299 {dimension_numbers = #tpu.dot_dimension_numbers<[1], [0], [0], [1], [0, 0, 1, 1], [], []>} : vector<2x128xbf16>, vector<128x512xbf16>, vector<2x512xf32> -> vector<2x512xf32>
    %896 = arith.addf %892, %895 : vector<2x512xf32>
    %c2_300 = arith.constant 2 : index
    %c512_301 = arith.constant 512 : index
    %897 = vector.load %arg12[%c2_300, %c512_301] : memref<16x1024xf32, #tpu.memory_space<vmem>>, vector<2x512xf32>
    %898 = arith.truncf %889 : vector<2x128xf32> to vector<2x128xbf16>
    %c0_302 = arith.constant 0 : index
    %c0_303 = arith.constant 0 : index
    %899 = vector.load %arg8[%c0_302, %c0_303] : memref<128x512xbf16, #tpu.memory_space<vmem>>, vector<128x512xbf16>
    %cst_304 = arith.constant dense<0.000000e+00> : vector<2x512xf32>
    %900 = tpu.matmul %898, %899, %cst_304 {dimension_numbers = #tpu.dot_dimension_numbers<[1], [0], [0], [1], [0, 0, 1, 1], [], []>} : vector<2x128xbf16>, vector<128x512xbf16>, vector<2x512xf32> -> vector<2x512xf32>
    %901 = arith.addf %897, %900 : vector<2x512xf32>
    %902 = vector.extract_strided_slice %896 {offsets = [0, 0], sizes = [2, 128], strides = [1, 1]} : vector<2x512xf32> to vector<2x128xf32>
    %903 = arith.negf %902 : vector<2x128xf32>
    %904 = math.exp %903 : vector<2x128xf32>
    %cst_305 = arith.constant 1.000000e+00 : f32
    %905 = vector.broadcast %cst_305 : f32 to vector<2x128xf32>
    %906 = arith.addf %905, %904 : vector<2x128xf32>
    %907 = arith.divf %905, %906 : vector<2x128xf32>
    %908 = vector.extract_strided_slice %896 {offsets = [0, 128], sizes = [2, 128], strides = [1, 1]} : vector<2x512xf32> to vector<2x128xf32>
    %909 = arith.negf %908 : vector<2x128xf32>
    %910 = math.exp %909 : vector<2x128xf32>
    %cst_306 = arith.constant 1.000000e+00 : f32
    %911 = vector.broadcast %cst_306 : f32 to vector<2x128xf32>
    %912 = arith.addf %911, %910 : vector<2x128xf32>
    %913 = arith.divf %911, %912 : vector<2x128xf32>
    %914 = vector.extract_strided_slice %896 {offsets = [0, 256], sizes = [2, 128], strides = [1, 1]} : vector<2x512xf32> to vector<2x128xf32>
    %915 = math.tanh %914 : vector<2x128xf32>
    %916 = vector.extract_strided_slice %896 {offsets = [0, 384], sizes = [2, 128], strides = [1, 1]} : vector<2x512xf32> to vector<2x128xf32>
    %917 = arith.negf %916 : vector<2x128xf32>
    %918 = math.exp %917 : vector<2x128xf32>
    %cst_307 = arith.constant 1.000000e+00 : f32
    %919 = vector.broadcast %cst_307 : f32 to vector<2x128xf32>
    %920 = arith.addf %919, %918 : vector<2x128xf32>
    %921 = arith.divf %919, %920 : vector<2x128xf32>
    %922 = arith.mulf %913, %862 : vector<2x128xf32>
    %923 = arith.mulf %907, %915 : vector<2x128xf32>
    %924 = arith.addf %922, %923 : vector<2x128xf32>
    %925 = math.tanh %924 : vector<2x128xf32>
    %926 = arith.mulf %921, %925 : vector<2x128xf32>
    %927 = vector.extract_strided_slice %901 {offsets = [0, 0], sizes = [2, 128], strides = [1, 1]} : vector<2x512xf32> to vector<2x128xf32>
    %928 = arith.negf %927 : vector<2x128xf32>
    %929 = math.exp %928 : vector<2x128xf32>
    %cst_308 = arith.constant 1.000000e+00 : f32
    %930 = vector.broadcast %cst_308 : f32 to vector<2x128xf32>
    %931 = arith.addf %930, %929 : vector<2x128xf32>
    %932 = arith.divf %930, %931 : vector<2x128xf32>
    %933 = vector.extract_strided_slice %901 {offsets = [0, 128], sizes = [2, 128], strides = [1, 1]} : vector<2x512xf32> to vector<2x128xf32>
    %934 = arith.negf %933 : vector<2x128xf32>
    %935 = math.exp %934 : vector<2x128xf32>
    %cst_309 = arith.constant 1.000000e+00 : f32
    %936 = vector.broadcast %cst_309 : f32 to vector<2x128xf32>
    %937 = arith.addf %936, %935 : vector<2x128xf32>
    %938 = arith.divf %936, %937 : vector<2x128xf32>
    %939 = vector.extract_strided_slice %901 {offsets = [0, 256], sizes = [2, 128], strides = [1, 1]} : vector<2x512xf32> to vector<2x128xf32>
    %940 = math.tanh %939 : vector<2x128xf32>
    %941 = vector.extract_strided_slice %901 {offsets = [0, 384], sizes = [2, 128], strides = [1, 1]} : vector<2x512xf32> to vector<2x128xf32>
    %942 = arith.negf %941 : vector<2x128xf32>
    %943 = math.exp %942 : vector<2x128xf32>
    %cst_310 = arith.constant 1.000000e+00 : f32
    %944 = vector.broadcast %cst_310 : f32 to vector<2x128xf32>
    %945 = arith.addf %944, %943 : vector<2x128xf32>
    %946 = arith.divf %944, %945 : vector<2x128xf32>
    %947 = arith.mulf %938, %887 : vector<2x128xf32>
    %948 = arith.mulf %932, %940 : vector<2x128xf32>
    %949 = arith.addf %947, %948 : vector<2x128xf32>
    %950 = math.tanh %949 : vector<2x128xf32>
    %951 = arith.mulf %946, %950 : vector<2x128xf32>
    %c12_311 = arith.constant 12 : index
    %c0_312 = arith.constant 0 : index
    %952 = vector.load %arg13[%c12_311, %c0_312] : memref<16x256xf32, #tpu.memory_space<vmem>>, vector<2x128xf32>
    tpu.vector_store %arg13[%c12_311, %c0_312], %926 {strides = array<i32>} : memref<16x256xf32, #tpu.memory_space<vmem>>, vector<2x128xf32>,
    %c2_313 = arith.constant 2 : index
    %c128_314 = arith.constant 128 : index
    %953 = vector.load %arg13[%c2_313, %c128_314] : memref<16x256xf32, #tpu.memory_space<vmem>>, vector<2x128xf32>
    tpu.vector_store %arg13[%c2_313, %c128_314], %951 {strides = array<i32>} : memref<16x256xf32, #tpu.memory_space<vmem>>, vector<2x128xf32>,
    %c14_315 = arith.constant 14 : index
    %c0_316 = arith.constant 0 : index
    %954 = vector.load %arg12[%c14_315, %c0_316] : memref<16x1024xf32, #tpu.memory_space<vmem>>, vector<2x512xf32>
    %955 = arith.truncf %926 : vector<2x128xf32> to vector<2x128xbf16>
    %c0_317 = arith.constant 0 : index
    %c0_318 = arith.constant 0 : index
    %956 = vector.load %arg7[%c0_317, %c0_318] : memref<128x512xbf16, #tpu.memory_space<vmem>>, vector<128x512xbf16>
    %cst_319 = arith.constant dense<0.000000e+00> : vector<2x512xf32>
    %957 = tpu.matmul %955, %956, %cst_319 {dimension_numbers = #tpu.dot_dimension_numbers<[1], [0], [0], [1], [0, 0, 1, 1], [], []>} : vector<2x128xbf16>, vector<128x512xbf16>, vector<2x512xf32> -> vector<2x512xf32>
    %958 = arith.addf %954, %957 : vector<2x512xf32>
    %c0_320 = arith.constant 0 : index
    %c512_321 = arith.constant 512 : index
    %959 = vector.load %arg12[%c0_320, %c512_321] : memref<16x1024xf32, #tpu.memory_space<vmem>>, vector<2x512xf32>
    %960 = arith.truncf %951 : vector<2x128xf32> to vector<2x128xbf16>
    %c0_322 = arith.constant 0 : index
    %c0_323 = arith.constant 0 : index
    %961 = vector.load %arg8[%c0_322, %c0_323] : memref<128x512xbf16, #tpu.memory_space<vmem>>, vector<128x512xbf16>
    %cst_324 = arith.constant dense<0.000000e+00> : vector<2x512xf32>
    %962 = tpu.matmul %960, %961, %cst_324 {dimension_numbers = #tpu.dot_dimension_numbers<[1], [0], [0], [1], [0, 0, 1, 1], [], []>} : vector<2x128xbf16>, vector<128x512xbf16>, vector<2x512xf32> -> vector<2x512xf32>
    %963 = arith.addf %959, %962 : vector<2x512xf32>
    %964 = vector.extract_strided_slice %958 {offsets = [0, 0], sizes = [2, 128], strides = [1, 1]} : vector<2x512xf32> to vector<2x128xf32>
    %965 = arith.negf %964 : vector<2x128xf32>
    %966 = math.exp %965 : vector<2x128xf32>
    %cst_325 = arith.constant 1.000000e+00 : f32
    %967 = vector.broadcast %cst_325 : f32 to vector<2x128xf32>
    %968 = arith.addf %967, %966 : vector<2x128xf32>
    %969 = arith.divf %967, %968 : vector<2x128xf32>
    %970 = vector.extract_strided_slice %958 {offsets = [0, 128], sizes = [2, 128], strides = [1, 1]} : vector<2x512xf32> to vector<2x128xf32>
    %971 = arith.negf %970 : vector<2x128xf32>
    %972 = math.exp %971 : vector<2x128xf32>
    %cst_326 = arith.constant 1.000000e+00 : f32
    %973 = vector.broadcast %cst_326 : f32 to vector<2x128xf32>
    %974 = arith.addf %973, %972 : vector<2x128xf32>
    %975 = arith.divf %973, %974 : vector<2x128xf32>
    %976 = vector.extract_strided_slice %958 {offsets = [0, 256], sizes = [2, 128], strides = [1, 1]} : vector<2x512xf32> to vector<2x128xf32>
    %977 = math.tanh %976 : vector<2x128xf32>
    %978 = vector.extract_strided_slice %958 {offsets = [0, 384], sizes = [2, 128], strides = [1, 1]} : vector<2x512xf32> to vector<2x128xf32>
    %979 = arith.negf %978 : vector<2x128xf32>
    %980 = math.exp %979 : vector<2x128xf32>
    %cst_327 = arith.constant 1.000000e+00 : f32
    %981 = vector.broadcast %cst_327 : f32 to vector<2x128xf32>
    %982 = arith.addf %981, %980 : vector<2x128xf32>
    %983 = arith.divf %981, %982 : vector<2x128xf32>
    %984 = arith.mulf %975, %924 : vector<2x128xf32>
    %985 = arith.mulf %969, %977 : vector<2x128xf32>
    %986 = arith.addf %984, %985 : vector<2x128xf32>
    %987 = math.tanh %986 : vector<2x128xf32>
    %988 = arith.mulf %983, %987 : vector<2x128xf32>
    %989 = vector.extract_strided_slice %963 {offsets = [0, 0], sizes = [2, 128], strides = [1, 1]} : vector<2x512xf32> to vector<2x128xf32>
    %990 = arith.negf %989 : vector<2x128xf32>
    %991 = math.exp %990 : vector<2x128xf32>
    %cst_328 = arith.constant 1.000000e+00 : f32
    %992 = vector.broadcast %cst_328 : f32 to vector<2x128xf32>
    %993 = arith.addf %992, %991 : vector<2x128xf32>
    %994 = arith.divf %992, %993 : vector<2x128xf32>
    %995 = vector.extract_strided_slice %963 {offsets = [0, 128], sizes = [2, 128], strides = [1, 1]} : vector<2x512xf32> to vector<2x128xf32>
    %996 = arith.negf %995 : vector<2x128xf32>
    %997 = math.exp %996 : vector<2x128xf32>
    %cst_329 = arith.constant 1.000000e+00 : f32
    %998 = vector.broadcast %cst_329 : f32 to vector<2x128xf32>
    %999 = arith.addf %998, %997 : vector<2x128xf32>
    %1000 = arith.divf %998, %999 : vector<2x128xf32>
    %1001 = vector.extract_strided_slice %963 {offsets = [0, 256], sizes = [2, 128], strides = [1, 1]} : vector<2x512xf32> to vector<2x128xf32>
    %1002 = math.tanh %1001 : vector<2x128xf32>
    %1003 = vector.extract_strided_slice %963 {offsets = [0, 384], sizes = [2, 128], strides = [1, 1]} : vector<2x512xf32> to vector<2x128xf32>
    %1004 = arith.negf %1003 : vector<2x128xf32>
    %1005 = math.exp %1004 : vector<2x128xf32>
    %cst_330 = arith.constant 1.000000e+00 : f32
    %1006 = vector.broadcast %cst_330 : f32 to vector<2x128xf32>
    %1007 = arith.addf %1006, %1005 : vector<2x128xf32>
    %1008 = arith.divf %1006, %1007 : vector<2x128xf32>
    %1009 = arith.mulf %1000, %949 : vector<2x128xf32>
    %1010 = arith.mulf %994, %1002 : vector<2x128xf32>
    %1011 = arith.addf %1009, %1010 : vector<2x128xf32>
    %1012 = math.tanh %1011 : vector<2x128xf32>
    %1013 = arith.mulf %1008, %1012 : vector<2x128xf32>
    %c14_331 = arith.constant 14 : index
    %c0_332 = arith.constant 0 : index
    %1014 = vector.load %arg13[%c14_331, %c0_332] : memref<16x256xf32, #tpu.memory_space<vmem>>, vector<2x128xf32>
    tpu.vector_store %arg13[%c14_331, %c0_332], %988 {strides = array<i32>} : memref<16x256xf32, #tpu.memory_space<vmem>>, vector<2x128xf32>,
    %c0_333 = arith.constant 0 : index
    %c128_334 = arith.constant 128 : index
    %1015 = vector.load %arg13[%c0_333, %c128_334] : memref<16x256xf32, #tpu.memory_space<vmem>>, vector<2x128xf32>
    tpu.vector_store %arg13[%c0_333, %c128_334], %1013 {strides = array<i32>} : memref<16x256xf32, #tpu.memory_space<vmem>>, vector<2x128xf32>,
    %c0_335 = arith.constant 0 : index
    %c0_336 = arith.constant 0 : index
    %1016 = vector.load %arg13[%c0_335, %c0_336] : memref<16x256xf32, #tpu.memory_space<vmem>>, vector<16x256xf32>
    %1017 = arith.truncf %1016 : vector<16x256xf32> to vector<16x256xbf16>
    %c0_337 = arith.constant 0 : index
    %c0_338 = arith.constant 0 : index
    %1018 = vector.load %arg9[%c0_337, %c0_338] : memref<256x768xbf16, #tpu.memory_space<vmem>>, vector<256x768xbf16>
    %cst_339 = arith.constant dense<0.000000e+00> : vector<16x768xf32>
    %1019 = tpu.matmul %1017, %1018, %cst_339 {dimension_numbers = #tpu.dot_dimension_numbers<[1], [0], [0], [1], [0, 0, 1, 1], [], []>} : vector<16x256xbf16>, vector<256x768xbf16>, vector<16x768xf32> -> vector<16x768xf32>
    %c0_340 = arith.constant 0 : index
    %c0_341 = arith.constant 0 : index
    %1020 = vector.load %arg10[%c0_340, %c0_341] : memref<1x768xf32, #tpu.memory_space<vmem>>, vector<1x768xf32>
    %1021 = vector.broadcast %1020 : vector<1x768xf32> to vector<16x768xf32>
    %1022 = arith.addf %1019, %1021 : vector<16x768xf32>
    %c0_342 = arith.constant 0 : index
    %c0_343 = arith.constant 0 : index
    %1023 = vector.load %arg11[%c0_342, %c0_343] : memref<16x768xf32, #tpu.memory_space<vmem>>, vector<16x768xf32>
    tpu.vector_store %arg11[%c0_342, %c0_343], %1022 {strides = array<i32>} : memref<16x768xf32, #tpu.memory_space<vmem>>, vector<16x768xf32>,
    return
  }
}

</mosaic_0001>

<bundles_post_ra>
// kernel: text_rnn_forward.1
= control target key start
LH: loop header
LB: loop body
LE: loop exit
PB: predicated region body
PF: predicated region fallthrough
CT: control target
= control target key end

     0   :  { %16 = vsyncpa [#allocation5], 0  ;;  %s18697_s0 = inlined_call_operand.vmem [shape: f32[16,256], index: 0, kind: input, shape index: {}]   ;;  %s18698_s1 = inlined_call_operand.hbm [shape: bf16[256,1024], index: 1, kind: input, shape index: {}]   ;;  %s18699_s2 = inlined_call_operand.vmem [shape: f32[1,1024], index: 2, kind: input, shape index: {}]   ;;  %s18700_s3 = inlined_call_operand.hbm [shape: bf16[128,512], index: 3, kind: input, shape index: {}]   ;;  %s18701_s4 = inlined_call_operand.hbm [shape: bf16[128,512], index: 4, kind: input, shape index: {}]   ;;  %s18702_s5 = inlined_call_operand.hbm [shape: bf16[256,1024], index: 5, kind: input, shape index: {}]   ;;  %s18703_s6 = inlined_call_operand.vmem [shape: f32[1,1024], index: 6, kind: input, shape index: {}]   ;;  %s18704_s7 = inlined_call_operand.hbm [shape: bf16[128,512], index: 7, kind: input, shape index: {}]   ;;  %s18705_s8 = inlined_call_operand.hbm [shape: bf16[128,512], index: 8, kind: input, shape index: {}]   ;;  %s18706_s9 = inlined_call_operand.hbm [shape: bf16[256,768], index: 9, kind: input, shape index: {}]   ;;  %s18707_s10 = inlined_call_operand.vmem [shape: f32[1,768], index: 10, kind: input, shape index: {}]   ;;  %s18708_s11 = inlined_call_operand.vmem [shape: f32[16,768], index: 11, kind: output, shape index: {}]  }
   0x1   :  { %17 = vsyncpa [#allocation7], 0 }
   0x2   :  { %18 = vsyncpa [#allocation10], 0 }
   0x3   :  { %19 = vsyncpa [#allocation13], 0  ;;  %s16268_s17 = smov [#allocation6]  }
   0x4   :  { %s41_s18 = sshll.u32 %s16268_s17, 4  ;;  %s42_s18 = int_to_ptr.vmem [resolvable:$true] %s41_s18 }
   0x5   :  { %s16128_s19 = scalar_lea.vmem %s42_s18, 4096  ;;  %p16133_p1 = scmp.lt.s32.totalorder %s42_s18, %s42_s18 }
   0x6   :  { %p16129_p0 = scmp.ne.s32.totalorder %s42_s18, %s16128_s19  ;;  %p16134_p2 = scmp.lt.s32.totalorder %s16128_s19, %s16128_s19 }
   0x8   :  { %p16135_p3 = por %p16134_p2, %p16133_p1 }
   0xa   :  { %p16136_p4 = pnand %p16135_p3, %p16129_p0 }
   0xc   :  { %16139 = shalt.err (!%p16136_p4)
}
   0xd   :  { %s16269_s20 = smov 256   ;;  %s16270_s21 = smov 16  }
   0xe   :  { %47 = dma.hbm_to_vmem [thread:$0]  %s18700_s3, 4096, %s42_s18, [#allocation7], %s16269_s20, %s16269_s20, %s16270_s21  }
   0xf   :  { %s16271_s24 = smov [#allocation9]   ;;  %s16272_s26 = smov [#allocation12]  }
  0x10   :  { %s65_s25 = sshll.u32 %s16271_s24, 4  ;;  %s91_s27 = sshll.u32 %s16272_s26, 4  ;;  %s66_s25 = int_to_ptr.vmem [resolvable:$true] %s65_s25  ;;  %s92_s27 = int_to_ptr.vmem [resolvable:$true] %s91_s27 }
  0x11   :  { %s16148_s28 = scalar_lea.vmem %s66_s25, 16384  ;;  %p16153_p6 = scmp.lt.s32.totalorder %s66_s25, %s66_s25 }
  0x12   :  { %p16149_p5 = scmp.ne.s32.totalorder %s66_s25, %s16148_s28  ;;  %p16154_p7 = scmp.lt.s32.totalorder %s16148_s28, %s16148_s28 }
  0x14   :  { %p16155_p8 = por %p16154_p7, %p16153_p6 }
  0x16   :  { %p16156_p9 = pnand %p16155_p8, %p16149_p5 }
  0x18   :  { %16159 = shalt.err (!%p16156_p9)
}
  0x19   :  { %s16273_s29 = smov 512   ;;  %s16274_s30 = smov 32  }
  0x1a   :  { %71 = dma.hbm_to_vmem [thread:$0]  %s18702_s5, 16384, %s66_s25, [#allocation10], %s16273_s29, %s16273_s29, %s16274_s30  }
  0x1b   :  { %s16168_s3 = scalar_lea.vmem %s92_s27, 4096  ;;  %p16173_p11 = scmp.lt.s32.totalorder %s92_s27, %s92_s27 }
  0x1c   :  { %p16169_p10 = scmp.ne.s32.totalorder %s92_s27, %s16168_s3  ;;  %p16174_p12 = scmp.lt.s32.totalorder %s16168_s3, %s16168_s3 }
  0x1e   :  { %p16175_p13 = por %p16174_p12, %p16173_p11 }
  0x20   :  { %p16176_p0 = pnand %p16175_p13, %p16169_p10 }
  0x22   :  { %16179 = shalt.err (!%p16176_p0)
}
  0x23   :  { %97 = dma.hbm_to_vmem [thread:$0]  %s18705_s8, 4096, %s92_s27, [#allocation13], %s16269_s20, %s16269_s20, %s16270_s21  }
  0x24   :  { %s16275_s16 = smov [#allocation4]   ;;  %s16276_s18 = smov [#allocation8]  }
  0x25   :  { %s27_s17 = sshll.u32 %s16275_s16, 4  ;;  %s53_s5 = sshll.u32 %s16276_s18, 4  ;;  %s28_s17 = int_to_ptr.vmem [resolvable:$true] %s27_s17  ;;  %s54_s5 = int_to_ptr.vmem [resolvable:$true] %s53_s5 }
  0x26   :  { %s16188_s19 = scalar_lea.vmem %s28_s17, 16384  ;;  %p16193_p2 = scmp.lt.s32.totalorder %s28_s17, %s28_s17 }
  0x27   :  { %p16189_p1 = scmp.ne.s32.totalorder %s28_s17, %s16188_s19  ;;  %p16194_p3 = scmp.lt.s32.totalorder %s16188_s19, %s16188_s19 }
  0x29   :  { %p16195_p4 = por %p16194_p3, %p16193_p2 }
  0x2b   :  { %p16196_p5 = pnand %p16195_p4, %p16189_p1 }
  0x2d   :  { %16199 = shalt.err (!%p16196_p5)
}
  0x2e   :  { %33 = dma.hbm_to_vmem [thread:$0]  %s18698_s1, 16384, %s28_s17, [#allocation5], %s16273_s29, %s16273_s29, %s16274_s30  }
  0x2f   :  { %s16208_s24 = scalar_lea.vmem %s54_s5, 4096  ;;  %p16213_p7 = scmp.lt.s32.totalorder %s54_s5, %s54_s5 }
  0x30   :  { %p16209_p6 = scmp.ne.s32.totalorder %s54_s5, %s16208_s24  ;;  %p16214_p8 = scmp.lt.s32.totalorder %s16208_s24, %s16208_s24 }
  0x32   :  { %p16215_p9 = por %p16214_p8, %p16213_p7 }
  0x34   :  { %p16216_p10 = pnand %p16215_p9, %p16209_p6 }
  0x36   :  { %16219 = shalt.err (!%p16216_p10)
}
  0x37   :  { %59 = dma.hbm_to_vmem [thread:$0]  %s18701_s4, 4096, %s54_s5, [#allocation7], %s16269_s20, %s16269_s20, %s16270_s21  }
  0x38   :  { %s16277_s26 = smov [#allocation11]   ;;  %s16278_s28 = smov [#allocation14]  }
  0x39   :  { %s79_s27 = sshll.u32 %s16277_s26, 4  ;;  %s103_s1 = sshll.u32 %s16278_s28, 4  ;;  %s80_s27 = int_to_ptr.vmem [resolvable:$true] %s79_s27  ;;  %s104_s1 = int_to_ptr.vmem [resolvable:$true] %s103_s1 }
  0x3a   :  { %s16228_s29 = scalar_lea.vmem %s80_s27, 4096  ;;  %p16233_p12 = scmp.lt.s32.totalorder %s80_s27, %s80_s27 }
  0x3b   :  { %p16229_p11 = scmp.ne.s32.totalorder %s80_s27, %s16228_s29  ;;  %p16234_p13 = scmp.lt.s32.totalorder %s16228_s29, %s16228_s29 }
  0x3d   :  { %p16235_p0 = por %p16234_p13, %p16233_p12 }
  0x3f   :  { %p16236_p1 = pnand %p16235_p0, %p16229_p11 }
  0x41   :  { %16239 = shalt.err (!%p16236_p1)
}
  0x42   :  { %85 = dma.hbm_to_vmem [thread:$0]  %s18704_s7, 4096, %s80_s27, [#allocation10], %s16269_s20, %s16269_s20, %s16270_s21  }
  0x43   :  { %s16248_s4 = scalar_lea.vmem %s104_s1, 12288  ;;  %p16253_p3 = scmp.lt.s32.totalorder %s104_s1, %s104_s1 }
  0x44   :  { %p16249_p2 = scmp.ne.s32.totalorder %s104_s1, %s16248_s4  ;;  %p16254_p4 = scmp.lt.s32.totalorder %s16248_s4, %s16248_s4 }
  0x46   :  { %p16255_p5 = por %p16254_p4, %p16253_p3 }
  0x48   :  { %p16256_p6 = pnand %p16255_p5, %p16249_p2 }
  0x4a   :  { %16259 = shalt.err (!%p16256_p6)
}
  0x4b   :  { %s16279_s13 = smov 384   ;;  %s16280_s3 = smov 24  }
  0x4c   :  { %109 = dma.hbm_to_vmem [thread:$0]  %s18706_s9, 12288, %s104_s1, [#allocation13], %s16279_s13, %s16279_s13, %s16280_s3  }
  0x4d   :  { %16260 = dma.done.wait [#allocation5], 16384  }
  0x4e   :  { %16261 = vsyncadd [#allocation5], 4294950912 }
  0x4f   :  { %16262 = dma.done.wait [#allocation7], 8192  }
  0x50   :  { %16263 = vsyncadd [#allocation7], 4294959104 }
  0x51   :  { %16264 = dma.done.wait [#allocation10], 20480  }
  0x52   :  { %16265 = vsyncadd [#allocation10], 4294946816 }
  0x53   :  { %16266 = dma.done.wait [#allocation13], 16384  }
  0x54   :  { %16267 = vsyncadd [#allocation13], 4294950912  ;;  %v197_v0 = vld [vmem:[#allocation4 + $0x1c8] sm:$0xff]  ;;  %v196_v10 = vld [vmem:[#allocation4 + $0x1c0] sm:$0xff] }
  0x55   :  { %v201_v1 = vld [vmem:[#allocation4 + $0x1e8] sm:$0xff]  ;;  %v200_v11 = vld [vmem:[#allocation4 + $0x1e0] sm:$0xff]  ;;  %v137_v47 = vld [vmem:[%s18697_s0 + $0x18] sm:$0xff] }
  0x56   :  { %v189_v2 = vld [vmem:[#allocation4 + $0x188] sm:$0xff]  ;;  %v13254_v3 = vcombine.high %v197_v0, %v201_v1  ;;  %v13253_v4 = vcombine.low %v197_v0, %v201_v1  ;;  %v13252_v13 = vcombine.high %v196_v10, %v200_v11  ;;  %v13251_v14 = vcombine.low %v196_v10, %v200_v11  ;;  %v188_v15 = vld [vmem:[#allocation4 + $0x180] sm:$0xff] }
  0x57   :  { %v193_v5 = vld [vmem:[#allocation4 + $0x1a8] sm:$0xff]  ;;  %v192_v16 = vld [vmem:[#allocation4 + $0x1a0] sm:$0xff] }
  0x58   :  { %v13246_v6 = vcombine.high %v189_v2, %v193_v5  ;;  %v181_v7 = vld [vmem:[#allocation4 + $0x148] sm:$0xff]  ;;  %993 = vmatprep.subr.bf16.mxu1 %v13254_v3  ;;  %v13245_v9 = vcombine.low %v189_v2, %v193_v5  ;;  %v13244_v19 = vcombine.high %v188_v15, %v192_v16  ;;  %v180_v20 = vld [vmem:[#allocation4 + $0x140] sm:$0xff]  ;;  %950 = vmatprep.subr.bf16.mxu0 %v13252_v13 }
  0x59   :  { %v185_v8 = vld [vmem:[#allocation4 + $0x168] sm:$0xff]  ;;  %994 = vmatpush1.bf16.msra.mxu1 %v13253_v4  ;;  %v184_v21 = vld [vmem:[#allocation4 + $0x160] sm:$0xff]  ;;  %951 = vmatpush1.bf16.msra.mxu0 %v13251_v14  ;;  %v13243_v23 = vcombine.low %v188_v15, %v192_v16 }
  0x5a   :  { %995 = vmatprep.subr.bf16.mxu1 %v13246_v6  ;;  %v13238_v12 = vcombine.high %v181_v7, %v185_v8  ;;  %v173_v17 = vld [vmem:[#allocation4 + $0x108] sm:$0xff]  ;;  %v13237_v22 = vcombine.low %v181_v7, %v185_v8  ;;  %952 = vmatprep.subr.bf16.mxu0 %v13244_v19  ;;  %v13236_v26 = vcombine.high %v180_v20, %v184_v21  ;;  %v172_v28 = vld [vmem:[#allocation4 + $0x100] sm:$0xff] }
  0x5b   :  { %v177_v18 = vld [vmem:[#allocation4 + $0x128] sm:$0xff]  ;;  %v176_v29 = vld [vmem:[#allocation4 + $0x120] sm:$0xff]  ;;  %v13235_v31 = vcombine.low %v180_v20, %v184_v21 }
  0x5c   :  { %v13230_v24 = vcombine.high %v173_v17, %v177_v18  ;;  %v165_v25 = vld [vmem:[#allocation4 + $0xc8] sm:$0xff]  ;;  %v13229_v30 = vcombine.low %v173_v17, %v177_v18  ;;  %v13228_v34 = vcombine.high %v172_v28, %v176_v29  ;;  %v164_v36 = vld [vmem:[#allocation4 + $0xc0] sm:$0xff]  ;;  %v13227_v39 = vcombine.low %v172_v28, %v176_v29 }
  0x5d   :  { %996 = vmatpush1.bf16.msra.mxu1 %v13245_v9  ;;  %v169_v27 = vld [vmem:[#allocation4 + $0xe8] sm:$0xff]  ;;  %953 = vmatpush1.bf16.msra.mxu0 %v13243_v23  ;;  %v168_v37 = vld [vmem:[#allocation4 + $0xe0] sm:$0xff] }
  0x5e   :  { %997 = vmatprep.subr.bf16.mxu1 %v13238_v12  ;;  %v13222_v32 = vcombine.high %v165_v25, %v169_v27  ;;  %v157_v33 = vld [vmem:[#allocation4 + $0x88] sm:$0xff]  ;;  %954 = vmatprep.subr.bf16.mxu0 %v13236_v26  ;;  %v13221_v38 = vcombine.low %v165_v25, %v169_v27  ;;  %v13220_v43 = vcombine.high %v164_v36, %v168_v37  ;;  %v156_v44 = vld [vmem:[#allocation4 + $0x80] sm:$0xff] }
  0x5f   :  { %v161_v35 = vld [vmem:[#allocation4 + $0xa8] sm:$0xff]  ;;  %v160_v45 = vld [vmem:[#allocation4 + $0xa0] sm:$0xff]  ;;  %v13219_v50 = vcombine.low %v164_v36, %v168_v37 }
  0x60   :  { %v13214_v40 = vcombine.high %v157_v33, %v161_v35  ;;  %v149_v41 = vld [vmem:[#allocation4 + $0x48] sm:$0xff]  ;;  %v13213_v49 = vcombine.low %v157_v33, %v161_v35  ;;  %v13212_v53 = vcombine.high %v156_v44, %v160_v45  ;;  %v148_v55 = vld [vmem:[#allocation4 + $0x40] sm:$0xff]  ;;  %v13211_v58 = vcombine.low %v156_v44, %v160_v45 }
  0x61   :  { %998 = vmatpush1.bf16.msra.mxu1 %v13237_v22  ;;  %955 = vmatpush1.bf16.msra.mxu0 %v13235_v31  ;;  %v153_v42 = vld [vmem:[#allocation4 + $0x68] sm:$0xff]  ;;  %v152_v56 = vld [vmem:[#allocation4 + $0x60] sm:$0xff] }
  0x62   :  { %999 = vmatprep.subr.bf16.mxu1 %v13230_v24  ;;  %956 = vmatprep.subr.bf16.mxu0 %v13228_v34  ;;  %v135_v46 = vld [vmem:[%s18697_s0 + $0x8] sm:$0xff]  ;;  %v13206_v51 = vcombine.high %v149_v41, %v153_v42  ;;  %v13205_v57 = vcombine.low %v149_v41, %v153_v42  ;;  %v13204_v61 = vcombine.high %v148_v55, %v152_v56  ;;  %v140_v63 = vld [vmem:[#allocation4] sm:$0xff] }
  0x63   :  { %v16381_v48 = vpack.c.bf16 %v137_v47, %v135_v46  ;;  %v141_v52 = vld [vmem:[#allocation4 + $0x8] sm:$0xff]  ;;  %v144_v0 = vld [vmem:[#allocation4 + $0x20] sm:$0xff]  ;;  %v13203_v2 = vcombine.low %v148_v55, %v152_v56 }
  0x64   :  { %v145_v54 = vld [vmem:[#allocation4 + $0x28] sm:$0xff]  ;;  %v13196_v5 = vcombine.high %v140_v63, %v144_v0  ;;  %v260_v7 = vld [vmem:[#allocation4 + $0x3c0] sm:$0xff]  ;;  %v13195_v10 = vcombine.low %v140_v63, %v144_v0 }
  0x65   :  { %1000 = vmatpush1.bf16.msra.mxu1 %v13229_v30  ;;  %957 = vmatpush1.bf16.msra.mxu0 %v13227_v39  ;;  %v13198_v59 = vcombine.high %v141_v52, %v145_v54  ;;  %v261_v60 = vld [vmem:[#allocation4 + $0x3c8] sm:$0xff]  ;;  %v13197_v1 = vcombine.low %v141_v52, %v145_v54  ;;  %v264_v8 = vld [vmem:[#allocation4 + $0x3e0] sm:$0xff] }
  0x66   :  { %1001 = vmatprep.subr.bf16.mxu1 %v13222_v32  ;;  %958 = vmatprep.subr.bf16.mxu0 %v13220_v43  ;;  %v265_v62 = vld [vmem:[#allocation4 + $0x3e8] sm:$0xff]  ;;  %v13316_v13 = vcombine.high %v260_v7, %v264_v8  ;;  %v252_v15 = vld [vmem:[#allocation4 + $0x380] sm:$0xff]  ;;  %v13315_v18 = vcombine.low %v260_v7, %v264_v8  ;;  %v195_v8 = vld [vmem:[#allocation4 + $0x1b8] sm:$0xff] }
  0x67   :  { %1025 = vmatprep.mubr.bf16.mxu1 %v16381_v48  ;;  %982 = vmatprep.mubr.bf16.mxu0 %v16381_v48  ;;  %v13318_v3 = vcombine.high %v261_v60, %v265_v62  ;;  %v253_v4 = vld [vmem:[#allocation4 + $0x388] sm:$0xff]  ;;  %v13317_v9 = vcombine.low %v261_v60, %v265_v62  ;;  %v256_v16 = vld [vmem:[#allocation4 + $0x3a0] sm:$0xff]  ;;  %v203_v62 = vld [vmem:[#allocation4 + $0x1f8] sm:$0xff] }
  0x68   :  { %v257_v6 = vld [vmem:[#allocation4 + $0x3a8] sm:$0xff]  ;;  %v13308_v21 = vcombine.high %v252_v15, %v256_v16  ;;  %v244_v23 = vld [vmem:[#allocation4 + $0x340] sm:$0xff]  ;;  %v13307_v26 = vcombine.low %v252_v15, %v256_v16 }
  0x69   :  { %1002 = vmatpush1.bf16.msra.mxu1 %v13221_v38  ;;  %959 = vmatpush1.bf16.msra.mxu0 %v13219_v50  ;;  %v13310_v11 = vcombine.high %v253_v4, %v257_v6  ;;  %v245_v12 = vld [vmem:[#allocation4 + $0x348] sm:$0xff]  ;;  %v13309_v17 = vcombine.low %v253_v4, %v257_v6  ;;  %v248_v24 = vld [vmem:[#allocation4 + $0x360] sm:$0xff] }
  0x6a   :  { %1003 = vmatprep.subr.bf16.mxu1 %v13214_v40  ;;  %960 = vmatprep.subr.bf16.mxu0 %v13212_v53  ;;  %v249_v14 = vld [vmem:[#allocation4 + $0x368] sm:$0xff]  ;;  %v13300_v30 = vcombine.high %v244_v23, %v248_v24  ;;  %v236_v31 = vld [vmem:[#allocation4 + $0x300] sm:$0xff]  ;;  %v13299_v34 = vcombine.low %v244_v23, %v248_v24 }
  0x6b   :  { %v13302_v19 = vcombine.high %v245_v12, %v249_v14  ;;  %v237_v20 = vld [vmem:[#allocation4 + $0x308] sm:$0xff]  ;;  %v13301_v25 = vcombine.low %v245_v12, %v249_v14  ;;  %v240_v32 = vld [vmem:[#allocation4 + $0x320] sm:$0xff]  ;;  %v183_v14 = vld [vmem:[#allocation4 + $0x158] sm:$0xff] }
  0x6c   :  { %v241_v22 = vld [vmem:[#allocation4 + $0x328] sm:$0xff]  ;;  %v13292_v38 = vcombine.high %v236_v31, %v240_v32  ;;  %v228_v39 = vld [vmem:[#allocation4 + $0x2c0] sm:$0xff]  ;;  %v13291_v42 = vcombine.low %v236_v31, %v240_v32 }
  0x6d   :  { %1004 = vmatpush1.bf16.msra.mxu1 %v13213_v49  ;;  %961 = vmatpush1.bf16.msra.mxu0 %v13211_v58  ;;  %v13294_v27 = vcombine.high %v237_v20, %v241_v22  ;;  %v229_v28 = vld [vmem:[#allocation4 + $0x2c8] sm:$0xff]  ;;  %v13293_v33 = vcombine.low %v237_v20, %v241_v22  ;;  %v232_v40 = vld [vmem:[#allocation4 + $0x2e0] sm:$0xff]  ;;  %v194_v20 = vld [vmem:[#allocation4 + $0x1b0] sm:$0xff] }
  0x6e   :  { %1005 = vmatprep.subr.bf16.mxu1 %v13206_v51  ;;  %962 = vmatprep.subr.bf16.mxu0 %v13204_v61  ;;  %v233_v29 = vld [vmem:[#allocation4 + $0x2e8] sm:$0xff]  ;;  %v13284_v46 = vcombine.high %v228_v39, %v232_v40  ;;  %v220_v47 = vld [vmem:[#allocation4 + $0x280] sm:$0xff]  ;;  %v13283_v52 = vcombine.low %v228_v39, %v232_v40  ;;  %v175_v22 = vld [vmem:[#allocation4 + $0x118] sm:$0xff] }
  0x6f   :  { %v13286_v35 = vcombine.high %v229_v28, %v233_v29  ;;  %v221_v36 = vld [vmem:[#allocation4 + $0x288] sm:$0xff]  ;;  %v13285_v41 = vcombine.low %v229_v28, %v233_v29  ;;  %v224_v49 = vld [vmem:[#allocation4 + $0x2a0] sm:$0xff]  ;;  %v186_v28 = vld [vmem:[#allocation4 + $0x170] sm:$0xff] }
  0x70   :  { %v225_v37 = vld [vmem:[#allocation4 + $0x2a8] sm:$0xff]  ;;  %v13276_v55 = vcombine.high %v220_v47, %v224_v49  ;;  %v212_v56 = vld [vmem:[#allocation4 + $0x240] sm:$0xff]  ;;  %v13275_v60 = vcombine.low %v220_v47, %v224_v49 }
  0x71   :  { %1006 = vmatpush1.bf16.msra.mxu1 %v13205_v57  ;;  %963 = vmatpush1.bf16.msra.mxu0 %v13203_v2  ;;  %v13278_v43 = vcombine.high %v221_v36, %v225_v37  ;;  %v213_v44 = vld [vmem:[#allocation4 + $0x248] sm:$0xff]  ;;  %v13277_v50 = vcombine.low %v221_v36, %v225_v37  ;;  %v216_v57 = vld [vmem:[#allocation4 + $0x260] sm:$0xff]  ;;  %v178_v36 = vld [vmem:[#allocation4 + $0x130] sm:$0xff] }
  0x72   :  { %1007 = vmatprep.subr.bf16.mxu1 %v13198_v59  ;;  %964 = vmatprep.subr.bf16.mxu0 %v13196_v5  ;;  %v217_v45 = vld [vmem:[#allocation4 + $0x268] sm:$0xff]  ;;  %v199_v59 = vld [vmem:[#allocation4 + $0x1d8] sm:$0xff]  ;;  %v13268_v63 = vcombine.high %v212_v56, %v216_v57  ;;  %v204_v0 = vld [vmem:[#allocation4 + $0x200] sm:$0xff]  ;;  %v13267_v6 = vcombine.low %v212_v56, %v216_v57 }
  0x73   :  { %v205_v51 = vld [vmem:[#allocation4 + $0x208] sm:$0xff]  ;;  %v13270_v53 = vcombine.high %v213_v44, %v217_v45  ;;  %v13269_v58 = vcombine.low %v213_v44, %v217_v45  ;;  %v134_v2 = vld [vmem:[%s18697_s0] sm:$0xff]  ;;  %v191_v5 = vld [vmem:[#allocation4 + $0x198] sm:$0xff]  ;;  %v13258_v7 = vcombine.high %v199_v59, %v203_v62 }
  0x74   :  { %v209_v54 = vld [vmem:[#allocation4 + $0x228] sm:$0xff]  ;;  %v13250_v16 = vcombine.high %v191_v5, %v195_v8  ;;  %v170_v44 = vld [vmem:[#allocation4 + $0xf0] sm:$0xff] }
  0x75   :  { %1008 = vmatpush1.bf16.msra.mxu1 %v13197_v1  ;;  %965 = vmatpush1.bf16.msra.mxu0 %v13195_v10  ;;  %v13262_v61 = vcombine.high %v205_v51, %v209_v54  ;;  %v208_v1 = vld [vmem:[#allocation4 + $0x220] sm:$0xff]  ;;  %v13261_v4 = vcombine.low %v205_v51, %v209_v54  ;;  %v198_v10 = vld [vmem:[#allocation4 + $0x1d0] sm:$0xff]  ;;  %v143_v54 = vld [vmem:[#allocation4 + $0x18] sm:$0xff] }
  0x76   :  { %1009 = vmatprep.subr.bf16.mxu1 %v13318_v3  ;;  %966 = vmatprep.subr.bf16.mxu0 %v13316_v13  ;;  %v136_v3 = vld [vmem:[%s18697_s0 + $0x10] sm:$0xff]  ;;  %v13257_v13 = vcombine.low %v199_v59, %v203_v62  ;;  %v13259_v15 = vcombine.low %v204_v0, %v208_v1  ;;  %v263_v62 = vld [vmem:[#allocation4 + $0x3d8] sm:$0xff] }
  0x77   :  { %v16391_v12 = vpack.c.bf16 %v136_v3, %v134_v2  ;;  %v158_v51 = vld [vmem:[#allocation4 + $0x90] sm:$0xff] }
  0x78   :  { %v150_v57 = vld [vmem:[#allocation4 + $0x50] sm:$0xff] }
  0x79   :  { %1010 = vmatpush2.bf16.msra.mxu1 %v13317_v9  ;;  %967 = vmatpush2.bf16.msra.mxu0 %v13315_v18  ;;  %v13260_v9 = vcombine.high %v204_v0, %v208_v1  ;;  %v142_v1 = vld [vmem:[#allocation4 + $0x10] sm:$0xff] }
  0x7a   :  { %1011 = vmatprep.subr.bf16.mxu1 %v13310_v11  ;;  %968 = vmatprep.subr.bf16.mxu0 %v13308_v21  ;;  %v202_v11 = vld [vmem:[#allocation4 + $0x1f0] sm:$0xff]  ;;  %v13249_v21 = vcombine.low %v191_v5, %v195_v8 }
  0x7b   :  { %v13256_v18 = vcombine.high %v198_v10, %v202_v11  ;;  %v13255_v23 = vcombine.low %v198_v10, %v202_v11  ;;  %v146_v2 = vld [vmem:[#allocation4 + $0x30] sm:$0xff] }
  0x7c   :  { %v266_v10 = vld [vmem:[#allocation4 + $0x3f0] sm:$0xff] }
  0x7d   :  { %1012 = vmatpush2.bf16.msra.mxu1 %v13309_v17  ;;  %969 = vmatpush2.bf16.msra.mxu0 %v13307_v26  ;;  %v187_v17 = vld [vmem:[#allocation4 + $0x178] sm:$0xff] }
  0x7e   :  { %1013 = vmatprep.subr.bf16.mxu1 %v13302_v19  ;;  %970 = vmatprep.subr.bf16.mxu0 %v13300_v30  ;;  %v190_v19 = vld [vmem:[#allocation4 + $0x190] sm:$0xff]  ;;  %v13242_v24 = vcombine.high %v183_v14, %v187_v17  ;;  %v13241_v29 = vcombine.low %v183_v14, %v187_v17  ;;  %v167_v30 = vld [vmem:[#allocation4 + $0xd8] sm:$0xff]  ;;  %v13199_v17 = vcombine.low %v142_v1, %v146_v2 }
  0x7f   :  { %v13248_v26 = vcombine.high %v190_v19, %v194_v20  ;;  %v13247_v31 = vcombine.low %v190_v19, %v194_v20  ;;  %v258_v19 = vld [vmem:[#allocation4 + $0x3b0] sm:$0xff] }
  0x81   :  { %1014 = vmatpush2.bf16.msra.mxu1 %v13301_v25  ;;  %971 = vmatpush2.bf16.msra.mxu0 %v13299_v34  ;;  %v179_v25 = vld [vmem:[#allocation4 + $0x138] sm:$0xff] }
  0x82   :  { %1015 = vmatprep.subr.bf16.mxu1 %v13294_v27  ;;  %972 = vmatprep.subr.bf16.mxu0 %v13292_v38  ;;  %v182_v27 = vld [vmem:[#allocation4 + $0x150] sm:$0xff]  ;;  %v13234_v32 = vcombine.high %v175_v22, %v179_v25  ;;  %v13233_v37 = vcombine.low %v175_v22, %v179_v25  ;;  %v159_v38 = vld [vmem:[#allocation4 + $0x98] sm:$0xff] }
  0x83   :  { %v13240_v34 = vcombine.high %v182_v27, %v186_v28  ;;  %v13239_v39 = vcombine.low %v182_v27, %v186_v28  ;;  %v250_v27 = vld [vmem:[#allocation4 + $0x370] sm:$0xff] }
  0x85   :  { %1016 = vmatpush2.bf16.msra.mxu1 %v13293_v33  ;;  %973 = vmatpush2.bf16.msra.mxu0 %v13291_v42  ;;  %v171_v33 = vld [vmem:[#allocation4 + $0xf8] sm:$0xff] }
  0x86   :  { %1017 = vmatprep.subr.bf16.mxu1 %v13286_v35  ;;  %974 = vmatprep.subr.bf16.mxu0 %v13284_v46  ;;  %v174_v35 = vld [vmem:[#allocation4 + $0x110] sm:$0xff]  ;;  %v13226_v40 = vcombine.high %v167_v30, %v171_v33  ;;  %v13225_v45 = vcombine.low %v167_v30, %v171_v33  ;;  %v151_v46 = vld [vmem:[#allocation4 + $0x58] sm:$0xff] }
  0x87   :  { %v13232_v42 = vcombine.high %v174_v35, %v178_v36  ;;  %v13231_v47 = vcombine.low %v174_v35, %v178_v36  ;;  %v242_v35 = vld [vmem:[#allocation4 + $0x330] sm:$0xff] }
  0x89   :  { %1018 = vmatpush2.bf16.msra.mxu1 %v13285_v41  ;;  %975 = vmatpush2.bf16.msra.mxu0 %v13283_v52  ;;  %v163_v41 = vld [vmem:[#allocation4 + $0xb8] sm:$0xff]  ;;  %v162_v52 = vld [vmem:[#allocation4 + $0xb0] sm:$0xff] }
  0x8a   :  { %1019 = vmatprep.subr.bf16.mxu1 %v13278_v43  ;;  %976 = vmatprep.subr.bf16.mxu0 %v13276_v55  ;;  %v166_v43 = vld [vmem:[#allocation4 + $0xd0] sm:$0xff]  ;;  %v13218_v49 = vcombine.high %v159_v38, %v163_v41  ;;  %v147_v55 = vld [vmem:[#allocation4 + $0x38] sm:$0xff]  ;;  %v13215_v0 = vcombine.low %v158_v51, %v162_v52 }
  0x8b   :  { %v13223_v56 = vcombine.low %v166_v43, %v170_v44  ;;  %v13202_v3 = vcombine.high %v143_v54, %v147_v55  ;;  %v13201_v5 = vcombine.low %v143_v54, %v147_v55  ;;  %v207_v55 = vld [vmem:[#allocation4 + $0x218] sm:$0xff] }
  0x8d   :  { %1020 = vmatpush2.bf16.msra.mxu1 %v13277_v50  ;;  %977 = vmatpush2.bf16.msra.mxu0 %v13275_v60  ;;  %v13224_v50 = vcombine.high %v166_v43, %v170_v44  ;;  %v13216_v60 = vcombine.high %v158_v51, %v162_v52  ;;  %v234_v43 = vld [vmem:[#allocation4 + $0x2f0] sm:$0xff] }
  0x8e   :  { %1021 = vmatprep.subr.bf16.mxu1 %v13270_v53  ;;  %978 = vmatprep.subr.bf16.mxu0 %v13268_v63  ;;  %v13217_v53 = vcombine.low %v159_v38, %v163_v41  ;;  %v267_v63 = vld [vmem:[#allocation4 + $0x3f8] sm:$0xff]  ;;  %v226_v51 = vld [vmem:[#allocation4 + $0x2b0] sm:$0xff] }
  0x8f   :  { %v13322_v11 = vcombine.high %v263_v62, %v267_v63  ;;  %v13321_v14 = vcombine.low %v263_v62, %v267_v63 }
  0x91   :  { %1022 = vmatpush2.bf16.msra.mxu1 %v13269_v58  ;;  %979 = vmatpush2.bf16.msra.mxu0 %v13267_v6  ;;  %v154_v58 = vld [vmem:[#allocation4 + $0x70] sm:$0xff]  ;;  %v255_v6 = vld [vmem:[#allocation4 + $0x398] sm:$0xff] }
  0x92   :  { %1023 = vmatprep.subr.bf16.mxu1 %v13262_v61  ;;  %980 = vmatprep.subr.bf16.mxu0 %v13260_v9  ;;  %v13207_v8 = vcombine.low %v150_v57, %v154_v58  ;;  %v262_v9 = vld [vmem:[#allocation4 + $0x3d0] sm:$0xff] }
  0x93   :  { %v13319_v25 = vcombine.low %v262_v9, %v266_v10 }
  0x95   :  { %1024 = vmatpush2.bf16.msra.mxu1 %v13261_v4  ;;  %981 = vmatpush2.bf16.msra.mxu0 %v13259_v15  ;;  %v13208_v4 = vcombine.high %v150_v57, %v154_v58  ;;  %v247_v15 = vld [vmem:[#allocation4 + $0x358] sm:$0xff]  ;;  %v214_v58 = vld [vmem:[#allocation4 + $0x250] sm:$0xff] }
  0x96   :  { %1079 = vmatprep.subr.bf16.mxu1 %v13258_v7  ;;  %1036 = vmatprep.subr.bf16.mxu0 %v13256_v18  ;;  %v259_v7 = vld [vmem:[#allocation4 + $0x3b8] sm:$0xff]  ;;  %v254_v18 = vld [vmem:[#allocation4 + $0x390] sm:$0xff] }
  0x97   :  { %v13314_v20 = vcombine.high %v255_v6, %v259_v7  ;;  %v13313_v22 = vcombine.low %v255_v6, %v259_v7  ;;  %v13311_v33 = vcombine.low %v254_v18, %v258_v19 }
  0x98   :  { %1026 = vmatmul.mubr.bf16.vlgmr.msra.gmra.mxu1 %v16391_v12  ;;  %983 = vmatmul.mubr.bf16.vlgmr.msra.gmra.mxu0 %v16391_v12 }
  0x99   :  { %1080 = vmatpush1.bf16.msra.mxu1 %v13257_v13  ;;  %1111 = vmatprep.mubr.bf16.mxu1 %v16381_v48  ;;  %v13200_v13 = vcombine.high %v142_v1, %v146_v2  ;;  %v210_v1 = vld [vmem:[#allocation4 + $0x230] sm:$0xff] }
  0x9a   :  { %1081 = vmatprep.subr.bf16.mxu1 %v13250_v16  ;;  %1037 = vmatpush1.bf16.msra.mxu0 %v13255_v23  ;;  %v251_v16 = vld [vmem:[#allocation4 + $0x378] sm:$0xff] }
  0x9b   :  { %1038 = vmatprep.subr.bf16.mxu0 %v13248_v26  ;;  %1068 = vmatprep.mubr.bf16.mxu0 %v16381_v48  ;;  %v155_v48 = vld [vmem:[#allocation4 + $0x78] sm:$0xff]  ;;  %v246_v26 = vld [vmem:[#allocation4 + $0x350] sm:$0xff]  ;;  %v13306_v28 = vcombine.high %v247_v15, %v251_v16  ;;  %v13305_v30 = vcombine.low %v247_v15, %v251_v16 }
  0x9c   :  { %v13210_v59 = vcombine.high %v151_v46, %v155_v48  ;;  %v13209_v61 = vcombine.low %v151_v46, %v155_v48  ;;  %v239_v23 = vld [vmem:[#allocation4 + $0x318] sm:$0xff]  ;;  %v13303_v41 = vcombine.low %v246_v26, %v250_v27  ;;  %v16409_v15 = vld [vmem:[#allocation6 + $0xa4] ss:$16 sps:$4 sm:$0xff]  }
  0x9d   :  { %1082 = vmatpush1.bf16.msra.mxu1 %v13249_v21  ;;  %v13320_v21 = vcombine.high %v262_v9, %v266_v10  ;;  %v16401_v9 = vld [vmem:[#allocation6 + $0xc4] ss:$16 sps:$4 sm:$0xff]  }
  0x9e   :  { %1083 = vmatprep.subr.bf16.mxu1 %v13242_v24  ;;  %1039 = vmatpush1.bf16.msra.mxu0 %v13247_v31  ;;  %v243_v24 = vld [vmem:[#allocation4 + $0x338] sm:$0xff]  ;;  %v16403_v10 = vld [vmem:[#allocation8 + $0xe4] ss:$16 sps:$4 sm:$0xff]  }
  0x9f   :  { %1040 = vmatprep.subr.bf16.mxu0 %v13240_v34  ;;  %v231_v31 = vld [vmem:[#allocation4 + $0x2d8] sm:$0xff]  ;;  %v238_v34 = vld [vmem:[#allocation4 + $0x310] sm:$0xff]  ;;  %v13298_v36 = vcombine.high %v239_v23, %v243_v24  ;;  %v13297_v38 = vcombine.low %v239_v23, %v243_v24 }
  0xa0   :  { %v13295_v48 = vcombine.low %v238_v34, %v242_v35  ;;  %v14707_v16 = vld [vmem:[#allocation8 + $0xc4] ss:$16 sps:$4 sm:$0xff]   ;;  %v14711_v23 = vld [vmem:[#allocation8 + $0xa0] ss:$16 sps:$4 sm:$0xff]  }
  0xa1   :  { %1084 = vmatpush1.bf16.msra.mxu1 %v13241_v29  ;;  %v13312_v29 = vcombine.high %v254_v18, %v258_v19  ;;  %v14705_v18 = vld [vmem:[#allocation8 + $0xc0] ss:$16 sps:$4 sm:$0xff]   ;;  %v18711_v19 = vmov 0   ;;  %v16425_v24 = vld [vmem:[#allocation6 + $0x64] ss:$16 sps:$4 sm:$0xff]  }
  0xa2   :  { %1085 = vmatprep.subr.bf16.mxu1 %v13234_v32  ;;  %1041 = vmatpush1.bf16.msra.mxu0 %v13239_v39  ;;  %v235_v32 = vld [vmem:[#allocation4 + $0x2f8] sm:$0xff] }
  0xa3   :  { %1042 = vmatprep.subr.bf16.mxu0 %v13232_v42  ;;  %v223_v39 = vld [vmem:[#allocation4 + $0x298] sm:$0xff]  ;;  %v230_v42 = vld [vmem:[#allocation4 + $0x2d0] sm:$0xff]  ;;  %v13290_v44 = vcombine.high %v231_v31, %v235_v32  ;;  %v13289_v46 = vcombine.low %v231_v31, %v235_v32 }
  0xa4   :  { %v13287_v57 = vcombine.low %v230_v42, %v234_v43  ;;  %v16437_v31 = vld [vmem:[#allocation6 + $0x24] ss:$16 sps:$4 sm:$0xff]  }
  0xa5   :  { %1086 = vmatpush1.bf16.msra.mxu1 %v13233_v37  ;;  %v13304_v37 = vcombine.high %v246_v26, %v250_v27  ;;  %v14717_v26 = vld [vmem:[#allocation8 + $0x80] ss:$16 sps:$4 sm:$0xff]   ;;  %v16431_v27 = vld [vmem:[#allocation6 + $0x44] ss:$16 sps:$4 sm:$0xff]  }
  0xa6   :  { %1087 = vmatprep.subr.bf16.mxu1 %v13226_v40  ;;  %1043 = vmatpush1.bf16.msra.mxu0 %v13231_v47  ;;  %v227_v40 = vld [vmem:[#allocation4 + $0x2b8] sm:$0xff]  ;;  %v14731_v32 = vld [vmem:[#allocation8 + $0x44] ss:$16 sps:$4 sm:$0xff]  }
  0xa7   :  { %1044 = vmatprep.subr.bf16.mxu0 %v13224_v50  ;;  %v215_v47 = vld [vmem:[#allocation4 + $0x258] sm:$0xff]  ;;  %v222_v50 = vld [vmem:[#allocation4 + $0x290] sm:$0xff]  ;;  %v13282_v52 = vcombine.high %v223_v39, %v227_v40  ;;  %v13281_v54 = vcombine.low %v223_v39, %v227_v40 }
  0xa8   :  { %v13279_v63 = vcombine.low %v222_v50, %v226_v51  ;;  %v16449_v39 = vld [vmem:[#allocation6 + $0xec] ss:$16 sps:$4 sm:$0xff]   ;;  %v14743_v40 = vld [vmem:[#allocation8 + $0x4] ss:$16 sps:$4 sm:$0xff]  }
  0xa9   :  { %1088 = vmatpush1.bf16.msra.mxu1 %v13225_v45  ;;  %v13296_v45 = vcombine.high %v238_v34, %v242_v35  ;;  %v14729_v34 = vld [vmem:[#allocation8 + $0x40] ss:$16 sps:$4 sm:$0xff]   ;;  %v16443_v35 = vld [vmem:[#allocation6 + $0x4] ss:$16 sps:$4 sm:$0xff]  }
  0xaa   :  { %1089 = vmatprep.subr.bf16.mxu1 %v13218_v49  ;;  %1045 = vmatpush1.bf16.msra.mxu0 %v13223_v56  ;;  %v219_v49 = vld [vmem:[#allocation4 + $0x278] sm:$0xff] }
  0xab   :  { %1046 = vmatprep.subr.bf16.mxu0 %v13216_v60  ;;  %v211_v56 = vld [vmem:[#allocation4 + $0x238] sm:$0xff]  ;;  %v13274_v60 = vcombine.high %v215_v47, %v219_v49  ;;  %v13273_v62 = vcombine.low %v215_v47, %v219_v49 }
  0xac   :  { %v13266_v2 = vcombine.high %v207_v55, %v211_v56  ;;  %v16470_v47 = vld [vmem:[#allocation6 + $0x8c] ss:$16 sps:$4 sm:$0xff]   ;;  %v16477_v49 = vld [vmem:[#allocation6 + $0x88] ss:$16 sps:$4 sm:$0xff]  }
  0xad   :  { %1090 = vmatpush1.bf16.msra.mxu1 %v13217_v53  ;;  %v13288_v53 = vcombine.high %v230_v42, %v234_v43  ;;  %v14741_v42 = vld [vmem:[#allocation8] ss:$16 sps:$4 sm:$0xff]   ;;  %v16455_v43 = vld [vmem:[#allocation6 + $0xcc] ss:$16 sps:$4 sm:$0xff]  }
  0xae   :  { %1091 = vmatprep.subr.bf16.mxu1 %v13210_v59  ;;  %1047 = vmatpush1.bf16.msra.mxu0 %v13215_v0  ;;  %v218_v59 = vld [vmem:[#allocation4 + $0x270] sm:$0xff] }
  0xaf   :  { %1048 = vmatprep.subr.bf16.mxu0 %v13208_v4  ;;  %v206_v0 = vld [vmem:[#allocation4 + $0x210] sm:$0xff]  ;;  %v13271_v6 = vcombine.low %v214_v58, %v218_v59 }
  0xb0   :  { %v16397_v4 = vld [vmem:[#allocation6 + $0xe4] ss:$16 sps:$4 sm:$0xff]   ;;  %v13264_v7 = vcombine.high %v206_v0, %v210_v1 }
  0xb1   :  { %1092 = vmatpush1.bf16.msra.mxu1 %v13209_v61  ;;  %v13280_v61 = vcombine.high %v222_v50, %v226_v51  ;;  %v16486_v50 = vld [vmem:[#allocation6 + $0x68] ss:$16 sps:$4 sm:$0xff]   ;;  %v16488_v51 = vld [vmem:[#allocation6 + $0x4c] ss:$16 sps:$4 sm:$0xff]  }
  0xb2   :  { %1093 = vmatprep.subr.bf16.mxu1 %v13202_v3  ;;  %1049 = vmatpush1.bf16.msra.mxu0 %v13207_v8  ;;  %v13272_v3 = vcombine.high %v214_v58, %v218_v59  ;;  %v16399_v8 = vld [vmem:[#allocation6 + $0xe0] ss:$16 sps:$4 sm:$0xff]   ;;  %v16518_v58 = vld [vmem:[#allocation8 + $0xe8] ss:$16 sps:$4 sm:$0xff]   ;;  %v16520_v59 = vld [vmem:[#allocation8 + $0xcc] ss:$16 sps:$4 sm:$0xff]  }
  0xb3   :  { %1050 = vmatprep.subr.bf16.mxu0 %v13200_v13  ;;  %v16406_v13 = vld [vmem:[#allocation6 + $0xc0] ss:$16 sps:$4 sm:$0xff]  }
  0xb5   :  { %1094 = vmatpush1.bf16.msra.mxu1 %v13201_v5  ;;  %v13265_v5 = vcombine.low %v207_v55, %v211_v56  ;;  %v16504_v55 = vld [vmem:[#allocation6 + $0xc] ss:$16 sps:$4 sm:$0xff]   ;;  %v16510_v56 = vld [vmem:[#allocation6 + $0x8] ss:$16 sps:$4 sm:$0xff]  }
  0xb6   :  { %1095 = vmatprep.subr.bf16.mxu1 %v13322_v11  ;;  %1051 = vmatpush1.bf16.msra.mxu0 %v13199_v17  ;;  %v13263_v11 = vcombine.low %v206_v0, %v210_v1  ;;  %v16414_v17 = vld [vmem:[#allocation6 + $0xa0] ss:$16 sps:$4 sm:$0xff]   ;;  %v16542_v0 = vld [vmem:[#allocation8 + $0x88] ss:$16 sps:$4 sm:$0xff]   ;;  %v16544_v1 = vld [vmem:[#allocation8 + $0x6c] ss:$16 sps:$4 sm:$0xff]  }
  0xb7   :  { %1052 = vmatprep.subr.bf16.mxu0 %v13320_v21  ;;  %v14713_v21 = vld [vmem:[#allocation8 + $0xa4] ss:$16 sps:$4 sm:$0xff]  }
  0xb9   :  { %1096 = vmatpush2.bf16.msra.mxu1 %v13321_v14  ;;  %v14699_v14 = vld [vmem:[#allocation8 + $0xe0] ss:$16 sps:$4 sm:$0xff]  }
  0xba   :  { %1097 = vmatprep.subr.bf16.mxu1 %v13314_v20  ;;  %1053 = vmatpush2.bf16.msra.mxu0 %v13319_v25  ;;  %v16417_v20 = vld [vmem:[#allocation6 + $0x84] ss:$16 sps:$4 sm:$0xff]  }
  0xbb   :  { %1054 = vmatprep.subr.bf16.mxu0 %v13312_v29  ;;  %v14719_v25 = vld [vmem:[#allocation8 + $0x84] ss:$16 sps:$4 sm:$0xff]   ;;  %v16435_v29 = vld [vmem:[#allocation6 + $0x40] ss:$16 sps:$4 sm:$0xff]  }
  0xbd   :  { %1098 = vmatpush2.bf16.msra.mxu1 %v13313_v22  ;;  %v16422_v22 = vld [vmem:[#allocation6 + $0x80] ss:$16 sps:$4 sm:$0xff]  }
  0xbe   :  { %1099 = vmatprep.subr.bf16.mxu1 %v13306_v28  ;;  %1055 = vmatpush2.bf16.msra.mxu0 %v13311_v33  ;;  %v14725_v28 = vld [vmem:[#allocation8 + $0x64] ss:$16 sps:$4 sm:$0xff]   ;;  %v16441_v33 = vld [vmem:[#allocation6 + $0x20] ss:$16 sps:$4 sm:$0xff]  }
  0xbf   :  { %1056 = vmatprep.subr.bf16.mxu0 %v13304_v37  ;;  %v16447_v37 = vld [vmem:[#allocation6] ss:$16 sps:$4 sm:$0xff]  }
  0xc1   :  { %1100 = vmatpush2.bf16.msra.mxu1 %v13305_v30  ;;  %v14723_v30 = vld [vmem:[#allocation8 + $0x60] ss:$16 sps:$4 sm:$0xff]  }
  0xc2   :  { %1101 = vmatprep.subr.bf16.mxu1 %v13298_v36  ;;  %1057 = vmatpush2.bf16.msra.mxu0 %v13303_v41  ;;  %v14737_v36 = vld [vmem:[#allocation8 + $0x24] ss:$16 sps:$4 sm:$0xff]   ;;  %v16453_v41 = vld [vmem:[#allocation6 + $0xe8] ss:$16 sps:$4 sm:$0xff]  }
  0xc3   :  { %1058 = vmatprep.subr.bf16.mxu0 %v13296_v45  ;;  %v16462_v45 = vld [vmem:[#allocation6 + $0xac] ss:$16 sps:$4 sm:$0xff]  }
  0xc5   :  { %1102 = vmatpush2.bf16.msra.mxu1 %v13297_v38  ;;  %v14735_v38 = vld [vmem:[#allocation8 + $0x20] ss:$16 sps:$4 sm:$0xff]  }
  0xc6   :  { %1103 = vmatprep.subr.bf16.mxu1 %v13290_v44  ;;  %1059 = vmatpush2.bf16.msra.mxu0 %v13295_v48  ;;  %v16459_v44 = vld [vmem:[#allocation6 + $0xc8] ss:$16 sps:$4 sm:$0xff]   ;;  %v16480_v48 = vld [vmem:[#allocation6 + $0x6c] ss:$16 sps:$4 sm:$0xff]  }
  0xc7   :  { %1060 = vmatprep.subr.bf16.mxu0 %v13288_v53  ;;  %v16496_v53 = vld [vmem:[#allocation6 + $0x2c] ss:$16 sps:$4 sm:$0xff]  }
  0xc9   :  { %1104 = vmatpush2.bf16.msra.mxu1 %v13289_v46  ;;  %v16467_v46 = vld [vmem:[#allocation6 + $0xa8] ss:$16 sps:$4 sm:$0xff]  }
  0xca   :  { %1105 = vmatprep.subr.bf16.mxu1 %v13282_v52  ;;  %1061 = vmatpush2.bf16.msra.mxu0 %v13287_v57  ;;  %v16494_v52 = vld [vmem:[#allocation6 + $0x48] ss:$16 sps:$4 sm:$0xff]   ;;  %v16512_v57 = vld [vmem:[#allocation8 + $0xec] ss:$16 sps:$4 sm:$0xff]  }
  0xcb   :  { %1062 = vmatprep.subr.bf16.mxu0 %v13280_v61  ;;  %v16529_v61 = vld [vmem:[#allocation8 + $0xac] ss:$16 sps:$4 sm:$0xff]  }
  0xcd   :  { %1106 = vmatpush2.bf16.msra.mxu1 %v13281_v54  ;;  %v16502_v54 = vld [vmem:[#allocation6 + $0x28] ss:$16 sps:$4 sm:$0xff]  }
  0xce   :  { %1107 = vmatprep.subr.bf16.mxu1 %v13274_v60  ;;  %1063 = vmatpush2.bf16.msra.mxu0 %v13279_v63  ;;  %v16526_v60 = vld [vmem:[#allocation8 + $0xc8] ss:$16 sps:$4 sm:$0xff]   ;;  %v16538_v63 = vld [vmem:[#allocation8 + $0x8c] ss:$16 sps:$4 sm:$0xff]  }
  0xcf   :  { %1064 = vmatprep.subr.bf16.mxu0 %v13272_v3  ;;  %v16550_v3 = vld [vmem:[#allocation8 + $0x4c] ss:$16 sps:$4 sm:$0xff]  }
  0xd1   :  { %1108 = vmatpush2.bf16.msra.mxu1 %v13273_v62  ;;  %v16535_v62 = vld [vmem:[#allocation8 + $0xa8] ss:$16 sps:$4 sm:$0xff]  }
  0xd2   :  { %1109 = vmatprep.subr.bf16.mxu1 %v13266_v2  ;;  %1065 = vmatpush2.bf16.msra.mxu0 %v13271_v6  ;;  %v16548_v2 = vld [vmem:[#allocation8 + $0x68] ss:$16 sps:$4 sm:$0xff]  }
  0xd3   :  { %1066 = vmatprep.subr.bf16.mxu0 %v13264_v7  ;;  %v16560_v6 = vld [vmem:[#allocation8 + $0x28] ss:$16 sps:$4 sm:$0xff]   ;;  %v16562_v7 = vld [vmem:[#allocation8 + $0xc] ss:$16 sps:$4 sm:$0xff]  }
  0xd5   :  { %1110 = vmatpush2.bf16.msra.mxu1 %v13265_v5  ;;  %v16556_v5 = vld [vmem:[#allocation8 + $0x2c] ss:$16 sps:$4 sm:$0xff]  }
  0xd6   :  { %1334 = vmatprep.subr.bf16.mxu1 %v16397_v4  ;;  %1067 = vmatpush2.bf16.msra.mxu0 %v13263_v11  ;;  %v268_v11 = vld [vmem:[%s18699_s2] sm:$0xff] }
  0xd7   :  { %1616 = vmatprep.subr.bf16.mxu0 %v16403_v10 }
  0xd8   :  { %1112 = vmatmul.mubr.bf16.vlgmr.msra.gmra.mxu1 %v16391_v12 }
  0xd9   :  { %1335 = vmatpush1.bf16.msra.mxu1 %v16399_v8  ;;  %1366 = vmatprep.mubr.bf16.mxu1 %v18711_v19 }
  0xda   :  { %1336 = vmatprep.subr.bf16.mxu1 %v16401_v9  ;;  %1069 = vmatmul.mubr.bf16.vlgmr.msra.gmra.mxu0 %v16391_v12  ;;  %v16429_v12 = vld [vmem:[#allocation6 + $0x60] ss:$16 sps:$4 sm:$0xff]  }
  0xdb   :  { %1617 = vmatpush1.bf16.msra.mxu0 %v14699_v14  ;;  %1648 = vmatprep.mubr.bf16.mxu0 %v18711_v19 }
  0xdc   :  { %1618 = vmatprep.subr.bf16.mxu0 %v14707_v16 }
  0xdd   :  { %1337 = vmatpush1.bf16.msra.mxu1 %v16406_v13 }
  0xde   :  { %1338 = vmatprep.subr.bf16.mxu1 %v16409_v15 }
  0xdf   :  { %1619 = vmatpush1.bf16.msra.mxu0 %v14705_v18 }
  0xe0   :  { %1620 = vmatprep.subr.bf16.mxu0 %v14713_v21 }
  0xe1   :  { %1339 = vmatpush1.bf16.msra.mxu1 %v16414_v17 }
  0xe2   :  { %1340 = vmatprep.subr.bf16.mxu1 %v16417_v20 }
  0xe3   :  { %1621 = vmatpush1.bf16.msra.mxu0 %v14711_v23 }
  0xe4   :  { %1622 = vmatprep.subr.bf16.mxu0 %v14719_v25 }
  0xe5   :  { %1341 = vmatpush1.bf16.msra.mxu1 %v16422_v22 }
  0xe6   :  { %1342 = vmatprep.subr.bf16.mxu1 %v16425_v24 }
  0xe7   :  { %1623 = vmatpush1.bf16.msra.mxu0 %v14717_v26 }
  0xe8   :  { %1624 = vmatprep.subr.bf16.mxu0 %v14725_v28 }
  0xe9   :  { %1343 = vmatpush1.bf16.msra.mxu1 %v16429_v12 }
  0xea   :  { %1344 = vmatprep.subr.bf16.mxu1 %v16431_v27 }
  0xeb   :  { %1625 = vmatpush1.bf16.msra.mxu0 %v14723_v30 }
  0xec   :  { %1626 = vmatprep.subr.bf16.mxu0 %v14731_v32 }
  0xed   :  { %1345 = vmatpush1.bf16.msra.mxu1 %v16435_v29 }
  0xee   :  { %1346 = vmatprep.subr.bf16.mxu1 %v16437_v31 }
  0xef   :  { %1627 = vmatpush1.bf16.msra.mxu0 %v14729_v34 }
  0xf0   :  { %1628 = vmatprep.subr.bf16.mxu0 %v14737_v36 }
  0xf1   :  { %1347 = vmatpush1.bf16.msra.mxu1 %v16441_v33 }
  0xf2   :  { %1348 = vmatprep.subr.bf16.mxu1 %v16443_v35 }
  0xf3   :  { %1629 = vmatpush1.bf16.msra.mxu0 %v14735_v38 }
  0xf4   :  { %1630 = vmatprep.subr.bf16.mxu0 %v14743_v40 }
  0xf5   :  { %1349 = vmatpush1.bf16.msra.mxu1 %v16447_v37 }
  0xf6   :  { %1375 = vmatprep.subr.bf16.mxu1 %v16449_v39 }
  0xf7   :  { %1631 = vmatpush1.bf16.msra.mxu0 %v14741_v42 }
  0xf8   :  { %1367 = vmatmul.mubr.bf16.vlgmr.msra.gmra.mxu1 %v18711_v19  ;;  %1961 = vmatprep.subr.bf16.mxu0 %v16397_v4  ;;  %v16554_v4 = vld [vmem:[#allocation8 + $0x48] ss:$16 sps:$4 sm:$0xff]  }
  0xf9   :  { %1376 = vmatpush1.bf16.msra.mxu1 %v16453_v41  ;;  %1407 = vmatprep.mubr.bf16.mxu1 %v18711_v19 }
  0xfa   :  { %1377 = vmatprep.subr.bf16.mxu1 %v16455_v43  ;;  %1649 = vmatmul.mubr.bf16.vlgmr.msra.gmra.mxu0 %v18711_v19 }
  0xfb   :  { %1962 = vmatpush1.bf16.msra.mxu0 %v16399_v8  ;;  %1993 = vmatprep.mubr.bf16.mxu0 %v18711_v19  ;;  %v16566_v8 = vld [vmem:[#allocation8 + $0x8] ss:$16 sps:$4 sm:$0xff]  }
  0xfc   :  { %1963 = vmatprep.subr.bf16.mxu0 %v16401_v9  ;;  %v270_v9 = vlaneseq }
  0xfd   :  { %1378 = vmatpush1.bf16.msra.mxu1 %v16459_v44 }
  0xfe   :  { %1379 = vmatprep.subr.bf16.mxu1 %v16462_v45 }
  0xff   :  { %1964 = vmatpush1.bf16.msra.mxu0 %v16406_v13 }
 0x100   :  { %1965 = vmatprep.subr.bf16.mxu0 %v16409_v15 }
 0x101   :  { %1380 = vmatpush1.bf16.msra.mxu1 %v16467_v46 }
 0x102   :  { %1381 = vmatprep.subr.bf16.mxu1 %v16470_v47 }
 0x103   :  { %1966 = vmatpush1.bf16.msra.mxu0 %v16414_v17 }
 0x104   :  { %1967 = vmatprep.subr.bf16.mxu0 %v16417_v20 }
 0x105   :  { %1382 = vmatpush1.bf16.msra.mxu1 %v16477_v49 }
 0x106   :  { %1383 = vmatprep.subr.bf16.mxu1 %v16480_v48 }
 0x107   :  { %1968 = vmatpush1.bf16.msra.mxu0 %v16422_v22 }
 0x108   :  { %1969 = vmatprep.subr.bf16.mxu0 %v16425_v24 }
 0x109   :  { %1384 = vmatpush1.bf16.msra.mxu1 %v16486_v50 }
 0x10a   :  { %1385 = vmatprep.subr.bf16.mxu1 %v16488_v51 }
 0x10b   :  { %1970 = vmatpush1.bf16.msra.mxu0 %v16429_v12 }
 0x10c   :  { %1971 = vmatprep.subr.bf16.mxu0 %v16431_v27 }
 0x10d   :  { %1386 = vmatpush1.bf16.msra.mxu1 %v16494_v52 }
 0x10e   :  { %1387 = vmatprep.subr.bf16.mxu1 %v16496_v53 }
 0x10f   :  { %1972 = vmatpush1.bf16.msra.mxu0 %v16435_v29 }
 0x110   :  { %1973 = vmatprep.subr.bf16.mxu0 %v16437_v31 }
 0x111   :  { %1388 = vmatpush1.bf16.msra.mxu1 %v16502_v54 }
 0x112   :  { %1389 = vmatprep.subr.bf16.mxu1 %v16504_v55 }
 0x113   :  { %1974 = vmatpush1.bf16.msra.mxu0 %v16441_v33 }
 0x114   :  { %1975 = vmatprep.subr.bf16.mxu0 %v16443_v35 }
 0x115   :  { %1390 = vmatpush1.bf16.msra.mxu1 %v16510_v56 }
 0x116   :  { %1657 = vmatprep.subr.bf16.mxu1 %v16512_v57 }
 0x117   :  { %1976 = vmatpush1.bf16.msra.mxu0 %v16447_v37 }
 0x118   :  { %1408 = vmatmul.mubr.bf16.vlgmr.msra.gmra.mxu1 %v18711_v19  ;;  %2259 = vmatprep.subr.bf16.mxu0 %v16403_v10  ;;  %v16584_v10 = vshrl.u32 %v270_v9, 7 }
 0x119   :  { %1658 = vmatpush1.bf16.msra.mxu1 %v16518_v58  ;;  %1689 = vmatprep.mubr.bf16.mxu1 %v18711_v19 }
 0x11a   :  { %1659 = vmatprep.subr.bf16.mxu1 %v16520_v59  ;;  %18774 = vst [vmem:[#allocation19_spill] sm:$0xff] %v16584_v10  ;;  %v16592_v13 = vsub.s32 2, %v16584_v10  ;;  %v16597_v14 = vsub.s32 3, %v16584_v10  ;;  %v16601_v16 = vsub.s32 0, %v16584_v10  ;;  %v16607_v18 = vsub.s32 1, %v16584_v10 }
 0x11b   :  { %v18710_v37 = vsub.s32 6, %v16584_v10  ;;  %v18709_v38 = vsub.s32 7, %v16584_v10  ;;  %v16616_v40 = vsub.s32 4, %v16584_v10  ;;  %v16621_v42 = vsub.s32 5, %v16584_v10 }
 0x11c   :  { %18775 = vst [vmem:[#allocation20_spill] sm:$0xff] %v16592_v13  ;;  %18776 = vst [vmem:[#allocation21_spill] sm:$0xff] %v16597_v14  ;;  %v281_v15 = vrot.slane %v268_v11, %v16592_v13  ;;  %v285_v17 = vrot.slane %v268_v11, %v16597_v14  ;;  %v273_v22 = vrot.slane %v268_v11, %v16601_v16  ;;  %v16809_v13 = vld [vmem:[#allocation8 + $0x68] ss:$16 sps:$4 sm:$0xff]  }
 0x11d   :  { %1660 = vmatpush1.bf16.msra.mxu1 %v16526_v60  ;;  %18777 = vst [vmem:[#allocation22_spill] sm:$0xff] %v16601_v16  ;;  %18778 = vst [vmem:[#allocation23_spill] sm:$0xff] %v16607_v18  ;;  %v277_v25 = vrot.slane %v268_v11, %v16607_v18  ;;  %v16807_v18 = vld [vmem:[#allocation8 + $0x60] ss:$16 sps:$4 sm:$0xff]   ;;  %v16815_v16 = vld [vmem:[#allocation8 + $0x4c] ss:$16 sps:$4 sm:$0xff]  }
 0x11e   :  { %1661 = vmatprep.subr.bf16.mxu1 %v16529_v61  ;;  %18779 = vst [vmem:[#allocation24_spill] sm:$0xff] %v16616_v40  ;;  %18780 = vst [vmem:[#allocation25_spill] sm:$0xff] %v16621_v42 }
 0x11f   :  { %18783 = vst [vmem:[#allocation27_spill] sm:$0xff] %v16815_v16 }
 0x121   :  { %1662 = vmatpush1.bf16.msra.mxu1 %v16535_v62 }
 0x122   :  { %1663 = vmatprep.subr.bf16.mxu1 %v16538_v63 }
 0x125   :  { %1664 = vmatpush1.bf16.msra.mxu1 %v16542_v0 }
 0x126   :  { %1665 = vmatprep.subr.bf16.mxu1 %v16544_v1 }
 0x129   :  { %1666 = vmatpush1.bf16.msra.mxu1 %v16548_v2 }
 0x12a   :  { %1667 = vmatprep.subr.bf16.mxu1 %v16550_v3 }
 0x12d   :  { %1668 = vmatpush1.bf16.msra.mxu1 %v16554_v4 }
 0x12e   :  { %1669 = vmatprep.subr.bf16.mxu1 %v16556_v5 }
 0x131   :  { %1670 = vmatpush1.bf16.msra.mxu1 %v16560_v6 }
 0x132   :  { %1671 = vmatprep.subr.bf16.mxu1 %v16562_v7 }
 0x135   :  { %1672 = vmatpush1.bf16.msra.mxu1 %v16566_v8 }
 0x136   :  { %2002 = vmatprep.subr.bf16.mxu1 %v16449_v39  ;;  %v297_v39 = vrot.slane %v268_v11, %v18710_v37 }
 0x138   :  { %1690 = vmatmul.mubr.bf16.vlgmr.msra.gmra.mxu1 %v18711_v19 }
 0x139   :  { %2003 = vmatpush1.bf16.msra.mxu1 %v16453_v41  ;;  %2034 = vmatprep.mubr.bf16.mxu1 %v18711_v19  ;;  %v301_v41 = vrot.slane %v268_v11, %v18709_v38 }
 0x13a   :  { %2004 = vmatprep.subr.bf16.mxu1 %v16455_v43 }
 0x13d   :  { %2005 = vmatpush1.bf16.msra.mxu1 %v16459_v44 }
 0x13e   :  { %2006 = vmatprep.subr.bf16.mxu1 %v16462_v45  ;;  %v289_v45 = vrot.slane %v268_v11, %v16616_v40 }
 0x141   :  { %2007 = vmatpush1.bf16.msra.mxu1 %v16467_v46 }
 0x142   :  { %2008 = vmatprep.subr.bf16.mxu1 %v16470_v47 }
 0x145   :  { %2009 = vmatpush1.bf16.msra.mxu1 %v16477_v49  ;;  %v293_v49 = vrot.slane %v268_v11, %v16621_v42 }
 0x146   :  { %2010 = vmatprep.subr.bf16.mxu1 %v16480_v48 }
 0x149   :  { %2011 = vmatpush1.bf16.msra.mxu1 %v16486_v50 }
 0x14a   :  { %2012 = vmatprep.subr.bf16.mxu1 %v16488_v51 }
 0x14d   :  { %2013 = vmatpush1.bf16.msra.mxu1 %v16494_v52 }
 0x14e   :  { %2014 = vmatprep.subr.bf16.mxu1 %v16496_v53 }
 0x151   :  { %2015 = vmatpush1.bf16.msra.mxu1 %v16502_v54 }
 0x152   :  { %2016 = vmatprep.subr.bf16.mxu1 %v16504_v55 }
 0x155   :  { %2017 = vmatpush1.bf16.msra.mxu1 %v16510_v56 }
 0x156   :  { %2300 = vmatprep.subr.bf16.mxu1 %v16512_v57 }
 0x158   :  { %v1027_v20 = vpop.f32.mrf.mxu1  ;;  %v984_v26 = vpop.f32.mrf.mxu0 }
 0x159   :  { %v1028_v21 = vadd.f32 %v1027_v20, %v281_v15  ;;  %v985_v28 = vadd.f32 %v984_v26, %v273_v22 }
 0x15a   :  { %v1029_v23 = vpop.f32.mrf.mxu1  ;;  %v986_v30 = vpop.f32.mrf.mxu0 }
 0x15b   :  { %1124 = vst [vmem:[#allocation2 + $0x58] sm:$0xff] %v1028_v21  ;;  %v1030_v24 = vadd.f32 %v1029_v23, %v285_v17  ;;  %1122 = vst [vmem:[#allocation2 + $0x30] sm:$0xff] %v985_v28  ;;  %v987_v32 = vadd.f32 %v986_v30, %v277_v25 }
 0x15c   :  { %v1031_v12 = vpop.f32.mrf.mxu1  ;;  %v988_v33 = vpop.f32.mrf.mxu0 }
 0x15d   :  { %1125 = vst [vmem:[#allocation2 + $0x18] sm:$0xff] %v1030_v24  ;;  %v1032_v27 = vadd.f32 %v1031_v12, %v281_v15  ;;  %1123 = vst [vmem:[#allocation2] sm:$0xff] %v987_v32  ;;  %v989_v34 = vadd.f32 %v988_v33, %v273_v22 }
 0x15e   :  { %v1033_v29 = vpop.f32.mrf.mxu1  ;;  %v990_v35 = vpop.f32.mrf.mxu0 }
 0x15f   :  { %1132 = vst [vmem:[#allocation2 + $0x10] sm:$0xff] %v1032_v27  ;;  %v1034_v31 = vadd.f32 %v1033_v29, %v285_v17  ;;  %1130 = vst [vmem:[#allocation2 + $0x40] sm:$0xff] %v989_v34  ;;  %v991_v36 = vadd.f32 %v990_v35, %v277_v25 }
 0x161   :  { %1133 = vst [vmem:[#allocation2 + $0x38] sm:$0xff] %v1034_v31  ;;  %1131 = vst [vmem:[#allocation2 + $0x20] sm:$0xff] %v991_v36 }
 0x162   :  { %v1138_v24 = vld [vmem:[#allocation2 + $0x30] sm:$0x3]  ;;  %v1140_v36 = vld [vmem:[#allocation2 + $0x58] sm:$0x3] }
 0x164   :  { %v1139_v21 = vld [vmem:[#allocation2] sm:$0x3] }
 0x198   :  { %v1113_v43 = vpop.f32.mrf.mxu1 }
 0x199   :  { %v1114_v44 = vadd.f32 %v1113_v43, %v297_v39  ;;  %v1141_v43 = vld [vmem:[#allocation2 + $0x18] sm:$0x3] }
 0x19a   :  { %v1115_v46 = vpop.f32.mrf.mxu1  ;;  %v1070_v50 = vpop.f32.mrf.mxu0 }
 0x19b   :  { %1128 = vst [vmem:[#allocation2 + $0x8] sm:$0xff] %v1114_v44  ;;  %v1116_v47 = vadd.f32 %v1115_v46, %v301_v41  ;;  %v1071_v52 = vadd.f32 %v1070_v50, %v289_v45 }
 0x19c   :  { %v1117_v48 = vpop.f32.mrf.mxu1  ;;  %v1072_v54 = vpop.f32.mrf.mxu0 }
 0x19d   :  { %1129 = vst [vmem:[#allocation2 + $0x48] sm:$0xff] %v1116_v47  ;;  %v1118_v51 = vadd.f32 %v1117_v48, %v297_v39  ;;  %1126 = vst [vmem:[#allocation2 + $0x50] sm:$0xff] %v1071_v52  ;;  %v1073_v56 = vadd.f32 %v1072_v54, %v293_v49 }
 0x19e   :  { %v1119_v53 = vpop.f32.mrf.mxu1  ;;  %v1074_v57 = vpop.f32.mrf.mxu0 }
 0x19f   :  { %1136 = vst [vmem:[#allocation2 + $0x78] sm:$0xff] %v1118_v51  ;;  %v1120_v55 = vadd.f32 %v1119_v53, %v301_v41  ;;  %1127 = vst [vmem:[#allocation2 + $0x68] sm:$0xff] %v1073_v56  ;;  %v1075_v9 = vadd.f32 %v1074_v57, %v289_v45 }
 0x1a0   :  { %v1076_v15 = vpop.f32.mrf.mxu0 }
 0x1a1   :  { %1137 = vst [vmem:[#allocation2 + $0x28] sm:$0xff] %v1120_v55  ;;  %1134 = vst [vmem:[#allocation2 + $0x60] sm:$0xff] %v1075_v9  ;;  %v1077_v17 = vadd.f32 %v1076_v15, %v293_v49 }
 0x1a3   :  { %1135 = vst [vmem:[#allocation2 + $0x70] sm:$0xff] %v1077_v17 }
 0x1a8   :  { %v1420_v50 = vld [vmem:[#allocation2 + $0x60] sm:$0xc0] }
 0x1aa   :  { %v1421_v49 = vld [vmem:[#allocation2 + $0x70] sm:$0xc0] }
 0x1b8   :  { %v1368_v11 = vpop.f32.mrf.mxu1 }
 0x1b9   :  { %v1416_v12 = vadd.f32 %v1368_v11, %v1138_v24 }
 0x1ba   :  { %v1370_v20 = vpop.f32.mrf.mxu1  ;;  %v1650_v23 = vpop.f32.mrf.mxu0 }
 0x1bb   :  { %v1417_v25 = vadd.f32 %v1370_v20, %v1139_v21  ;;  %v13387_v30 = vmul.f32 -1.442695, %v1416_v12  ;;  %v1702_v47 = vrot.slane %v1650_v23, 2 }
 0x1bc   :  { %v1372_v22 = vpop.f32.mrf.mxu1  ;;  %v1652_v27 = vpop.f32.mrf.mxu0 }
 0x1bd   :  { %v13388_v29 = vmul.f32 -1.442695, %v1417_v25  ;;  %v1703_v45 = vrot.slane %v1652_v27, 2  ;;  %v1710_v54 = vadd.f32 %v1702_v47, %v1420_v50  ;;  %v16107_v47 = vld [vmem:[#allocation8 + $0xc0] ss:$16 sps:$4 sm:$0xff]  }
 0x1be   :  { %v1373_v26 = vpop.f32.mrf.mxu1  ;;  %v1654_v28 = vpop.f32.mrf.mxu0 }
 0x1bf   :  { %15593 = vpow2.f32 %v13388_v29  ;;  %v1711_v53 = vadd.f32 %v1703_v45, %v1421_v49  ;;  %v13390_v56 = vmul.f32 -1.442695, %v1710_v54  ;;  %v1422_v28 = vld [vmem:[#allocation2 + $0x78] sm:$0xc0]  ;;  %v16105_v45 = vld [vmem:[#allocation8 + $0xe0] ss:$16 sps:$4 sm:$0xff]  }
 0x1c0   :  { %v1655_v31 = vpop.f32.mrf.mxu0  ;;  %15595 = vpow2.f32 %v13387_v30  ;;  %v16108_v49 = vld [vmem:[#allocation8 + $0xa4] ss:$16 sps:$4 sm:$0xff]  }
 0x1c1   :  { %v13391_v55 = vmul.f32 -1.442695, %v1711_v53  ;;  %v16110_v53 = vld [vmem:[#allocation8 + $0x84] ss:$16 sps:$4 sm:$0xff]  }
 0x1cc   :  { %v15594_v32 = vpop.eup %15593 }
 0x1cd   :  { %v15596_v33 = vpop.eup %15595  ;;  %v1723_v34 = vadd.f32 1.0, %v15594_v32 }
 0x1ce   :  { %v1717_v35 = vadd.f32 1.0, %v15596_v33 }
 0x1cf   :  { %15597 = vrcp.f32 %v1723_v34  ;;  %v1423_v34 = vld [vmem:[#allocation2 + $0x28] sm:$0xc0] }
 0x1d0   :  { %15599 = vrcp.f32 %v1717_v35 }
 0x1d8   :  { %v1409_v39 = vpop.f32.mrf.mxu1 }
 0x1d9   :  { %v1418_v41 = vadd.f32 %v1409_v39, %v1140_v36 }
 0x1da   :  { %v1411_v44 = vpop.f32.mrf.mxu1 }
 0x1db   :  { %15601 = vtanh.f32 %v1418_v41  ;;  %v1419_v46 = vadd.f32 %v1411_v44, %v1141_v43 }
 0x1dc   :  { %v1413_v48 = vpop.f32.mrf.mxu1  ;;  %v15598_v57 = vpop.eup %15597 }
 0x1dd   :  { %v13389_v51 = vmul.f32 -1.442695, %v1419_v46  ;;  %v15600_v9 = vpop.eup %15599  ;;  %v1733_v17 = vmul.f32 0.0, %v15598_v57  ;;  %v16106_v46 = vld [vmem:[#allocation8 + $0xc4] ss:$16 sps:$4 sm:$0xff]  }
 0x1de   :  { %v1414_v52 = vpop.f32.mrf.mxu1  ;;  %v16115_v57 = vld [vmem:[#allocation8 + $0x40] ss:$16 sps:$4 sm:$0xff]  }
 0x1df   :  { %15603 = vpow2.f32 %v13389_v51 }
 0x1e0   :  { %15605 = vpow2.f32 %v13391_v55  ;;  %v16111_v55 = vld [vmem:[#allocation8 + $0x80] ss:$16 sps:$4 sm:$0xff]  }
 0x1e1   :  { %15607 = vpow2.f32 %v13390_v56  ;;  %v16112_v56 = vld [vmem:[#allocation8 + $0x64] ss:$16 sps:$4 sm:$0xff]  }
 0x1e8   :  { %v15602_v15 = vpop.eup %15601 }
 0x1e9   :  { %v1734_v11 = vmul.f32 %v15602_v15, %v15600_v9  ;;  %v16118_v9 = vld [vmem:[#allocation8 + $0x4] ss:$16 sps:$4 sm:$0xff]  }
 0x1eb   :  { %v16625_v20 = vadd.f32 %v1734_v11, %v1733_v17  ;;  %v16119_v17 = vld [vmem:[#allocation8] ss:$16 sps:$4 sm:$0xff]  }
 0x1ec   :  { %v15604_v21 = vpop.eup %15603 }
 0x1ed   :  { %v1730_v22 = vadd.f32 1.0, %v15604_v21  ;;  %15609 = vtanh.f32 %v16625_v20  ;;  %v15606_v23 = vpop.eup %15605  ;;  %v16656_v21 = vld [vmem:[#allocation6 + $0xe8] ss:$16 sps:$4 sm:$0xff]  }
 0x1ee   :  { %v15608_v24 = vpop.eup %15607  ;;  %v1747_v25 = vadd.f32 1.0, %v15606_v23  ;;  %v16666_v23 = vld [vmem:[#allocation6 + $0xc0] ss:$16 sps:$4 sm:$0xff]  }
 0x1ef   :  { %15611 = vrcp.f32 %v1730_v22  ;;  %v1741_v12 = vadd.f32 1.0, %v15608_v24  ;;  %v16664_v22 = vld [vmem:[#allocation6 + $0xcc] ss:$16 sps:$4 sm:$0xff]   ;;  %v16668_v24 = vld [vmem:[#allocation6 + $0xc8] ss:$16 sps:$4 sm:$0xff]  }
 0x1f0   :  { %15613 = vrcp.f32 %v1747_v25  ;;  %v16674_v25 = vld [vmem:[#allocation6 + $0xa4] ss:$16 sps:$4 sm:$0xff]  }
 0x1f1   :  { %15615 = vrcp.f32 %v1741_v12  ;;  %v16676_v12 = vld [vmem:[#allocation6 + $0xac] ss:$16 sps:$4 sm:$0xff]  }
 0x1f8   :  { %v1691_v26 = vpop.f32.mrf.mxu1 }
 0x1f9   :  { %v1704_v27 = vrot.slane %v1691_v26, 2  ;;  %v16678_v26 = vld [vmem:[#allocation6 + $0xa0] ss:$16 sps:$4 sm:$0xff]  }
 0x1fa   :  { %v1693_v29 = vpop.f32.mrf.mxu1  ;;  %v15610_v30 = vpop.eup %15609 }
 0x1fb   :  { %v1712_v31 = vadd.f32 %v1704_v27, %v1422_v28  ;;  %v1705_v32 = vrot.slane %v1693_v29, 2  ;;  %v16680_v27 = vld [vmem:[#allocation6 + $0xa8] ss:$16 sps:$4 sm:$0xff]   ;;  %v16686_v28 = vld [vmem:[#allocation6 + $0x84] ss:$16 sps:$4 sm:$0xff]  }
 0x1fc   :  { %v15612_v33 = vpop.eup %15611  ;;  %v1695_v35 = vpop.f32.mrf.mxu1  ;;  %v16688_v29 = vld [vmem:[#allocation6 + $0x8c] ss:$16 sps:$4 sm:$0xff]  }
 0x1fd   :  { %15617 = vtanh.f32 %v1712_v31  ;;  %v1713_v36 = vadd.f32 %v1705_v32, %v1423_v34  ;;  %v1737_v39 = vmul.f32 %v15612_v33, %v15610_v30  ;;  %v15614_v48 = vpop.eup %15613  ;;  %v16690_v30 = vld [vmem:[#allocation6 + $0x80] ss:$16 sps:$4 sm:$0xff]   ;;  %v16692_v31 = vld [vmem:[#allocation6 + $0x88] ss:$16 sps:$4 sm:$0xff]   ;;  %v16698_v32 = vld [vmem:[#allocation6 + $0x64] ss:$16 sps:$4 sm:$0xff]  }
 0x1fe   :  { %v1696_v41 = vpop.f32.mrf.mxu1  ;;  %v15616_v50 = vpop.eup %15615  ;;  %v16700_v33 = vld [vmem:[#allocation6 + $0x6c] ss:$16 sps:$4 sm:$0xff]   ;;  %v16702_v34 = vld [vmem:[#allocation6 + $0x60] ss:$16 sps:$4 sm:$0xff]   ;;  %v16704_v35 = vld [vmem:[#allocation6 + $0x68] ss:$16 sps:$4 sm:$0xff]  }
 0x1ff   :  { %v13392_v43 = vmul.f32 -1.442695, %v1713_v36  ;;  %1762 = vst [vmem:[#allocation3 + $0x18] sm:$0x3] %v1737_v39  ;;  %v1768_v44 = vpack.c.bf16 %v1737_v39, %v1737_v39  ;;  %v16710_v36 = vld [vmem:[#allocation6 + $0x44] ss:$16 sps:$4 sm:$0xff]  }
 0x200   :  { %v16712_v39 = vld [vmem:[#allocation6 + $0x4c] ss:$16 sps:$4 sm:$0xff]   ;;  %v16714_v41 = vld [vmem:[#allocation6 + $0x40] ss:$16 sps:$4 sm:$0xff]  }
 0x201   :  { %15619 = vpow2.f32 %v13392_v43  ;;  %1994 = vmatmul.mubr.bf16.vlgmr.msra.gmra.mxu0 %v1768_v44  ;;  %2035 = vmatmul.mubr.bf16.vlgmr.msra.gmra.mxu1 %v1768_v44  ;;  %v16716_v43 = vld [vmem:[#allocation6 + $0x48] ss:$16 sps:$4 sm:$0xff]   ;;  %v16722_v44 = vld [vmem:[#allocation6 + $0x24] ss:$16 sps:$4 sm:$0xff]  }
 0x202   :  { %2260 = vmatpush1.bf16.msra.mxu0 %v16105_v45  ;;  %2301 = vmatpush1.bf16.msra.mxu1 %v16518_v58  ;;  %v16109_v58 = vld [vmem:[#allocation8 + $0xa0] ss:$16 sps:$4 sm:$0xff]   ;;  %v16724_v45 = vld [vmem:[#allocation6 + $0x2c] ss:$16 sps:$4 sm:$0xff]  }
 0x203   :  { %2261 = vmatprep.subr.bf16.mxu0 %v16106_v46  ;;  %2302 = vmatprep.subr.bf16.mxu1 %v16520_v59  ;;  %v1757_v59 = vmul.f32 0.0, %v15614_v48  ;;  %v16726_v46 = vld [vmem:[#allocation6 + $0x20] ss:$16 sps:$4 sm:$0xff]   ;;  %v16736_v48 = vld [vmem:[#allocation6 + $0xc] ss:$16 sps:$4 sm:$0xff]  }
 0x204   :  { %2291 = vmatprep.mubr.bf16.mxu0 %v18711_v19  ;;  %2332 = vmatprep.mubr.bf16.mxu1 %v18711_v19 }
 0x206   :  { %2262 = vmatpush1.bf16.msra.mxu0 %v16107_v47  ;;  %2303 = vmatpush1.bf16.msra.mxu1 %v16526_v60  ;;  %v16728_v47 = vld [vmem:[#allocation6 + $0x28] ss:$16 sps:$4 sm:$0xff]  }
 0x207   :  { %2263 = vmatprep.subr.bf16.mxu0 %v16108_v49  ;;  %2304 = vmatprep.subr.bf16.mxu1 %v16529_v61  ;;  %v16734_v49 = vld [vmem:[#allocation6 + $0x4] ss:$16 sps:$4 sm:$0xff]  }
 0x20a   :  { %v15618_v51 = vpop.eup %15617  ;;  %2264 = vmatpush1.bf16.msra.mxu0 %v16109_v58  ;;  %2305 = vmatpush1.bf16.msra.mxu1 %v16535_v62  ;;  %v16113_v62 = vld [vmem:[#allocation8 + $0x60] ss:$16 sps:$4 sm:$0xff]   ;;  %v16746_v58 = vld [vmem:[#allocation8 + $0xe4] ss:$16 sps:$4 sm:$0xff]  }
 0x20b   :  { %v1758_v52 = vmul.f32 %v15618_v51, %v15616_v50  ;;  %2265 = vmatprep.subr.bf16.mxu0 %v16110_v53  ;;  %2306 = vmatprep.subr.bf16.mxu1 %v16538_v63  ;;  %v16114_v63 = vld [vmem:[#allocation8 + $0x44] ss:$16 sps:$4 sm:$0xff]   ;;  %v16738_v50 = vld [vmem:[#allocation6] ss:$16 sps:$4 sm:$0xff]   ;;  %v16740_v51 = vld [vmem:[#allocation6 + $0x8] ss:$16 sps:$4 sm:$0xff]  }
 0x20d   :  { %v16636_v54 = vadd.f32 %v1758_v52, %v1757_v59  ;;  %v16748_v59 = vld [vmem:[#allocation8 + $0xec] ss:$16 sps:$4 sm:$0xff]  }
 0x20e   :  { %v15620_v60 = vpop.eup %15619  ;;  %2266 = vmatpush1.bf16.msra.mxu0 %v16111_v55  ;;  %2307 = vmatpush1.bf16.msra.mxu1 %v16542_v0  ;;  %v16116_v0 = vld [vmem:[#allocation8 + $0x24] ss:$16 sps:$4 sm:$0xff]   ;;  %v1764_v55 = vld [vmem:[#allocation2 + $0x30] sm:$0xc] }
 0x20f   :  { %v1754_v61 = vadd.f32 1.0, %v15620_v60  ;;  %2267 = vmatprep.subr.bf16.mxu0 %v16112_v56  ;;  %2308 = vmatprep.subr.bf16.mxu1 %v16544_v1  ;;  %15621 = vtanh.f32 %v16636_v54  ;;  %v16117_v1 = vld [vmem:[#allocation8 + $0x20] ss:$16 sps:$4 sm:$0xff]  }
 0x211   :  { %15623 = vrcp.f32 %v1754_v61 }
 0x212   :  { %2268 = vmatpush1.bf16.msra.mxu0 %v16113_v62  ;;  %2309 = vmatpush1.bf16.msra.mxu1 %v16548_v2 }
 0x213   :  { %2269 = vmatprep.subr.bf16.mxu0 %v16114_v63  ;;  %2310 = vmatprep.subr.bf16.mxu1 %v16550_v3 }
 0x216   :  { %2270 = vmatpush1.bf16.msra.mxu0 %v16115_v57  ;;  %2311 = vmatpush1.bf16.msra.mxu1 %v16554_v4  ;;  %v1765_v57 = vld [vmem:[#allocation2] sm:$0xc] }
 0x217   :  { %2271 = vmatprep.subr.bf16.mxu0 %v16116_v0  ;;  %2312 = vmatprep.subr.bf16.mxu1 %v16556_v5  ;;  %v16650_v5 = vld [vmem:[#allocation6 + $0xe4] ss:$16 sps:$4 sm:$0xff]  }
 0x21a   :  { %2272 = vmatpush1.bf16.msra.mxu0 %v16117_v1  ;;  %2313 = vmatpush1.bf16.msra.mxu1 %v16560_v6  ;;  %v16652_v6 = vld [vmem:[#allocation6 + $0xec] ss:$16 sps:$4 sm:$0xff]  }
 0x21b   :  { %2273 = vmatprep.subr.bf16.mxu0 %v16118_v9  ;;  %2314 = vmatprep.subr.bf16.mxu1 %v16562_v7  ;;  %v16654_v7 = vld [vmem:[#allocation6 + $0xe0] ss:$16 sps:$4 sm:$0xff]  }
 0x21c   :  { %v15622_v2 = vpop.eup %15621 }
 0x21e   :  { %v15624_v15 = vpop.eup %15623  ;;  %2274 = vmatpush1.bf16.msra.mxu0 %v16119_v17  ;;  %2315 = vmatpush1.bf16.msra.mxu1 %v16566_v8  ;;  %v16662_v8 = vld [vmem:[#allocation6 + $0xc4] ss:$16 sps:$4 sm:$0xff]  }
 0x21f   :  { %v1761_v3 = vmul.f32 %v15624_v15, %v15622_v2  ;;  %2613 = vmatprep.subr.bf16.mxu0 %v16650_v5  ;;  %2654 = vmatprep.subr.bf16.mxu1 %v16652_v6 }
 0x221   :  { %1763 = vst [vmem:[#allocation3] sm:$0xc0] %v1761_v3  ;;  %v2063_v4 = vpack.c.bf16 %v1761_v3, %v1761_v3 }
 0x223   :  { %v2097_v11 = vrot.slane %v2063_v4, 3 }
 0x225   :  { %2292 = vmatmul.mubr.bf16.vlgmr.msra.gmra.mxu0 %v2097_v11  ;;  %2333 = vmatmul.mubr.bf16.vlgmr.msra.gmra.mxu1 %v2097_v11  ;;  %v1767_v11 = vld [vmem:[#allocation2 + $0x18] sm:$0xc] }
 0x226   :  { %2645 = vmatprep.mubr.bf16.mxu0 %v18711_v19  ;;  %2686 = vmatprep.mubr.bf16.mxu1 %v18711_v19  ;;  %v1766_v19 = vld [vmem:[#allocation2 + $0x58] sm:$0xc] }
 0x227   :  { %2614 = vmatpush1.bf16.msra.mxu0 %v16654_v7  ;;  %2655 = vmatpush1.bf16.msra.mxu1 %v16656_v21 }
 0x228   :  { %2615 = vmatprep.subr.bf16.mxu0 %v16662_v8  ;;  %2656 = vmatprep.subr.bf16.mxu1 %v16664_v22 }
 0x22b   :  { %2616 = vmatpush1.bf16.msra.mxu0 %v16666_v23  ;;  %2657 = vmatpush1.bf16.msra.mxu1 %v16668_v24 }
 0x22c   :  { %2617 = vmatprep.subr.bf16.mxu0 %v16674_v25  ;;  %2658 = vmatprep.subr.bf16.mxu1 %v16676_v12 }
 0x22f   :  { %2618 = vmatpush1.bf16.msra.mxu0 %v16678_v26  ;;  %2659 = vmatpush1.bf16.msra.mxu1 %v16680_v27 }
 0x230   :  { %2619 = vmatprep.subr.bf16.mxu0 %v16686_v28  ;;  %2660 = vmatprep.subr.bf16.mxu1 %v16688_v29 }
 0x233   :  { %2620 = vmatpush1.bf16.msra.mxu0 %v16690_v30  ;;  %2661 = vmatpush1.bf16.msra.mxu1 %v16692_v31 }
 0x234   :  { %2621 = vmatprep.subr.bf16.mxu0 %v16698_v32  ;;  %2662 = vmatprep.subr.bf16.mxu1 %v16700_v33 }
 0x237   :  { %2622 = vmatpush1.bf16.msra.mxu0 %v16702_v34  ;;  %2663 = vmatpush1.bf16.msra.mxu1 %v16704_v35 }
 0x238   :  { %2623 = vmatprep.subr.bf16.mxu0 %v16710_v36  ;;  %2664 = vmatprep.subr.bf16.mxu1 %v16712_v39 }
 0x23b   :  { %2624 = vmatpush1.bf16.msra.mxu0 %v16714_v41  ;;  %2665 = vmatpush1.bf16.msra.mxu1 %v16716_v43 }
 0x23c   :  { %2625 = vmatprep.subr.bf16.mxu0 %v16722_v44  ;;  %2666 = vmatprep.subr.bf16.mxu1 %v16724_v45 }
 0x23f   :  { %2626 = vmatpush1.bf16.msra.mxu0 %v16726_v46  ;;  %2667 = vmatpush1.bf16.msra.mxu1 %v16728_v47 }
 0x240   :  { %2627 = vmatprep.subr.bf16.mxu0 %v16734_v49  ;;  %2668 = vmatprep.subr.bf16.mxu1 %v16736_v48 }
 0x243   :  { %2628 = vmatpush1.bf16.msra.mxu0 %v16738_v50  ;;  %2669 = vmatpush1.bf16.msra.mxu1 %v16740_v51 }
 0x244   :  { %2911 = vmatprep.subr.bf16.mxu0 %v16746_v58  ;;  %2952 = vmatprep.subr.bf16.mxu1 %v16748_v59 }
 0x2c1   :  { %v1995_v52 = vpop.f32.mrf.mxu0  ;;  %v2036_v53 = vpop.f32.mrf.mxu1 }
 0x2c2   :  { %v2047_v60 = vrot.slane %v1995_v52, 6  ;;  %v2049_v37 = vrot.slane %v2036_v53, 6 }
 0x2c3   :  { %v1997_v61 = vpop.f32.mrf.mxu0  ;;  %v2038_v56 = vpop.f32.mrf.mxu1 }
 0x2c4   :  { %v2055_v62 = vadd.f32 %v2047_v60, %v1764_v55  ;;  %v2048_v63 = vrot.slane %v1997_v61, 6  ;;  %v2050_v4 = vrot.slane %v2038_v56, 6  ;;  %v2057_v10 = vadd.f32 %v2049_v37, %v1766_v19 }
 0x2c5   :  { %v1999_v0 = vpop.f32.mrf.mxu0  ;;  %v2040_v1 = vpop.f32.mrf.mxu1  ;;  %v2377_v56 = vrot.slane %v16625_v20, 6 }
 0x2c6   :  { %v13457_v9 = vmul.f32 -1.442695, %v2055_v62  ;;  %v2056_v2 = vadd.f32 %v2048_v63, %v1765_v57  ;;  %v2058_v38 = vadd.f32 %v2050_v4, %v1767_v11  ;;  %v2060_v4 = vld [vmem:[#allocation2 + $0x70] sm:$0x30] }
 0x2c7   :  { %v2000_v15 = vpop.f32.mrf.mxu0  ;;  %v2041_v17 = vpop.f32.mrf.mxu1 }
 0x2c8   :  { %15625 = vpow2.f32 %v13457_v9  ;;  %v13458_v3 = vmul.f32 -1.442695, %v2056_v2  ;;  %v13459_v52 = vmul.f32 -1.442695, %v2058_v38  ;;  %v2059_v2 = vld [vmem:[#allocation2 + $0x60] sm:$0x30] }
 0x2ca   :  { %15627 = vpow2.f32 %v13458_v3 }
 0x2cb   :  { %15629 = vpow2.f32 %v13459_v52 }
 0x2d5   :  { %v15626_v42 = vpop.eup %15625 }
 0x2d6   :  { %v2360_v60 = vadd.f32 1.0, %v15626_v42 }
 0x2d7   :  { %v15628_v55 = vpop.eup %15627 }
 0x2d8   :  { %15631 = vrcp.f32 %v2360_v60  ;;  %v2366_v61 = vadd.f32 1.0, %v15628_v55  ;;  %v15630_v62 = vpop.eup %15629 }
 0x2d9   :  { %15633 = vtanh.f32 %v2057_v10  ;;  %v2373_v38 = vadd.f32 1.0, %v15630_v62 }
 0x2da   :  { %15635 = vrcp.f32 %v2366_v61 }
 0x2db   :  { %15637 = vrcp.f32 %v2373_v38 }
 0x2e5   :  { %v15632_v63 = vpop.eup %15631  ;;  %v2293_v57 = vpop.f32.mrf.mxu0 }
 0x2e6   :  { %v2334_v0 = vpop.f32.mrf.mxu1  ;;  %v15634_v1 = vpop.eup %15633  ;;  %v2345_v9 = vrot.slane %v2293_v57, 4 }
 0x2e7   :  { %v15636_v53 = vpop.eup %15635  ;;  %v2295_v15 = vpop.f32.mrf.mxu0  ;;  %v2380_v37 = vmul.f32 %v15634_v1, %v15632_v63  ;;  %v2062_v63 = vld [vmem:[#allocation2 + $0x28] sm:$0x30] }
 0x2e8   :  { %v2336_v19 = vpop.f32.mrf.mxu1  ;;  %v2379_v42 = vmul.f32 %v15636_v53, %v2377_v56  ;;  %v2353_v17 = vadd.f32 %v2345_v9, %v2059_v2  ;;  %v2346_v3 = vrot.slane %v2295_v15, 4  ;;  %v2347_v56 = vrot.slane %v2334_v0, 4  ;;  %v15638_v53 = vpop.eup %15637  ;;  %v2061_v2 = vld [vmem:[#allocation2 + $0x78] sm:$0x30] }
 0x2e9   :  { %v2297_v10 = vpop.f32.mrf.mxu0  ;;  %v2348_v62 = vrot.slane %v2336_v19, 4  ;;  %v16756_v19 = vld [vmem:[#allocation8 + $0xe0] ss:$16 sps:$4 sm:$0xff]  }
 0x2ea   :  { %v2338_v11 = vpop.f32.mrf.mxu1  ;;  %v16753_v52 = vadd.f32 %v2380_v37, %v2379_v42  ;;  %v13460_v60 = vmul.f32 -1.442695, %v2353_v17  ;;  %v2354_v55 = vadd.f32 %v2346_v3, %v2060_v4  ;;  %v2355_v37 = vadd.f32 %v2347_v56, %v2061_v2  ;;  %v16782_v56 = vld [vmem:[#allocation8 + $0xa8] ss:$16 sps:$4 sm:$0xff]  }
 0x2eb   :  { %v2298_v61 = vpop.f32.mrf.mxu0  ;;  %v2356_v1 = vadd.f32 %v2348_v62, %v2062_v63  ;;  %v16758_v11 = vld [vmem:[#allocation8 + $0xe8] ss:$16 sps:$4 sm:$0xff]   ;;  %v16774_v62 = vld [vmem:[#allocation8 + $0xac] ss:$16 sps:$4 sm:$0xff]   ;;  %v18781_v63 = vmov 0  }
 0x2ec   :  { %v2339_v20 = vpop.f32.mrf.mxu1  ;;  %15639 = vpow2.f32 %v13460_v60  ;;  %v13461_v57 = vmul.f32 -1.442695, %v2354_v55  ;;  %v16760_v60 = vld [vmem:[#allocation8 + $0xc4] ss:$16 sps:$4 sm:$0xff]   ;;  %v16762_v55 = vld [vmem:[#allocation8 + $0xcc] ss:$16 sps:$4 sm:$0xff]  }
 0x2ed   :  { %15641 = vtanh.f32 %v16753_v52  ;;  %v13462_v9 = vmul.f32 -1.442695, %v2356_v1  ;;  %v16766_v61 = vld [vmem:[#allocation8 + $0xc0] ss:$16 sps:$4 sm:$0xff]   ;;  %v16768_v20 = vld [vmem:[#allocation8 + $0xc8] ss:$16 sps:$4 sm:$0xff]  }
 0x2ee   :  { %15643 = vpow2.f32 %v13461_v57  ;;  %v16772_v57 = vld [vmem:[#allocation8 + $0xa4] ss:$16 sps:$4 sm:$0xff]   ;;  %v16780_v1 = vld [vmem:[#allocation8 + $0xa0] ss:$16 sps:$4 sm:$0xff]  }
 0x2ef   :  { %15645 = vpow2.f32 %v13462_v9  ;;  %v16786_v9 = vld [vmem:[#allocation8 + $0x84] ss:$16 sps:$4 sm:$0xff]  }
 0x2f9   :  { %v15640_v15 = vpop.eup %15639 }
 0x2fa   :  { %v15642_v42 = vpop.eup %15641  ;;  %v2387_v17 = vadd.f32 1.0, %v15640_v15 }
 0x2fb   :  { %v15644_v3 = vpop.eup %15643  ;;  %v2383_v38 = vmul.f32 %v15642_v42, %v15638_v53  ;;  %v16788_v53 = vld [vmem:[#allocation8 + $0x8c] ss:$16 sps:$4 sm:$0xff]   ;;  %v2404_v42 = vrot.slane %v16636_v54, 2 }
 0x2fc   :  { %15647 = vrcp.f32 %v2387_v17  ;;  %v2393_v4 = vadd.f32 1.0, %v15644_v3  ;;  %v15646_v2 = vpop.eup %15645  ;;  %v16793_v17 = vld [vmem:[#allocation8 + $0x80] ss:$16 sps:$4 sm:$0xff]   ;;  %v16795_v3 = vld [vmem:[#allocation8 + $0x88] ss:$16 sps:$4 sm:$0xff]  }
 0x2fd   :  { %15649 = vtanh.f32 %v2355_v37  ;;  %2411 = vst [vmem:[#allocation3 + $0x18] sm:$0xc] %v2383_v38  ;;  %v2417_v10 = vpack.c.bf16 %v2383_v38, %v2383_v38 }
 0x2fe   :  { %15651 = vrcp.f32 %v2393_v4  ;;  %v2400_v4 = vadd.f32 1.0, %v15646_v2  ;;  %v16813_v2 = vld [vmem:[#allocation8 + $0x44] ss:$16 sps:$4 sm:$0xff]  }
 0x2ff   :  { %v2451_v0 = vrot.slane %v2417_v10, 1  ;;  %v16799_v10 = vld [vmem:[#allocation8 + $0x64] ss:$16 sps:$4 sm:$0xff]   ;;  %18782 = vst [vmem:[#allocation26_spill] sm:$0xff] %v16813_v2 }
 0x300   :  { %15653 = vrcp.f32 %v2400_v4  ;;  %v16834_v4 = vld [vmem:[#allocation8 + $0x28] ss:$16 sps:$4 sm:$0xff]  }
 0x301   :  { %2646 = vmatmul.mubr.bf16.vlgmr.msra.gmra.mxu0 %v2451_v0  ;;  %2687 = vmatmul.mubr.bf16.vlgmr.msra.gmra.mxu1 %v2451_v0  ;;  %v16801_v0 = vld [vmem:[#allocation8 + $0x6c] ss:$16 sps:$4 sm:$0xff]   ;;  %18789 = vst [vmem:[#allocation33_spill] sm:$0xff] %v16834_v4 }
 0x302   :  { %2912 = vmatpush1.bf16.msra.mxu0 %v16756_v19  ;;  %2953 = vmatpush1.bf16.msra.mxu1 %v16758_v11 }
 0x303   :  { %2913 = vmatprep.subr.bf16.mxu0 %v16760_v60  ;;  %2954 = vmatprep.subr.bf16.mxu1 %v16762_v55 }
 0x304   :  { %2943 = vmatprep.mubr.bf16.mxu0 %v18781_v63  ;;  %2984 = vmatprep.mubr.bf16.mxu1 %v18781_v63 }
 0x306   :  { %2914 = vmatpush1.bf16.msra.mxu0 %v16766_v61  ;;  %2955 = vmatpush1.bf16.msra.mxu1 %v16768_v20 }
 0x307   :  { %2915 = vmatprep.subr.bf16.mxu0 %v16772_v57  ;;  %2956 = vmatprep.subr.bf16.mxu1 %v16774_v62 }
 0x309   :  { %v15648_v15 = vpop.eup %15647 }
 0x30a   :  { %v15650_v37 = vpop.eup %15649  ;;  %2916 = vmatpush1.bf16.msra.mxu0 %v16780_v1  ;;  %2957 = vmatpush1.bf16.msra.mxu1 %v16782_v56 }
 0x30b   :  { %v15652_v38 = vpop.eup %15651  ;;  %2917 = vmatprep.subr.bf16.mxu0 %v16786_v9  ;;  %2958 = vmatprep.subr.bf16.mxu1 %v16788_v53  ;;  %v2407_v40 = vmul.f32 %v15650_v37, %v15648_v15  ;;  %v16822_v15 = vld [vmem:[#allocation8 + $0x48] ss:$16 sps:$4 sm:$0xff]   ;;  %v16826_v37 = vld [vmem:[#allocation8 + $0x24] ss:$16 sps:$4 sm:$0xff]  }
 0x30c   :  { %v2406_v54 = vmul.f32 %v15652_v38, %v2404_v42  ;;  %18785 = vst [vmem:[#allocation29_spill] sm:$0xff] %v16822_v15  ;;  %18786 = vst [vmem:[#allocation30_spill] sm:$0xff] %v16826_v37  ;;  %v16828_v42 = vld [vmem:[#allocation8 + $0x2c] ss:$16 sps:$4 sm:$0xff]   ;;  %v16832_v38 = vld [vmem:[#allocation8 + $0x20] ss:$16 sps:$4 sm:$0xff]  }
 0x30d   :  { %18787 = vst [vmem:[#allocation31_spill] sm:$0xff] %v16828_v42  ;;  %18788 = vst [vmem:[#allocation32_spill] sm:$0xff] %v16832_v38 }
 0x30e   :  { %v16803_v14 = vadd.f32 %v2407_v40, %v2406_v54  ;;  %2918 = vmatpush1.bf16.msra.mxu0 %v16793_v17  ;;  %2959 = vmatpush1.bf16.msra.mxu1 %v16795_v3  ;;  %v16820_v40 = vld [vmem:[#allocation8 + $0x40] ss:$16 sps:$4 sm:$0xff]   ;;  %v16838_v54 = vld [vmem:[#allocation8 + $0x4] ss:$16 sps:$4 sm:$0xff]  }
 0x30f   :  { %2919 = vmatprep.subr.bf16.mxu0 %v16799_v10  ;;  %2960 = vmatprep.subr.bf16.mxu1 %v16801_v0  ;;  %18784 = vst [vmem:[#allocation28_spill] sm:$0xff] %v16820_v40 }
 0x310   :  { %15655 = vtanh.f32 %v16803_v14 }
 0x312   :  { %2920 = vmatpush1.bf16.msra.mxu0 %v16807_v18  ;;  %2961 = vmatpush1.bf16.msra.mxu1 %v16809_v13 }
 0x313   :  { %2921 = vmatprep.subr.bf16.mxu0 %v16813_v2  ;;  %2962 = vmatprep.subr.bf16.mxu1 %v16815_v16  ;;  %v16840_v2 = vld [vmem:[#allocation8 + $0xc] ss:$16 sps:$4 sm:$0xff]   ;;  %v16844_v16 = vld [vmem:[#allocation8] ss:$16 sps:$4 sm:$0xff]  }
 0x316   :  { %2922 = vmatpush1.bf16.msra.mxu0 %v16820_v40  ;;  %2963 = vmatpush1.bf16.msra.mxu1 %v16822_v15  ;;  %v16846_v40 = vld [vmem:[#allocation8 + $0x8] ss:$16 sps:$4 sm:$0xff]   ;;  %v15654_v15 = vpop.eup %15653 }
 0x317   :  { %2923 = vmatprep.subr.bf16.mxu0 %v16826_v37  ;;  %2964 = vmatprep.subr.bf16.mxu1 %v16828_v42 }
 0x31a   :  { %2924 = vmatpush1.bf16.msra.mxu0 %v16832_v38  ;;  %2965 = vmatpush1.bf16.msra.mxu1 %v16834_v4 }
 0x31b   :  { %2925 = vmatprep.subr.bf16.mxu0 %v16838_v54  ;;  %2966 = vmatprep.subr.bf16.mxu1 %v16840_v2 }
 0x31d   :  { %v15656_v37 = vpop.eup %15655 }
 0x31e   :  { %2926 = vmatpush1.bf16.msra.mxu0 %v16844_v16  ;;  %2967 = vmatpush1.bf16.msra.mxu1 %v16846_v40  ;;  %v2410_v42 = vmul.f32 %v15656_v37, %v15654_v15  ;;  %v2711_v37 = vld [vmem:[#allocation2 + $0x60] sm:$0xc] }
 0x31f   :  { %3265 = vmatprep.subr.bf16.mxu0 %v16650_v5  ;;  %3306 = vmatprep.subr.bf16.mxu1 %v16652_v6 }
 0x320   :  { %2412 = vst [vmem:[#allocation3] sm:$0x30] %v2410_v42  ;;  %v2715_v4 = vpack.c.bf16 %v2410_v42, %v2410_v42 }
 0x322   :  { %v2749_v38 = vrot.slane %v2715_v4, 2 }
 0x324   :  { %2944 = vmatmul.mubr.bf16.vlgmr.msra.gmra.mxu0 %v2749_v38  ;;  %2985 = vmatmul.mubr.bf16.vlgmr.msra.gmra.mxu1 %v2749_v38 }
 0x325   :  { %3266 = vmatpush1.bf16.msra.mxu0 %v16654_v7  ;;  %3307 = vmatpush1.bf16.msra.mxu1 %v16656_v21  ;;  %v2413_v21 = vld [vmem:[#allocation2 + $0x30] sm:$0x30] }
 0x326   :  { %3267 = vmatprep.subr.bf16.mxu0 %v16662_v8  ;;  %3308 = vmatprep.subr.bf16.mxu1 %v16664_v22 }
 0x327   :  { %3297 = vmatprep.mubr.bf16.mxu0 %v18781_v63  ;;  %3338 = vmatprep.mubr.bf16.mxu1 %v18781_v63 }
 0x329   :  { %3268 = vmatpush1.bf16.msra.mxu0 %v16666_v23  ;;  %3309 = vmatpush1.bf16.msra.mxu1 %v16668_v24 }
 0x32a   :  { %3269 = vmatprep.subr.bf16.mxu0 %v16674_v25  ;;  %3310 = vmatprep.subr.bf16.mxu1 %v16676_v12  ;;  %v2414_v25 = vld [vmem:[#allocation2] sm:$0x30] }
 0x32d   :  { %3270 = vmatpush1.bf16.msra.mxu0 %v16678_v26  ;;  %3311 = vmatpush1.bf16.msra.mxu1 %v16680_v27 }
 0x32e   :  { %3271 = vmatprep.subr.bf16.mxu0 %v16686_v28  ;;  %3312 = vmatprep.subr.bf16.mxu1 %v16688_v29 }
 0x331   :  { %3272 = vmatpush1.bf16.msra.mxu0 %v16690_v30  ;;  %3313 = vmatpush1.bf16.msra.mxu1 %v16692_v31 }
 0x332   :  { %3273 = vmatprep.subr.bf16.mxu0 %v16698_v32  ;;  %3314 = vmatprep.subr.bf16.mxu1 %v16700_v33  ;;  %v2416_v33 = vld [vmem:[#allocation2 + $0x18] sm:$0x30] }
 0x335   :  { %3274 = vmatpush1.bf16.msra.mxu0 %v16702_v34  ;;  %3315 = vmatpush1.bf16.msra.mxu1 %v16704_v35 }
 0x336   :  { %3275 = vmatprep.subr.bf16.mxu0 %v16710_v36  ;;  %3316 = vmatprep.subr.bf16.mxu1 %v16712_v39  ;;  %v2415_v39 = vld [vmem:[#allocation2 + $0x58] sm:$0x30] }
 0x339   :  { %3276 = vmatpush1.bf16.msra.mxu0 %v16714_v41  ;;  %3317 = vmatpush1.bf16.msra.mxu1 %v16716_v43 }
 0x33a   :  { %3277 = vmatprep.subr.bf16.mxu0 %v16722_v44  ;;  %3318 = vmatprep.subr.bf16.mxu1 %v16724_v45 }
 0x33d   :  { %3278 = vmatpush1.bf16.msra.mxu0 %v16726_v46  ;;  %3319 = vmatpush1.bf16.msra.mxu1 %v16728_v47 }
 0x33e   :  { %3279 = vmatprep.subr.bf16.mxu0 %v16734_v49  ;;  %3320 = vmatprep.subr.bf16.mxu1 %v16736_v48 }
 0x341   :  { %3280 = vmatpush1.bf16.msra.mxu0 %v16738_v50  ;;  %3321 = vmatpush1.bf16.msra.mxu1 %v16740_v51 }
 0x342   :  { %3563 = vmatprep.subr.bf16.mxu0 %v16746_v58  ;;  %3604 = vmatprep.subr.bf16.mxu1 %v16748_v59  ;;  %v3029_v59 = vrot.slane %v16753_v52, 6 }
 0x3c1   :  { %v2647_v5 = vpop.f32.mrf.mxu0  ;;  %v2688_v6 = vpop.f32.mrf.mxu1 }
 0x3c2   :  { %v2699_v7 = vrot.slane %v2647_v5, 4  ;;  %v2701_v35 = vrot.slane %v2688_v6, 4 }
 0x3c3   :  { %v2649_v8 = vpop.f32.mrf.mxu0  ;;  %v2690_v22 = vpop.f32.mrf.mxu1 }
 0x3c4   :  { %v2707_v23 = vadd.f32 %v2699_v7, %v2413_v21  ;;  %v2700_v24 = vrot.slane %v2649_v8, 4  ;;  %v2702_v32 = vrot.slane %v2690_v22, 4  ;;  %v2709_v43 = vadd.f32 %v2701_v35, %v2415_v39  ;;  %v2712_v8 = vld [vmem:[#allocation2 + $0x70] sm:$0xc] }
 0x3c5   :  { %v2651_v12 = vpop.f32.mrf.mxu0  ;;  %v2692_v26 = vpop.f32.mrf.mxu1 }
 0x3c6   :  { %v13527_v27 = vmul.f32 -1.442695, %v2707_v23  ;;  %v2708_v28 = vadd.f32 %v2700_v24, %v2414_v25  ;;  %v2710_v34 = vadd.f32 %v2702_v32, %v2416_v33 }
 0x3c7   :  { %v2652_v29 = vpop.f32.mrf.mxu0  ;;  %v2693_v30 = vpop.f32.mrf.mxu1 }
 0x3c8   :  { %15657 = vpow2.f32 %v13527_v27  ;;  %v13528_v31 = vmul.f32 -1.442695, %v2708_v28  ;;  %v13529_v36 = vmul.f32 -1.442695, %v2710_v34  ;;  %v2714_v29 = vld [vmem:[#allocation2 + $0x28] sm:$0xc] }
 0x3c9   :  { %v2713_v34 = vld [vmem:[#allocation2 + $0x78] sm:$0xc] }
 0x3ca   :  { %15659 = vpow2.f32 %v13528_v31 }
 0x3cb   :  { %15661 = vpow2.f32 %v13529_v36 }
 0x3d5   :  { %v15658_v41 = vpop.eup %15657 }
 0x3d6   :  { %v3012_v44 = vadd.f32 1.0, %v15658_v41 }
 0x3d7   :  { %v15660_v45 = vpop.eup %15659 }
 0x3d8   :  { %15663 = vrcp.f32 %v3012_v44  ;;  %v3018_v46 = vadd.f32 1.0, %v15660_v45  ;;  %v15662_v47 = vpop.eup %15661 }
 0x3d9   :  { %15665 = vtanh.f32 %v2709_v43  ;;  %v3025_v15 = vadd.f32 1.0, %v15662_v47 }
 0x3da   :  { %15667 = vrcp.f32 %v3018_v46 }
 0x3db   :  { %15669 = vrcp.f32 %v3025_v15  ;;  %v16948_v15 = vld [vmem:[#allocation6 + $0xc8] ss:$16 sps:$4 sm:$0xff]  }
 0x3e4   :  { %v2945_v49 = vpop.f32.mrf.mxu0  ;;  %v2986_v48 = vpop.f32.mrf.mxu1 }
 0x3e5   :  { %v15664_v50 = vpop.eup %15663  ;;  %v2997_v51 = vrot.slane %v2945_v49, 6  ;;  %v2999_v31 = vrot.slane %v2986_v48, 6 }
 0x3e6   :  { %v15666_v58 = vpop.eup %15665  ;;  %v2947_v42 = vpop.f32.mrf.mxu0 }
 0x3e7   :  { %v2988_v38 = vpop.f32.mrf.mxu1  ;;  %v15668_v4 = vpop.eup %15667  ;;  %v3005_v5 = vadd.f32 %v2997_v51, %v2711_v37  ;;  %v2998_v6 = vrot.slane %v2947_v42, 6  ;;  %v3032_v7 = vmul.f32 %v15666_v58, %v15664_v50  ;;  %v3007_v36 = vadd.f32 %v2999_v31, %v2713_v34  ;;  %v16930_v51 = vld [vmem:[#allocation6 + $0xe4] ss:$16 sps:$4 sm:$0xff]   ;;  %v16936_v58 = vld [vmem:[#allocation6 + $0xe8] ss:$16 sps:$4 sm:$0xff]  }
 0x3e8   :  { %v3031_v21 = vmul.f32 %v15668_v4, %v3029_v59  ;;  %v2949_v22 = vpop.f32.mrf.mxu0  ;;  %v3000_v28 = vrot.slane %v2988_v38, 6  ;;  %v15670_v33 = vpop.eup %15669  ;;  %v16946_v59 = vld [vmem:[#allocation6 + $0xc0] ss:$16 sps:$4 sm:$0xff]   ;;  %v16954_v37 = vld [vmem:[#allocation6 + $0xa4] ss:$16 sps:$4 sm:$0xff]  }
 0x3e9   :  { %v2990_v23 = vpop.f32.mrf.mxu1  ;;  %v13530_v24 = vmul.f32 -1.442695, %v3005_v5  ;;  %v3006_v25 = vadd.f32 %v2998_v6, %v2712_v8  ;;  %v16956_v42 = vld [vmem:[#allocation6 + $0xac] ss:$16 sps:$4 sm:$0xff]   ;;  %v16958_v38 = vld [vmem:[#allocation6 + $0xa0] ss:$16 sps:$4 sm:$0xff]  }
 0x3ea   :  { %v16889_v12 = vadd.f32 %v3032_v7, %v3031_v21  ;;  %v2950_v26 = vpop.f32.mrf.mxu0  ;;  %v3008_v30 = vadd.f32 %v3000_v28, %v2714_v29  ;;  %v16960_v4 = vld [vmem:[#allocation6 + $0xa8] ss:$16 sps:$4 sm:$0xff]   ;;  %v16966_v5 = vld [vmem:[#allocation6 + $0x84] ss:$16 sps:$4 sm:$0xff]   ;;  %v16968_v6 = vld [vmem:[#allocation6 + $0x8c] ss:$16 sps:$4 sm:$0xff]  }
 0x3eb   :  { %v2991_v27 = vpop.f32.mrf.mxu1  ;;  %15671 = vpow2.f32 %v13530_v24  ;;  %v13531_v52 = vmul.f32 -1.442695, %v3006_v25  ;;  %v16970_v7 = vld [vmem:[#allocation6 + $0x80] ss:$16 sps:$4 sm:$0xff]   ;;  %v16972_v21 = vld [vmem:[#allocation6 + $0x88] ss:$16 sps:$4 sm:$0xff]  }
 0x3ec   :  { %15673 = vtanh.f32 %v16889_v12  ;;  %v13532_v32 = vmul.f32 -1.442695, %v3008_v30  ;;  %v16978_v8 = vld [vmem:[#allocation6 + $0x64] ss:$16 sps:$4 sm:$0xff]   ;;  %v16980_v22 = vld [vmem:[#allocation6 + $0x6c] ss:$16 sps:$4 sm:$0xff]  }
 0x3ed   :  { %15675 = vpow2.f32 %v13531_v52  ;;  %v16982_v23 = vld [vmem:[#allocation6 + $0x60] ss:$16 sps:$4 sm:$0xff]   ;;  %v16984_v24 = vld [vmem:[#allocation6 + $0x68] ss:$16 sps:$4 sm:$0xff]   ;;  %v16990_v25 = vld [vmem:[#allocation6 + $0x44] ss:$16 sps:$4 sm:$0xff]  }
 0x3ee   :  { %15677 = vpow2.f32 %v13532_v32  ;;  %v16992_v26 = vld [vmem:[#allocation6 + $0x4c] ss:$16 sps:$4 sm:$0xff]   ;;  %v16994_v27 = vld [vmem:[#allocation6 + $0x40] ss:$16 sps:$4 sm:$0xff]   ;;  %v16996_v52 = vld [vmem:[#allocation6 + $0x48] ss:$16 sps:$4 sm:$0xff]  }
 0x3ef   :  { %v17002_v28 = vld [vmem:[#allocation6 + $0x24] ss:$16 sps:$4 sm:$0xff]   ;;  %v17004_v29 = vld [vmem:[#allocation6 + $0x2c] ss:$16 sps:$4 sm:$0xff]   ;;  %v17006_v30 = vld [vmem:[#allocation6 + $0x20] ss:$16 sps:$4 sm:$0xff]  }
 0x3f0   :  { %v17008_v31 = vld [vmem:[#allocation6 + $0x28] ss:$16 sps:$4 sm:$0xff]   ;;  %v17014_v32 = vld [vmem:[#allocation6 + $0x4] ss:$16 sps:$4 sm:$0xff]   ;;  %v17018_v34 = vld [vmem:[#allocation6] ss:$16 sps:$4 sm:$0xff]  }
 0x3f8   :  { %v15672_v35 = vpop.eup %15671 }
 0x3f9   :  { %v15674_v39 = vpop.eup %15673  ;;  %v3039_v41 = vadd.f32 1.0, %v15672_v35  ;;  %v17020_v35 = vld [vmem:[#allocation6 + $0x8] ss:$16 sps:$4 sm:$0xff]  }
 0x3fa   :  { %v15676_v43 = vpop.eup %15675  ;;  %v3035_v44 = vmul.f32 %v15674_v39, %v15670_v33  ;;  %v17016_v33 = vld [vmem:[#allocation6 + $0xc] ss:$16 sps:$4 sm:$0xff]  }
 0x3fb   :  { %15679 = vrcp.f32 %v3039_v41  ;;  %v3045_v45 = vadd.f32 1.0, %v15676_v43  ;;  %v15678_v49 = vpop.eup %15677  ;;  %v17028_v39 = vld [vmem:[#allocation8 + $0xec] ss:$16 sps:$4 sm:$0xff]  }
 0x3fc   :  { %15681 = vtanh.f32 %v3007_v36  ;;  %3063 = vst [vmem:[#allocation3 + $0x18] sm:$0x30] %v3035_v44  ;;  %v3069_v46 = vpack.c.bf16 %v3035_v44, %v3035_v44  ;;  %v17026_v36 = vld [vmem:[#allocation8 + $0xe4] ss:$16 sps:$4 sm:$0xff]  }
 0x3fd   :  { %15683 = vrcp.f32 %v3045_v45  ;;  %v3065_v45 = vld [vmem:[#allocation2 + $0x30] sm:$0xc0] }
 0x3fe   :  { %v3103_v47 = vrot.slane %v3069_v46, 2 }
 0x400   :  { %3298 = vmatmul.mubr.bf16.vlgmr.msra.gmra.mxu0 %v3103_v47  ;;  %3339 = vmatmul.mubr.bf16.vlgmr.msra.gmra.mxu1 %v3103_v47 }
 0x401   :  { %3564 = vmatpush1.bf16.msra.mxu0 %v16756_v19  ;;  %3605 = vmatpush1.bf16.msra.mxu1 %v16758_v11  ;;  %v3056_v11 = vrot.slane %v16803_v14, 2  ;;  %v18790_v14 = vld [vmem:[#allocation26_spill] sm:$0xff] }
 0x402   :  { %3565 = vmatprep.subr.bf16.mxu0 %v16760_v60  ;;  %3606 = vmatprep.subr.bf16.mxu1 %v16762_v55  ;;  %v3052_v55 = vadd.f32 1.0, %v15678_v49 }
 0x403   :  { %3595 = vmatprep.mubr.bf16.mxu0 %v18781_v63  ;;  %3636 = vmatprep.mubr.bf16.mxu1 %v18781_v63 }
 0x404   :  { %15685 = vrcp.f32 %v3052_v55 }
 0x405   :  { %3566 = vmatpush1.bf16.msra.mxu0 %v16766_v61  ;;  %3607 = vmatpush1.bf16.msra.mxu1 %v16768_v20 }
 0x406   :  { %3567 = vmatprep.subr.bf16.mxu0 %v16772_v57  ;;  %3608 = vmatprep.subr.bf16.mxu1 %v16774_v62  ;;  %v18791_v62 = vld [vmem:[#allocation27_spill] sm:$0xff] }
 0x408   :  { %v15680_v19 = vpop.eup %15679 }
 0x409   :  { %v15682_v48 = vpop.eup %15681  ;;  %3568 = vmatpush1.bf16.msra.mxu0 %v16780_v1  ;;  %3609 = vmatpush1.bf16.msra.mxu1 %v16782_v56  ;;  %v18792_v1 = vld [vmem:[#allocation28_spill] sm:$0xff]  ;;  %v18793_v56 = vld [vmem:[#allocation29_spill] sm:$0xff] }
 0x40a   :  { %v15684_v60 = vpop.eup %15683  ;;  %3569 = vmatprep.subr.bf16.mxu0 %v16786_v9  ;;  %3610 = vmatprep.subr.bf16.mxu1 %v16788_v53  ;;  %v3059_v61 = vmul.f32 %v15682_v48, %v15680_v19  ;;  %v18794_v9 = vld [vmem:[#allocation30_spill] sm:$0xff]  ;;  %v18795_v53 = vld [vmem:[#allocation31_spill] sm:$0xff] }
 0x40b   :  { %v3058_v20 = vmul.f32 %v15684_v60, %v3056_v11  ;;  %v3066_v48 = vld [vmem:[#allocation2] sm:$0xc0] }
 0x40d   :  { %v16907_v57 = vadd.f32 %v3059_v61, %v3058_v20  ;;  %3570 = vmatpush1.bf16.msra.mxu0 %v16793_v17  ;;  %3611 = vmatpush1.bf16.msra.mxu1 %v16795_v3  ;;  %v18796_v17 = vld [vmem:[#allocation32_spill] sm:$0xff]  ;;  %v18797_v3 = vld [vmem:[#allocation33_spill] sm:$0xff] }
 0x40e   :  { %3571 = vmatprep.subr.bf16.mxu0 %v16799_v10  ;;  %3612 = vmatprep.subr.bf16.mxu1 %v16801_v0 }
 0x40f   :  { %15687 = vtanh.f32 %v16907_v57 }
 0x411   :  { %3572 = vmatpush1.bf16.msra.mxu0 %v16807_v18  ;;  %3613 = vmatpush1.bf16.msra.mxu1 %v16809_v13  ;;  %v15686_v13 = vpop.eup %15685 }
 0x412   :  { %3573 = vmatprep.subr.bf16.mxu0 %v18790_v14  ;;  %3614 = vmatprep.subr.bf16.mxu1 %v18791_v62 }
 0x415   :  { %3574 = vmatpush1.bf16.msra.mxu0 %v18792_v1  ;;  %3615 = vmatpush1.bf16.msra.mxu1 %v18793_v56  ;;  %v3068_v56 = vld [vmem:[#allocation2 + $0x18] sm:$0xc0] }
 0x416   :  { %3575 = vmatprep.subr.bf16.mxu0 %v18794_v9  ;;  %3616 = vmatprep.subr.bf16.mxu1 %v18795_v53 }
 0x419   :  { %3576 = vmatpush1.bf16.msra.mxu0 %v18796_v17  ;;  %3617 = vmatpush1.bf16.msra.mxu1 %v18797_v3  ;;  %v3067_v3 = vld [vmem:[#allocation2 + $0x58] sm:$0xc0] }
 0x41a   :  { %3577 = vmatprep.subr.bf16.mxu0 %v16838_v54  ;;  %3618 = vmatprep.subr.bf16.mxu1 %v16840_v2  ;;  %v16932_v54 = vld [vmem:[#allocation6 + $0xec] ss:$16 sps:$4 sm:$0xff]   ;;  %v16934_v2 = vld [vmem:[#allocation6 + $0xe0] ss:$16 sps:$4 sm:$0xff]  }
 0x41c   :  { %v15688_v18 = vpop.eup %15687 }
 0x41d   :  { %3578 = vmatpush1.bf16.msra.mxu0 %v16844_v16  ;;  %3619 = vmatpush1.bf16.msra.mxu1 %v16846_v40  ;;  %v3062_v10 = vmul.f32 %v15688_v18, %v15686_v13  ;;  %v16942_v16 = vld [vmem:[#allocation6 + $0xc4] ss:$16 sps:$4 sm:$0xff]   ;;  %v16944_v40 = vld [vmem:[#allocation6 + $0xcc] ss:$16 sps:$4 sm:$0xff]  }
 0x41e   :  { %3905 = vmatprep.subr.bf16.mxu0 %v16930_v51  ;;  %3946 = vmatprep.subr.bf16.mxu1 %v16932_v54 }
 0x41f   :  { %3064 = vst [vmem:[#allocation3] sm:$0xc] %v3062_v10  ;;  %v3367_v0 = vpack.c.bf16 %v3062_v10, %v3062_v10 }
 0x421   :  { %v3401_v50 = vrot.slane %v3367_v0, 1 }
 0x423   :  { %3596 = vmatmul.mubr.bf16.vlgmr.msra.gmra.mxu0 %v3401_v50  ;;  %3637 = vmatmul.mubr.bf16.vlgmr.msra.gmra.mxu1 %v3401_v50 }
 0x424   :  { %3937 = vmatprep.mubr.bf16.mxu0 %v18781_v63  ;;  %3978 = vmatprep.mubr.bf16.mxu1 %v18781_v63 }
 0x425   :  { %3906 = vmatpush1.bf16.msra.mxu0 %v16934_v2  ;;  %3947 = vmatpush1.bf16.msra.mxu1 %v16936_v58 }
 0x426   :  { %3907 = vmatprep.subr.bf16.mxu0 %v16942_v16  ;;  %3948 = vmatprep.subr.bf16.mxu1 %v16944_v40 }
 0x429   :  { %3908 = vmatpush1.bf16.msra.mxu0 %v16946_v59  ;;  %3949 = vmatpush1.bf16.msra.mxu1 %v16948_v15 }
 0x42a   :  { %3909 = vmatprep.subr.bf16.mxu0 %v16954_v37  ;;  %3950 = vmatprep.subr.bf16.mxu1 %v16956_v42 }
 0x42d   :  { %3910 = vmatpush1.bf16.msra.mxu0 %v16958_v38  ;;  %3951 = vmatpush1.bf16.msra.mxu1 %v16960_v4 }
 0x42e   :  { %3911 = vmatprep.subr.bf16.mxu0 %v16966_v5  ;;  %3952 = vmatprep.subr.bf16.mxu1 %v16968_v6 }
 0x431   :  { %3912 = vmatpush1.bf16.msra.mxu0 %v16970_v7  ;;  %3953 = vmatpush1.bf16.msra.mxu1 %v16972_v21 }
 0x432   :  { %3913 = vmatprep.subr.bf16.mxu0 %v16978_v8  ;;  %3954 = vmatprep.subr.bf16.mxu1 %v16980_v22 }
 0x435   :  { %3914 = vmatpush1.bf16.msra.mxu0 %v16982_v23  ;;  %3955 = vmatpush1.bf16.msra.mxu1 %v16984_v24 }
 0x436   :  { %3915 = vmatprep.subr.bf16.mxu0 %v16990_v25  ;;  %3956 = vmatprep.subr.bf16.mxu1 %v16992_v26 }
 0x439   :  { %3916 = vmatpush1.bf16.msra.mxu0 %v16994_v27  ;;  %3957 = vmatpush1.bf16.msra.mxu1 %v16996_v52 }
 0x43a   :  { %3917 = vmatprep.subr.bf16.mxu0 %v17002_v28  ;;  %3958 = vmatprep.subr.bf16.mxu1 %v17004_v29 }
 0x43d   :  { %3918 = vmatpush1.bf16.msra.mxu0 %v17006_v30  ;;  %3959 = vmatpush1.bf16.msra.mxu1 %v17008_v31 }
 0x43e   :  { %3919 = vmatprep.subr.bf16.mxu0 %v17014_v32  ;;  %3960 = vmatprep.subr.bf16.mxu1 %v17016_v33 }
 0x441   :  { %3920 = vmatpush1.bf16.msra.mxu0 %v17018_v34  ;;  %3961 = vmatpush1.bf16.msra.mxu1 %v17020_v35 }
 0x442   :  { %4188 = vmatprep.subr.bf16.mxu0 %v17026_v36  ;;  %4229 = vmatprep.subr.bf16.mxu1 %v17028_v39 }
 0x4c0   :  { %v3299_v41 = vpop.f32.mrf.mxu0  ;;  %v3340_v43 = vpop.f32.mrf.mxu1 }
 0x4c1   :  { %v3351_v44 = vrot.slane %v3299_v41, 2  ;;  %v3353_v53 = vrot.slane %v3340_v43, 2  ;;  %v3669_v43 = vrot.slane %v16889_v12, 6  ;;  %v3366_v12 = vld [vmem:[#allocation2 + $0x28] sm:$0x3] }
 0x4c2   :  { %v3301_v46 = vpop.f32.mrf.mxu0  ;;  %v3342_v47 = vpop.f32.mrf.mxu1 }
 0x4c3   :  { %v3359_v49 = vadd.f32 %v3351_v44, %v3065_v45  ;;  %v3352_v19 = vrot.slane %v3301_v46, 2  ;;  %v3354_v1 = vrot.slane %v3342_v47, 2  ;;  %v3361_v18 = vadd.f32 %v3353_v53, %v3067_v3  ;;  %v3363_v44 = vld [vmem:[#allocation2 + $0x60] sm:$0x3] }
 0x4c4   :  { %v3303_v11 = vpop.f32.mrf.mxu0  ;;  %v3344_v60 = vpop.f32.mrf.mxu1 }
 0x4c5   :  { %v13597_v55 = vmul.f32 -1.442695, %v3359_v49  ;;  %v3360_v61 = vadd.f32 %v3352_v19, %v3066_v48  ;;  %v3362_v9 = vadd.f32 %v3354_v1, %v3068_v56  ;;  %v3364_v48 = vld [vmem:[#allocation2 + $0x70] sm:$0x3] }
 0x4c6   :  { %v3304_v20 = vpop.f32.mrf.mxu0  ;;  %v3345_v14 = vpop.f32.mrf.mxu1 }
 0x4c7   :  { %15689 = vpow2.f32 %v13597_v55  ;;  %v13598_v62 = vmul.f32 -1.442695, %v3360_v61  ;;  %v13599_v17 = vmul.f32 -1.442695, %v3362_v9 }
 0x4c9   :  { %15691 = vpow2.f32 %v13598_v62 }
 0x4ca   :  { %15693 = vpow2.f32 %v13599_v17 }
 0x4d4   :  { %v15690_v13 = vpop.eup %15689 }
 0x4d5   :  { %v3652_v10 = vadd.f32 1.0, %v15690_v13 }
 0x4d6   :  { %v15692_v0 = vpop.eup %15691 }
 0x4d7   :  { %15695 = vrcp.f32 %v3652_v10  ;;  %v3658_v50 = vadd.f32 1.0, %v15692_v0  ;;  %v15694_v41 = vpop.eup %15693  ;;  %v3365_v0 = vld [vmem:[#allocation2 + $0x78] sm:$0x3] }
 0x4d8   :  { %15697 = vtanh.f32 %v3361_v18  ;;  %v3665_v1 = vadd.f32 1.0, %v15694_v41 }
 0x4d9   :  { %15699 = vrcp.f32 %v3658_v50 }
 0x4e3   :  { %v3597_v45 = vpop.f32.mrf.mxu0  ;;  %v3638_v46 = vpop.f32.mrf.mxu1 }
 0x4e4   :  { %v15696_v49 = vpop.eup %15695  ;;  %v3645_v47 = vadd.f32 %v3597_v45, %v3363_v44  ;;  %v3647_v44 = vadd.f32 %v3638_v46, %v3365_v0  ;;  %v17042_v46 = vld [vmem:[#allocation8 + $0xcc] ss:$16 sps:$4 sm:$0xff]  }
 0x4e5   :  { %v15698_v19 = vpop.eup %15697  ;;  %v3599_v11 = vpop.f32.mrf.mxu0 }
 0x4e6   :  { %v3640_v60 = vpop.f32.mrf.mxu1  ;;  %v15700_v55 = vpop.eup %15699  ;;  %v13600_v61 = vmul.f32 -1.442695, %v3645_v47  ;;  %v3646_v20 = vadd.f32 %v3599_v11, %v3364_v48  ;;  %v3672_v14 = vmul.f32 %v15698_v19, %v15696_v49  ;;  %v17036_v11 = vld [vmem:[#allocation8 + $0xe0] ss:$16 sps:$4 sm:$0xff]  }
 0x4e7   :  { %v3671_v62 = vmul.f32 %v15700_v55, %v3669_v43  ;;  %v3601_v56 = vpop.f32.mrf.mxu0  ;;  %v3648_v18 = vadd.f32 %v3640_v60, %v3366_v12  ;;  %v17038_v55 = vld [vmem:[#allocation8 + $0xe8] ss:$16 sps:$4 sm:$0xff]   ;;  %v3696_v12 = vrot.slane %v16907_v57, 2 }
 0x4e8   :  { %v3642_v9 = vpop.f32.mrf.mxu1  ;;  %15701 = vpow2.f32 %v13600_v61  ;;  %v13601_v53 = vmul.f32 -1.442695, %v3646_v20  ;;  %v17040_v61 = vld [vmem:[#allocation8 + $0xc4] ss:$16 sps:$4 sm:$0xff]   ;;  %v17046_v20 = vld [vmem:[#allocation8 + $0xc0] ss:$16 sps:$4 sm:$0xff]  }
 0x4e9   :  { %v17033_v17 = vadd.f32 %v3672_v14, %v3671_v62  ;;  %v3602_v3 = vpop.f32.mrf.mxu0  ;;  %v13602_v10 = vmul.f32 -1.442695, %v3648_v18  ;;  %v17048_v14 = vld [vmem:[#allocation8 + $0xc8] ss:$16 sps:$4 sm:$0xff]   ;;  %v17052_v62 = vld [vmem:[#allocation8 + $0xa4] ss:$16 sps:$4 sm:$0xff]  }
 0x4ea   :  { %v3643_v13 = vpop.f32.mrf.mxu1  ;;  %15703 = vpow2.f32 %v13601_v53  ;;  %v17060_v53 = vld [vmem:[#allocation8 + $0xa0] ss:$16 sps:$4 sm:$0xff]   ;;  %v17062_v3 = vld [vmem:[#allocation8 + $0xa8] ss:$16 sps:$4 sm:$0xff]   ;;  %v17067_v18 = vld [vmem:[#allocation8 + $0x84] ss:$16 sps:$4 sm:$0xff]  }
 0x4eb   :  { %15705 = vrcp.f32 %v3665_v1  ;;  %v17054_v1 = vld [vmem:[#allocation8 + $0xac] ss:$16 sps:$4 sm:$0xff]  }
 0x4ec   :  { %15707 = vtanh.f32 %v17033_v17 }
 0x4ed   :  { %15709 = vpow2.f32 %v13602_v10  ;;  %v17069_v10 = vld [vmem:[#allocation8 + $0x8c] ss:$16 sps:$4 sm:$0xff]  }
 0x4f5   :  { %v15702_v50 = vpop.eup %15701 }
 0x4f6   :  { %v3679_v45 = vadd.f32 1.0, %v15702_v50 }
 0x4f7   :  { %v15704_v41 = vpop.eup %15703 }
 0x4f8   :  { %v15706_v49 = vpop.eup %15705  ;;  %15711 = vrcp.f32 %v3679_v45  ;;  %v3685_v47 = vadd.f32 1.0, %v15704_v41  ;;  %v17073_v41 = vld [vmem:[#allocation8 + $0x80] ss:$16 sps:$4 sm:$0xff]  }
 0x4f9   :  { %v15708_v19 = vpop.eup %15707  ;;  %15713 = vtanh.f32 %v3647_v44 }
 0x4fa   :  { %15715 = vrcp.f32 %v3685_v47  ;;  %v3675_v43 = vmul.f32 %v15708_v19, %v15706_v49  ;;  %v15710_v56 = vpop.eup %15709  ;;  %v17075_v49 = vld [vmem:[#allocation8 + $0x88] ss:$16 sps:$4 sm:$0xff]   ;;  %v17081_v47 = vld [vmem:[#allocation8 + $0x64] ss:$16 sps:$4 sm:$0xff]   ;;  %v17083_v19 = vld [vmem:[#allocation8 + $0x6c] ss:$16 sps:$4 sm:$0xff]  }
 0x4fb   :  { %v3692_v50 = vadd.f32 1.0, %v15710_v56  ;;  %v17096_v56 = vld [vmem:[#allocation8 + $0x4c] ss:$16 sps:$4 sm:$0xff]  }
 0x4fc   :  { %3703 = vst [vmem:[#allocation3 + $0x18] sm:$0xc0] %v3675_v43  ;;  %v3709_v48 = vpack.c.bf16 %v3675_v43, %v3675_v43  ;;  %v17088_v43 = vld [vmem:[#allocation8 + $0x60] ss:$16 sps:$4 sm:$0xff]   ;;  %18800 = vst [vmem:[#allocation28_spill] sm:$0xff] %v17096_v56 }
 0x4fd   :  { %15717 = vrcp.f32 %v3692_v50  ;;  %v17112_v50 = vld [vmem:[#allocation8 + $0x20] ss:$16 sps:$4 sm:$0xff]  }
 0x4fe   :  { %v3743_v60 = vrot.slane %v3709_v48, 3  ;;  %v17090_v48 = vld [vmem:[#allocation8 + $0x68] ss:$16 sps:$4 sm:$0xff]  }
 0x4ff   :  { %18798 = vst [vmem:[#allocation26_spill] sm:$0xff] %v17090_v48 }
 0x500   :  { %3938 = vmatmul.mubr.bf16.vlgmr.msra.gmra.mxu0 %v3743_v60  ;;  %3979 = vmatmul.mubr.bf16.vlgmr.msra.gmra.mxu1 %v3743_v60  ;;  %v17094_v60 = vld [vmem:[#allocation8 + $0x44] ss:$16 sps:$4 sm:$0xff]  }
 0x501   :  { %4189 = vmatpush1.bf16.msra.mxu0 %v17036_v11  ;;  %4230 = vmatpush1.bf16.msra.mxu1 %v17038_v55  ;;  %18799 = vst [vmem:[#allocation27_spill] sm:$0xff] %v17094_v60 }
 0x502   :  { %4190 = vmatprep.subr.bf16.mxu0 %v17040_v61  ;;  %4231 = vmatprep.subr.bf16.mxu1 %v17042_v46 }
 0x503   :  { %4220 = vmatprep.mubr.bf16.mxu0 %v18781_v63  ;;  %4261 = vmatprep.mubr.bf16.mxu1 %v18781_v63 }
 0x505   :  { %v15712_v9 = vpop.eup %15711  ;;  %4191 = vmatpush1.bf16.msra.mxu0 %v17046_v20  ;;  %4232 = vmatpush1.bf16.msra.mxu1 %v17048_v14 }
 0x506   :  { %v15714_v13 = vpop.eup %15713  ;;  %4192 = vmatprep.subr.bf16.mxu0 %v17052_v62  ;;  %4233 = vmatprep.subr.bf16.mxu1 %v17054_v1 }
 0x507   :  { %v15716_v0 = vpop.eup %15715  ;;  %v3699_v44 = vmul.f32 %v15714_v13, %v15712_v9  ;;  %v17100_v9 = vld [vmem:[#allocation8 + $0x40] ss:$16 sps:$4 sm:$0xff]   ;;  %v17102_v13 = vld [vmem:[#allocation8 + $0x48] ss:$16 sps:$4 sm:$0xff]  }
 0x508   :  { %v3698_v45 = vmul.f32 %v15716_v0, %v3696_v12  ;;  %18801 = vst [vmem:[#allocation29_spill] sm:$0xff] %v17100_v9  ;;  %18802 = vst [vmem:[#allocation30_spill] sm:$0xff] %v17102_v13  ;;  %v17106_v12 = vld [vmem:[#allocation8 + $0x24] ss:$16 sps:$4 sm:$0xff]   ;;  %v17108_v0 = vld [vmem:[#allocation8 + $0x2c] ss:$16 sps:$4 sm:$0xff]  }
 0x509   :  { %4193 = vmatpush1.bf16.msra.mxu0 %v17060_v53  ;;  %4234 = vmatpush1.bf16.msra.mxu1 %v17062_v3  ;;  %18803 = vst [vmem:[#allocation31_spill] sm:$0xff] %v17106_v12  ;;  %18804 = vst [vmem:[#allocation32_spill] sm:$0xff] %v17108_v0 }
 0x50a   :  { %v17077_v57 = vadd.f32 %v3699_v44, %v3698_v45  ;;  %4194 = vmatprep.subr.bf16.mxu0 %v17067_v18  ;;  %4235 = vmatprep.subr.bf16.mxu1 %v17069_v10  ;;  %v17114_v44 = vld [vmem:[#allocation8 + $0x28] ss:$16 sps:$4 sm:$0xff]   ;;  %v17118_v45 = vld [vmem:[#allocation8 + $0x4] ss:$16 sps:$4 sm:$0xff]  }
 0x50c   :  { %15719 = vtanh.f32 %v17077_v57 }
 0x50d   :  { %4195 = vmatpush1.bf16.msra.mxu0 %v17073_v41  ;;  %4236 = vmatpush1.bf16.msra.mxu1 %v17075_v49 }
 0x50e   :  { %4196 = vmatprep.subr.bf16.mxu0 %v17081_v47  ;;  %4237 = vmatprep.subr.bf16.mxu1 %v17083_v19 }
 0x511   :  { %4197 = vmatpush1.bf16.msra.mxu0 %v17088_v43  ;;  %4238 = vmatpush1.bf16.msra.mxu1 %v17090_v48 }
 0x512   :  { %4198 = vmatprep.subr.bf16.mxu0 %v17094_v60  ;;  %4239 = vmatprep.subr.bf16.mxu1 %v17096_v56  ;;  %v17120_v60 = vld [vmem:[#allocation8 + $0xc] ss:$16 sps:$4 sm:$0xff]   ;;  %v15718_v56 = vpop.eup %15717 }
 0x515   :  { %4199 = vmatpush1.bf16.msra.mxu0 %v17100_v9  ;;  %4240 = vmatpush1.bf16.msra.mxu1 %v17102_v13  ;;  %v17124_v9 = vld [vmem:[#allocation8] ss:$16 sps:$4 sm:$0xff]   ;;  %v17126_v13 = vld [vmem:[#allocation8 + $0x8] ss:$16 sps:$4 sm:$0xff]  }
 0x516   :  { %4200 = vmatprep.subr.bf16.mxu0 %v17106_v12  ;;  %4241 = vmatprep.subr.bf16.mxu1 %v17108_v0 }
 0x519   :  { %v15720_v48 = vpop.eup %15719  ;;  %4201 = vmatpush1.bf16.msra.mxu0 %v17112_v50  ;;  %4242 = vmatpush1.bf16.msra.mxu1 %v17114_v44 }
 0x51a   :  { %4202 = vmatprep.subr.bf16.mxu0 %v17118_v45  ;;  %4243 = vmatprep.subr.bf16.mxu1 %v17120_v60  ;;  %v3702_v12 = vmul.f32 %v15720_v48, %v15718_v56 }
 0x51c   :  { %3704 = vst [vmem:[#allocation3] sm:$0x3] %v3702_v12  ;;  %v3995_v0 = vpack.c.bf16 %v3702_v12, %v3702_v12  ;;  %v3992_v12 = vld [vmem:[#allocation2 + $0x68] sm:$0xc0] }
 0x51d   :  { %4203 = vmatpush1.bf16.msra.mxu0 %v17124_v9  ;;  %4244 = vmatpush1.bf16.msra.mxu1 %v17126_v13 }
 0x51e   :  { %4539 = vmatprep.subr.bf16.mxu0 %v16930_v51  ;;  %4580 = vmatprep.subr.bf16.mxu1 %v16932_v54  ;;  %v3705_v51 = vld [vmem:[#allocation2 + $0x40] sm:$0x3] }
 0x520   :  { %4221 = vmatmul.mubr.bf16.vlgmr.msra.gmra.mxu0 %v3995_v0  ;;  %4262 = vmatmul.mubr.bf16.vlgmr.msra.gmra.mxu1 %v3995_v0 }
 0x521   :  { %4540 = vmatpush1.bf16.msra.mxu0 %v16934_v2  ;;  %4581 = vmatpush1.bf16.msra.mxu1 %v16936_v58 }
 0x522   :  { %4541 = vmatprep.subr.bf16.mxu0 %v16942_v16  ;;  %4582 = vmatprep.subr.bf16.mxu1 %v16944_v40  ;;  %v3706_v16 = vld [vmem:[#allocation2 + $0x20] sm:$0x3] }
 0x523   :  { %4571 = vmatprep.mubr.bf16.mxu0 %v18781_v63  ;;  %4612 = vmatprep.mubr.bf16.mxu1 %v18781_v63 }
 0x525   :  { %4542 = vmatpush1.bf16.msra.mxu0 %v16946_v59  ;;  %4583 = vmatpush1.bf16.msra.mxu1 %v16948_v15 }
 0x526   :  { %4543 = vmatprep.subr.bf16.mxu0 %v16954_v37  ;;  %4584 = vmatprep.subr.bf16.mxu1 %v16956_v42 }
 0x529   :  { %4544 = vmatpush1.bf16.msra.mxu0 %v16958_v38  ;;  %4585 = vmatpush1.bf16.msra.mxu1 %v16960_v4 }
 0x52a   :  { %4545 = vmatprep.subr.bf16.mxu0 %v16966_v5  ;;  %4586 = vmatprep.subr.bf16.mxu1 %v16968_v6 }
 0x52d   :  { %4546 = vmatpush1.bf16.msra.mxu0 %v16970_v7  ;;  %4587 = vmatpush1.bf16.msra.mxu1 %v16972_v21  ;;  %v3708_v7 = vld [vmem:[#allocation2 + $0x38] sm:$0x3] }
 0x52e   :  { %4547 = vmatprep.subr.bf16.mxu0 %v16978_v8  ;;  %4588 = vmatprep.subr.bf16.mxu1 %v16980_v22  ;;  %v3707_v8 = vld [vmem:[#allocation2 + $0x10] sm:$0x3] }
 0x531   :  { %4548 = vmatpush1.bf16.msra.mxu0 %v16982_v23  ;;  %4589 = vmatpush1.bf16.msra.mxu1 %v16984_v24 }
 0x532   :  { %4549 = vmatprep.subr.bf16.mxu0 %v16990_v25  ;;  %4590 = vmatprep.subr.bf16.mxu1 %v16992_v26 }
 0x535   :  { %4550 = vmatpush1.bf16.msra.mxu0 %v16994_v27  ;;  %4591 = vmatpush1.bf16.msra.mxu1 %v16996_v52 }
 0x536   :  { %4551 = vmatprep.subr.bf16.mxu0 %v17002_v28  ;;  %4592 = vmatprep.subr.bf16.mxu1 %v17004_v29 }
 0x539   :  { %4552 = vmatpush1.bf16.msra.mxu0 %v17006_v30  ;;  %4593 = vmatpush1.bf16.msra.mxu1 %v17008_v31 }
 0x53a   :  { %4553 = vmatprep.subr.bf16.mxu0 %v17014_v32  ;;  %4594 = vmatprep.subr.bf16.mxu1 %v17016_v33  ;;  %v3991_v32 = vld [vmem:[#allocation2 + $0x50] sm:$0xc0] }
 0x53d   :  { %4554 = vmatpush1.bf16.msra.mxu0 %v17018_v34  ;;  %4595 = vmatpush1.bf16.msra.mxu1 %v17020_v35 }
 0x53e   :  { %4837 = vmatprep.subr.bf16.mxu0 %v17026_v36  ;;  %4878 = vmatprep.subr.bf16.mxu1 %v17028_v39  ;;  %v4306_v36 = vrot.slane %v17033_v17, 6 }
 0x5c0   :  { %v3939_v54 = vpop.f32.mrf.mxu0  ;;  %v3980_v2 = vpop.f32.mrf.mxu1 }
 0x5c1   :  { %v3987_v58 = vadd.f32 %v3939_v54, %v3705_v51  ;;  %v3989_v22 = vadd.f32 %v3980_v2, %v3707_v8 }
 0x5c2   :  { %v3941_v40 = vpop.f32.mrf.mxu0  ;;  %v3982_v59 = vpop.f32.mrf.mxu1 }
 0x5c3   :  { %v13667_v15 = vmul.f32 -1.442695, %v3987_v58  ;;  %v3988_v37 = vadd.f32 %v3941_v40, %v3706_v16  ;;  %v3990_v21 = vadd.f32 %v3982_v59, %v3708_v7  ;;  %v3993_v7 = vld [vmem:[#allocation2 + $0x8] sm:$0xc0] }
 0x5c4   :  { %v3943_v42 = vpop.f32.mrf.mxu0  ;;  %v3984_v38 = vpop.f32.mrf.mxu1 }
 0x5c5   :  { %15721 = vpow2.f32 %v13667_v15  ;;  %v13668_v4 = vmul.f32 -1.442695, %v3988_v37  ;;  %v13669_v24 = vmul.f32 -1.442695, %v3990_v21  ;;  %v3994_v38 = vld [vmem:[#allocation2 + $0x48] sm:$0xc0] }
 0x5c6   :  { %v3944_v5 = vpop.f32.mrf.mxu0  ;;  %v3985_v6 = vpop.f32.mrf.mxu1 }
 0x5c7   :  { %15723 = vpow2.f32 %v13668_v4 }
 0x5c8   :  { %15725 = vtanh.f32 %v3989_v22 }
 0x5d2   :  { %v15722_v23 = vpop.eup %15721 }
 0x5d3   :  { %v4289_v25 = vadd.f32 1.0, %v15722_v23 }
 0x5d4   :  { %v15724_v26 = vpop.eup %15723 }
 0x5d5   :  { %15727 = vrcp.f32 %v4289_v25  ;;  %v4295_v27 = vadd.f32 1.0, %v15724_v26  ;;  %v15726_v29 = vpop.eup %15725 }
 0x5d6   :  { %15729 = vpow2.f32 %v13669_v24 }
 0x5d7   :  { %15731 = vrcp.f32 %v4295_v27 }
 0x5e0   :  { %v4222_v52 = vpop.f32.mrf.mxu0  ;;  %v4263_v28 = vpop.f32.mrf.mxu1 }
 0x5e1   :  { %v4274_v30 = vrot.slane %v4222_v52, 2  ;;  %v4276_v5 = vrot.slane %v4263_v28, 2 }
 0x5e2   :  { %v15728_v31 = vpop.eup %15727  ;;  %v4224_v33 = vpop.f32.mrf.mxu0 }
 0x5e3   :  { %v4265_v34 = vpop.f32.mrf.mxu1  ;;  %v15730_v35 = vpop.eup %15729  ;;  %v4282_v39 = vadd.f32 %v4274_v30, %v3991_v32  ;;  %v4275_v48 = vrot.slane %v4224_v33, 2  ;;  %v4309_v54 = vmul.f32 %v15728_v31, %v15726_v29  ;;  %v4284_v8 = vadd.f32 %v4276_v5, %v3993_v7  ;;  %v17228_v32 = vld [vmem:[#allocation6 + $0xc8] ss:$16 sps:$4 sm:$0xff]   ;;  %v17234_v33 = vld [vmem:[#allocation6 + $0xa4] ss:$16 sps:$4 sm:$0xff]  }
 0x5e4   :  { %v15732_v56 = vpop.eup %15731  ;;  %v4226_v0 = vpop.f32.mrf.mxu0  ;;  %v4302_v40 = vadd.f32 1.0, %v15730_v35  ;;  %v4277_v17 = vrot.slane %v4265_v34, 2  ;;  %v17236_v34 = vld [vmem:[#allocation6 + $0xac] ss:$16 sps:$4 sm:$0xff]   ;;  %v17238_v35 = vld [vmem:[#allocation6 + $0xa0] ss:$16 sps:$4 sm:$0xff]  }
 0x5e5   :  { %v4267_v51 = vpop.f32.mrf.mxu1  ;;  %v4308_v2 = vmul.f32 %v15732_v56, %v4306_v36  ;;  %v13670_v58 = vmul.f32 -1.442695, %v4282_v39  ;;  %v4283_v16 = vadd.f32 %v4275_v48, %v3992_v12  ;;  %v17240_v36 = vld [vmem:[#allocation6 + $0xa8] ss:$16 sps:$4 sm:$0xff]   ;;  %v17246_v39 = vld [vmem:[#allocation6 + $0x84] ss:$16 sps:$4 sm:$0xff]  }
 0x5e6   :  { %v4227_v59 = vpop.f32.mrf.mxu0  ;;  %v4285_v4 = vadd.f32 %v4277_v17, %v3994_v38  ;;  %v17248_v48 = vld [vmem:[#allocation6 + $0x8c] ss:$16 sps:$4 sm:$0xff]   ;;  %v17250_v56 = vld [vmem:[#allocation6 + $0x80] ss:$16 sps:$4 sm:$0xff]   ;;  %v17252_v12 = vld [vmem:[#allocation6 + $0x88] ss:$16 sps:$4 sm:$0xff]  }
 0x5e7   :  { %v4268_v15 = vpop.f32.mrf.mxu1  ;;  %v17169_v37 = vadd.f32 %v4309_v54, %v4308_v2  ;;  %15733 = vpow2.f32 %v13670_v58  ;;  %v13671_v42 = vmul.f32 -1.442695, %v4283_v16  ;;  %v17258_v0 = vld [vmem:[#allocation6 + $0x64] ss:$16 sps:$4 sm:$0xff]   ;;  %v17260_v51 = vld [vmem:[#allocation6 + $0x6c] ss:$16 sps:$4 sm:$0xff]  }
 0x5e8   :  { %v13672_v6 = vmul.f32 -1.442695, %v4285_v4  ;;  %v17262_v54 = vld [vmem:[#allocation6 + $0x60] ss:$16 sps:$4 sm:$0xff]   ;;  %v17264_v2 = vld [vmem:[#allocation6 + $0x68] ss:$16 sps:$4 sm:$0xff]  }
 0x5e9   :  { %15735 = vpow2.f32 %v13671_v42  ;;  %v17270_v58 = vld [vmem:[#allocation6 + $0x44] ss:$16 sps:$4 sm:$0xff]   ;;  %v17272_v16 = vld [vmem:[#allocation6 + $0x4c] ss:$16 sps:$4 sm:$0xff]   ;;  %v17276_v59 = vld [vmem:[#allocation6 + $0x48] ss:$16 sps:$4 sm:$0xff]  }
 0x5ea   :  { %15737 = vrcp.f32 %v4302_v40  ;;  %v17274_v40 = vld [vmem:[#allocation6 + $0x40] ss:$16 sps:$4 sm:$0xff]   ;;  %v17282_v15 = vld [vmem:[#allocation6 + $0x24] ss:$16 sps:$4 sm:$0xff]   ;;  %v17284_v42 = vld [vmem:[#allocation6 + $0x2c] ss:$16 sps:$4 sm:$0xff]  }
 0x5eb   :  { %15739 = vtanh.f32 %v17169_v37  ;;  %v17286_v17 = vld [vmem:[#allocation6 + $0x20] ss:$16 sps:$4 sm:$0xff]   ;;  %v17288_v38 = vld [vmem:[#allocation6 + $0x28] ss:$16 sps:$4 sm:$0xff]   ;;  %v17294_v4 = vld [vmem:[#allocation6 + $0x4] ss:$16 sps:$4 sm:$0xff]  }
 0x5ec   :  { %15741 = vpow2.f32 %v13672_v6  ;;  %v17296_v5 = vld [vmem:[#allocation6 + $0xc] ss:$16 sps:$4 sm:$0xff]   ;;  %v17298_v6 = vld [vmem:[#allocation6] ss:$16 sps:$4 sm:$0xff]   ;;  %v17300_v7 = vld [vmem:[#allocation6 + $0x8] ss:$16 sps:$4 sm:$0xff]  }
 0x5f4   :  { %v15734_v21 = vpop.eup %15733 }
 0x5f5   :  { %v4316_v22 = vadd.f32 1.0, %v15734_v21  ;;  %v17306_v21 = vld [vmem:[#allocation8 + $0xe4] ss:$16 sps:$4 sm:$0xff]  }
 0x5f6   :  { %v15736_v23 = vpop.eup %15735 }
 0x5f7   :  { %v15738_v24 = vpop.eup %15737  ;;  %15743 = vrcp.f32 %v4316_v22  ;;  %v4322_v25 = vadd.f32 1.0, %v15736_v23 }
 0x5f8   :  { %v15740_v26 = vpop.eup %15739  ;;  %15745 = vtanh.f32 %v4284_v8  ;;  %v17308_v8 = vld [vmem:[#allocation8 + $0xec] ss:$16 sps:$4 sm:$0xff]  }
 0x5f9   :  { %15747 = vrcp.f32 %v4322_v25  ;;  %v4312_v27 = vmul.f32 %v15740_v26, %v15738_v24  ;;  %v15742_v28 = vpop.eup %15741  ;;  %v4342_v25 = vld [vmem:[#allocation2 + $0x40] sm:$0xc] }
 0x5fa   :  { %v4329_v30 = vadd.f32 1.0, %v15742_v28 }
 0x5fb   :  { %4340 = vst [vmem:[#allocation3 + $0x10] sm:$0x3] %v4312_v27  ;;  %v4346_v52 = vpack.c.bf16 %v4312_v27, %v4312_v27 }
 0x5fc   :  { %15749 = vrcp.f32 %v4329_v30 }
 0x5fd   :  { %4572 = vmatmul.mubr.bf16.vlgmr.msra.gmra.mxu0 %v4346_v52  ;;  %4613 = vmatmul.mubr.bf16.vlgmr.msra.gmra.mxu1 %v4346_v52 }
 0x5fe   :  { %4838 = vmatpush1.bf16.msra.mxu0 %v17036_v11  ;;  %4879 = vmatpush1.bf16.msra.mxu1 %v17038_v55  ;;  %v4333_v55 = vrot.slane %v17077_v57, 2 }
 0x5ff   :  { %4839 = vmatprep.subr.bf16.mxu0 %v17040_v61  ;;  %4880 = vmatprep.subr.bf16.mxu1 %v17042_v46 }
 0x600   :  { %4869 = vmatprep.mubr.bf16.mxu0 %v18781_v63  ;;  %4910 = vmatprep.mubr.bf16.mxu1 %v18781_v63 }
 0x602   :  { %4840 = vmatpush1.bf16.msra.mxu0 %v17046_v20  ;;  %4881 = vmatpush1.bf16.msra.mxu1 %v17048_v14  ;;  %v18805_v14 = vld [vmem:[#allocation26_spill] sm:$0xff] }
 0x603   :  { %4841 = vmatprep.subr.bf16.mxu0 %v17052_v62  ;;  %4882 = vmatprep.subr.bf16.mxu1 %v17054_v1  ;;  %v18806_v62 = vld [vmem:[#allocation27_spill] sm:$0xff]  ;;  %v18807_v1 = vld [vmem:[#allocation28_spill] sm:$0xff] }
 0x604   :  { %v15744_v11 = vpop.eup %15743 }
 0x605   :  { %v15746_v29 = vpop.eup %15745 }
 0x606   :  { %v15748_v61 = vpop.eup %15747  ;;  %4842 = vmatpush1.bf16.msra.mxu0 %v17060_v53  ;;  %4883 = vmatpush1.bf16.msra.mxu1 %v17062_v3  ;;  %v4336_v46 = vmul.f32 %v15746_v29, %v15744_v11  ;;  %v18808_v53 = vld [vmem:[#allocation29_spill] sm:$0xff]  ;;  %v18809_v3 = vld [vmem:[#allocation30_spill] sm:$0xff]  ;;  %v4343_v11 = vld [vmem:[#allocation2 + $0x20] sm:$0xc] }
 0x607   :  { %v4335_v31 = vmul.f32 %v15748_v61, %v4333_v55  ;;  %4843 = vmatprep.subr.bf16.mxu0 %v17067_v18  ;;  %4884 = vmatprep.subr.bf16.mxu1 %v17069_v10  ;;  %v18810_v18 = vld [vmem:[#allocation31_spill] sm:$0xff]  ;;  %v18811_v10 = vld [vmem:[#allocation32_spill] sm:$0xff] }
 0x609   :  { %v17187_v20 = vadd.f32 %v4336_v46, %v4335_v31 }
 0x60a   :  { %4844 = vmatpush1.bf16.msra.mxu0 %v17073_v41  ;;  %4885 = vmatpush1.bf16.msra.mxu1 %v17075_v49  ;;  %v15750_v41 = vpop.eup %15749 }
 0x60b   :  { %4845 = vmatprep.subr.bf16.mxu0 %v17081_v47  ;;  %4886 = vmatprep.subr.bf16.mxu1 %v17083_v19  ;;  %15751 = vtanh.f32 %v17187_v20 }
 0x60e   :  { %4846 = vmatpush1.bf16.msra.mxu0 %v17088_v43  ;;  %4887 = vmatpush1.bf16.msra.mxu1 %v18805_v14  ;;  %v17210_v43 = vld [vmem:[#allocation6 + $0xe4] ss:$16 sps:$4 sm:$0xff]  }
 0x60f   :  { %4847 = vmatprep.subr.bf16.mxu0 %v18806_v62  ;;  %4888 = vmatprep.subr.bf16.mxu1 %v18807_v1 }
 0x612   :  { %4848 = vmatpush1.bf16.msra.mxu0 %v18808_v53  ;;  %4889 = vmatpush1.bf16.msra.mxu1 %v18809_v3  ;;  %v4345_v53 = vld [vmem:[#allocation2 + $0x38] sm:$0xc] }
 0x613   :  { %4849 = vmatprep.subr.bf16.mxu0 %v18810_v18  ;;  %4890 = vmatprep.subr.bf16.mxu1 %v18811_v10  ;;  %v4344_v18 = vld [vmem:[#allocation2 + $0x10] sm:$0xc] }
 0x616   :  { %4850 = vmatpush1.bf16.msra.mxu0 %v17112_v50  ;;  %4891 = vmatpush1.bf16.msra.mxu1 %v17114_v44  ;;  %v17212_v50 = vld [vmem:[#allocation6 + $0xec] ss:$16 sps:$4 sm:$0xff]   ;;  %v17216_v44 = vld [vmem:[#allocation6 + $0xe8] ss:$16 sps:$4 sm:$0xff]  }
 0x617   :  { %4851 = vmatprep.subr.bf16.mxu0 %v17118_v45  ;;  %4892 = vmatprep.subr.bf16.mxu1 %v17120_v60  ;;  %v17214_v60 = vld [vmem:[#allocation6 + $0xe0] ss:$16 sps:$4 sm:$0xff]  }
 0x618   :  { %v15752_v49 = vpop.eup %15751  ;;  %v17226_v45 = vld [vmem:[#allocation6 + $0xc0] ss:$16 sps:$4 sm:$0xff]  }
 0x619   :  { %v4339_v57 = vmul.f32 %v15752_v49, %v15750_v41 }
 0x61a   :  { %4852 = vmatpush1.bf16.msra.mxu0 %v17124_v9  ;;  %4893 = vmatpush1.bf16.msra.mxu1 %v17126_v13  ;;  %v17222_v9 = vld [vmem:[#allocation6 + $0xc4] ss:$16 sps:$4 sm:$0xff]   ;;  %v17224_v13 = vld [vmem:[#allocation6 + $0xcc] ss:$16 sps:$4 sm:$0xff]  }
 0x61b   :  { %4341 = vst [vmem:[#allocation3 + $0x8] sm:$0xc0] %v4339_v57  ;;  %v4641_v47 = vpack.c.bf16 %v4339_v57, %v4339_v57  ;;  %5191 = vmatprep.subr.bf16.mxu0 %v17210_v43  ;;  %5232 = vmatprep.subr.bf16.mxu1 %v17212_v50 }
 0x61d   :  { %v4675_v19 = vrot.slane %v4641_v47, 3 }
 0x61f   :  { %4870 = vmatmul.mubr.bf16.vlgmr.msra.gmra.mxu0 %v4675_v19  ;;  %4911 = vmatmul.mubr.bf16.vlgmr.msra.gmra.mxu1 %v4675_v19 }
 0x620   :  { %5223 = vmatprep.mubr.bf16.mxu0 %v18781_v63  ;;  %5264 = vmatprep.mubr.bf16.mxu1 %v18781_v63 }
 0x621   :  { %5192 = vmatpush1.bf16.msra.mxu0 %v17214_v60  ;;  %5233 = vmatpush1.bf16.msra.mxu1 %v17216_v44 }
 0x622   :  { %5193 = vmatprep.subr.bf16.mxu0 %v17222_v9  ;;  %5234 = vmatprep.subr.bf16.mxu1 %v17224_v13 }
 0x625   :  { %5194 = vmatpush1.bf16.msra.mxu0 %v17226_v45  ;;  %5235 = vmatpush1.bf16.msra.mxu1 %v17228_v32 }
 0x626   :  { %5195 = vmatprep.subr.bf16.mxu0 %v17234_v33  ;;  %5236 = vmatprep.subr.bf16.mxu1 %v17236_v34 }
 0x629   :  { %5196 = vmatpush1.bf16.msra.mxu0 %v17238_v35  ;;  %5237 = vmatpush1.bf16.msra.mxu1 %v17240_v36 }
 0x62a   :  { %5197 = vmatprep.subr.bf16.mxu0 %v17246_v39  ;;  %5238 = vmatprep.subr.bf16.mxu1 %v17248_v48 }
 0x62d   :  { %5198 = vmatpush1.bf16.msra.mxu0 %v17250_v56  ;;  %5239 = vmatpush1.bf16.msra.mxu1 %v17252_v12 }
 0x62e   :  { %5199 = vmatprep.subr.bf16.mxu0 %v17258_v0  ;;  %5240 = vmatprep.subr.bf16.mxu1 %v17260_v51 }
 0x631   :  { %5200 = vmatpush1.bf16.msra.mxu0 %v17262_v54  ;;  %5241 = vmatpush1.bf16.msra.mxu1 %v17264_v2 }
 0x632   :  { %5201 = vmatprep.subr.bf16.mxu0 %v17270_v58  ;;  %5242 = vmatprep.subr.bf16.mxu1 %v17272_v16 }
 0x635   :  { %5202 = vmatpush1.bf16.msra.mxu0 %v17274_v40  ;;  %5243 = vmatpush1.bf16.msra.mxu1 %v17276_v59 }
 0x636   :  { %5203 = vmatprep.subr.bf16.mxu0 %v17282_v15  ;;  %5244 = vmatprep.subr.bf16.mxu1 %v17284_v42 }
 0x639   :  { %5204 = vmatpush1.bf16.msra.mxu0 %v17286_v17  ;;  %5245 = vmatpush1.bf16.msra.mxu1 %v17288_v38 }
 0x63a   :  { %5205 = vmatprep.subr.bf16.mxu0 %v17294_v4  ;;  %5246 = vmatprep.subr.bf16.mxu1 %v17296_v5 }
 0x63d   :  { %5206 = vmatpush1.bf16.msra.mxu0 %v17298_v6  ;;  %5247 = vmatpush1.bf16.msra.mxu1 %v17300_v7 }
 0x63e   :  { %5489 = vmatprep.subr.bf16.mxu0 %v17306_v21  ;;  %5530 = vmatprep.subr.bf16.mxu1 %v17308_v8 }
 0x6bd   :  { %v4573_v22 = vpop.f32.mrf.mxu0  ;;  %v4614_v23 = vpop.f32.mrf.mxu1 }
 0x6be   :  { %v4625_v24 = vrot.slane %v4573_v22, 6  ;;  %v4627_v1 = vrot.slane %v4614_v23, 6 }
 0x6bf   :  { %v4575_v26 = vpop.f32.mrf.mxu0  ;;  %v4616_v27 = vpop.f32.mrf.mxu1 }
 0x6c0   :  { %v4633_v52 = vadd.f32 %v4625_v24, %v4342_v25  ;;  %v4626_v28 = vrot.slane %v4575_v26, 6  ;;  %v4628_v62 = vrot.slane %v4616_v27, 6  ;;  %v4635_v10 = vadd.f32 %v4627_v1, %v4344_v18  ;;  %v4637_v27 = vld [vmem:[#allocation2 + $0x50] sm:$0x30] }
 0x6c1   :  { %v4577_v29 = vpop.f32.mrf.mxu0  ;;  %v4618_v55 = vpop.f32.mrf.mxu1 }
 0x6c2   :  { %v13737_v61 = vmul.f32 -1.442695, %v4633_v52  ;;  %v4634_v30 = vadd.f32 %v4626_v28, %v4343_v11  ;;  %v4636_v3 = vadd.f32 %v4628_v62, %v4345_v53  ;;  %v4955_v29 = vrot.slane %v17169_v37, 6 }
 0x6c3   :  { %v4578_v46 = vpop.f32.mrf.mxu0  ;;  %v4619_v31 = vpop.f32.mrf.mxu1 }
 0x6c4   :  { %15753 = vpow2.f32 %v13737_v61  ;;  %v13738_v14 = vmul.f32 -1.442695, %v4634_v30  ;;  %v13739_v49 = vmul.f32 -1.442695, %v4636_v3  ;;  %v4638_v46 = vld [vmem:[#allocation2 + $0x68] sm:$0x30] }
 0x6c6   :  { %15755 = vpow2.f32 %v13738_v14 }
 0x6c7   :  { %15757 = vtanh.f32 %v4635_v10 }
 0x6d1   :  { %v15754_v41 = vpop.eup %15753 }
 0x6d2   :  { %v4938_v57 = vadd.f32 1.0, %v15754_v41 }
 0x6d3   :  { %v15756_v47 = vpop.eup %15755 }
 0x6d4   :  { %15759 = vrcp.f32 %v4938_v57  ;;  %v4944_v19 = vadd.f32 1.0, %v15756_v47  ;;  %v15758_v25 = vpop.eup %15757  ;;  %v4640_v47 = vld [vmem:[#allocation2 + $0x48] sm:$0x30] }
 0x6d5   :  { %15761 = vpow2.f32 %v13739_v49 }
 0x6d6   :  { %15763 = vrcp.f32 %v4944_v19 }
 0x6df   :  { %v4871_v22 = vpop.f32.mrf.mxu0  ;;  %v4912_v24 = vpop.f32.mrf.mxu1 }
 0x6e0   :  { %v4923_v26 = vrot.slane %v4871_v22, 4  ;;  %v4925_v22 = vrot.slane %v4912_v24, 4 }
 0x6e1   :  { %v15760_v52 = vpop.eup %15759  ;;  %v4873_v23 = vpop.f32.mrf.mxu0 }
 0x6e2   :  { %v4914_v28 = vpop.f32.mrf.mxu1  ;;  %v15762_v11 = vpop.eup %15761  ;;  %v4931_v55 = vadd.f32 %v4923_v26, %v4637_v27  ;;  %v4924_v61 = vrot.slane %v4873_v23, 4  ;;  %v4958_v62 = vmul.f32 %v15760_v52, %v15758_v25  ;;  %v4639_v25 = vld [vmem:[#allocation2 + $0x8] sm:$0x30] }
 0x6e3   :  { %v15764_v30 = vpop.eup %15763  ;;  %v4875_v31 = vpop.f32.mrf.mxu0  ;;  %v4951_v18 = vadd.f32 1.0, %v15762_v11  ;;  %v4926_v37 = vrot.slane %v4914_v28, 4  ;;  %v4933_v27 = vadd.f32 %v4925_v22, %v4639_v25  ;;  %v17347_v22 = vld [vmem:[#allocation8 + $0x84] ss:$16 sps:$4 sm:$0xff]  }
 0x6e4   :  { %v4916_v14 = vpop.f32.mrf.mxu1  ;;  %v4957_v1 = vmul.f32 %v15764_v30, %v4955_v29  ;;  %v13740_v53 = vmul.f32 -1.442695, %v4931_v55  ;;  %v4932_v3 = vadd.f32 %v4924_v61, %v4638_v46  ;;  %v17316_v46 = vld [vmem:[#allocation8 + $0xe0] ss:$16 sps:$4 sm:$0xff]   ;;  %v17318_v31 = vld [vmem:[#allocation8 + $0xe8] ss:$16 sps:$4 sm:$0xff]  }
 0x6e5   :  { %v4876_v10 = vpop.f32.mrf.mxu0  ;;  %v4934_v19 = vadd.f32 %v4926_v37, %v4640_v47  ;;  %v17320_v14 = vld [vmem:[#allocation8 + $0xc4] ss:$16 sps:$4 sm:$0xff]   ;;  %v17342_v37 = vld [vmem:[#allocation8 + $0xa8] ss:$16 sps:$4 sm:$0xff]  }
 0x6e6   :  { %v4917_v41 = vpop.f32.mrf.mxu1  ;;  %v17313_v49 = vadd.f32 %v4958_v62, %v4957_v1  ;;  %15765 = vpow2.f32 %v13740_v53  ;;  %v13741_v57 = vmul.f32 -1.442695, %v4932_v3  ;;  %v17322_v62 = vld [vmem:[#allocation8 + $0xcc] ss:$16 sps:$4 sm:$0xff]   ;;  %v17326_v1 = vld [vmem:[#allocation8 + $0xc0] ss:$16 sps:$4 sm:$0xff]  }
 0x6e7   :  { %v13742_v26 = vmul.f32 -1.442695, %v4934_v19  ;;  %v17328_v53 = vld [vmem:[#allocation8 + $0xc8] ss:$16 sps:$4 sm:$0xff]   ;;  %v17332_v3 = vld [vmem:[#allocation8 + $0xa4] ss:$16 sps:$4 sm:$0xff]  }
 0x6e8   :  { %15767 = vpow2.f32 %v13741_v57  ;;  %v17340_v57 = vld [vmem:[#allocation8 + $0xa0] ss:$16 sps:$4 sm:$0xff]   ;;  %v4982_v19 = vrot.slane %v17187_v20, 2 }
 0x6e9   :  { %15769 = vrcp.f32 %v4951_v18  ;;  %v17334_v18 = vld [vmem:[#allocation8 + $0xac] ss:$16 sps:$4 sm:$0xff]  }
 0x6ea   :  { %15771 = vtanh.f32 %v17313_v49 }
 0x6eb   :  { %15773 = vpow2.f32 %v13742_v26  ;;  %v17349_v26 = vld [vmem:[#allocation8 + $0x8c] ss:$16 sps:$4 sm:$0xff]  }
 0x6f3   :  { %v15766_v52 = vpop.eup %15765 }
 0x6f4   :  { %v4965_v23 = vadd.f32 1.0, %v15766_v52 }
 0x6f5   :  { %v15768_v11 = vpop.eup %15767 }
 0x6f6   :  { %v15770_v29 = vpop.eup %15769  ;;  %15775 = vrcp.f32 %v4965_v23  ;;  %v4971_v55 = vadd.f32 1.0, %v15768_v11  ;;  %v17353_v11 = vld [vmem:[#allocation8 + $0x80] ss:$16 sps:$4 sm:$0xff]  }
 0x6f7   :  { %v15772_v61 = vpop.eup %15771  ;;  %15777 = vtanh.f32 %v4933_v27 }
 0x6f8   :  { %15779 = vrcp.f32 %v4971_v55  ;;  %v4961_v30 = vmul.f32 %v15772_v61, %v15770_v29  ;;  %v15774_v10 = vpop.eup %15773  ;;  %v17355_v29 = vld [vmem:[#allocation8 + $0x88] ss:$16 sps:$4 sm:$0xff]   ;;  %v17361_v55 = vld [vmem:[#allocation8 + $0x64] ss:$16 sps:$4 sm:$0xff]   ;;  %v17363_v61 = vld [vmem:[#allocation8 + $0x6c] ss:$16 sps:$4 sm:$0xff]  }
 0x6f9   :  { %v4978_v52 = vadd.f32 1.0, %v15774_v10  ;;  %v17376_v10 = vld [vmem:[#allocation8 + $0x4c] ss:$16 sps:$4 sm:$0xff]  }
 0x6fa   :  { %4989 = vst [vmem:[#allocation3 + $0x10] sm:$0xc] %v4961_v30  ;;  %v4995_v28 = vpack.c.bf16 %v4961_v30, %v4961_v30  ;;  %v17368_v30 = vld [vmem:[#allocation8 + $0x60] ss:$16 sps:$4 sm:$0xff]   ;;  %18815 = vst [vmem:[#allocation28_spill] sm:$0xff] %v17376_v10 }
 0x6fb   :  { %15781 = vrcp.f32 %v4978_v52  ;;  %18812 = vst [vmem:[#allocation33_spill] sm:$0xff] %v17368_v30  ;;  %v17392_v52 = vld [vmem:[#allocation8 + $0x20] ss:$16 sps:$4 sm:$0xff]  }
 0x6fc   :  { %v5029_v24 = vrot.slane %v4995_v28, 1  ;;  %v17370_v28 = vld [vmem:[#allocation8 + $0x68] ss:$16 sps:$4 sm:$0xff]  }
 0x6fd   :  { %18813 = vst [vmem:[#allocation26_spill] sm:$0xff] %v17370_v28 }
 0x6fe   :  { %5224 = vmatmul.mubr.bf16.vlgmr.msra.gmra.mxu0 %v5029_v24  ;;  %5265 = vmatmul.mubr.bf16.vlgmr.msra.gmra.mxu1 %v5029_v24  ;;  %v17374_v24 = vld [vmem:[#allocation8 + $0x44] ss:$16 sps:$4 sm:$0xff]  }
 0x6ff   :  { %5490 = vmatpush1.bf16.msra.mxu0 %v17316_v46  ;;  %5531 = vmatpush1.bf16.msra.mxu1 %v17318_v31  ;;  %18814 = vst [vmem:[#allocation27_spill] sm:$0xff] %v17374_v24 }
 0x700   :  { %5491 = vmatprep.subr.bf16.mxu0 %v17320_v14  ;;  %5532 = vmatprep.subr.bf16.mxu1 %v17322_v62 }
 0x701   :  { %5521 = vmatprep.mubr.bf16.mxu0 %v18781_v63  ;;  %5562 = vmatprep.mubr.bf16.mxu1 %v18781_v63 }
 0x703   :  { %v15776_v41 = vpop.eup %15775  ;;  %5492 = vmatpush1.bf16.msra.mxu0 %v17326_v1  ;;  %5533 = vmatpush1.bf16.msra.mxu1 %v17328_v53 }
 0x704   :  { %v15778_v47 = vpop.eup %15777  ;;  %5493 = vmatprep.subr.bf16.mxu0 %v17332_v3  ;;  %5534 = vmatprep.subr.bf16.mxu1 %v17334_v18 }
 0x705   :  { %v15780_v25 = vpop.eup %15779  ;;  %v4985_v27 = vmul.f32 %v15778_v47, %v15776_v41  ;;  %v17380_v41 = vld [vmem:[#allocation8 + $0x40] ss:$16 sps:$4 sm:$0xff]   ;;  %v17382_v47 = vld [vmem:[#allocation8 + $0x48] ss:$16 sps:$4 sm:$0xff]  }
 0x706   :  { %v4984_v23 = vmul.f32 %v15780_v25, %v4982_v19  ;;  %18816 = vst [vmem:[#allocation29_spill] sm:$0xff] %v17380_v41  ;;  %18817 = vst [vmem:[#allocation30_spill] sm:$0xff] %v17382_v47  ;;  %v17386_v19 = vld [vmem:[#allocation8 + $0x24] ss:$16 sps:$4 sm:$0xff]   ;;  %v17388_v25 = vld [vmem:[#allocation8 + $0x2c] ss:$16 sps:$4 sm:$0xff]  }
 0x707   :  { %5494 = vmatpush1.bf16.msra.mxu0 %v17340_v57  ;;  %5535 = vmatpush1.bf16.msra.mxu1 %v17342_v37  ;;  %18818 = vst [vmem:[#allocation31_spill] sm:$0xff] %v17386_v19  ;;  %18819 = vst [vmem:[#allocation32_spill] sm:$0xff] %v17388_v25 }
 0x708   :  { %v17357_v20 = vadd.f32 %v4985_v27, %v4984_v23  ;;  %5495 = vmatprep.subr.bf16.mxu0 %v17347_v22  ;;  %5536 = vmatprep.subr.bf16.mxu1 %v17349_v26  ;;  %v17394_v27 = vld [vmem:[#allocation8 + $0x28] ss:$16 sps:$4 sm:$0xff]   ;;  %v17398_v23 = vld [vmem:[#allocation8 + $0x4] ss:$16 sps:$4 sm:$0xff]  }
 0x70a   :  { %15783 = vtanh.f32 %v17357_v20 }
 0x70b   :  { %5496 = vmatpush1.bf16.msra.mxu0 %v17353_v11  ;;  %5537 = vmatpush1.bf16.msra.mxu1 %v17355_v29 }
 0x70c   :  { %5497 = vmatprep.subr.bf16.mxu0 %v17361_v55  ;;  %5538 = vmatprep.subr.bf16.mxu1 %v17363_v61 }
 0x70f   :  { %5498 = vmatpush1.bf16.msra.mxu0 %v17368_v30  ;;  %5539 = vmatpush1.bf16.msra.mxu1 %v17370_v28 }
 0x710   :  { %5499 = vmatprep.subr.bf16.mxu0 %v17374_v24  ;;  %5540 = vmatprep.subr.bf16.mxu1 %v17376_v10  ;;  %v17400_v24 = vld [vmem:[#allocation8 + $0xc] ss:$16 sps:$4 sm:$0xff]   ;;  %v15782_v10 = vpop.eup %15781 }
 0x713   :  { %5500 = vmatpush1.bf16.msra.mxu0 %v17380_v41  ;;  %5541 = vmatpush1.bf16.msra.mxu1 %v17382_v47  ;;  %v17404_v41 = vld [vmem:[#allocation8] ss:$16 sps:$4 sm:$0xff]   ;;  %v17406_v47 = vld [vmem:[#allocation8 + $0x8] ss:$16 sps:$4 sm:$0xff]  }
 0x714   :  { %5501 = vmatprep.subr.bf16.mxu0 %v17386_v19  ;;  %5542 = vmatprep.subr.bf16.mxu1 %v17388_v25 }
 0x717   :  { %v15784_v28 = vpop.eup %15783  ;;  %5502 = vmatpush1.bf16.msra.mxu0 %v17392_v52  ;;  %5543 = vmatpush1.bf16.msra.mxu1 %v17394_v27 }
 0x718   :  { %5503 = vmatprep.subr.bf16.mxu0 %v17398_v23  ;;  %5544 = vmatprep.subr.bf16.mxu1 %v17400_v24  ;;  %v4988_v19 = vmul.f32 %v15784_v28, %v15782_v10 }
 0x71a   :  { %4990 = vst [vmem:[#allocation3 + $0x8] sm:$0x30] %v4988_v19  ;;  %v5293_v25 = vpack.c.bf16 %v4988_v19, %v4988_v19  ;;  %v5290_v19 = vld [vmem:[#allocation2 + $0x68] sm:$0xc] }
 0x71b   :  { %5504 = vmatpush1.bf16.msra.mxu0 %v17404_v41  ;;  %5545 = vmatpush1.bf16.msra.mxu1 %v17406_v47 }
 0x71c   :  { %v5327_v30 = vrot.slane %v5293_v25, 2  ;;  %5843 = vmatprep.subr.bf16.mxu0 %v17210_v43  ;;  %5884 = vmatprep.subr.bf16.mxu1 %v17212_v50 }
 0x71e   :  { %5522 = vmatmul.mubr.bf16.vlgmr.msra.gmra.mxu0 %v5327_v30  ;;  %5563 = vmatmul.mubr.bf16.vlgmr.msra.gmra.mxu1 %v5327_v30 }
 0x71f   :  { %5844 = vmatpush1.bf16.msra.mxu0 %v17214_v60  ;;  %5885 = vmatpush1.bf16.msra.mxu1 %v17216_v44  ;;  %v4991_v44 = vld [vmem:[#allocation2 + $0x40] sm:$0x30] }
 0x720   :  { %5845 = vmatprep.subr.bf16.mxu0 %v17222_v9  ;;  %5886 = vmatprep.subr.bf16.mxu1 %v17224_v13 }
 0x721   :  { %5875 = vmatprep.mubr.bf16.mxu0 %v18781_v63  ;;  %5916 = vmatprep.mubr.bf16.mxu1 %v18781_v63 }
 0x723   :  { %5846 = vmatpush1.bf16.msra.mxu0 %v17226_v45  ;;  %5887 = vmatpush1.bf16.msra.mxu1 %v17228_v32 }
 0x724   :  { %5847 = vmatprep.subr.bf16.mxu0 %v17234_v33  ;;  %5888 = vmatprep.subr.bf16.mxu1 %v17236_v34  ;;  %v4992_v33 = vld [vmem:[#allocation2 + $0x20] sm:$0x30] }
 0x727   :  { %5848 = vmatpush1.bf16.msra.mxu0 %v17238_v35  ;;  %5889 = vmatpush1.bf16.msra.mxu1 %v17240_v36 }
 0x728   :  { %5849 = vmatprep.subr.bf16.mxu0 %v17246_v39  ;;  %5890 = vmatprep.subr.bf16.mxu1 %v17248_v48 }
 0x72b   :  { %5850 = vmatpush1.bf16.msra.mxu0 %v17250_v56  ;;  %5891 = vmatpush1.bf16.msra.mxu1 %v17252_v12 }
 0x72c   :  { %5851 = vmatprep.subr.bf16.mxu0 %v17258_v0  ;;  %5892 = vmatprep.subr.bf16.mxu1 %v17260_v51  ;;  %v4994_v51 = vld [vmem:[#allocation2 + $0x38] sm:$0x30] }
 0x72f   :  { %5852 = vmatpush1.bf16.msra.mxu0 %v17262_v54  ;;  %5893 = vmatpush1.bf16.msra.mxu1 %v17264_v2 }
 0x730   :  { %5853 = vmatprep.subr.bf16.mxu0 %v17270_v58  ;;  %5894 = vmatprep.subr.bf16.mxu1 %v17272_v16  ;;  %v4993_v16 = vld [vmem:[#allocation2 + $0x10] sm:$0x30] }
 0x733   :  { %5854 = vmatpush1.bf16.msra.mxu0 %v17274_v40  ;;  %5895 = vmatpush1.bf16.msra.mxu1 %v17276_v59 }
 0x734   :  { %5855 = vmatprep.subr.bf16.mxu0 %v17282_v15  ;;  %5896 = vmatprep.subr.bf16.mxu1 %v17284_v42 }
 0x737   :  { %5856 = vmatpush1.bf16.msra.mxu0 %v17286_v17  ;;  %5897 = vmatpush1.bf16.msra.mxu1 %v17288_v38 }
 0x738   :  { %5857 = vmatprep.subr.bf16.mxu0 %v17294_v4  ;;  %5898 = vmatprep.subr.bf16.mxu1 %v17296_v5 }
 0x73b   :  { %5858 = vmatpush1.bf16.msra.mxu0 %v17298_v6  ;;  %5899 = vmatpush1.bf16.msra.mxu1 %v17300_v7  ;;  %v5289_v6 = vld [vmem:[#allocation2 + $0x50] sm:$0xc] }
 0x73c   :  { %6141 = vmatprep.subr.bf16.mxu0 %v17306_v21  ;;  %6182 = vmatprep.subr.bf16.mxu1 %v17308_v8 }
 0x7be   :  { %v5225_v43 = vpop.f32.mrf.mxu0  ;;  %v5266_v50 = vpop.f32.mrf.mxu1 }
 0x7bf   :  { %v5277_v60 = vrot.slane %v5225_v43, 4  ;;  %v5279_v2 = vrot.slane %v5266_v50, 4 }
 0x7c0   :  { %v5227_v9 = vpop.f32.mrf.mxu0  ;;  %v5268_v13 = vpop.f32.mrf.mxu1 }
 0x7c1   :  { %v5285_v45 = vadd.f32 %v5277_v60, %v4991_v44  ;;  %v5278_v32 = vrot.slane %v5227_v9, 4  ;;  %v5280_v0 = vrot.slane %v5268_v13, 4  ;;  %v5287_v59 = vadd.f32 %v5279_v2, %v4993_v16 }
 0x7c2   :  { %v5229_v34 = vpop.f32.mrf.mxu0  ;;  %v5270_v35 = vpop.f32.mrf.mxu1  ;;  %v5607_v60 = vrot.slane %v17313_v49, 6 }
 0x7c3   :  { %v13807_v36 = vmul.f32 -1.442695, %v5285_v45  ;;  %v5286_v39 = vadd.f32 %v5278_v32, %v4992_v33  ;;  %v5288_v54 = vadd.f32 %v5280_v0, %v4994_v51  ;;  %v5291_v51 = vld [vmem:[#allocation2 + $0x8] sm:$0xc] }
 0x7c4   :  { %v5230_v48 = vpop.f32.mrf.mxu0  ;;  %v5271_v56 = vpop.f32.mrf.mxu1 }
 0x7c5   :  { %15785 = vpow2.f32 %v13807_v36  ;;  %v13808_v12 = vmul.f32 -1.442695, %v5286_v39  ;;  %v13809_v58 = vmul.f32 -1.442695, %v5288_v54  ;;  %v5292_v56 = vld [vmem:[#allocation2 + $0x48] sm:$0xc] }
 0x7c7   :  { %15787 = vpow2.f32 %v13808_v12 }
 0x7c8   :  { %15789 = vpow2.f32 %v13809_v58 }
 0x7d2   :  { %v15786_v40 = vpop.eup %15785 }
 0x7d3   :  { %v5590_v15 = vadd.f32 1.0, %v15786_v40 }
 0x7d4   :  { %v15788_v42 = vpop.eup %15787 }
 0x7d5   :  { %15791 = vrcp.f32 %v5590_v15  ;;  %v5596_v17 = vadd.f32 1.0, %v15788_v42  ;;  %v15790_v8 = vpop.eup %15789 }
 0x7d6   :  { %15793 = vtanh.f32 %v5287_v59  ;;  %v5603_v45 = vadd.f32 1.0, %v15790_v8  ;;  %v6345_v8 = vld [vmem:[#allocation9 + $0x1c0] sm:$0xff] }
 0x7d7   :  { %15795 = vrcp.f32 %v5596_v17 }
 0x7de   :  { %v5523_v38 = vpop.f32.mrf.mxu0  ;;  %v5564_v4 = vpop.f32.mrf.mxu1 }
 0x7df   :  { %v5575_v5 = vrot.slane %v5523_v38, 6  ;;  %v5577_v49 = vrot.slane %v5564_v4, 6 }
 0x7e0   :  { %v5525_v7 = vpop.f32.mrf.mxu0  ;;  %v5566_v21 = vpop.f32.mrf.mxu1 }
 0x7e1   :  { %v5583_v30 = vadd.f32 %v5575_v5, %v5289_v6  ;;  %v5576_v28 = vrot.slane %v5525_v7, 6  ;;  %v5578_v48 = vrot.slane %v5566_v21, 6  ;;  %v5585_v2 = vadd.f32 %v5577_v49, %v5291_v51 }
 0x7e2   :  { %v15792_v10 = vpop.eup %15791  ;;  %v5527_v25 = vpop.f32.mrf.mxu0  ;;  %v5634_v7 = vrot.slane %v17357_v20, 2 }
 0x7e3   :  { %v5568_v43 = vpop.f32.mrf.mxu1  ;;  %v15794_v50 = vpop.eup %15793  ;;  %v13810_v44 = vmul.f32 -1.442695, %v5583_v30  ;;  %v5584_v9 = vadd.f32 %v5576_v28, %v5290_v19  ;;  %v5586_v12 = vadd.f32 %v5578_v48, %v5292_v56  ;;  %v6349_v30 = vld [vmem:[#allocation9 + $0x1e0] sm:$0xff]  ;;  %v6346_v28 = vld [vmem:[#allocation9 + $0x1c8] sm:$0xff] }
 0x7e4   :  { %v15796_v13 = vpop.eup %15795  ;;  %v5528_v32 = vpop.f32.mrf.mxu0  ;;  %v5610_v34 = vmul.f32 %v15794_v50, %v15792_v10  ;;  %v6350_v10 = vld [vmem:[#allocation9 + $0x1e8] sm:$0xff]  ;;  %v6341_v25 = vld [vmem:[#allocation9 + $0x1a0] sm:$0xff] }
 0x7e5   :  { %v5569_v33 = vpop.f32.mrf.mxu1  ;;  %v5609_v35 = vmul.f32 %v15796_v13, %v5607_v60  ;;  %15797 = vpow2.f32 %v13810_v44  ;;  %v13811_v36 = vmul.f32 -1.442695, %v5584_v9  ;;  %v13812_v0 = vmul.f32 -1.442695, %v5586_v12  ;;  %v6338_v43 = vld [vmem:[#allocation9 + $0x188] sm:$0xff]  ;;  %v6329_v9 = vld [vmem:[#allocation9 + $0x140] sm:$0xff] }
 0x7e6   :  { %v13941_v19 = vcombine.low %v6346_v28, %v6350_v10  ;;  %v6333_v13 = vld [vmem:[#allocation9 + $0x160] sm:$0xff]  ;;  %v6334_v33 = vld [vmem:[#allocation9 + $0x168] sm:$0xff] }
 0x7e7   :  { %v17449_v39 = vadd.f32 %v5610_v34, %v5609_v35  ;;  %15799 = vpow2.f32 %v13811_v36  ;;  %v13924_v32 = vcombine.high %v6329_v9, %v6333_v13  ;;  %v13923_v34 = vcombine.low %v6329_v9, %v6333_v13  ;;  %v6321_v48 = vld [vmem:[#allocation9 + $0x100] sm:$0xff]  ;;  %v6322_v12 = vld [vmem:[#allocation9 + $0x108] sm:$0xff] }
 0x7e8   :  { %15801 = vrcp.f32 %v5603_v45  ;;  %v6330_v45 = vld [vmem:[#allocation9 + $0x148] sm:$0xff]  ;;  %v6325_v56 = vld [vmem:[#allocation9 + $0x120] sm:$0xff] }
 0x7e9   :  { %15803 = vtanh.f32 %v17449_v39  ;;  %v13925_v35 = vcombine.low %v6330_v45, %v6334_v33  ;;  %v13926_v36 = vcombine.high %v6330_v45, %v6334_v33  ;;  %v13916_v49 = vcombine.high %v6321_v48, %v6325_v56  ;;  %v6397_v33 = vld [vmem:[#allocation9 + $0x360] sm:$0xff] }
 0x7ea   :  { %15805 = vpow2.f32 %v13812_v0  ;;  %v6326_v0 = vld [vmem:[#allocation9 + $0x128] sm:$0xff]  ;;  %v13915_v51 = vcombine.low %v6321_v48, %v6325_v56 }
 0x7f2   :  { %v15798_v54 = vpop.eup %15797 }
 0x7f3   :  { %v5617_v58 = vadd.f32 1.0, %v15798_v54  ;;  %v13917_v54 = vcombine.low %v6322_v12, %v6326_v0 }
 0x7f4   :  { %v15800_v16 = vpop.eup %15799 }
 0x7f5   :  { %v15802_v40 = vpop.eup %15801  ;;  %15807 = vrcp.f32 %v5617_v58  ;;  %v5623_v59 = vadd.f32 1.0, %v15800_v16  ;;  %v6313_v58 = vld [vmem:[#allocation9 + $0xc0] sm:$0xff] }
 0x7f6   :  { %v15804_v15 = vpop.eup %15803  ;;  %15809 = vtanh.f32 %v5585_v2  ;;  %v13918_v2 = vcombine.high %v6322_v12, %v6326_v0  ;;  %v6317_v16 = vld [vmem:[#allocation9 + $0xe0] sm:$0xff] }
 0x7f7   :  { %15811 = vrcp.f32 %v5623_v59  ;;  %v5613_v42 = vmul.f32 %v15804_v15, %v15802_v40  ;;  %v15806_v4 = vpop.eup %15805  ;;  %v6314_v40 = vld [vmem:[#allocation9 + $0xc8] sm:$0xff]  ;;  %v13908_v59 = vcombine.high %v6313_v58, %v6317_v16  ;;  %v6389_v0 = vld [vmem:[#allocation9 + $0x320] sm:$0xff] }
 0x7f8   :  { %v6318_v15 = vld [vmem:[#allocation9 + $0xe8] sm:$0xff] }
 0x7f9   :  { %5641 = vst [vmem:[#allocation3 + $0x10] sm:$0x30] %v5613_v42  ;;  %v5647_v17 = vpack.c.bf16 %v5613_v42, %v5613_v42  ;;  %v13907_v42 = vcombine.low %v6313_v58, %v6317_v16 }
 0x7fb   :  { %v5681_v38 = vrot.slane %v5647_v17, 2  ;;  %v13909_v17 = vcombine.low %v6314_v40, %v6318_v15 }
 0x7fd   :  { %5876 = vmatmul.mubr.bf16.vlgmr.msra.gmra.mxu0 %v5681_v38  ;;  %5917 = vmatmul.mubr.bf16.vlgmr.msra.gmra.mxu1 %v5681_v38  ;;  %v13910_v38 = vcombine.high %v6314_v40, %v6318_v15  ;;  %v6381_v15 = vld [vmem:[#allocation9 + $0x2e0] sm:$0xff] }
 0x7fe   :  { %6142 = vmatpush1.bf16.msra.mxu0 %v17316_v46  ;;  %6183 = vmatpush1.bf16.msra.mxu1 %v17318_v31  ;;  %v5630_v31 = vadd.f32 1.0, %v15806_v4  ;;  %v6305_v4 = vld [vmem:[#allocation9 + $0x80] sm:$0xff] }
 0x7ff   :  { %6143 = vmatprep.subr.bf16.mxu0 %v17320_v14  ;;  %6184 = vmatprep.subr.bf16.mxu1 %v17322_v62 }
 0x800   :  { %6173 = vmatprep.mubr.bf16.mxu0 %v18781_v63  ;;  %6214 = vmatprep.mubr.bf16.mxu1 %v18781_v63  ;;  %15813 = vrcp.f32 %v5630_v31 }
 0x802   :  { %v15808_v5 = vpop.eup %15807  ;;  %6144 = vmatpush1.bf16.msra.mxu0 %v17326_v1  ;;  %6185 = vmatpush1.bf16.msra.mxu1 %v17328_v53  ;;  %v18820_v1 = vld [vmem:[#allocation33_spill] sm:$0xff]  ;;  %v18821_v53 = vld [vmem:[#allocation26_spill] sm:$0xff] }
 0x803   :  { %v15810_v6 = vpop.eup %15809  ;;  %6145 = vmatprep.subr.bf16.mxu0 %v17332_v3  ;;  %6186 = vmatprep.subr.bf16.mxu1 %v17334_v18  ;;  %v18822_v3 = vld [vmem:[#allocation27_spill] sm:$0xff]  ;;  %v18823_v18 = vld [vmem:[#allocation28_spill] sm:$0xff] }
 0x804   :  { %v15812_v46 = vpop.eup %15811  ;;  %v5637_v14 = vmul.f32 %v15810_v6, %v15808_v5  ;;  %v6309_v5 = vld [vmem:[#allocation9 + $0xa0] sm:$0xff]  ;;  %v6306_v6 = vld [vmem:[#allocation9 + $0x88] sm:$0xff] }
 0x805   :  { %v5636_v62 = vmul.f32 %v15812_v46, %v5634_v7  ;;  %v13900_v7 = vcombine.high %v6305_v4, %v6309_v5  ;;  %v6310_v46 = vld [vmem:[#allocation9 + $0xa8] sm:$0xff]  ;;  %v13899_v31 = vcombine.low %v6305_v4, %v6309_v5 }
 0x806   :  { %6146 = vmatpush1.bf16.msra.mxu0 %v17340_v57  ;;  %6187 = vmatpush1.bf16.msra.mxu1 %v17342_v37  ;;  %v18824_v57 = vld [vmem:[#allocation29_spill] sm:$0xff]  ;;  %v18825_v37 = vld [vmem:[#allocation30_spill] sm:$0xff] }
 0x807   :  { %v17465_v21 = vadd.f32 %v5637_v14, %v5636_v62  ;;  %6147 = vmatprep.subr.bf16.mxu0 %v17347_v22  ;;  %6188 = vmatprep.subr.bf16.mxu1 %v17349_v26  ;;  %v18826_v22 = vld [vmem:[#allocation31_spill] sm:$0xff]  ;;  %v18827_v26 = vld [vmem:[#allocation32_spill] sm:$0xff]  ;;  %v13901_v14 = vcombine.low %v6306_v6, %v6310_v46  ;;  %v13902_v62 = vcombine.high %v6306_v6, %v6310_v46 }
 0x808   :  { %v6373_v46 = vld [vmem:[#allocation9 + $0x2a0] sm:$0xff] }
 0x809   :  { %15815 = vtanh.f32 %v17465_v21 }
 0x80a   :  { %6148 = vmatpush1.bf16.msra.mxu0 %v17353_v11  ;;  %6189 = vmatpush1.bf16.msra.mxu1 %v17355_v29 }
 0x80b   :  { %6149 = vmatprep.subr.bf16.mxu0 %v17361_v55  ;;  %6190 = vmatprep.subr.bf16.mxu1 %v17363_v61 }
 0x80d   :  { %v15814_v11 = vpop.eup %15813 }
 0x80e   :  { %6150 = vmatpush1.bf16.msra.mxu0 %v18820_v1  ;;  %6191 = vmatpush1.bf16.msra.mxu1 %v18821_v53  ;;  %v6297_v1 = vld [vmem:[#allocation9 + $0x40] sm:$0xff] }
 0x80f   :  { %6151 = vmatprep.subr.bf16.mxu0 %v18822_v3  ;;  %6192 = vmatprep.subr.bf16.mxu1 %v18823_v18  ;;  %v6301_v53 = vld [vmem:[#allocation9 + $0x60] sm:$0xff]  ;;  %v6298_v3 = vld [vmem:[#allocation9 + $0x48] sm:$0xff] }
 0x810   :  { %v13892_v18 = vcombine.high %v6297_v1, %v6301_v53 }
 0x812   :  { %6152 = vmatpush1.bf16.msra.mxu0 %v18824_v57  ;;  %6193 = vmatpush1.bf16.msra.mxu1 %v18825_v37  ;;  %v6302_v57 = vld [vmem:[#allocation9 + $0x68] sm:$0xff]  ;;  %v13891_v37 = vcombine.low %v6297_v1, %v6301_v53  ;;  %v6361_v53 = vld [vmem:[#allocation9 + $0x240] sm:$0xff] }
 0x813   :  { %6153 = vmatprep.subr.bf16.mxu0 %v18826_v22  ;;  %6194 = vmatprep.subr.bf16.mxu1 %v18827_v26  ;;  %v13893_v22 = vcombine.low %v6298_v3, %v6302_v57  ;;  %v13894_v26 = vcombine.high %v6298_v3, %v6302_v57  ;;  %v6374_v1 = vld [vmem:[#allocation9 + $0x2a8] sm:$0xff]  ;;  %v6365_v3 = vld [vmem:[#allocation9 + $0x260] sm:$0xff] }
 0x816   :  { %v15816_v29 = vpop.eup %15815  ;;  %6154 = vmatpush1.bf16.msra.mxu0 %v17392_v52  ;;  %6195 = vmatpush1.bf16.msra.mxu1 %v17394_v27  ;;  %v13940_v52 = vcombine.high %v6345_v8, %v6349_v30  ;;  %v13939_v27 = vcombine.low %v6345_v8, %v6349_v30 }
 0x817   :  { %6155 = vmatprep.subr.bf16.mxu0 %v17398_v23  ;;  %6196 = vmatprep.subr.bf16.mxu1 %v17400_v24  ;;  %v5640_v20 = vmul.f32 %v15816_v29, %v15814_v11  ;;  %v13942_v23 = vcombine.high %v6346_v28, %v6350_v10  ;;  %v6337_v24 = vld [vmem:[#allocation9 + $0x180] sm:$0xff] }
 0x818   :  { %v13931_v50 = vcombine.low %v6337_v24, %v6341_v25  ;;  %v6289_v11 = vld [vmem:[#allocation9] sm:$0xff] }
 0x819   :  { %5642 = vst [vmem:[#allocation3 + $0x8] sm:$0xc] %v5640_v20  ;;  %v5945_v55 = vpack.c.bf16 %v5640_v20, %v5640_v20  ;;  %v6293_v29 = vld [vmem:[#allocation9 + $0x20] sm:$0xff]  ;;  %v6290_v20 = vld [vmem:[#allocation9 + $0x8] sm:$0xff] }
 0x81a   :  { %6156 = vmatpush1.bf16.msra.mxu0 %v17404_v41  ;;  %6197 = vmatpush1.bf16.msra.mxu1 %v17406_v47  ;;  %v13932_v41 = vcombine.high %v6337_v24, %v6341_v25  ;;  %v6342_v47 = vld [vmem:[#allocation9 + $0x1a8] sm:$0xff]  ;;  %v13883_v8 = vcombine.low %v6289_v11, %v6293_v29  ;;  %v6413_v10 = vld [vmem:[#allocation9 + $0x3e0] sm:$0xff] }
 0x81b   :  { %v5979_v61 = vrot.slane %v5945_v55, 1  ;;  %7099 = vmatprep.subr.bf16.mxu0 %v13940_v52  ;;  %7142 = vmatprep.subr.bf16.mxu1 %v13942_v23  ;;  %v13933_v60 = vcombine.low %v6338_v43, %v6342_v47  ;;  %v13934_v44 = vcombine.high %v6338_v43, %v6342_v47  ;;  %v13884_v55 = vcombine.high %v6289_v11, %v6293_v29  ;;  %v6409_v52 = vld [vmem:[#allocation9 + $0x3c0] sm:$0xff]  ;;  %v6414_v23 = vld [vmem:[#allocation9 + $0x3e8] sm:$0xff] }
 0x81c   :  { %v14003_v24 = vcombine.low %v6409_v52, %v6413_v10  ;;  %v6405_v47 = vld [vmem:[#allocation9 + $0x3a0] sm:$0xff] }
 0x81d   :  { %6174 = vmatmul.mubr.bf16.vlgmr.msra.gmra.mxu0 %v5979_v61  ;;  %6215 = vmatmul.mubr.bf16.vlgmr.msra.gmra.mxu1 %v5979_v61  ;;  %v6294_v61 = vld [vmem:[#allocation9 + $0x28] sm:$0xff]  ;;  %v6353_v11 = vld [vmem:[#allocation9 + $0x200] sm:$0xff] }
 0x81e   :  { %7100 = vmatpush1.bf16.msra.mxu0 %v13939_v27  ;;  %7143 = vmatpush1.bf16.msra.mxu1 %v13941_v19  ;;  %v13885_v30 = vcombine.low %v6290_v20, %v6294_v61  ;;  %v13886_v28 = vcombine.high %v6290_v20, %v6294_v61  ;;  %v6410_v27 = vld [vmem:[#allocation9 + $0x3c8] sm:$0xff]  ;;  %v14004_v19 = vcombine.high %v6409_v52, %v6413_v10  ;;  %v6357_v20 = vld [vmem:[#allocation9 + $0x220] sm:$0xff] }
 0x81f   :  { %7101 = vmatprep.subr.bf16.mxu0 %v13932_v41  ;;  %7144 = vmatprep.subr.bf16.mxu1 %v13934_v44  ;;  %v14005_v25 = vcombine.low %v6410_v27, %v6414_v23  ;;  %v14006_v43 = vcombine.high %v6410_v27, %v6414_v23  ;;  %v6401_v41 = vld [vmem:[#allocation9 + $0x380] sm:$0xff]  ;;  %v6406_v44 = vld [vmem:[#allocation9 + $0x3a8] sm:$0xff]  ;;  %v13947_v10 = vcombine.low %v6353_v11, %v6357_v20  ;;  %v17490_v23 = vld [vmem:[#allocation9 + $0x1f0] sm:$0xff] }
 0x820   :  { %v13995_v9 = vcombine.low %v6401_v41, %v6405_v47  ;;  %v6358_v61 = vld [vmem:[#allocation9 + $0x228] sm:$0xff] }
 0x822   :  { %7102 = vmatpush1.bf16.msra.mxu0 %v13931_v50  ;;  %7145 = vmatpush1.bf16.msra.mxu1 %v13933_v60  ;;  %v6402_v50 = vld [vmem:[#allocation9 + $0x388] sm:$0xff]  ;;  %v13996_v60 = vcombine.high %v6401_v41, %v6405_v47  ;;  %v17498_v41 = vld [vmem:[#allocation9 + $0x1f8] sm:$0xff] }
 0x823   :  { %7103 = vmatprep.subr.bf16.mxu0 %v13924_v32  ;;  %7146 = vmatprep.subr.bf16.mxu1 %v13926_v36  ;;  %v13997_v13 = vcombine.low %v6402_v50, %v6406_v44  ;;  %v13998_v45 = vcombine.high %v6402_v50, %v6406_v44  ;;  %v6393_v32 = vld [vmem:[#allocation9 + $0x340] sm:$0xff]  ;;  %v6398_v36 = vld [vmem:[#allocation9 + $0x368] sm:$0xff] }
 0x824   :  { %v13987_v48 = vcombine.low %v6393_v32, %v6397_v33 }
 0x826   :  { %7104 = vmatpush1.bf16.msra.mxu0 %v13923_v34  ;;  %7147 = vmatpush1.bf16.msra.mxu1 %v13925_v35  ;;  %v6394_v34 = vld [vmem:[#allocation9 + $0x348] sm:$0xff]  ;;  %v13988_v35 = vcombine.high %v6393_v32, %v6397_v33 }
 0x827   :  { %7105 = vmatprep.subr.bf16.mxu0 %v13916_v49  ;;  %7148 = vmatprep.subr.bf16.mxu1 %v13918_v2  ;;  %v13989_v56 = vcombine.low %v6394_v34, %v6398_v36  ;;  %v13990_v12 = vcombine.high %v6394_v34, %v6398_v36  ;;  %v6385_v49 = vld [vmem:[#allocation9 + $0x300] sm:$0xff]  ;;  %v6390_v2 = vld [vmem:[#allocation9 + $0x328] sm:$0xff] }
 0x828   :  { %v13979_v58 = vcombine.low %v6385_v49, %v6389_v0 }
 0x82a   :  { %7106 = vmatpush1.bf16.msra.mxu0 %v13915_v51  ;;  %7149 = vmatpush1.bf16.msra.mxu1 %v13917_v54  ;;  %v6386_v51 = vld [vmem:[#allocation9 + $0x308] sm:$0xff]  ;;  %v13980_v54 = vcombine.high %v6385_v49, %v6389_v0 }
 0x82b   :  { %7107 = vmatprep.subr.bf16.mxu0 %v13908_v59  ;;  %7150 = vmatprep.subr.bf16.mxu1 %v13910_v38  ;;  %v13981_v16 = vcombine.low %v6386_v51, %v6390_v2  ;;  %v13982_v40 = vcombine.high %v6386_v51, %v6390_v2  ;;  %v6377_v59 = vld [vmem:[#allocation9 + $0x2c0] sm:$0xff]  ;;  %v6382_v38 = vld [vmem:[#allocation9 + $0x2e8] sm:$0xff]  ;;  %v5646_v2 = vld [vmem:[#allocation2 + $0x38] sm:$0xc0] }
 0x82c   :  { %v13971_v4 = vcombine.low %v6377_v59, %v6381_v15 }
 0x82e   :  { %7108 = vmatpush1.bf16.msra.mxu0 %v13907_v42  ;;  %7151 = vmatpush1.bf16.msra.mxu1 %v13909_v17  ;;  %v6378_v42 = vld [vmem:[#allocation9 + $0x2c8] sm:$0xff]  ;;  %v13972_v17 = vcombine.high %v6377_v59, %v6381_v15  ;;  %v5645_v59 = vld [vmem:[#allocation2 + $0x10] sm:$0xc0] }
 0x82f   :  { %7109 = vmatprep.subr.bf16.mxu0 %v13900_v7  ;;  %7152 = vmatprep.subr.bf16.mxu1 %v13902_v62  ;;  %v13973_v5 = vcombine.low %v6378_v42, %v6382_v38  ;;  %v13974_v6 = vcombine.high %v6378_v42, %v6382_v38  ;;  %v6369_v7 = vld [vmem:[#allocation9 + $0x280] sm:$0xff] }
 0x830   :  { %v13964_v62 = vcombine.high %v6369_v7, %v6373_v46 }
 0x832   :  { %7110 = vmatpush1.bf16.msra.mxu0 %v13899_v31  ;;  %7153 = vmatpush1.bf16.msra.mxu1 %v13901_v14  ;;  %v6370_v31 = vld [vmem:[#allocation9 + $0x288] sm:$0xff]  ;;  %v13963_v14 = vcombine.low %v6369_v7, %v6373_v46 }
 0x833   :  { %7111 = vmatprep.subr.bf16.mxu0 %v13892_v18  ;;  %7154 = vmatprep.subr.bf16.mxu1 %v13894_v26  ;;  %v13965_v18 = vcombine.low %v6370_v31, %v6374_v1  ;;  %v13966_v57 = vcombine.high %v6370_v31, %v6374_v1  ;;  %v6366_v26 = vld [vmem:[#allocation9 + $0x268] sm:$0xff] }
 0x834   :  { %v5942_v31 = vld [vmem:[#allocation2 + $0x68] sm:$0x3] }
 0x836   :  { %7112 = vmatpush1.bf16.msra.mxu0 %v13891_v37  ;;  %7155 = vmatpush1.bf16.msra.mxu1 %v13893_v22  ;;  %v13956_v37 = vcombine.high %v6361_v53, %v6365_v3  ;;  %v6362_v22 = vld [vmem:[#allocation9 + $0x248] sm:$0xff] }
 0x837   :  { %7113 = vmatprep.subr.bf16.mxu0 %v13884_v55  ;;  %7156 = vmatprep.subr.bf16.mxu1 %v13886_v28  ;;  %v13958_v29 = vcombine.high %v6362_v22, %v6366_v26  ;;  %v6354_v55 = vld [vmem:[#allocation9 + $0x208] sm:$0xff]  ;;  %v13948_v28 = vcombine.high %v6353_v11, %v6357_v20 }
 0x838   :  { %v13950_v52 = vcombine.high %v6354_v55, %v6358_v61  ;;  %v13949_v27 = vcombine.low %v6354_v55, %v6358_v61 }
 0x83a   :  { %7114 = vmatpush1.bf16.msra.mxu0 %v13883_v8  ;;  %7157 = vmatpush1.bf16.msra.mxu1 %v13885_v30  ;;  %v13955_v8 = vcombine.low %v6361_v53, %v6365_v3  ;;  %v13957_v30 = vcombine.low %v6362_v22, %v6366_v26  ;;  %v6247_v26 = vrot.slane %v17449_v39, 6 }
 0x83b   :  { %7115 = vmatprep.subr.bf16.mxu0 %v14004_v19  ;;  %7158 = vmatprep.subr.bf16.mxu1 %v14006_v43  ;;  %v17488_v19 = vld [vmem:[#allocation9 + $0x1d0] sm:$0xff] }
 0x83c   :  { %v13944_v43 = vcombine.high %v17488_v19, %v17490_v23 }
 0x83e   :  { %7116 = vmatpush2.bf16.msra.mxu0 %v14003_v24  ;;  %7159 = vmatpush2.bf16.msra.mxu1 %v14005_v25  ;;  %v17492_v24 = vld [vmem:[#allocation9 + $0x1d8] sm:$0xff]  ;;  %v13943_v25 = vcombine.low %v17488_v19, %v17490_v23 }
 0x83f   :  { %7117 = vmatprep.subr.bf16.mxu0 %v13996_v60  ;;  %7160 = vmatprep.subr.bf16.mxu1 %v13998_v45  ;;  %v13945_v47 = vcombine.low %v17492_v24, %v17498_v41  ;;  %v13946_v50 = vcombine.high %v17492_v24, %v17498_v41  ;;  %v6315_v41 = vld [vmem:[#allocation9 + $0xd0] sm:$0xff] }
 0x842   :  { %7118 = vmatpush2.bf16.msra.mxu0 %v13995_v9  ;;  %7161 = vmatpush2.bf16.msra.mxu1 %v13997_v13  ;;  %v5643_v13 = vld [vmem:[#allocation2 + $0x40] sm:$0xc0] }
 0x843   :  { %7119 = vmatprep.subr.bf16.mxu0 %v13988_v35  ;;  %7162 = vmatprep.subr.bf16.mxu1 %v13990_v12  ;;  %v5644_v35 = vld [vmem:[#allocation2 + $0x20] sm:$0xc0] }
 0x846   :  { %7120 = vmatpush2.bf16.msra.mxu0 %v13987_v48  ;;  %7163 = vmatpush2.bf16.msra.mxu1 %v13989_v56 }
 0x847   :  { %7121 = vmatprep.subr.bf16.mxu0 %v13980_v54  ;;  %7164 = vmatprep.subr.bf16.mxu1 %v13982_v40 }
 0x84a   :  { %7122 = vmatpush2.bf16.msra.mxu0 %v13979_v58  ;;  %7165 = vmatpush2.bf16.msra.mxu1 %v13981_v16 }
 0x84b   :  { %7123 = vmatprep.subr.bf16.mxu0 %v13972_v17  ;;  %7166 = vmatprep.subr.bf16.mxu1 %v13974_v6 }
 0x84e   :  { %7124 = vmatpush2.bf16.msra.mxu0 %v13971_v4  ;;  %7167 = vmatpush2.bf16.msra.mxu1 %v13973_v5  ;;  %v5941_v5 = vld [vmem:[#allocation2 + $0x50] sm:$0x3] }
 0x84f   :  { %7125 = vmatprep.subr.bf16.mxu0 %v13964_v62  ;;  %7168 = vmatprep.subr.bf16.mxu1 %v13966_v57 }
 0x852   :  { %7126 = vmatpush2.bf16.msra.mxu0 %v13963_v14  ;;  %7169 = vmatpush2.bf16.msra.mxu1 %v13965_v18 }
 0x853   :  { %7127 = vmatprep.subr.bf16.mxu0 %v13956_v37  ;;  %7170 = vmatprep.subr.bf16.mxu1 %v13958_v29 }
 0x856   :  { %7128 = vmatpush2.bf16.msra.mxu0 %v13955_v8  ;;  %7171 = vmatpush2.bf16.msra.mxu1 %v13957_v30 }
 0x857   :  { %7129 = vmatprep.subr.bf16.mxu0 %v13948_v28  ;;  %7172 = vmatprep.subr.bf16.mxu1 %v13950_v52  ;;  %v5944_v52 = vld [vmem:[#allocation2 + $0x48] sm:$0x3] }
 0x85a   :  { %7130 = vmatpush2.bf16.msra.mxu0 %v13947_v10  ;;  %7173 = vmatpush2.bf16.msra.mxu1 %v13949_v27 }
 0x85b   :  { %7185 = vmatprep.subr.bf16.mxu0 %v13944_v43  ;;  %7228 = vmatprep.subr.bf16.mxu1 %v13946_v50  ;;  %v5943_v43 = vld [vmem:[#allocation2 + $0x8] sm:$0x3] }
 0x8bd   :  { %v5877_v60 = vpop.f32.mrf.mxu0  ;;  %v5918_v44 = vpop.f32.mrf.mxu1 }
 0x8be   :  { %v5929_v9 = vrot.slane %v5877_v60, 2  ;;  %v5931_v16 = vrot.slane %v5918_v44, 2 }
 0x8bf   :  { %v5879_v45 = vpop.f32.mrf.mxu0  ;;  %v5920_v32 = vpop.f32.mrf.mxu1 }
 0x8c0   :  { %v5937_v33 = vadd.f32 %v5929_v9, %v5643_v13  ;;  %v5930_v34 = vrot.slane %v5879_v45, 2  ;;  %v5932_v54 = vrot.slane %v5920_v32, 2  ;;  %v5939_v42 = vadd.f32 %v5931_v16, %v5645_v59  ;;  %v6343_v59 = vld [vmem:[#allocation9 + $0x1b0] sm:$0xff] }
 0x8c1   :  { %v5881_v36 = vpop.f32.mrf.mxu0  ;;  %v5922_v48 = vpop.f32.mrf.mxu1 }
 0x8c2   :  { %v13877_v56 = vmul.f32 -1.442695, %v5937_v33  ;;  %v5938_v12 = vadd.f32 %v5930_v34, %v5644_v35  ;;  %v5940_v58 = vadd.f32 %v5932_v54, %v5646_v2  ;;  %v6274_v36 = vrot.slane %v17465_v21, 2  ;;  %v6283_v21 = vld [vmem:[#allocation3 + $0x18] sm:$0xff] }
 0x8c3   :  { %v5882_v49 = vpop.f32.mrf.mxu0  ;;  %v5923_v0 = vpop.f32.mrf.mxu1 }
 0x8c4   :  { %15817 = vpow2.f32 %v13877_v56  ;;  %v13878_v51 = vmul.f32 -1.442695, %v5938_v12  ;;  %v13879_v40 = vmul.f32 -1.442695, %v5940_v58  ;;  %v6286_v58 = vld [vmem:[#allocation3] sm:$0xff] }
 0x8c6   :  { %15819 = vpow2.f32 %v13878_v51 }
 0x8c7   :  { %15821 = vpow2.f32 %v13879_v40  ;;  %v6339_v40 = vld [vmem:[#allocation9 + $0x190] sm:$0xff] }
 0x8d1   :  { %v15818_v15 = vpop.eup %15817 }
 0x8d2   :  { %v6230_v17 = vadd.f32 1.0, %v15818_v15 }
 0x8d3   :  { %v15820_v38 = vpop.eup %15819 }
 0x8d4   :  { %15823 = vrcp.f32 %v6230_v17  ;;  %v6236_v4 = vadd.f32 1.0, %v15820_v38  ;;  %v15822_v1 = vpop.eup %15821  ;;  %v6344_v17 = vld [vmem:[#allocation9 + $0x1b8] sm:$0xff] }
 0x8d5   :  { %15825 = vtanh.f32 %v5939_v42  ;;  %v6243_v20 = vadd.f32 1.0, %v15822_v1  ;;  %v6340_v42 = vld [vmem:[#allocation9 + $0x198] sm:$0xff] }
 0x8d6   :  { %15827 = vrcp.f32 %v6236_v4  ;;  %v13937_v1 = vcombine.low %v6340_v42, %v6344_v17 }
 0x8dd   :  { %v6175_v6 = vpop.f32.mrf.mxu0  ;;  %v6216_v7 = vpop.f32.mrf.mxu1 }
 0x8de   :  { %v6223_v46 = vadd.f32 %v6175_v6, %v5941_v5  ;;  %v6225_v60 = vadd.f32 %v6216_v7, %v5943_v43  ;;  %v6331_v5 = vld [vmem:[#allocation9 + $0x150] sm:$0xff]  ;;  %v13936_v6 = vcombine.high %v6339_v40, %v6343_v59  ;;  %v13938_v7 = vcombine.high %v6340_v42, %v6344_v17 }
 0x8df   :  { %v6177_v14 = vpop.f32.mrf.mxu0  ;;  %v6218_v62 = vpop.f32.mrf.mxu1  ;;  %v6403_v42 = vld [vmem:[#allocation9 + $0x390] sm:$0xff] }
 0x8e0   :  { %v13880_v53 = vmul.f32 -1.442695, %v6223_v46  ;;  %v6224_v3 = vadd.f32 %v6177_v14, %v5942_v31  ;;  %v6226_v10 = vadd.f32 %v6218_v62, %v5944_v52  ;;  %v6335_v46 = vld [vmem:[#allocation9 + $0x170] sm:$0xff]  ;;  %v6332_v31 = vld [vmem:[#allocation9 + $0x158] sm:$0xff]  ;;  %v13935_v62 = vcombine.low %v6339_v40, %v6343_v59 }
 0x8e1   :  { %v15824_v18 = vpop.eup %15823  ;;  %v6179_v57 = vpop.f32.mrf.mxu0  ;;  %v6336_v14 = vld [vmem:[#allocation9 + $0x178] sm:$0xff]  ;;  %v13927_v19 = vcombine.low %v6331_v5, %v6335_v46  ;;  %v6407_v17 = vld [vmem:[#allocation9 + $0x3b0] sm:$0xff] }
 0x8e2   :  { %v6220_v37 = vpop.f32.mrf.mxu1  ;;  %v15826_v22 = vpop.eup %15825  ;;  %15829 = vpow2.f32 %v13880_v53  ;;  %v13881_v11 = vmul.f32 -1.442695, %v6224_v3  ;;  %v13882_v27 = vmul.f32 -1.442695, %v6226_v10  ;;  %v13928_v53 = vcombine.high %v6331_v5, %v6335_v46  ;;  %v6327_v57 = vld [vmem:[#allocation9 + $0x130] sm:$0xff]  ;;  %v6312_v52 = vld [vmem:[#allocation9 + $0xb8] sm:$0xff] }
 0x8e3   :  { %v15828_v29 = vpop.eup %15827  ;;  %v6180_v55 = vpop.f32.mrf.mxu0  ;;  %v6250_v8 = vmul.f32 %v15826_v22, %v15824_v18  ;;  %v13930_v3 = vcombine.high %v6332_v31, %v6336_v14  ;;  %v6323_v18 = vld [vmem:[#allocation9 + $0x110] sm:$0xff]  ;;  %v6324_v37 = vld [vmem:[#allocation9 + $0x118] sm:$0xff]  ;;  %v13929_v23 = vcombine.low %v6332_v31, %v6336_v14 }
 0x8e4   :  { %v6221_v61 = vpop.f32.mrf.mxu1  ;;  %v6249_v30 = vmul.f32 %v15828_v29, %v6247_v26  ;;  %15831 = vpow2.f32 %v13881_v11  ;;  %v6328_v22 = vld [vmem:[#allocation9 + $0x138] sm:$0xff]  ;;  %v13920_v24 = vcombine.high %v6323_v18, %v6327_v57  ;;  %v13919_v29 = vcombine.low %v6323_v18, %v6327_v57  ;;  %v6395_v31 = vld [vmem:[#allocation9 + $0x350] sm:$0xff] }
 0x8e5   :  { %15833 = vrcp.f32 %v6243_v20  ;;  %v6316_v26 = vld [vmem:[#allocation9 + $0xd8] sm:$0xff]  ;;  %v13921_v20 = vcombine.low %v6324_v37, %v6328_v22  ;;  %v6399_v14 = vld [vmem:[#allocation9 + $0x370] sm:$0xff] }
 0x8e6   :  { %v6251_v28 = vadd.f32 %v6250_v8, %v6249_v30  ;;  %v6320_v11 = vld [vmem:[#allocation9 + $0xf8] sm:$0xff]  ;;  %v6307_v8 = vld [vmem:[#allocation9 + $0x90] sm:$0xff]  ;;  %v13992_v18 = vcombine.high %v6395_v31, %v6399_v14 }
 0x8e7   :  { %v13914_v61 = vcombine.high %v6316_v26, %v6320_v11  ;;  %v6311_v30 = vld [vmem:[#allocation9 + $0xb0] sm:$0xff] }
 0x8e8   :  { %15835 = vtanh.f32 %v6251_v28  ;;  %v6308_v28 = vld [vmem:[#allocation9 + $0x98] sm:$0xff]  ;;  %v13904_v43 = vcombine.high %v6307_v8, %v6311_v30 }
 0x8e9   :  { %15837 = vpow2.f32 %v13882_v27  ;;  %v13913_v27 = vcombine.low %v6316_v26, %v6320_v11  ;;  %v6379_v26 = vld [vmem:[#allocation9 + $0x2d0] sm:$0xff] }
 0x8ea   :  { %v6383_v11 = vld [vmem:[#allocation9 + $0x2f0] sm:$0xff] }
 0x8ef   :  { %v15830_v50 = vpop.eup %15829 }
 0x8f0   :  { %v6257_v44 = vadd.f32 1.0, %v15830_v50  ;;  %v13906_v50 = vcombine.high %v6308_v28, %v6312_v52 }
 0x8f1   :  { %v15832_v39 = vpop.eup %15831 }
 0x8f2   :  { %15839 = vrcp.f32 %v6257_v44  ;;  %v6263_v9 = vadd.f32 1.0, %v15832_v39  ;;  %v15834_v13 = vpop.eup %15833  ;;  %v6303_v44 = vld [vmem:[#allocation9 + $0x70] sm:$0xff]  ;;  %v6300_v39 = vld [vmem:[#allocation9 + $0x58] sm:$0xff] }
 0x8f3   :  { %15841 = vtanh.f32 %v6225_v60  ;;  %v6299_v60 = vld [vmem:[#allocation9 + $0x50] sm:$0xff] }
 0x8f4   :  { %15843 = vrcp.f32 %v6263_v9  ;;  %v6304_v9 = vld [vmem:[#allocation9 + $0x78] sm:$0xff] }
 0x8f5   :  { %v15836_v45 = vpop.eup %15835 }
 0x8f6   :  { %v6253_v32 = vmul.f32 %v15836_v45, %v15834_v13  ;;  %v15838_v33 = vpop.eup %15837  ;;  %v13903_v13 = vcombine.low %v6307_v8, %v6311_v30  ;;  %v13905_v45 = vcombine.low %v6308_v28, %v6312_v52  ;;  %v13976_v8 = vcombine.high %v6379_v26, %v6383_v11  ;;  %v6371_v28 = vld [vmem:[#allocation9 + $0x290] sm:$0xff] }
 0x8f7   :  { %v6270_v56 = vadd.f32 1.0, %v15838_v33  ;;  %v13898_v33 = vcombine.high %v6300_v39, %v6304_v9  ;;  %v6375_v52 = vld [vmem:[#allocation9 + $0x2b0] sm:$0xff] }
 0x8f8   :  { %6281 = vst [vmem:[#allocation3 + $0x10] sm:$0xc0] %v6253_v32  ;;  %v13896_v32 = vcombine.high %v6299_v60, %v6303_v44 }
 0x8f9   :  { %15845 = vrcp.f32 %v6270_v56  ;;  %v13895_v56 = vcombine.low %v6299_v60, %v6303_v44  ;;  %v13968_v60 = vcombine.high %v6371_v28, %v6375_v52 }
 0x8ff   :  { %v15840_v34 = vpop.eup %15839  ;;  %v6285_v16 = vld [vmem:[#allocation3 + $0x10] sm:$0xff] }
 0x900   :  { %v15842_v35 = vpop.eup %15841  ;;  %v17506_v4 = vpack.c.bf16 %v6285_v16, %v6283_v21  ;;  %v6408_v21 = vld [vmem:[#allocation9 + $0x3b8] sm:$0xff] }
 0x901   :  { %v15844_v48 = vpop.eup %15843  ;;  %v6277_v12 = vmul.f32 %v15842_v35, %v15840_v34  ;;  %v6291_v34 = vld [vmem:[#allocation9 + $0x10] sm:$0xff] }
 0x902   :  { %v6276_v49 = vmul.f32 %v15844_v48, %v6274_v36  ;;  %v6295_v35 = vld [vmem:[#allocation9 + $0x30] sm:$0xff]  ;;  %v6292_v36 = vld [vmem:[#allocation9 + $0x18] sm:$0xff] }
 0x903   :  { %v6296_v48 = vld [vmem:[#allocation9 + $0x38] sm:$0xff]  ;;  %v13887_v16 = vcombine.low %v6291_v34, %v6295_v35 }
 0x904   :  { %v6278_v0 = vadd.f32 %v6277_v12, %v6276_v49  ;;  %v13897_v12 = vcombine.low %v6300_v39, %v6304_v9  ;;  %v13888_v49 = vcombine.high %v6291_v34, %v6295_v35  ;;  %v13889_v40 = vcombine.low %v6292_v36, %v6296_v48  ;;  %v6363_v39 = vld [vmem:[#allocation9 + $0x250] sm:$0xff] }
 0x905   :  { %v6367_v9 = vld [vmem:[#allocation9 + $0x270] sm:$0xff] }
 0x906   :  { %15847 = vtanh.f32 %v6278_v0  ;;  %v15846_v51 = vpop.eup %15845  ;;  %v13890_v0 = vcombine.high %v6292_v36, %v6296_v48  ;;  %v13960_v34 = vcombine.high %v6363_v39, %v6367_v9  ;;  %v6355_v36 = vld [vmem:[#allocation9 + $0x210] sm:$0xff] }
 0x907   :  { %v6359_v48 = vld [vmem:[#allocation9 + $0x230] sm:$0xff] }
 0x913   :  { %v15848_v54 = vpop.eup %15847 }
 0x914   :  { %v6280_v2 = vmul.f32 %v15848_v54, %v15846_v51  ;;  %v6411_v51 = vld [vmem:[#allocation9 + $0x3d0] sm:$0xff] }
 0x915   :  { %v6415_v54 = vld [vmem:[#allocation9 + $0x3f0] sm:$0xff] }
 0x916   :  { %6282 = vst [vmem:[#allocation3 + $0x8] sm:$0x3] %v6280_v2  ;;  %v6412_v2 = vld [vmem:[#allocation9 + $0x3d8] sm:$0xff]  ;;  %v14008_v59 = vcombine.high %v6411_v51, %v6415_v54  ;;  %v14007_v5 = vcombine.low %v6411_v51, %v6415_v54  ;;  %v13952_v51 = vcombine.high %v6355_v36, %v6359_v48 }
 0x91d   :  { %v6284_v15 = vld [vmem:[#allocation3 + $0x8] sm:$0xff] }
 0x91e   :  { %v6288_v38 = vpack.c.bf16 %v6286_v58, %v6284_v15  ;;  %v6416_v58 = vld [vmem:[#allocation9 + $0x3f8] sm:$0xff] }
 0x91f   :  { %v14010_v15 = vcombine.high %v6412_v2, %v6416_v58 }
 0x920   :  { %7131 = vmatprep.mubr.bf16.mxu0 %v6288_v38  ;;  %7174 = vmatprep.mubr.bf16.mxu1 %v6288_v38 }
 0x921   :  { %7132 = vmatmul.mubr.bf16.vlgmr.msra.gmra.mxu0 %v17506_v4  ;;  %7175 = vmatmul.mubr.bf16.vlgmr.msra.gmra.mxu1 %v17506_v4 }
 0x922   :  { %7186 = vmatpush1.bf16.msra.mxu0 %v13943_v25  ;;  %7229 = vmatpush1.bf16.msra.mxu1 %v13945_v47  ;;  %v13922_v25 = vcombine.high %v6324_v37, %v6328_v22  ;;  %v6319_v47 = vld [vmem:[#allocation9 + $0xf0] sm:$0xff] }
 0x923   :  { %7217 = vmatprep.mubr.bf16.mxu0 %v6288_v38  ;;  %7260 = vmatprep.mubr.bf16.mxu1 %v6288_v38  ;;  %v13912_v55 = vcombine.high %v6315_v41, %v6319_v47  ;;  %v13911_v10 = vcombine.low %v6315_v41, %v6319_v47  ;;  %v6404_v38 = vld [vmem:[#allocation9 + $0x398] sm:$0xff]  ;;  %v6387_v37 = vld [vmem:[#allocation9 + $0x310] sm:$0xff] }
 0x924   :  { %7187 = vmatprep.subr.bf16.mxu0 %v13936_v6  ;;  %7230 = vmatprep.subr.bf16.mxu1 %v13938_v7  ;;  %v14009_v6 = vcombine.low %v6412_v2, %v6416_v58  ;;  %v14000_v7 = vcombine.high %v6403_v42, %v6407_v17  ;;  %v14002_v46 = vcombine.high %v6404_v38, %v6408_v21  ;;  %v6391_v22 = vld [vmem:[#allocation9 + $0x330] sm:$0xff] }
 0x925   :  { %v13984_v41 = vcombine.high %v6387_v37, %v6391_v22  ;;  %v13951_v2 = vcombine.low %v6355_v36, %v6359_v48  ;;  %v17680_v36 = vld [vmem:[#allocation12 + $0x4c] ss:$16 sps:$4 sm:$0xff]   ;;  %v17684_v48 = vld [vmem:[#allocation12 + $0x40] ss:$16 sps:$4 sm:$0xff]  }
 0x926   :  { %7188 = vmatpush1.bf16.msra.mxu0 %v13935_v62  ;;  %7231 = vmatpush1.bf16.msra.mxu1 %v13937_v1  ;;  %v6396_v62 = vld [vmem:[#allocation9 + $0x358] sm:$0xff]  ;;  %18828 = vst [vmem:[#allocation33_spill] sm:$0xff] %v17684_v48 }
 0x927   :  { %7189 = vmatprep.subr.bf16.mxu0 %v13928_v53  ;;  %7232 = vmatprep.subr.bf16.mxu1 %v13930_v3  ;;  %v6400_v1 = vld [vmem:[#allocation9 + $0x378] sm:$0xff]  ;;  %v13999_v53 = vcombine.low %v6403_v42, %v6407_v17  ;;  %v14001_v3 = vcombine.low %v6404_v38, %v6408_v21  ;;  %v17526_v42 = vld [vmem:[#allocation11 + $0xc4] ss:$16 sps:$4 sm:$0xff]   ;;  %v17534_v38 = vld [vmem:[#allocation11 + $0xc0] ss:$16 sps:$4 sm:$0xff]  }
 0x928   :  { %v13994_v57 = vcombine.high %v6396_v62, %v6400_v1  ;;  %v17528_v17 = vld [vmem:[#allocation11 + $0xcc] ss:$16 sps:$4 sm:$0xff]   ;;  %v17536_v21 = vld [vmem:[#allocation11 + $0xc8] ss:$16 sps:$4 sm:$0xff]  }
 0x92a   :  { %7190 = vmatpush1.bf16.msra.mxu0 %v13927_v19  ;;  %7233 = vmatpush1.bf16.msra.mxu1 %v13929_v23  ;;  %v6388_v19 = vld [vmem:[#allocation9 + $0x318] sm:$0xff] }
 0x92b   :  { %7191 = vmatprep.subr.bf16.mxu0 %v13920_v24  ;;  %7234 = vmatprep.subr.bf16.mxu1 %v13922_v25  ;;  %v6392_v23 = vld [vmem:[#allocation9 + $0x338] sm:$0xff]  ;;  %v13991_v24 = vcombine.low %v6395_v31, %v6399_v14  ;;  %v13993_v25 = vcombine.low %v6396_v62, %v6400_v1  ;;  %v17560_v14 = vld [vmem:[#allocation11 + $0x80] ss:$16 sps:$4 sm:$0xff]   ;;  %v17566_v1 = vld [vmem:[#allocation11 + $0x64] ss:$16 sps:$4 sm:$0xff]  }
 0x92c   :  { %v13986_v47 = vcombine.high %v6388_v19, %v6392_v23  ;;  %v17556_v31 = vld [vmem:[#allocation11 + $0x8c] ss:$16 sps:$4 sm:$0xff]   ;;  %v17562_v62 = vld [vmem:[#allocation11 + $0x88] ss:$16 sps:$4 sm:$0xff]  }
 0x92e   :  { %7192 = vmatpush1.bf16.msra.mxu0 %v13919_v29  ;;  %7235 = vmatpush1.bf16.msra.mxu1 %v13921_v20  ;;  %v6380_v29 = vld [vmem:[#allocation9 + $0x2d8] sm:$0xff] }
 0x92f   :  { %7193 = vmatprep.subr.bf16.mxu0 %v13912_v55  ;;  %7236 = vmatprep.subr.bf16.mxu1 %v13914_v61  ;;  %v6384_v20 = vld [vmem:[#allocation9 + $0x2f8] sm:$0xff]  ;;  %v13983_v55 = vcombine.low %v6387_v37, %v6391_v22  ;;  %v13985_v61 = vcombine.low %v6388_v19, %v6392_v23  ;;  %v17584_v22 = vld [vmem:[#allocation11 + $0x40] ss:$16 sps:$4 sm:$0xff]   ;;  %v17590_v23 = vld [vmem:[#allocation11 + $0x24] ss:$16 sps:$4 sm:$0xff]  }
 0x930   :  { %v13978_v30 = vcombine.high %v6380_v29, %v6384_v20  ;;  %v17580_v37 = vld [vmem:[#allocation11 + $0x4c] ss:$16 sps:$4 sm:$0xff]   ;;  %v17586_v19 = vld [vmem:[#allocation11 + $0x48] ss:$16 sps:$4 sm:$0xff]  }
 0x932   :  { %7194 = vmatpush1.bf16.msra.mxu0 %v13911_v10  ;;  %7237 = vmatpush1.bf16.msra.mxu1 %v13913_v27  ;;  %v6372_v10 = vld [vmem:[#allocation9 + $0x298] sm:$0xff] }
 0x933   :  { %7195 = vmatprep.subr.bf16.mxu0 %v13904_v43  ;;  %7238 = vmatprep.subr.bf16.mxu1 %v13906_v50  ;;  %v6376_v27 = vld [vmem:[#allocation9 + $0x2b8] sm:$0xff]  ;;  %v13975_v43 = vcombine.low %v6379_v26, %v6383_v11  ;;  %v13977_v50 = vcombine.low %v6380_v29, %v6384_v20  ;;  %v17608_v11 = vld [vmem:[#allocation11] ss:$16 sps:$4 sm:$0xff]   ;;  %v17614_v20 = vld [vmem:[#allocation12 + $0xe4] ss:$16 sps:$4 sm:$0xff]  }
 0x934   :  { %v13970_v44 = vcombine.high %v6372_v10, %v6376_v27  ;;  %v17604_v26 = vld [vmem:[#allocation11 + $0xc] ss:$16 sps:$4 sm:$0xff]   ;;  %v17610_v29 = vld [vmem:[#allocation11 + $0x8] ss:$16 sps:$4 sm:$0xff]  }
 0x936   :  { %7196 = vmatpush1.bf16.msra.mxu0 %v13903_v13  ;;  %7239 = vmatpush1.bf16.msra.mxu1 %v13905_v45  ;;  %v6364_v13 = vld [vmem:[#allocation9 + $0x258] sm:$0xff] }
 0x937   :  { %7197 = vmatprep.subr.bf16.mxu0 %v13896_v32  ;;  %7240 = vmatprep.subr.bf16.mxu1 %v13898_v33  ;;  %v6368_v45 = vld [vmem:[#allocation9 + $0x278] sm:$0xff]  ;;  %v13967_v32 = vcombine.low %v6371_v28, %v6375_v52  ;;  %v13969_v33 = vcombine.low %v6372_v10, %v6376_v27  ;;  %v17634_v52 = vld [vmem:[#allocation12 + $0xc0] ss:$16 sps:$4 sm:$0xff]   ;;  %v17640_v27 = vld [vmem:[#allocation12 + $0xa4] ss:$16 sps:$4 sm:$0xff]  }
 0x938   :  { %v13962_v35 = vcombine.high %v6364_v13, %v6368_v45  ;;  %v17628_v28 = vld [vmem:[#allocation12 + $0xcc] ss:$16 sps:$4 sm:$0xff]   ;;  %v17636_v10 = vld [vmem:[#allocation12 + $0xc8] ss:$16 sps:$4 sm:$0xff]  }
 0x93a   :  { %7198 = vmatpush1.bf16.msra.mxu0 %v13895_v56  ;;  %7241 = vmatpush1.bf16.msra.mxu1 %v13897_v12  ;;  %v6356_v56 = vld [vmem:[#allocation9 + $0x218] sm:$0xff] }
 0x93b   :  { %7199 = vmatprep.subr.bf16.mxu0 %v13888_v49  ;;  %7242 = vmatprep.subr.bf16.mxu1 %v13890_v0  ;;  %v6360_v12 = vld [vmem:[#allocation9 + $0x238] sm:$0xff]  ;;  %v13959_v49 = vcombine.low %v6363_v39, %v6367_v9  ;;  %v13961_v0 = vcombine.low %v6364_v13, %v6368_v45  ;;  %v17660_v9 = vld [vmem:[#allocation12 + $0x80] ss:$16 sps:$4 sm:$0xff]   ;;  %v17666_v45 = vld [vmem:[#allocation12 + $0x64] ss:$16 sps:$4 sm:$0xff]  }
 0x93c   :  { %v13954_v54 = vcombine.high %v6356_v56, %v6360_v12  ;;  %v13953_v58 = vcombine.low %v6356_v56, %v6360_v12  ;;  %v17656_v39 = vld [vmem:[#allocation12 + $0x8c] ss:$16 sps:$4 sm:$0xff]   ;;  %v17662_v13 = vld [vmem:[#allocation12 + $0x88] ss:$16 sps:$4 sm:$0xff]   ;;  %v17690_v12 = vld [vmem:[#allocation12 + $0x24] ss:$16 sps:$4 sm:$0xff]  }
 0x93d   :  { %v17686_v56 = vld [vmem:[#allocation12 + $0x48] ss:$16 sps:$4 sm:$0xff]  }
 0x93e   :  { %7200 = vmatpush1.bf16.msra.mxu0 %v13887_v16  ;;  %7243 = vmatpush1.bf16.msra.mxu1 %v13889_v40  ;;  %v17516_v16 = vld [vmem:[#allocation11 + $0xe4] ss:$16 sps:$4 sm:$0xff]   ;;  %v17518_v40 = vld [vmem:[#allocation11 + $0xec] ss:$16 sps:$4 sm:$0xff]  }
 0x93f   :  { %7201 = vmatprep.subr.bf16.mxu0 %v14008_v59  ;;  %7244 = vmatprep.subr.bf16.mxu1 %v14010_v15  ;;  %v17520_v59 = vld [vmem:[#allocation11 + $0xe0] ss:$16 sps:$4 sm:$0xff]   ;;  %v17522_v15 = vld [vmem:[#allocation11 + $0xe8] ss:$16 sps:$4 sm:$0xff]  }
 0x942   :  { %7202 = vmatpush2.bf16.msra.mxu0 %v14007_v5  ;;  %7245 = vmatpush2.bf16.msra.mxu1 %v14009_v6  ;;  %v17540_v5 = vld [vmem:[#allocation11 + $0xa4] ss:$16 sps:$4 sm:$0xff]   ;;  %v17542_v6 = vld [vmem:[#allocation11 + $0xac] ss:$16 sps:$4 sm:$0xff]  }
 0x943   :  { %7203 = vmatprep.subr.bf16.mxu0 %v14000_v7  ;;  %7246 = vmatprep.subr.bf16.mxu1 %v14002_v46  ;;  %v17550_v7 = vld [vmem:[#allocation11 + $0xa8] ss:$16 sps:$4 sm:$0xff]   ;;  %v17554_v46 = vld [vmem:[#allocation11 + $0x84] ss:$16 sps:$4 sm:$0xff]  }
 0x946   :  { %7204 = vmatpush2.bf16.msra.mxu0 %v13999_v53  ;;  %7247 = vmatpush2.bf16.msra.mxu1 %v14001_v3  ;;  %v17568_v53 = vld [vmem:[#allocation11 + $0x6c] ss:$16 sps:$4 sm:$0xff]   ;;  %v17572_v3 = vld [vmem:[#allocation11 + $0x60] ss:$16 sps:$4 sm:$0xff]  }
 0x947   :  { %7205 = vmatprep.subr.bf16.mxu0 %v13992_v18  ;;  %7248 = vmatprep.subr.bf16.mxu1 %v13994_v57  ;;  %v17574_v18 = vld [vmem:[#allocation11 + $0x68] ss:$16 sps:$4 sm:$0xff]   ;;  %v17578_v57 = vld [vmem:[#allocation11 + $0x44] ss:$16 sps:$4 sm:$0xff]  }
 0x94a   :  { %7206 = vmatpush2.bf16.msra.mxu0 %v13991_v24  ;;  %7249 = vmatpush2.bf16.msra.mxu1 %v13993_v25  ;;  %v17592_v24 = vld [vmem:[#allocation11 + $0x2c] ss:$16 sps:$4 sm:$0xff]   ;;  %v17596_v25 = vld [vmem:[#allocation11 + $0x20] ss:$16 sps:$4 sm:$0xff]  }
 0x94b   :  { %7207 = vmatprep.subr.bf16.mxu0 %v13984_v41  ;;  %7250 = vmatprep.subr.bf16.mxu1 %v13986_v47  ;;  %v17598_v41 = vld [vmem:[#allocation11 + $0x28] ss:$16 sps:$4 sm:$0xff]   ;;  %v17602_v47 = vld [vmem:[#allocation11 + $0x4] ss:$16 sps:$4 sm:$0xff]  }
 0x94e   :  { %7208 = vmatpush2.bf16.msra.mxu0 %v13983_v55  ;;  %7251 = vmatpush2.bf16.msra.mxu1 %v13985_v61  ;;  %v17616_v55 = vld [vmem:[#allocation12 + $0xec] ss:$16 sps:$4 sm:$0xff]   ;;  %v17620_v61 = vld [vmem:[#allocation12 + $0xe0] ss:$16 sps:$4 sm:$0xff]  }
 0x94f   :  { %7209 = vmatprep.subr.bf16.mxu0 %v13976_v8  ;;  %7252 = vmatprep.subr.bf16.mxu1 %v13978_v30  ;;  %v17622_v8 = vld [vmem:[#allocation12 + $0xe8] ss:$16 sps:$4 sm:$0xff]   ;;  %v17626_v30 = vld [vmem:[#allocation12 + $0xc4] ss:$16 sps:$4 sm:$0xff]  }
 0x952   :  { %7210 = vmatpush2.bf16.msra.mxu0 %v13975_v43  ;;  %7253 = vmatpush2.bf16.msra.mxu1 %v13977_v50  ;;  %v17642_v43 = vld [vmem:[#allocation12 + $0xac] ss:$16 sps:$4 sm:$0xff]   ;;  %v17648_v50 = vld [vmem:[#allocation12 + $0xa0] ss:$16 sps:$4 sm:$0xff]  }
 0x953   :  { %7211 = vmatprep.subr.bf16.mxu0 %v13968_v60  ;;  %7254 = vmatprep.subr.bf16.mxu1 %v13970_v44  ;;  %v17650_v60 = vld [vmem:[#allocation12 + $0xa8] ss:$16 sps:$4 sm:$0xff]   ;;  %v17654_v44 = vld [vmem:[#allocation12 + $0x84] ss:$16 sps:$4 sm:$0xff]  }
 0x956   :  { %7212 = vmatpush2.bf16.msra.mxu0 %v13967_v32  ;;  %7255 = vmatpush2.bf16.msra.mxu1 %v13969_v33  ;;  %v17668_v32 = vld [vmem:[#allocation12 + $0x6c] ss:$16 sps:$4 sm:$0xff]   ;;  %v17672_v33 = vld [vmem:[#allocation12 + $0x60] ss:$16 sps:$4 sm:$0xff]  }
 0x957   :  { %7213 = vmatprep.subr.bf16.mxu0 %v13960_v34  ;;  %7256 = vmatprep.subr.bf16.mxu1 %v13962_v35  ;;  %v17674_v34 = vld [vmem:[#allocation12 + $0x68] ss:$16 sps:$4 sm:$0xff]   ;;  %v17678_v35 = vld [vmem:[#allocation12 + $0x44] ss:$16 sps:$4 sm:$0xff]  }
 0x95a   :  { %7214 = vmatpush2.bf16.msra.mxu0 %v13959_v49  ;;  %7257 = vmatpush2.bf16.msra.mxu1 %v13961_v0  ;;  %v17692_v49 = vld [vmem:[#allocation12 + $0x2c] ss:$16 sps:$4 sm:$0xff]   ;;  %v17696_v0 = vld [vmem:[#allocation12 + $0x20] ss:$16 sps:$4 sm:$0xff]  }
 0x95b   :  { %7215 = vmatprep.subr.bf16.mxu0 %v13952_v51  ;;  %7258 = vmatprep.subr.bf16.mxu1 %v13954_v54  ;;  %v17698_v51 = vld [vmem:[#allocation12 + $0x28] ss:$16 sps:$4 sm:$0xff]   ;;  %v17702_v54 = vld [vmem:[#allocation12 + $0x4] ss:$16 sps:$4 sm:$0xff]  }
 0x95e   :  { %7216 = vmatpush2.bf16.msra.mxu0 %v13951_v2  ;;  %7259 = vmatpush2.bf16.msra.mxu1 %v13953_v58  ;;  %v17704_v2 = vld [vmem:[#allocation12 + $0xc] ss:$16 sps:$4 sm:$0xff]   ;;  %v17708_v58 = vld [vmem:[#allocation12] ss:$16 sps:$4 sm:$0xff]  }
 0x95f   :  { %7483 = vmatprep.subr.bf16.mxu0 %v17516_v16  ;;  %7524 = vmatprep.subr.bf16.mxu1 %v17518_v40 }
 0x961   :  { %7218 = vmatmul.mubr.bf16.vlgmr.msra.gmra.mxu0 %v17506_v4  ;;  %7261 = vmatmul.mubr.bf16.vlgmr.msra.gmra.mxu1 %v17506_v4  ;;  %v17548_v4 = vld [vmem:[#allocation11 + $0xa0] ss:$16 sps:$4 sm:$0xff]  }
 0x962   :  { %7484 = vmatpush1.bf16.msra.mxu0 %v17520_v59  ;;  %7525 = vmatpush1.bf16.msra.mxu1 %v17522_v15 }
 0x963   :  { %7485 = vmatprep.subr.bf16.mxu0 %v17526_v42  ;;  %7526 = vmatprep.subr.bf16.mxu1 %v17528_v17 }
 0x964   :  { %7515 = vmatprep.mubr.bf16.mxu0 %v18781_v63  ;;  %7556 = vmatprep.mubr.bf16.mxu1 %v18781_v63 }
 0x966   :  { %7486 = vmatpush1.bf16.msra.mxu0 %v17534_v38  ;;  %7527 = vmatpush1.bf16.msra.mxu1 %v17536_v21 }
 0x967   :  { %7487 = vmatprep.subr.bf16.mxu0 %v17540_v5  ;;  %7528 = vmatprep.subr.bf16.mxu1 %v17542_v6 }
 0x96a   :  { %7488 = vmatpush1.bf16.msra.mxu0 %v17548_v4  ;;  %7529 = vmatpush1.bf16.msra.mxu1 %v17550_v7 }
 0x96b   :  { %7489 = vmatprep.subr.bf16.mxu0 %v17554_v46  ;;  %7530 = vmatprep.subr.bf16.mxu1 %v17556_v31 }
 0x96e   :  { %7490 = vmatpush1.bf16.msra.mxu0 %v17560_v14  ;;  %7531 = vmatpush1.bf16.msra.mxu1 %v17562_v62 }
 0x96f   :  { %7491 = vmatprep.subr.bf16.mxu0 %v17566_v1  ;;  %7532 = vmatprep.subr.bf16.mxu1 %v17568_v53 }
 0x972   :  { %7492 = vmatpush1.bf16.msra.mxu0 %v17572_v3  ;;  %7533 = vmatpush1.bf16.msra.mxu1 %v17574_v18 }
 0x973   :  { %7493 = vmatprep.subr.bf16.mxu0 %v17578_v57  ;;  %7534 = vmatprep.subr.bf16.mxu1 %v17580_v37 }
 0x976   :  { %7494 = vmatpush1.bf16.msra.mxu0 %v17584_v22  ;;  %7535 = vmatpush1.bf16.msra.mxu1 %v17586_v19 }
 0x977   :  { %7495 = vmatprep.subr.bf16.mxu0 %v17590_v23  ;;  %7536 = vmatprep.subr.bf16.mxu1 %v17592_v24 }
 0x97a   :  { %7496 = vmatpush1.bf16.msra.mxu0 %v17596_v25  ;;  %7537 = vmatpush1.bf16.msra.mxu1 %v17598_v41 }
 0x97b   :  { %7497 = vmatprep.subr.bf16.mxu0 %v17602_v47  ;;  %7538 = vmatprep.subr.bf16.mxu1 %v17604_v26 }
 0x97e   :  { %7498 = vmatpush1.bf16.msra.mxu0 %v17608_v11  ;;  %7539 = vmatpush1.bf16.msra.mxu1 %v17610_v29 }
 0x97f   :  { %7765 = vmatprep.subr.bf16.mxu0 %v17614_v20  ;;  %7806 = vmatprep.subr.bf16.mxu1 %v17616_v55 }
 0x981   :  { %7516 = vmatmul.mubr.bf16.vlgmr.msra.gmra.mxu0 %v18781_v63  ;;  %7557 = vmatmul.mubr.bf16.vlgmr.msra.gmra.mxu1 %v18781_v63 }
 0x982   :  { %7766 = vmatpush1.bf16.msra.mxu0 %v17620_v61  ;;  %7807 = vmatpush1.bf16.msra.mxu1 %v17622_v8 }
 0x983   :  { %7767 = vmatprep.subr.bf16.mxu0 %v17626_v30  ;;  %7808 = vmatprep.subr.bf16.mxu1 %v17628_v28 }
 0x984   :  { %7797 = vmatprep.mubr.bf16.mxu0 %v18781_v63  ;;  %7838 = vmatprep.mubr.bf16.mxu1 %v18781_v63 }
 0x986   :  { %7768 = vmatpush1.bf16.msra.mxu0 %v17634_v52  ;;  %7809 = vmatpush1.bf16.msra.mxu1 %v17636_v10 }
 0x987   :  { %7769 = vmatprep.subr.bf16.mxu0 %v17640_v27  ;;  %7810 = vmatprep.subr.bf16.mxu1 %v17642_v43 }
 0x98a   :  { %7770 = vmatpush1.bf16.msra.mxu0 %v17648_v50  ;;  %7811 = vmatpush1.bf16.msra.mxu1 %v17650_v60 }
 0x98b   :  { %7771 = vmatprep.subr.bf16.mxu0 %v17654_v44  ;;  %7812 = vmatprep.subr.bf16.mxu1 %v17656_v39 }
 0x98e   :  { %7772 = vmatpush1.bf16.msra.mxu0 %v17660_v9  ;;  %7813 = vmatpush1.bf16.msra.mxu1 %v17662_v13 }
 0x98f   :  { %7773 = vmatprep.subr.bf16.mxu0 %v17666_v45  ;;  %7814 = vmatprep.subr.bf16.mxu1 %v17668_v32 }
 0x992   :  { %7774 = vmatpush1.bf16.msra.mxu0 %v17672_v33  ;;  %7815 = vmatpush1.bf16.msra.mxu1 %v17674_v34 }
 0x993   :  { %7775 = vmatprep.subr.bf16.mxu0 %v17678_v35  ;;  %7816 = vmatprep.subr.bf16.mxu1 %v17680_v36 }
 0x996   :  { %7776 = vmatpush1.bf16.msra.mxu0 %v17684_v48  ;;  %7817 = vmatpush1.bf16.msra.mxu1 %v17686_v56  ;;  %v17710_v48 = vld [vmem:[#allocation12 + $0x8] ss:$16 sps:$4 sm:$0xff]  }
 0x997   :  { %7777 = vmatprep.subr.bf16.mxu0 %v17690_v12  ;;  %7818 = vmatprep.subr.bf16.mxu1 %v17692_v49 }
 0x99a   :  { %7778 = vmatpush1.bf16.msra.mxu0 %v17696_v0  ;;  %7819 = vmatpush1.bf16.msra.mxu1 %v17698_v51 }
 0x99b   :  { %7779 = vmatprep.subr.bf16.mxu0 %v17702_v54  ;;  %7820 = vmatprep.subr.bf16.mxu1 %v17704_v2 }
 0x99e   :  { %7780 = vmatpush1.bf16.msra.mxu0 %v17708_v58  ;;  %7821 = vmatpush1.bf16.msra.mxu1 %v17710_v48 }
 0x99f   :  { %8110 = vmatprep.subr.bf16.mxu0 %v17516_v16  ;;  %8151 = vmatprep.subr.bf16.mxu1 %v17518_v40  ;;  %v6417_v16 = vld [vmem:[%s18703_s6] sm:$0xff]  ;;  %v18829_v40 = vld [vmem:[#allocation22_spill] sm:$0xff] }
 0x9a1   :  { %7798 = vmatmul.mubr.bf16.vlgmr.msra.gmra.mxu0 %v18781_v63  ;;  %7839 = vmatmul.mubr.bf16.vlgmr.msra.gmra.mxu1 %v18781_v63 }
 0x9a2   :  { %8111 = vmatpush1.bf16.msra.mxu0 %v17520_v59  ;;  %8152 = vmatpush1.bf16.msra.mxu1 %v17522_v15  ;;  %v6422_v59 = vrot.slane %v6417_v16, %v18829_v40  ;;  %v18830_v15 = vld [vmem:[#allocation20_spill] sm:$0xff]  ;;  %v17968_v40 = vld [vmem:[#allocation12 + $0x44] ss:$16 sps:$4 sm:$0xff]  }
 0x9a3   :  { %8112 = vmatprep.subr.bf16.mxu0 %v17526_v42  ;;  %8153 = vmatprep.subr.bf16.mxu1 %v17528_v17  ;;  %v6430_v42 = vrot.slane %v6417_v16, %v18830_v15  ;;  %v18831_v17 = vld [vmem:[#allocation23_spill] sm:$0xff]  ;;  %v17964_v15 = vld [vmem:[#allocation12 + $0x68] ss:$16 sps:$4 sm:$0xff]  }
 0x9a4   :  { %8142 = vmatprep.mubr.bf16.mxu0 %v18781_v63  ;;  %8183 = vmatprep.mubr.bf16.mxu1 %v18781_v63 }
 0x9a6   :  { %8113 = vmatpush1.bf16.msra.mxu0 %v17534_v38  ;;  %8154 = vmatpush1.bf16.msra.mxu1 %v17536_v21  ;;  %v6426_v38 = vrot.slane %v6417_v16, %v18831_v17  ;;  %v18832_v21 = vld [vmem:[#allocation21_spill] sm:$0xff] }
 0x9a7   :  { %8114 = vmatprep.subr.bf16.mxu0 %v17540_v5  ;;  %8155 = vmatprep.subr.bf16.mxu1 %v17542_v6  ;;  %v6434_v5 = vrot.slane %v6417_v16, %v18832_v21  ;;  %v17962_v17 = vld [vmem:[#allocation12 + $0x60] ss:$16 sps:$4 sm:$0xff]  }
 0x9aa   :  { %8115 = vmatpush1.bf16.msra.mxu0 %v17548_v4  ;;  %8156 = vmatpush1.bf16.msra.mxu1 %v17550_v7 }
 0x9ab   :  { %8116 = vmatprep.subr.bf16.mxu0 %v17554_v46  ;;  %8157 = vmatprep.subr.bf16.mxu1 %v17556_v31 }
 0x9ae   :  { %8117 = vmatpush1.bf16.msra.mxu0 %v17560_v14  ;;  %8158 = vmatpush1.bf16.msra.mxu1 %v17562_v62 }
 0x9af   :  { %8118 = vmatprep.subr.bf16.mxu0 %v17566_v1  ;;  %8159 = vmatprep.subr.bf16.mxu1 %v17568_v53 }
 0x9b2   :  { %8119 = vmatpush1.bf16.msra.mxu0 %v17572_v3  ;;  %8160 = vmatpush1.bf16.msra.mxu1 %v17574_v18 }
 0x9b3   :  { %8120 = vmatprep.subr.bf16.mxu0 %v17578_v57  ;;  %8161 = vmatprep.subr.bf16.mxu1 %v17580_v37 }
 0x9b6   :  { %8121 = vmatpush1.bf16.msra.mxu0 %v17584_v22  ;;  %8162 = vmatpush1.bf16.msra.mxu1 %v17586_v19 }
 0x9b7   :  { %8122 = vmatprep.subr.bf16.mxu0 %v17590_v23  ;;  %8163 = vmatprep.subr.bf16.mxu1 %v17592_v24  ;;  %v18833_v24 = vld [vmem:[#allocation24_spill] sm:$0xff] }
 0x9ba   :  { %8123 = vmatpush1.bf16.msra.mxu0 %v17596_v25  ;;  %8164 = vmatpush1.bf16.msra.mxu1 %v17598_v41  ;;  %v6438_v25 = vrot.slane %v6417_v16, %v18833_v24  ;;  %v18834_v41 = vld [vmem:[#allocation19_spill] sm:$0xff] }
 0x9bb   :  { %8124 = vmatprep.subr.bf16.mxu0 %v17602_v47  ;;  %8165 = vmatprep.subr.bf16.mxu1 %v17604_v26  ;;  %v18835_v47 = vsub.s32 6, %v18834_v41 }
 0x9bd   :  { %v6446_v26 = vrot.slane %v6417_v16, %v18835_v47 }
 0x9be   :  { %8125 = vmatpush1.bf16.msra.mxu0 %v17608_v11  ;;  %8166 = vmatpush1.bf16.msra.mxu1 %v17610_v29  ;;  %v18836_v11 = vld [vmem:[#allocation25_spill] sm:$0xff] }
 0x9bf   :  { %8408 = vmatprep.subr.bf16.mxu0 %v17614_v20  ;;  %8449 = vmatprep.subr.bf16.mxu1 %v17616_v55  ;;  %v6442_v29 = vrot.slane %v6417_v16, %v18836_v11  ;;  %v18837_v20 = vsub.s32 7, %v18834_v41 }
 0x9c1   :  { %v6450_v55 = vrot.slane %v6417_v16, %v18837_v20 }
 0x9e1   :  { %v7133_v6 = vpop.f32.mrf.mxu0  ;;  %v7176_v4 = vpop.f32.mrf.mxu1 }
 0x9e2   :  { %v7134_v7 = vadd.f32 %v7133_v6, %v6422_v59  ;;  %v7177_v46 = vadd.f32 %v7176_v4, %v6430_v42 }
 0x9e3   :  { %v7135_v31 = vpop.f32.mrf.mxu0  ;;  %v7178_v14 = vpop.f32.mrf.mxu1 }
 0x9e4   :  { %7271 = vst [vmem:[#allocation2 + $0x30] sm:$0xff] %v7134_v7  ;;  %7273 = vst [vmem:[#allocation2 + $0x58] sm:$0xff] %v7177_v46  ;;  %v7136_v62 = vadd.f32 %v7135_v31, %v6426_v38  ;;  %v7179_v1 = vadd.f32 %v7178_v14, %v6434_v5 }
 0x9e5   :  { %v7137_v53 = vpop.f32.mrf.mxu0  ;;  %v7180_v3 = vpop.f32.mrf.mxu1 }
 0x9e6   :  { %7272 = vst [vmem:[#allocation2] sm:$0xff] %v7136_v62  ;;  %7274 = vst [vmem:[#allocation2 + $0x18] sm:$0xff] %v7179_v1  ;;  %v7138_v18 = vadd.f32 %v7137_v53, %v6422_v59  ;;  %v7181_v57 = vadd.f32 %v7180_v3, %v6430_v42 }
 0x9e7   :  { %v7139_v37 = vpop.f32.mrf.mxu0  ;;  %v7182_v22 = vpop.f32.mrf.mxu1 }
 0x9e8   :  { %7279 = vst [vmem:[#allocation2 + $0x40] sm:$0xff] %v7138_v18  ;;  %7281 = vst [vmem:[#allocation2 + $0x10] sm:$0xff] %v7181_v57  ;;  %v7140_v19 = vadd.f32 %v7139_v37, %v6426_v38  ;;  %v7183_v23 = vadd.f32 %v7182_v22, %v6434_v5 }
 0x9ea   :  { %7280 = vst [vmem:[#allocation2 + $0x20] sm:$0xff] %v7140_v19  ;;  %7282 = vst [vmem:[#allocation2 + $0x38] sm:$0xff] %v7183_v23 }
 0x9eb   :  { %v7287_v57 = vld [vmem:[#allocation2 + $0x30] sm:$0x3] }
 0x9ed   :  { %v7288_v23 = vld [vmem:[#allocation2] sm:$0x3] }
 0xa21   :  { %v7219_v59 = vpop.f32.mrf.mxu0  ;;  %v7262_v42 = vpop.f32.mrf.mxu1 }
 0xa22   :  { %v7220_v6 = vadd.f32 %v7219_v59, %v6438_v25  ;;  %v7263_v4 = vadd.f32 %v7262_v42, %v6446_v26 }
 0xa23   :  { %v7221_v7 = vpop.f32.mrf.mxu0  ;;  %v7264_v46 = vpop.f32.mrf.mxu1 }
 0xa24   :  { %7275 = vst [vmem:[#allocation2 + $0x50] sm:$0xff] %v7220_v6  ;;  %7277 = vst [vmem:[#allocation2 + $0x8] sm:$0xff] %v7263_v4  ;;  %v7222_v38 = vadd.f32 %v7221_v7, %v6442_v29  ;;  %v7265_v5 = vadd.f32 %v7264_v46, %v6450_v55  ;;  %v7289_v46 = vld [vmem:[#allocation2 + $0x58] sm:$0x3] }
 0xa25   :  { %v7223_v31 = vpop.f32.mrf.mxu0  ;;  %v7266_v14 = vpop.f32.mrf.mxu1 }
 0xa26   :  { %7276 = vst [vmem:[#allocation2 + $0x68] sm:$0xff] %v7222_v38  ;;  %7278 = vst [vmem:[#allocation2 + $0x48] sm:$0xff] %v7265_v5  ;;  %v7224_v62 = vadd.f32 %v7223_v31, %v6438_v25  ;;  %v7267_v1 = vadd.f32 %v7266_v14, %v6446_v26 }
 0xa27   :  { %v7225_v53 = vpop.f32.mrf.mxu0  ;;  %v7268_v3 = vpop.f32.mrf.mxu1 }
 0xa28   :  { %7283 = vst [vmem:[#allocation2 + $0x60] sm:$0xff] %v7224_v62  ;;  %7285 = vst [vmem:[#allocation2 + $0x78] sm:$0xff] %v7267_v1  ;;  %v7226_v16 = vadd.f32 %v7225_v53, %v6442_v29  ;;  %v7269_v18 = vadd.f32 %v7268_v3, %v6450_v55  ;;  %v7290_v29 = vld [vmem:[#allocation2 + $0x18] sm:$0x3] }
 0xa2a   :  { %7284 = vst [vmem:[#allocation2 + $0x70] sm:$0xff] %v7226_v16  ;;  %7286 = vst [vmem:[#allocation2 + $0x28] sm:$0xff] %v7269_v18 }
 0xa41   :  { %v7517_v37 = vpop.f32.mrf.mxu0  ;;  %v7558_v22 = vpop.f32.mrf.mxu1 }
 0xa42   :  { %v7565_v19 = vadd.f32 %v7517_v37, %v7287_v57  ;;  %v7567_v5 = vadd.f32 %v7558_v22, %v7289_v46  ;;  %v7569_v57 = vld [vmem:[#allocation2 + $0x60] sm:$0xc0] }
 0xa43   :  { %v7519_v41 = vpop.f32.mrf.mxu0  ;;  %v7560_v47 = vpop.f32.mrf.mxu1 }
 0xa44   :  { %v14075_v20 = vmul.f32 -1.442695, %v7565_v19  ;;  %v7566_v59 = vadd.f32 %v7519_v41, %v7288_v23  ;;  %v7568_v55 = vadd.f32 %v7560_v47, %v7290_v29 }
 0xa45   :  { %v7521_v42 = vpop.f32.mrf.mxu0  ;;  %v7562_v25 = vpop.f32.mrf.mxu1 }
 0xa46   :  { %15849 = vpow2.f32 %v14075_v20  ;;  %v14076_v26 = vmul.f32 -1.442695, %v7566_v59  ;;  %v14077_v7 = vmul.f32 -1.442695, %v7568_v55  ;;  %v7570_v59 = vld [vmem:[#allocation2 + $0x70] sm:$0xc0] }
 0xa47   :  { %v7522_v6 = vpop.f32.mrf.mxu0  ;;  %v7563_v4 = vpop.f32.mrf.mxu1 }
 0xa48   :  { %15851 = vpow2.f32 %v14076_v26 }
 0xa49   :  { %15853 = vpow2.f32 %v14077_v7 }
 0xa53   :  { %v15850_v38 = vpop.eup %15849 }
 0xa54   :  { %v7866_v31 = vadd.f32 1.0, %v15850_v38 }
 0xa55   :  { %v15852_v14 = vpop.eup %15851 }
 0xa56   :  { %15855 = vrcp.f32 %v7866_v31  ;;  %v7872_v62 = vadd.f32 1.0, %v15852_v14  ;;  %v15854_v3 = vpop.eup %15853  ;;  %v7572_v31 = vld [vmem:[#allocation2 + $0x28] sm:$0xc0] }
 0xa57   :  { %15857 = vtanh.f32 %v7567_v5  ;;  %v7879_v22 = vadd.f32 1.0, %v15854_v3 }
 0xa58   :  { %15859 = vrcp.f32 %v7872_v62 }
 0xa61   :  { %v7799_v1 = vpop.f32.mrf.mxu0  ;;  %v7840_v53 = vpop.f32.mrf.mxu1 }
 0xa62   :  { %v7851_v16 = vrot.slane %v7799_v1, 2  ;;  %v7853_v62 = vrot.slane %v7840_v53, 2 }
 0xa63   :  { %v15856_v18 = vpop.eup %15855  ;;  %v7801_v37 = vpop.f32.mrf.mxu0 }
 0xa64   :  { %v7842_v19 = vpop.f32.mrf.mxu1  ;;  %v15858_v23 = vpop.eup %15857  ;;  %v7859_v41 = vadd.f32 %v7851_v16, %v7569_v57  ;;  %v7852_v47 = vrot.slane %v7801_v37, 2  ;;  %v7571_v16 = vld [vmem:[#allocation2 + $0x78] sm:$0xc0] }
 0xa65   :  { %v15860_v20 = vpop.eup %15859  ;;  %v7803_v42 = vpop.f32.mrf.mxu0  ;;  %v7883_v6 = vmul.f32 %v15858_v23, %v15856_v18  ;;  %v7854_v5 = vrot.slane %v7842_v19, 2  ;;  %v7861_v37 = vadd.f32 %v7853_v62, %v7571_v16  ;;  %v17895_v62 = vld [vmem:[#allocation11] ss:$16 sps:$4 sm:$0xff]   ;;  %v17905_v16 = vld [vmem:[#allocation12 + $0xec] ss:$16 sps:$4 sm:$0xff]  }
 0xa66   :  { %v7844_v25 = vpop.f32.mrf.mxu1  ;;  %v7882_v26 = vmul.f32 0.0, %v15860_v20  ;;  %v14078_v4 = vmul.f32 -1.442695, %v7859_v41  ;;  %v7860_v29 = vadd.f32 %v7852_v47, %v7570_v59  ;;  %v17857_v59 = vld [vmem:[#allocation11 + $0x6c] ss:$16 sps:$4 sm:$0xff]  }
 0xa67   :  { %v7804_v55 = vpop.f32.mrf.mxu0  ;;  %v7862_v14 = vadd.f32 %v7854_v5, %v7572_v31  ;;  %v17859_v42 = vld [vmem:[#allocation11 + $0x60] ss:$16 sps:$4 sm:$0xff]   ;;  %v17861_v25 = vld [vmem:[#allocation11 + $0x68] ss:$16 sps:$4 sm:$0xff]   ;;  %v17891_v31 = vld [vmem:[#allocation11 + $0x4] ss:$16 sps:$4 sm:$0xff]  }
 0xa68   :  { %v7845_v7 = vpop.f32.mrf.mxu1  ;;  %v17767_v46 = vadd.f32 %v7883_v6, %v7882_v26  ;;  %15861 = vpow2.f32 %v14078_v4  ;;  %v14079_v38 = vmul.f32 -1.442695, %v7860_v29  ;;  %v17867_v26 = vld [vmem:[#allocation11 + $0x44] ss:$16 sps:$4 sm:$0xff]   ;;  %v17869_v6 = vld [vmem:[#allocation11 + $0x4c] ss:$16 sps:$4 sm:$0xff]  }
 0xa69   :  { %15863 = vrcp.f32 %v7879_v22  ;;  %v14080_v1 = vmul.f32 -1.442695, %v7862_v14  ;;  %v17871_v4 = vld [vmem:[#allocation11 + $0x40] ss:$16 sps:$4 sm:$0xff]   ;;  %v17873_v29 = vld [vmem:[#allocation11 + $0x48] ss:$16 sps:$4 sm:$0xff]  }
 0xa6a   :  { %15865 = vtanh.f32 %v17767_v46  ;;  %v17879_v55 = vld [vmem:[#allocation11 + $0x24] ss:$16 sps:$4 sm:$0xff]   ;;  %v17881_v7 = vld [vmem:[#allocation11 + $0x2c] ss:$16 sps:$4 sm:$0xff]   ;;  %v17885_v5 = vld [vmem:[#allocation11 + $0x28] ss:$16 sps:$4 sm:$0xff]  }
 0xa6b   :  { %15867 = vpow2.f32 %v14079_v38  ;;  %v17883_v38 = vld [vmem:[#allocation11 + $0x20] ss:$16 sps:$4 sm:$0xff]   ;;  %v17893_v14 = vld [vmem:[#allocation11 + $0xc] ss:$16 sps:$4 sm:$0xff]  }
 0xa6c   :  { %15869 = vpow2.f32 %v14080_v1  ;;  %v17897_v1 = vld [vmem:[#allocation11 + $0x8] ss:$16 sps:$4 sm:$0xff]  }
 0xa75   :  { %v15862_v3 = vpop.eup %15861 }
 0xa76   :  { %v15864_v18 = vpop.eup %15863  ;;  %v7890_v57 = vadd.f32 1.0, %v15862_v3  ;;  %v17903_v3 = vld [vmem:[#allocation12 + $0xe4] ss:$16 sps:$4 sm:$0xff]  }
 0xa77   :  { %v15866_v23 = vpop.eup %15865 }
 0xa78   :  { %v15868_v41 = vpop.eup %15867  ;;  %v7886_v47 = vmul.f32 %v15866_v23, %v15864_v18  ;;  %15871 = vrcp.f32 %v7890_v57  ;;  %v7913_v23 = vld [vmem:[#allocation2 + $0x30] sm:$0xc] }
 0xa79   :  { %v7896_v20 = vadd.f32 1.0, %v15868_v41  ;;  %15873 = vtanh.f32 %v7861_v37  ;;  %v15870_v53 = vpop.eup %15869 }
 0xa7a   :  { %7911 = vst [vmem:[#allocation3 + $0x18] sm:$0x3] %v7886_v47  ;;  %v7917_v22 = vpack.c.bf16 %v7886_v47, %v7886_v47 }
 0xa7b   :  { %15875 = vrcp.f32 %v7896_v20 }
 0xa7c   :  { %8143 = vmatmul.mubr.bf16.vlgmr.msra.gmra.mxu0 %v7917_v22  ;;  %8184 = vmatmul.mubr.bf16.vlgmr.msra.gmra.mxu1 %v7917_v22 }
 0xa7d   :  { %8409 = vmatpush1.bf16.msra.mxu0 %v17620_v61  ;;  %8450 = vmatpush1.bf16.msra.mxu1 %v17622_v8 }
 0xa7e   :  { %8410 = vmatprep.subr.bf16.mxu0 %v17626_v30  ;;  %8451 = vmatprep.subr.bf16.mxu1 %v17628_v28  ;;  %v7903_v28 = vadd.f32 1.0, %v15870_v53  ;;  %v7914_v53 = vld [vmem:[#allocation2] sm:$0xc] }
 0xa7f   :  { %8440 = vmatprep.mubr.bf16.mxu0 %v18781_v63  ;;  %8481 = vmatprep.mubr.bf16.mxu1 %v18781_v63 }
 0xa80   :  { %15877 = vrcp.f32 %v7903_v28 }
 0xa81   :  { %8411 = vmatpush1.bf16.msra.mxu0 %v17634_v52  ;;  %8452 = vmatpush1.bf16.msra.mxu1 %v17636_v10 }
 0xa82   :  { %8412 = vmatprep.subr.bf16.mxu0 %v17640_v27  ;;  %8453 = vmatprep.subr.bf16.mxu1 %v17642_v43  ;;  %v18838_v27 = vld [vmem:[#allocation33_spill] sm:$0xff] }
 0xa85   :  { %8413 = vmatpush1.bf16.msra.mxu0 %v17648_v50  ;;  %8454 = vmatpush1.bf16.msra.mxu1 %v17650_v60  ;;  %v15872_v61 = vpop.eup %15871 }
 0xa86   :  { %8414 = vmatprep.subr.bf16.mxu0 %v17654_v44  ;;  %8455 = vmatprep.subr.bf16.mxu1 %v17656_v39  ;;  %v15874_v8 = vpop.eup %15873 }
 0xa87   :  { %v7907_v19 = vmul.f32 %v15874_v8, %v15872_v61 }
 0xa88   :  { %v15876_v30 = vpop.eup %15875 }
 0xa89   :  { %v7906_v52 = vmul.f32 0.0, %v15876_v30  ;;  %8415 = vmatpush1.bf16.msra.mxu0 %v17660_v9  ;;  %8456 = vmatpush1.bf16.msra.mxu1 %v17662_v13  ;;  %v17807_v9 = vld [vmem:[#allocation11 + $0xe4] ss:$16 sps:$4 sm:$0xff]   ;;  %v17809_v13 = vld [vmem:[#allocation11 + $0xec] ss:$16 sps:$4 sm:$0xff]  }
 0xa8a   :  { %8416 = vmatprep.subr.bf16.mxu0 %v17666_v45  ;;  %8457 = vmatprep.subr.bf16.mxu1 %v17668_v32  ;;  %v17811_v45 = vld [vmem:[#allocation11 + $0xe0] ss:$16 sps:$4 sm:$0xff]   ;;  %v17813_v32 = vld [vmem:[#allocation11 + $0xe8] ss:$16 sps:$4 sm:$0xff]  }
 0xa8b   :  { %v17788_v10 = vadd.f32 %v7907_v19, %v7906_v52 }
 0xa8d   :  { %15879 = vtanh.f32 %v17788_v10  ;;  %8417 = vmatpush1.bf16.msra.mxu0 %v17672_v33  ;;  %8458 = vmatpush1.bf16.msra.mxu1 %v17674_v34  ;;  %v15878_v43 = vpop.eup %15877  ;;  %v17819_v33 = vld [vmem:[#allocation11 + $0xc4] ss:$16 sps:$4 sm:$0xff]   ;;  %v17821_v34 = vld [vmem:[#allocation11 + $0xcc] ss:$16 sps:$4 sm:$0xff]  }
 0xa8e   :  { %8418 = vmatprep.subr.bf16.mxu0 %v17678_v35  ;;  %8459 = vmatprep.subr.bf16.mxu1 %v17680_v36  ;;  %v17823_v35 = vld [vmem:[#allocation11 + $0xc0] ss:$16 sps:$4 sm:$0xff]   ;;  %v17825_v36 = vld [vmem:[#allocation11 + $0xc8] ss:$16 sps:$4 sm:$0xff]  }
 0xa91   :  { %8419 = vmatpush1.bf16.msra.mxu0 %v18838_v27  ;;  %8460 = vmatpush1.bf16.msra.mxu1 %v17686_v56  ;;  %v17833_v56 = vld [vmem:[#allocation11 + $0xac] ss:$16 sps:$4 sm:$0xff]  }
 0xa92   :  { %8420 = vmatprep.subr.bf16.mxu0 %v17690_v12  ;;  %8461 = vmatprep.subr.bf16.mxu1 %v17692_v49  ;;  %v17835_v12 = vld [vmem:[#allocation11 + $0xa0] ss:$16 sps:$4 sm:$0xff]   ;;  %v17837_v49 = vld [vmem:[#allocation11 + $0xa8] ss:$16 sps:$4 sm:$0xff]  }
 0xa95   :  { %8421 = vmatpush1.bf16.msra.mxu0 %v17696_v0  ;;  %8462 = vmatpush1.bf16.msra.mxu1 %v17698_v51  ;;  %v17843_v0 = vld [vmem:[#allocation11 + $0x84] ss:$16 sps:$4 sm:$0xff]   ;;  %v17845_v51 = vld [vmem:[#allocation11 + $0x8c] ss:$16 sps:$4 sm:$0xff]  }
 0xa96   :  { %8422 = vmatprep.subr.bf16.mxu0 %v17702_v54  ;;  %8463 = vmatprep.subr.bf16.mxu1 %v17704_v2  ;;  %v17847_v54 = vld [vmem:[#allocation11 + $0x80] ss:$16 sps:$4 sm:$0xff]   ;;  %v17849_v2 = vld [vmem:[#allocation11 + $0x88] ss:$16 sps:$4 sm:$0xff]  }
 0xa99   :  { %8423 = vmatpush1.bf16.msra.mxu0 %v17708_v58  ;;  %8464 = vmatpush1.bf16.msra.mxu1 %v17710_v48  ;;  %v17831_v48 = vld [vmem:[#allocation11 + $0xa4] ss:$16 sps:$4 sm:$0xff]  }
 0xa9a   :  { %v15880_v50 = vpop.eup %15879  ;;  %8762 = vmatprep.subr.bf16.mxu0 %v17807_v9  ;;  %8803 = vmatprep.subr.bf16.mxu1 %v17809_v13  ;;  %v17855_v58 = vld [vmem:[#allocation11 + $0x64] ss:$16 sps:$4 sm:$0xff]  }
 0xa9b   :  { %v7910_v60 = vmul.f32 %v15880_v50, %v15878_v43  ;;  %v7916_v50 = vld [vmem:[#allocation2 + $0x18] sm:$0xc] }
 0xa9d   :  { %7912 = vst [vmem:[#allocation3] sm:$0xc0] %v7910_v60  ;;  %v8212_v44 = vpack.c.bf16 %v7910_v60, %v7910_v60 }
 0xa9f   :  { %v8246_v39 = vrot.slane %v8212_v44, 3 }
 0xaa1   :  { %8441 = vmatmul.mubr.bf16.vlgmr.msra.gmra.mxu0 %v8246_v39  ;;  %8482 = vmatmul.mubr.bf16.vlgmr.msra.gmra.mxu1 %v8246_v39 }
 0xaa2   :  { %8794 = vmatprep.mubr.bf16.mxu0 %v18781_v63  ;;  %8835 = vmatprep.mubr.bf16.mxu1 %v18781_v63 }
 0xaa3   :  { %8763 = vmatpush1.bf16.msra.mxu0 %v17811_v45  ;;  %8804 = vmatpush1.bf16.msra.mxu1 %v17813_v32 }
 0xaa4   :  { %8764 = vmatprep.subr.bf16.mxu0 %v17819_v33  ;;  %8805 = vmatprep.subr.bf16.mxu1 %v17821_v34 }
 0xaa7   :  { %8765 = vmatpush1.bf16.msra.mxu0 %v17823_v35  ;;  %8806 = vmatpush1.bf16.msra.mxu1 %v17825_v36 }
 0xaa8   :  { %8766 = vmatprep.subr.bf16.mxu0 %v17831_v48  ;;  %8807 = vmatprep.subr.bf16.mxu1 %v17833_v56 }
 0xaab   :  { %8767 = vmatpush1.bf16.msra.mxu0 %v17835_v12  ;;  %8808 = vmatpush1.bf16.msra.mxu1 %v17837_v49 }
 0xaac   :  { %8768 = vmatprep.subr.bf16.mxu0 %v17843_v0  ;;  %8809 = vmatprep.subr.bf16.mxu1 %v17845_v51 }
 0xaaf   :  { %8769 = vmatpush1.bf16.msra.mxu0 %v17847_v54  ;;  %8810 = vmatpush1.bf16.msra.mxu1 %v17849_v2 }
 0xab0   :  { %8770 = vmatprep.subr.bf16.mxu0 %v17855_v58  ;;  %8811 = vmatprep.subr.bf16.mxu1 %v17857_v59 }
 0xab3   :  { %8771 = vmatpush1.bf16.msra.mxu0 %v17859_v42  ;;  %8812 = vmatpush1.bf16.msra.mxu1 %v17861_v25 }
 0xab4   :  { %8772 = vmatprep.subr.bf16.mxu0 %v17867_v26  ;;  %8813 = vmatprep.subr.bf16.mxu1 %v17869_v6 }
 0xab7   :  { %8773 = vmatpush1.bf16.msra.mxu0 %v17871_v4  ;;  %8814 = vmatpush1.bf16.msra.mxu1 %v17873_v29 }
 0xab8   :  { %8774 = vmatprep.subr.bf16.mxu0 %v17879_v55  ;;  %8815 = vmatprep.subr.bf16.mxu1 %v17881_v7 }
 0xabb   :  { %8775 = vmatpush1.bf16.msra.mxu0 %v17883_v38  ;;  %8816 = vmatpush1.bf16.msra.mxu1 %v17885_v5 }
 0xabc   :  { %8776 = vmatprep.subr.bf16.mxu0 %v17891_v31  ;;  %8817 = vmatprep.subr.bf16.mxu1 %v17893_v14 }
 0xabf   :  { %8777 = vmatpush1.bf16.msra.mxu0 %v17895_v62  ;;  %8818 = vmatpush1.bf16.msra.mxu1 %v17897_v1 }
 0xac0   :  { %9060 = vmatprep.subr.bf16.mxu0 %v17903_v3  ;;  %9101 = vmatprep.subr.bf16.mxu1 %v17905_v16 }
 0xb3c   :  { %v8144_v18 = vpop.f32.mrf.mxu0  ;;  %v8185_v57 = vpop.f32.mrf.mxu1 }
 0xb3d   :  { %v8196_v37 = vrot.slane %v8144_v18, 6  ;;  %v8198_v44 = vrot.slane %v8185_v57, 6  ;;  %v7915_v18 = vld [vmem:[#allocation2 + $0x58] sm:$0xc] }
 0xb3e   :  { %v8146_v41 = vpop.f32.mrf.mxu0  ;;  %v8187_v47 = vpop.f32.mrf.mxu1 }
 0xb3f   :  { %v8204_v20 = vadd.f32 %v8196_v37, %v7913_v23  ;;  %v8197_v22 = vrot.slane %v8146_v41, 6  ;;  %v8199_v43 = vrot.slane %v8187_v47, 6  ;;  %v8206_v24 = vadd.f32 %v8198_v44, %v7915_v18 }
 0xb40   :  { %v8148_v61 = vpop.f32.mrf.mxu0  ;;  %v8189_v8 = vpop.f32.mrf.mxu1 }
 0xb41   :  { %v14145_v30 = vmul.f32 -1.442695, %v8204_v20  ;;  %v8205_v28 = vadd.f32 %v8197_v22, %v7914_v53  ;;  %v8207_v60 = vadd.f32 %v8199_v43, %v7916_v50  ;;  %v8526_v61 = vrot.slane %v17767_v46, 6 }
 0xb42   :  { %v8149_v52 = vpop.f32.mrf.mxu0  ;;  %v8190_v19 = vpop.f32.mrf.mxu1 }
 0xb43   :  { %15881 = vpow2.f32 %v14145_v30  ;;  %v14146_v27 = vmul.f32 -1.442695, %v8205_v28  ;;  %v14147_v39 = vmul.f32 -1.442695, %v8207_v60 }
 0xb45   :  { %15883 = vpow2.f32 %v14146_v27  ;;  %v8208_v27 = vld [vmem:[#allocation2 + $0x60] sm:$0x30] }
 0xb46   :  { %15885 = vpow2.f32 %v14147_v39 }
 0xb50   :  { %v15882_v11 = vpop.eup %15881 }
 0xb51   :  { %v8509_v37 = vadd.f32 1.0, %v15882_v11 }
 0xb52   :  { %v15884_v23 = vpop.eup %15883 }
 0xb53   :  { %15887 = vrcp.f32 %v8509_v37  ;;  %v8515_v41 = vadd.f32 1.0, %v15884_v23  ;;  %v15886_v20 = vpop.eup %15885 }
 0xb54   :  { %15889 = vtanh.f32 %v8206_v24  ;;  %v8522_v57 = vadd.f32 1.0, %v15886_v20  ;;  %v8209_v24 = vld [vmem:[#allocation2 + $0x70] sm:$0x30] }
 0xb55   :  { %15891 = vrcp.f32 %v8515_v41 }
 0xb56   :  { %15893 = vrcp.f32 %v8522_v57 }
 0xb60   :  { %v15888_v22 = vpop.eup %15887 }
 0xb61   :  { %v15890_v53 = vpop.eup %15889  ;;  %v8442_v47 = vpop.f32.mrf.mxu0 }
 0xb62   :  { %v8483_v8 = vpop.f32.mrf.mxu1  ;;  %v15892_v30 = vpop.eup %15891  ;;  %v8494_v28 = vrot.slane %v8442_v47, 4  ;;  %v8529_v52 = vmul.f32 %v15890_v53, %v15888_v22  ;;  %v8211_v53 = vld [vmem:[#allocation2 + $0x28] sm:$0x30] }
 0xb63   :  { %v8528_v19 = vmul.f32 %v15892_v30, %v8526_v61  ;;  %v8444_v11 = vpop.f32.mrf.mxu0  ;;  %v8496_v47 = vrot.slane %v8483_v8, 4  ;;  %v15894_v30 = vpop.eup %15893 }
 0xb64   :  { %v8485_v43 = vpop.f32.mrf.mxu1  ;;  %v8502_v50 = vadd.f32 %v8494_v28, %v8208_v27  ;;  %v8495_v60 = vrot.slane %v8444_v11, 4 }
 0xb65   :  { %v17910_v44 = vadd.f32 %v8529_v52, %v8528_v19  ;;  %v8446_v39 = vpop.f32.mrf.mxu0  ;;  %v8497_v22 = vrot.slane %v8485_v43, 4  ;;  %v8210_v19 = vld [vmem:[#allocation2 + $0x78] sm:$0x30]  ;;  %v17915_v43 = vld [vmem:[#allocation12 + $0xe8] ss:$16 sps:$4 sm:$0xff]  }
 0xb66   :  { %v8487_v18 = vpop.f32.mrf.mxu1  ;;  %v14148_v37 = vmul.f32 -1.442695, %v8502_v50  ;;  %v8503_v46 = vadd.f32 %v8495_v60, %v8209_v24  ;;  %v8504_v11 = vadd.f32 %v8496_v47, %v8210_v19  ;;  %v17943_v47 = vld [vmem:[#allocation12 + $0x84] ss:$16 sps:$4 sm:$0xff]   ;;  %v17951_v19 = vld [vmem:[#allocation12 + $0x88] ss:$16 sps:$4 sm:$0xff]  }
 0xb67   :  { %v8447_v23 = vpop.f32.mrf.mxu0  ;;  %15895 = vtanh.f32 %v17910_v44  ;;  %v8505_v61 = vadd.f32 %v8497_v22, %v8211_v53  ;;  %v17913_v18 = vld [vmem:[#allocation12 + $0xe0] ss:$16 sps:$4 sm:$0xff]   ;;  %v17931_v22 = vld [vmem:[#allocation12 + $0xac] ss:$16 sps:$4 sm:$0xff]  }
 0xb68   :  { %v8488_v41 = vpop.f32.mrf.mxu1  ;;  %15897 = vpow2.f32 %v14148_v37  ;;  %v14149_v20 = vmul.f32 -1.442695, %v8503_v46  ;;  %v17917_v37 = vld [vmem:[#allocation12 + $0xc4] ss:$16 sps:$4 sm:$0xff]   ;;  %v17919_v46 = vld [vmem:[#allocation12 + $0xcc] ss:$16 sps:$4 sm:$0xff]  }
 0xb69   :  { %v14150_v28 = vmul.f32 -1.442695, %v8505_v61  ;;  %v17923_v23 = vld [vmem:[#allocation12 + $0xc0] ss:$16 sps:$4 sm:$0xff]   ;;  %v17925_v41 = vld [vmem:[#allocation12 + $0xc8] ss:$16 sps:$4 sm:$0xff]  }
 0xb6a   :  { %15899 = vpow2.f32 %v14149_v20  ;;  %v17929_v20 = vld [vmem:[#allocation12 + $0xa4] ss:$16 sps:$4 sm:$0xff]   ;;  %v17937_v53 = vld [vmem:[#allocation12 + $0xa0] ss:$16 sps:$4 sm:$0xff]   ;;  %v17939_v61 = vld [vmem:[#allocation12 + $0xa8] ss:$16 sps:$4 sm:$0xff]  }
 0xb6b   :  { %15901 = vpow2.f32 %v14150_v28 }
 0xb74   :  { %v15896_v52 = vpop.eup %15895 }
 0xb75   :  { %v15898_v27 = vpop.eup %15897  ;;  %v8532_v57 = vmul.f32 %v15896_v52, %v15894_v30  ;;  %v17945_v30 = vld [vmem:[#allocation12 + $0x8c] ss:$16 sps:$4 sm:$0xff]   ;;  %v17949_v52 = vld [vmem:[#allocation12 + $0x80] ss:$16 sps:$4 sm:$0xff]  }
 0xb76   :  { %v8536_v50 = vadd.f32 1.0, %v15898_v27  ;;  %18839 = vst [vmem:[#allocation26_spill] sm:$0xff] %v17945_v30 }
 0xb77   :  { %v15900_v60 = vpop.eup %15899  ;;  %8560 = vst [vmem:[#allocation3 + $0x18] sm:$0xc] %v8532_v57  ;;  %v8566_v24 = vpack.c.bf16 %v8532_v57, %v8532_v57  ;;  %v17957_v57 = vld [vmem:[#allocation12 + $0x6c] ss:$16 sps:$4 sm:$0xff]  }
 0xb78   :  { %15903 = vrcp.f32 %v8536_v50  ;;  %v8542_v39 = vadd.f32 1.0, %v15900_v60  ;;  %v15902_v28 = vpop.eup %15901  ;;  %v8553_v60 = vrot.slane %v17788_v10, 2 }
 0xb79   :  { %15905 = vtanh.f32 %v8504_v11  ;;  %v8600_v8 = vrot.slane %v8566_v24, 1  ;;  %v17955_v11 = vld [vmem:[#allocation12 + $0x64] ss:$16 sps:$4 sm:$0xff]  }
 0xb7a   :  { %15907 = vrcp.f32 %v8542_v39  ;;  %v8549_v39 = vadd.f32 1.0, %v15902_v28  ;;  %v17976_v28 = vld [vmem:[#allocation12 + $0x40] ss:$16 sps:$4 sm:$0xff]  }
 0xb7b   :  { %8795 = vmatmul.mubr.bf16.vlgmr.msra.gmra.mxu0 %v8600_v8  ;;  %8836 = vmatmul.mubr.bf16.vlgmr.msra.gmra.mxu1 %v8600_v8  ;;  %18841 = vst [vmem:[#allocation28_spill] sm:$0xff] %v17976_v28 }
 0xb7c   :  { %9061 = vmatpush1.bf16.msra.mxu0 %v17913_v18  ;;  %9102 = vmatpush1.bf16.msra.mxu1 %v17915_v43  ;;  %15909 = vrcp.f32 %v8549_v39  ;;  %v17995_v39 = vld [vmem:[#allocation12 + $0x4] ss:$16 sps:$4 sm:$0xff]  }
 0xb7d   :  { %9062 = vmatprep.subr.bf16.mxu0 %v17917_v37  ;;  %9103 = vmatprep.subr.bf16.mxu1 %v17919_v46 }
 0xb7e   :  { %9092 = vmatprep.mubr.bf16.mxu0 %v18781_v63  ;;  %9133 = vmatprep.mubr.bf16.mxu1 %v18781_v63 }
 0xb80   :  { %9063 = vmatpush1.bf16.msra.mxu0 %v17923_v23  ;;  %9104 = vmatpush1.bf16.msra.mxu1 %v17925_v41 }
 0xb81   :  { %9064 = vmatprep.subr.bf16.mxu0 %v17929_v20  ;;  %9105 = vmatprep.subr.bf16.mxu1 %v17931_v22 }
 0xb84   :  { %9065 = vmatpush1.bf16.msra.mxu0 %v17937_v53  ;;  %9106 = vmatpush1.bf16.msra.mxu1 %v17939_v61 }
 0xb85   :  { %v15904_v27 = vpop.eup %15903  ;;  %9066 = vmatprep.subr.bf16.mxu0 %v17943_v47  ;;  %9107 = vmatprep.subr.bf16.mxu1 %v17945_v30  ;;  %v17970_v30 = vld [vmem:[#allocation12 + $0x4c] ss:$16 sps:$4 sm:$0xff]  }
 0xb86   :  { %v15906_v50 = vpop.eup %15905  ;;  %18840 = vst [vmem:[#allocation27_spill] sm:$0xff] %v17970_v30 }
 0xb87   :  { %v15908_v24 = vpop.eup %15907  ;;  %v8556_v8 = vmul.f32 %v15906_v50, %v15904_v27  ;;  %v17978_v27 = vld [vmem:[#allocation12 + $0x48] ss:$16 sps:$4 sm:$0xff]   ;;  %v17983_v50 = vld [vmem:[#allocation12 + $0x24] ss:$16 sps:$4 sm:$0xff]  }
 0xb88   :  { %v8555_v21 = vmul.f32 %v15908_v24, %v8553_v60  ;;  %9067 = vmatpush1.bf16.msra.mxu0 %v17949_v52  ;;  %9108 = vmatpush1.bf16.msra.mxu1 %v17951_v19  ;;  %18842 = vst [vmem:[#allocation29_spill] sm:$0xff] %v17978_v27  ;;  %18843 = vst [vmem:[#allocation30_spill] sm:$0xff] %v17983_v50  ;;  %v17985_v60 = vld [vmem:[#allocation12 + $0x2c] ss:$16 sps:$4 sm:$0xff]   ;;  %v17991_v24 = vld [vmem:[#allocation12 + $0x28] ss:$16 sps:$4 sm:$0xff]  }
 0xb89   :  { %9068 = vmatprep.subr.bf16.mxu0 %v17955_v11  ;;  %9109 = vmatprep.subr.bf16.mxu1 %v17957_v57  ;;  %18844 = vst [vmem:[#allocation31_spill] sm:$0xff] %v17985_v60  ;;  %18846 = vst [vmem:[#allocation19_spill] sm:$0xff] %v17991_v24 }
 0xb8a   :  { %v17972_v10 = vadd.f32 %v8556_v8, %v8555_v21  ;;  %v17989_v21 = vld [vmem:[#allocation12 + $0x20] ss:$16 sps:$4 sm:$0xff]   ;;  %v17997_v8 = vld [vmem:[#allocation12 + $0xc] ss:$16 sps:$4 sm:$0xff]  }
 0xb8b   :  { %18845 = vst [vmem:[#allocation32_spill] sm:$0xff] %v17989_v21 }
 0xb8c   :  { %9069 = vmatpush1.bf16.msra.mxu0 %v17962_v17  ;;  %9110 = vmatpush1.bf16.msra.mxu1 %v17964_v15  ;;  %15911 = vtanh.f32 %v17972_v10 }
 0xb8d   :  { %9070 = vmatprep.subr.bf16.mxu0 %v17968_v40  ;;  %9111 = vmatprep.subr.bf16.mxu1 %v17970_v30  ;;  %v18001_v30 = vld [vmem:[#allocation12] ss:$16 sps:$4 sm:$0xff]  }
 0xb90   :  { %9071 = vmatpush1.bf16.msra.mxu0 %v17976_v28  ;;  %9112 = vmatpush1.bf16.msra.mxu1 %v17978_v27  ;;  %v18003_v28 = vld [vmem:[#allocation12 + $0x8] ss:$16 sps:$4 sm:$0xff]   ;;  %v15910_v27 = vpop.eup %15909 }
 0xb91   :  { %9072 = vmatprep.subr.bf16.mxu0 %v17983_v50  ;;  %9113 = vmatprep.subr.bf16.mxu1 %v17985_v60 }
 0xb94   :  { %9073 = vmatpush1.bf16.msra.mxu0 %v17989_v21  ;;  %9114 = vmatpush1.bf16.msra.mxu1 %v17991_v24 }
 0xb95   :  { %9074 = vmatprep.subr.bf16.mxu0 %v17995_v39  ;;  %9115 = vmatprep.subr.bf16.mxu1 %v17997_v8 }
 0xb98   :  { %9075 = vmatpush1.bf16.msra.mxu0 %v18001_v30  ;;  %9116 = vmatpush1.bf16.msra.mxu1 %v18003_v28 }
 0xb99   :  { %v15912_v60 = vpop.eup %15911  ;;  %9414 = vmatprep.subr.bf16.mxu0 %v17807_v9  ;;  %9455 = vmatprep.subr.bf16.mxu1 %v17809_v13 }
 0xb9a   :  { %v8559_v21 = vmul.f32 %v15912_v60, %v15910_v27 }
 0xb9c   :  { %8561 = vst [vmem:[#allocation3] sm:$0x30] %v8559_v21  ;;  %v8864_v24 = vpack.c.bf16 %v8559_v21, %v8559_v21 }
 0xb9e   :  { %v8898_v50 = vrot.slane %v8864_v24, 2  ;;  %v8860_v24 = vld [vmem:[#allocation2 + $0x60] sm:$0xc] }
 0xba0   :  { %9093 = vmatmul.mubr.bf16.vlgmr.msra.gmra.mxu0 %v8898_v50  ;;  %9134 = vmatmul.mubr.bf16.vlgmr.msra.gmra.mxu1 %v8898_v50 }
 0xba1   :  { %9415 = vmatpush1.bf16.msra.mxu0 %v17811_v45  ;;  %9456 = vmatpush1.bf16.msra.mxu1 %v17813_v32  ;;  %v8562_v32 = vld [vmem:[#allocation2 + $0x30] sm:$0x30] }
 0xba2   :  { %9416 = vmatprep.subr.bf16.mxu0 %v17819_v33  ;;  %9457 = vmatprep.subr.bf16.mxu1 %v17821_v34 }
 0xba3   :  { %9446 = vmatprep.mubr.bf16.mxu0 %v18781_v63  ;;  %9487 = vmatprep.mubr.bf16.mxu1 %v18781_v63 }
 0xba5   :  { %9417 = vmatpush1.bf16.msra.mxu0 %v17823_v35  ;;  %9458 = vmatpush1.bf16.msra.mxu1 %v17825_v36 }
 0xba6   :  { %9418 = vmatprep.subr.bf16.mxu0 %v17831_v48  ;;  %9459 = vmatprep.subr.bf16.mxu1 %v17833_v56  ;;  %v8563_v48 = vld [vmem:[#allocation2] sm:$0x30] }
 0xba9   :  { %9419 = vmatpush1.bf16.msra.mxu0 %v17835_v12  ;;  %9460 = vmatpush1.bf16.msra.mxu1 %v17837_v49 }
 0xbaa   :  { %9420 = vmatprep.subr.bf16.mxu0 %v17843_v0  ;;  %9461 = vmatprep.subr.bf16.mxu1 %v17845_v51 }
 0xbad   :  { %9421 = vmatpush1.bf16.msra.mxu0 %v17847_v54  ;;  %9462 = vmatpush1.bf16.msra.mxu1 %v17849_v2 }
 0xbae   :  { %9422 = vmatprep.subr.bf16.mxu0 %v17855_v58  ;;  %9463 = vmatprep.subr.bf16.mxu1 %v17857_v59  ;;  %v8565_v59 = vld [vmem:[#allocation2 + $0x18] sm:$0x30] }
 0xbb1   :  { %9423 = vmatpush1.bf16.msra.mxu0 %v17859_v42  ;;  %9464 = vmatpush1.bf16.msra.mxu1 %v17861_v25 }
 0xbb2   :  { %9424 = vmatprep.subr.bf16.mxu0 %v17867_v26  ;;  %9465 = vmatprep.subr.bf16.mxu1 %v17869_v6  ;;  %v8564_v6 = vld [vmem:[#allocation2 + $0x58] sm:$0x30] }
 0xbb5   :  { %9425 = vmatpush1.bf16.msra.mxu0 %v17871_v4  ;;  %9466 = vmatpush1.bf16.msra.mxu1 %v17873_v29 }
 0xbb6   :  { %9426 = vmatprep.subr.bf16.mxu0 %v17879_v55  ;;  %9467 = vmatprep.subr.bf16.mxu1 %v17881_v7 }
 0xbb9   :  { %9427 = vmatpush1.bf16.msra.mxu0 %v17883_v38  ;;  %9468 = vmatpush1.bf16.msra.mxu1 %v17885_v5 }
 0xbba   :  { %9428 = vmatprep.subr.bf16.mxu0 %v17891_v31  ;;  %9469 = vmatprep.subr.bf16.mxu1 %v17893_v14 }
 0xbbd   :  { %9429 = vmatpush1.bf16.msra.mxu0 %v17895_v62  ;;  %9470 = vmatpush1.bf16.msra.mxu1 %v17897_v1  ;;  %v9178_v62 = vrot.slane %v17910_v44, 6 }
 0xbbe   :  { %9712 = vmatprep.subr.bf16.mxu0 %v17903_v3  ;;  %9753 = vmatprep.subr.bf16.mxu1 %v17905_v16 }
 0xc3b   :  { %v8796_v9 = vpop.f32.mrf.mxu0  ;;  %v8837_v13 = vpop.f32.mrf.mxu1 }
 0xc3c   :  { %v8848_v45 = vrot.slane %v8796_v9, 4  ;;  %v8850_v25 = vrot.slane %v8837_v13, 4 }
 0xc3d   :  { %v8798_v33 = vpop.f32.mrf.mxu0  ;;  %v8839_v34 = vpop.f32.mrf.mxu1 }
 0xc3e   :  { %v8856_v35 = vadd.f32 %v8848_v45, %v8562_v32  ;;  %v8849_v36 = vrot.slane %v8798_v33, 4  ;;  %v8851_v58 = vrot.slane %v8839_v34, 4  ;;  %v8858_v29 = vadd.f32 %v8850_v25, %v8564_v6  ;;  %v8861_v34 = vld [vmem:[#allocation2 + $0x70] sm:$0xc]  ;;  %v8862_v25 = vld [vmem:[#allocation2 + $0x78] sm:$0xc] }
 0xc3f   :  { %v8800_v56 = vpop.f32.mrf.mxu0  ;;  %v8841_v12 = vpop.f32.mrf.mxu1 }
 0xc40   :  { %v14215_v49 = vmul.f32 -1.442695, %v8856_v35  ;;  %v8857_v0 = vadd.f32 %v8849_v36, %v8563_v48  ;;  %v8859_v42 = vadd.f32 %v8851_v58, %v8565_v59 }
 0xc41   :  { %v8801_v51 = vpop.f32.mrf.mxu0  ;;  %v8842_v54 = vpop.f32.mrf.mxu1 }
 0xc42   :  { %15913 = vpow2.f32 %v14215_v49  ;;  %v14216_v2 = vmul.f32 -1.442695, %v8857_v0  ;;  %v14217_v26 = vmul.f32 -1.442695, %v8859_v42  ;;  %v8863_v51 = vld [vmem:[#allocation2 + $0x28] sm:$0xc] }
 0xc44   :  { %15915 = vpow2.f32 %v14216_v2 }
 0xc45   :  { %15917 = vpow2.f32 %v14217_v26 }
 0xc4f   :  { %v15914_v4 = vpop.eup %15913 }
 0xc50   :  { %v9161_v55 = vadd.f32 1.0, %v15914_v4 }
 0xc51   :  { %v15916_v7 = vpop.eup %15915 }
 0xc52   :  { %15919 = vrcp.f32 %v9161_v55  ;;  %v9167_v38 = vadd.f32 1.0, %v15916_v7  ;;  %v15918_v5 = vpop.eup %15917 }
 0xc53   :  { %15921 = vtanh.f32 %v8858_v29  ;;  %v9174_v27 = vadd.f32 1.0, %v15918_v5 }
 0xc54   :  { %15923 = vrcp.f32 %v9167_v38 }
 0xc55   :  { %15925 = vrcp.f32 %v9174_v27  ;;  %v18105_v27 = vld [vmem:[#allocation11 + $0xc8] ss:$16 sps:$4 sm:$0xff]  }
 0xc5f   :  { %v15920_v31 = vpop.eup %15919 }
 0xc60   :  { %v15922_v14 = vpop.eup %15921  ;;  %v9094_v1 = vpop.f32.mrf.mxu0 }
 0xc61   :  { %v9135_v3 = vpop.f32.mrf.mxu1  ;;  %v15924_v16 = vpop.eup %15923  ;;  %v9146_v50 = vrot.slane %v9094_v1, 6  ;;  %v9181_v60 = vmul.f32 %v15922_v14, %v15920_v31  ;;  %v18087_v1 = vld [vmem:[#allocation11 + $0xe4] ss:$16 sps:$4 sm:$0xff]  }
 0xc62   :  { %v9180_v21 = vmul.f32 %v15924_v16, %v9178_v62  ;;  %v9096_v9 = vpop.f32.mrf.mxu0  ;;  %v9148_v2 = vrot.slane %v9135_v3, 6  ;;  %v15926_v58 = vpop.eup %15925  ;;  %v18101_v3 = vld [vmem:[#allocation11 + $0xcc] ss:$16 sps:$4 sm:$0xff]   ;;  %v18103_v16 = vld [vmem:[#allocation11 + $0xc0] ss:$16 sps:$4 sm:$0xff]  }
 0xc63   :  { %v9137_v13 = vpop.f32.mrf.mxu1  ;;  %v9154_v45 = vadd.f32 %v9146_v50, %v8860_v24  ;;  %v9147_v32 = vrot.slane %v9096_v9, 6  ;;  %v18111_v50 = vld [vmem:[#allocation11 + $0xa4] ss:$16 sps:$4 sm:$0xff]   ;;  %v18117_v24 = vld [vmem:[#allocation11 + $0xa8] ss:$16 sps:$4 sm:$0xff]  }
 0xc64   :  { %v18046_v33 = vadd.f32 %v9181_v60, %v9180_v21  ;;  %v9098_v35 = vpop.f32.mrf.mxu0  ;;  %v9149_v0 = vrot.slane %v9137_v13, 6  ;;  %v9156_v6 = vadd.f32 %v9148_v2, %v8862_v25  ;;  %v18113_v60 = vld [vmem:[#allocation11 + $0xac] ss:$16 sps:$4 sm:$0xff]   ;;  %v18115_v21 = vld [vmem:[#allocation11 + $0xa0] ss:$16 sps:$4 sm:$0xff]  }
 0xc65   :  { %v9139_v36 = vpop.f32.mrf.mxu1  ;;  %v14218_v48 = vmul.f32 -1.442695, %v9154_v45  ;;  %v9155_v44 = vadd.f32 %v9147_v32, %v8861_v34  ;;  %v18123_v9 = vld [vmem:[#allocation11 + $0x84] ss:$16 sps:$4 sm:$0xff]   ;;  %v18125_v13 = vld [vmem:[#allocation11 + $0x8c] ss:$16 sps:$4 sm:$0xff]  }
 0xc66   :  { %v9099_v56 = vpop.f32.mrf.mxu0  ;;  %15927 = vtanh.f32 %v18046_v33  ;;  %v9157_v54 = vadd.f32 %v9149_v0, %v8863_v51  ;;  %v18127_v45 = vld [vmem:[#allocation11 + $0x80] ss:$16 sps:$4 sm:$0xff]   ;;  %v18129_v32 = vld [vmem:[#allocation11 + $0x88] ss:$16 sps:$4 sm:$0xff]   ;;  %v18135_v34 = vld [vmem:[#allocation11 + $0x64] ss:$16 sps:$4 sm:$0xff]  }
 0xc67   :  { %v9140_v12 = vpop.f32.mrf.mxu1  ;;  %15929 = vpow2.f32 %v14218_v48  ;;  %v14219_v49 = vmul.f32 -1.442695, %v9155_v44  ;;  %v18137_v35 = vld [vmem:[#allocation11 + $0x6c] ss:$16 sps:$4 sm:$0xff]   ;;  %v18139_v36 = vld [vmem:[#allocation11 + $0x60] ss:$16 sps:$4 sm:$0xff]  }
 0xc68   :  { %v14220_v59 = vmul.f32 -1.442695, %v9157_v54  ;;  %v18141_v48 = vld [vmem:[#allocation11 + $0x68] ss:$16 sps:$4 sm:$0xff]   ;;  %v18147_v44 = vld [vmem:[#allocation11 + $0x44] ss:$16 sps:$4 sm:$0xff]  }
 0xc69   :  { %15931 = vpow2.f32 %v14219_v49  ;;  %v18149_v56 = vld [vmem:[#allocation11 + $0x4c] ss:$16 sps:$4 sm:$0xff]   ;;  %v18151_v12 = vld [vmem:[#allocation11 + $0x40] ss:$16 sps:$4 sm:$0xff]   ;;  %v18153_v49 = vld [vmem:[#allocation11 + $0x48] ss:$16 sps:$4 sm:$0xff]  }
 0xc6a   :  { %15933 = vpow2.f32 %v14220_v59  ;;  %v18159_v0 = vld [vmem:[#allocation11 + $0x24] ss:$16 sps:$4 sm:$0xff]   ;;  %v18161_v51 = vld [vmem:[#allocation11 + $0x2c] ss:$16 sps:$4 sm:$0xff]   ;;  %v18163_v54 = vld [vmem:[#allocation11 + $0x20] ss:$16 sps:$4 sm:$0xff]  }
 0xc6b   :  { %v18165_v2 = vld [vmem:[#allocation11 + $0x28] ss:$16 sps:$4 sm:$0xff]   ;;  %v18173_v59 = vld [vmem:[#allocation11 + $0xc] ss:$16 sps:$4 sm:$0xff]  }
 0xc6c   :  { %v18177_v25 = vld [vmem:[#allocation11 + $0x8] ss:$16 sps:$4 sm:$0xff]  }
 0xc73   :  { %v15928_v42 = vpop.eup %15927 }
 0xc74   :  { %v15930_v26 = vpop.eup %15929  ;;  %v9184_v4 = vmul.f32 %v15928_v42, %v15926_v58  ;;  %v18171_v58 = vld [vmem:[#allocation11 + $0x4] ss:$16 sps:$4 sm:$0xff]   ;;  %v18175_v42 = vld [vmem:[#allocation11] ss:$16 sps:$4 sm:$0xff]  }
 0xc75   :  { %v9188_v29 = vadd.f32 1.0, %v15930_v26  ;;  %v18183_v26 = vld [vmem:[#allocation12 + $0xe4] ss:$16 sps:$4 sm:$0xff]  }
 0xc76   :  { %v15932_v55 = vpop.eup %15931  ;;  %9212 = vst [vmem:[#allocation3 + $0x18] sm:$0x30] %v9184_v4  ;;  %v9218_v7 = vpack.c.bf16 %v9184_v4, %v9184_v4 }
 0xc77   :  { %15935 = vrcp.f32 %v9188_v29  ;;  %v9194_v38 = vadd.f32 1.0, %v15932_v55  ;;  %v15934_v31 = vpop.eup %15933 }
 0xc78   :  { %15937 = vtanh.f32 %v9156_v6  ;;  %v9252_v5 = vrot.slane %v9218_v7, 2  ;;  %v9201_v14 = vadd.f32 1.0, %v15934_v31  ;;  %v18185_v6 = vld [vmem:[#allocation12 + $0xec] ss:$16 sps:$4 sm:$0xff]   ;;  %v9214_v7 = vld [vmem:[#allocation2 + $0x30] sm:$0xc0] }
 0xc79   :  { %15939 = vrcp.f32 %v9194_v38 }
 0xc7a   :  { %9447 = vmatmul.mubr.bf16.vlgmr.msra.gmra.mxu0 %v9252_v5  ;;  %9488 = vmatmul.mubr.bf16.vlgmr.msra.gmra.mxu1 %v9252_v5  ;;  %15941 = vrcp.f32 %v9201_v14 }
 0xc7b   :  { %9713 = vmatpush1.bf16.msra.mxu0 %v17913_v18  ;;  %9754 = vmatpush1.bf16.msra.mxu1 %v17915_v43  ;;  %v18847_v43 = vld [vmem:[#allocation26_spill] sm:$0xff] }
 0xc7c   :  { %9714 = vmatprep.subr.bf16.mxu0 %v17917_v37  ;;  %9755 = vmatprep.subr.bf16.mxu1 %v17919_v46  ;;  %v9205_v46 = vrot.slane %v17972_v10, 2 }
 0xc7d   :  { %9744 = vmatprep.mubr.bf16.mxu0 %v18781_v63  ;;  %9785 = vmatprep.mubr.bf16.mxu1 %v18781_v63 }
 0xc7f   :  { %9715 = vmatpush1.bf16.msra.mxu0 %v17923_v23  ;;  %9756 = vmatpush1.bf16.msra.mxu1 %v17925_v41 }
 0xc80   :  { %9716 = vmatprep.subr.bf16.mxu0 %v17929_v20  ;;  %9757 = vmatprep.subr.bf16.mxu1 %v17931_v22  ;;  %v18848_v22 = vld [vmem:[#allocation27_spill] sm:$0xff] }
 0xc83   :  { %9717 = vmatpush1.bf16.msra.mxu0 %v17937_v53  ;;  %9758 = vmatpush1.bf16.msra.mxu1 %v17939_v61  ;;  %v18849_v53 = vld [vmem:[#allocation28_spill] sm:$0xff]  ;;  %v18850_v61 = vld [vmem:[#allocation29_spill] sm:$0xff] }
 0xc84   :  { %v15936_v18 = vpop.eup %15935  ;;  %9718 = vmatprep.subr.bf16.mxu0 %v17943_v47  ;;  %9759 = vmatprep.subr.bf16.mxu1 %v18847_v43  ;;  %v18851_v47 = vld [vmem:[#allocation30_spill] sm:$0xff]  ;;  %v9215_v43 = vld [vmem:[#allocation2] sm:$0xc0] }
 0xc85   :  { %v15938_v37 = vpop.eup %15937 }
 0xc86   :  { %v15940_v23 = vpop.eup %15939  ;;  %v9208_v41 = vmul.f32 %v15938_v37, %v15936_v18 }
 0xc87   :  { %v9207_v62 = vmul.f32 %v15940_v23, %v9205_v46  ;;  %9719 = vmatpush1.bf16.msra.mxu0 %v17949_v52  ;;  %9760 = vmatpush1.bf16.msra.mxu1 %v17951_v19  ;;  %v18852_v52 = vld [vmem:[#allocation31_spill] sm:$0xff]  ;;  %v18853_v19 = vld [vmem:[#allocation32_spill] sm:$0xff] }
 0xc88   :  { %9720 = vmatprep.subr.bf16.mxu0 %v17955_v11  ;;  %9761 = vmatprep.subr.bf16.mxu1 %v17957_v57  ;;  %v18854_v11 = vld [vmem:[#allocation19_spill] sm:$0xff] }
 0xc89   :  { %v18068_v20 = vadd.f32 %v9208_v41, %v9207_v62 }
 0xc8b   :  { %9721 = vmatpush1.bf16.msra.mxu0 %v17962_v17  ;;  %9762 = vmatpush1.bf16.msra.mxu1 %v17964_v15  ;;  %15943 = vtanh.f32 %v18068_v20  ;;  %v15942_v15 = vpop.eup %15941 }
 0xc8c   :  { %9722 = vmatprep.subr.bf16.mxu0 %v17968_v40  ;;  %9763 = vmatprep.subr.bf16.mxu1 %v18848_v22 }
 0xc8f   :  { %9723 = vmatpush1.bf16.msra.mxu0 %v18849_v53  ;;  %9764 = vmatpush1.bf16.msra.mxu1 %v18850_v61  ;;  %v9217_v61 = vld [vmem:[#allocation2 + $0x18] sm:$0xc0] }
 0xc90   :  { %9724 = vmatprep.subr.bf16.mxu0 %v18851_v47  ;;  %9765 = vmatprep.subr.bf16.mxu1 %v18852_v52 }
 0xc93   :  { %9725 = vmatpush1.bf16.msra.mxu0 %v18853_v19  ;;  %9766 = vmatpush1.bf16.msra.mxu1 %v18854_v11  ;;  %v9216_v11 = vld [vmem:[#allocation2 + $0x58] sm:$0xc0] }
 0xc94   :  { %9726 = vmatprep.subr.bf16.mxu0 %v17995_v39  ;;  %9767 = vmatprep.subr.bf16.mxu1 %v17997_v8  ;;  %v18089_v39 = vld [vmem:[#allocation11 + $0xec] ss:$16 sps:$4 sm:$0xff]   ;;  %v18091_v8 = vld [vmem:[#allocation11 + $0xe0] ss:$16 sps:$4 sm:$0xff]  }
 0xc97   :  { %9727 = vmatpush1.bf16.msra.mxu0 %v18001_v30  ;;  %9768 = vmatpush1.bf16.msra.mxu1 %v18003_v28  ;;  %v18093_v30 = vld [vmem:[#allocation11 + $0xe8] ss:$16 sps:$4 sm:$0xff]   ;;  %v18099_v28 = vld [vmem:[#allocation11 + $0xc4] ss:$16 sps:$4 sm:$0xff]  }
 0xc98   :  { %v15944_v40 = vpop.eup %15943  ;;  %10054 = vmatprep.subr.bf16.mxu0 %v18087_v1  ;;  %10095 = vmatprep.subr.bf16.mxu1 %v18089_v39 }
 0xc99   :  { %v9211_v17 = vmul.f32 %v15944_v40, %v15942_v15 }
 0xc9b   :  { %9213 = vst [vmem:[#allocation3] sm:$0xc] %v9211_v17  ;;  %v9516_v57 = vpack.c.bf16 %v9211_v17, %v9211_v17 }
 0xc9d   :  { %v9550_v10 = vrot.slane %v9516_v57, 1 }
 0xc9f   :  { %9745 = vmatmul.mubr.bf16.vlgmr.msra.gmra.mxu0 %v9550_v10  ;;  %9786 = vmatmul.mubr.bf16.vlgmr.msra.gmra.mxu1 %v9550_v10 }
 0xca0   :  { %10086 = vmatprep.mubr.bf16.mxu0 %v18781_v63  ;;  %10127 = vmatprep.mubr.bf16.mxu1 %v18781_v63 }
 0xca1   :  { %10055 = vmatpush1.bf16.msra.mxu0 %v18091_v8  ;;  %10096 = vmatpush1.bf16.msra.mxu1 %v18093_v30 }
 0xca2   :  { %10056 = vmatprep.subr.bf16.mxu0 %v18099_v28  ;;  %10097 = vmatprep.subr.bf16.mxu1 %v18101_v3 }
 0xca5   :  { %10057 = vmatpush1.bf16.msra.mxu0 %v18103_v16  ;;  %10098 = vmatpush1.bf16.msra.mxu1 %v18105_v27 }
 0xca6   :  { %10058 = vmatprep.subr.bf16.mxu0 %v18111_v50  ;;  %10099 = vmatprep.subr.bf16.mxu1 %v18113_v60 }
 0xca9   :  { %10059 = vmatpush1.bf16.msra.mxu0 %v18115_v21  ;;  %10100 = vmatpush1.bf16.msra.mxu1 %v18117_v24 }
 0xcaa   :  { %10060 = vmatprep.subr.bf16.mxu0 %v18123_v9  ;;  %10101 = vmatprep.subr.bf16.mxu1 %v18125_v13 }
 0xcad   :  { %10061 = vmatpush1.bf16.msra.mxu0 %v18127_v45  ;;  %10102 = vmatpush1.bf16.msra.mxu1 %v18129_v32 }
 0xcae   :  { %10062 = vmatprep.subr.bf16.mxu0 %v18135_v34  ;;  %10103 = vmatprep.subr.bf16.mxu1 %v18137_v35 }
 0xcb1   :  { %10063 = vmatpush1.bf16.msra.mxu0 %v18139_v36  ;;  %10104 = vmatpush1.bf16.msra.mxu1 %v18141_v48 }
 0xcb2   :  { %10064 = vmatprep.subr.bf16.mxu0 %v18147_v44  ;;  %10105 = vmatprep.subr.bf16.mxu1 %v18149_v56 }
 0xcb5   :  { %10065 = vmatpush1.bf16.msra.mxu0 %v18151_v12  ;;  %10106 = vmatpush1.bf16.msra.mxu1 %v18153_v49 }
 0xcb6   :  { %10066 = vmatprep.subr.bf16.mxu0 %v18159_v0  ;;  %10107 = vmatprep.subr.bf16.mxu1 %v18161_v51 }
 0xcb9   :  { %10067 = vmatpush1.bf16.msra.mxu0 %v18163_v54  ;;  %10108 = vmatpush1.bf16.msra.mxu1 %v18165_v2 }
 0xcba   :  { %10068 = vmatprep.subr.bf16.mxu0 %v18171_v58  ;;  %10109 = vmatprep.subr.bf16.mxu1 %v18173_v59 }
 0xcbd   :  { %10069 = vmatpush1.bf16.msra.mxu0 %v18175_v42  ;;  %10110 = vmatpush1.bf16.msra.mxu1 %v18177_v25 }
 0xcbe   :  { %10337 = vmatprep.subr.bf16.mxu0 %v18183_v26  ;;  %10378 = vmatprep.subr.bf16.mxu1 %v18185_v6 }
 0xd3a   :  { %v9448_v4 = vpop.f32.mrf.mxu0  ;;  %v9489_v29 = vpop.f32.mrf.mxu1 }
 0xd3b   :  { %v9500_v55 = vrot.slane %v9448_v4, 2  ;;  %v9502_v52 = vrot.slane %v9489_v29, 2 }
 0xd3c   :  { %v9450_v38 = vpop.f32.mrf.mxu0  ;;  %v9491_v5 = vpop.f32.mrf.mxu1 }
 0xd3d   :  { %v9508_v31 = vadd.f32 %v9500_v55, %v9214_v7  ;;  %v9501_v18 = vrot.slane %v9450_v38, 2  ;;  %v9503_v53 = vrot.slane %v9491_v5, 2  ;;  %v9510_v40 = vadd.f32 %v9502_v52, %v9216_v11 }
 0xd3e   :  { %v9452_v37 = vpop.f32.mrf.mxu0  ;;  %v9493_v46 = vpop.f32.mrf.mxu1  ;;  %v9818_v38 = vrot.slane %v18046_v33, 6 }
 0xd3f   :  { %v14285_v23 = vmul.f32 -1.442695, %v9508_v31  ;;  %v9509_v14 = vadd.f32 %v9501_v18, %v9215_v43  ;;  %v9511_v47 = vadd.f32 %v9503_v53, %v9217_v61  ;;  %v9512_v31 = vld [vmem:[#allocation2 + $0x60] sm:$0x3] }
 0xd40   :  { %v9453_v41 = vpop.f32.mrf.mxu0  ;;  %v9494_v62 = vpop.f32.mrf.mxu1 }
 0xd41   :  { %15945 = vpow2.f32 %v14285_v23  ;;  %v14286_v22 = vmul.f32 -1.442695, %v9509_v14  ;;  %v14287_v19 = vmul.f32 -1.442695, %v9511_v47  ;;  %v9513_v14 = vld [vmem:[#allocation2 + $0x70] sm:$0x3] }
 0xd43   :  { %15947 = vpow2.f32 %v14286_v22 }
 0xd44   :  { %15949 = vpow2.f32 %v14287_v19 }
 0xd4e   :  { %v15946_v15 = vpop.eup %15945 }
 0xd4f   :  { %v9801_v17 = vadd.f32 1.0, %v15946_v15  ;;  %v9515_v15 = vld [vmem:[#allocation2 + $0x28] sm:$0x3] }
 0xd50   :  { %v15948_v57 = vpop.eup %15947 }
 0xd51   :  { %15951 = vrcp.f32 %v9801_v17  ;;  %v9807_v10 = vadd.f32 1.0, %v15948_v57  ;;  %v15950_v4 = vpop.eup %15949 }
 0xd52   :  { %15953 = vtanh.f32 %v9510_v40  ;;  %v9814_v5 = vadd.f32 1.0, %v15950_v4 }
 0xd53   :  { %15955 = vrcp.f32 %v9807_v10  ;;  %v9514_v10 = vld [vmem:[#allocation2 + $0x78] sm:$0x3] }
 0xd54   :  { %15957 = vrcp.f32 %v9814_v5 }
 0xd5e   :  { %v15952_v55 = vpop.eup %15951 }
 0xd5f   :  { %v15954_v7 = vpop.eup %15953  ;;  %v9746_v18 = vpop.f32.mrf.mxu0 }
 0xd60   :  { %v9787_v29 = vpop.f32.mrf.mxu1  ;;  %v15956_v43 = vpop.eup %15955  ;;  %v9794_v37 = vadd.f32 %v9746_v18, %v9512_v31  ;;  %v9821_v46 = vmul.f32 %v15954_v7, %v15952_v55 }
 0xd61   :  { %v9820_v23 = vmul.f32 %v15956_v43, %v9818_v38  ;;  %v9748_v41 = vpop.f32.mrf.mxu0  ;;  %v15958_v57 = vpop.eup %15957  ;;  %v9796_v55 = vadd.f32 %v9787_v29, %v9514_v10  ;;  %v18203_v29 = vld [vmem:[#allocation12 + $0xc0] ss:$16 sps:$4 sm:$0xff]   ;;  %v18232_v10 = vld [vmem:[#allocation12 + $0x88] ss:$16 sps:$4 sm:$0xff]  }
 0xd62   :  { %v9789_v62 = vpop.f32.mrf.mxu1  ;;  %v14288_v22 = vmul.f32 -1.442695, %v9794_v37  ;;  %v9795_v53 = vadd.f32 %v9748_v41, %v9513_v14  ;;  %v18193_v37 = vld [vmem:[#allocation12 + $0xe0] ss:$16 sps:$4 sm:$0xff]   ;;  %v18197_v14 = vld [vmem:[#allocation12 + $0xc4] ss:$16 sps:$4 sm:$0xff]  }
 0xd63   :  { %v18190_v61 = vadd.f32 %v9821_v46, %v9820_v23  ;;  %v9750_v47 = vpop.f32.mrf.mxu0  ;;  %v9797_v40 = vadd.f32 %v9789_v62, %v9515_v15  ;;  %v18195_v46 = vld [vmem:[#allocation12 + $0xe8] ss:$16 sps:$4 sm:$0xff]   ;;  %v18199_v41 = vld [vmem:[#allocation12 + $0xcc] ss:$16 sps:$4 sm:$0xff]  }
 0xd64   :  { %v9791_v52 = vpop.f32.mrf.mxu1  ;;  %15959 = vpow2.f32 %v14288_v22  ;;  %v14289_v33 = vmul.f32 -1.442695, %v9795_v53  ;;  %v18205_v62 = vld [vmem:[#allocation12 + $0xc8] ss:$16 sps:$4 sm:$0xff]   ;;  %v18209_v22 = vld [vmem:[#allocation12 + $0xa4] ss:$16 sps:$4 sm:$0xff]  }
 0xd65   :  { %v9751_v19 = vpop.f32.mrf.mxu0  ;;  %15961 = vtanh.f32 %v18190_v61  ;;  %v14290_v17 = vmul.f32 -1.442695, %v9797_v40  ;;  %v18211_v53 = vld [vmem:[#allocation12 + $0xac] ss:$16 sps:$4 sm:$0xff]   ;;  %v18217_v47 = vld [vmem:[#allocation12 + $0xa0] ss:$16 sps:$4 sm:$0xff]  }
 0xd66   :  { %v9792_v11 = vpop.f32.mrf.mxu1  ;;  %15963 = vpow2.f32 %v14289_v33  ;;  %v18219_v52 = vld [vmem:[#allocation12 + $0xa8] ss:$16 sps:$4 sm:$0xff]   ;;  %v18223_v33 = vld [vmem:[#allocation12 + $0x84] ss:$16 sps:$4 sm:$0xff]   ;;  %v18225_v19 = vld [vmem:[#allocation12 + $0x8c] ss:$16 sps:$4 sm:$0xff]  }
 0xd67   :  { %15965 = vpow2.f32 %v14290_v17  ;;  %v9845_v17 = vrot.slane %v18068_v20, 2 }
 0xd71   :  { %v15960_v4 = vpop.eup %15959 }
 0xd72   :  { %v15962_v7 = vpop.eup %15961  ;;  %v9828_v38 = vadd.f32 1.0, %v15960_v4 }
 0xd73   :  { %v15964_v31 = vpop.eup %15963  ;;  %v9824_v5 = vmul.f32 %v15962_v7, %v15958_v57  ;;  %v18230_v57 = vld [vmem:[#allocation12 + $0x80] ss:$16 sps:$4 sm:$0xff]   ;;  %v18236_v7 = vld [vmem:[#allocation12 + $0x64] ss:$16 sps:$4 sm:$0xff]  }
 0xd74   :  { %15967 = vrcp.f32 %v9828_v38  ;;  %v9834_v18 = vadd.f32 1.0, %v15964_v31  ;;  %v15966_v11 = vpop.eup %15965  ;;  %v18238_v38 = vld [vmem:[#allocation12 + $0x6c] ss:$16 sps:$4 sm:$0xff]  }
 0xd75   :  { %15969 = vtanh.f32 %v9796_v55  ;;  %9852 = vst [vmem:[#allocation3 + $0x18] sm:$0xc0] %v9824_v5  ;;  %v9858_v43 = vpack.c.bf16 %v9824_v5, %v9824_v5  ;;  %v9841_v55 = vadd.f32 1.0, %v15966_v11  ;;  %v18252_v11 = vld [vmem:[#allocation12 + $0x4c] ss:$16 sps:$4 sm:$0xff]  }
 0xd76   :  { %15971 = vrcp.f32 %v9834_v18  ;;  %v18244_v18 = vld [vmem:[#allocation12 + $0x60] ss:$16 sps:$4 sm:$0xff]   ;;  %18856 = vst [vmem:[#allocation26_spill] sm:$0xff] %v18252_v11 }
 0xd77   :  { %v9892_v23 = vrot.slane %v9858_v43, 3  ;;  %v18246_v43 = vld [vmem:[#allocation12 + $0x68] ss:$16 sps:$4 sm:$0xff]   ;;  %15973 = vrcp.f32 %v9841_v55  ;;  %v18269_v55 = vld [vmem:[#allocation12 + $0x20] ss:$16 sps:$4 sm:$0xff]  }
 0xd79   :  { %10087 = vmatmul.mubr.bf16.vlgmr.msra.gmra.mxu0 %v9892_v23  ;;  %10128 = vmatmul.mubr.bf16.vlgmr.msra.gmra.mxu1 %v9892_v23  ;;  %v18250_v23 = vld [vmem:[#allocation12 + $0x44] ss:$16 sps:$4 sm:$0xff]  }
 0xd7a   :  { %10338 = vmatpush1.bf16.msra.mxu0 %v18193_v37  ;;  %10379 = vmatpush1.bf16.msra.mxu1 %v18195_v46  ;;  %18855 = vst [vmem:[#allocation33_spill] sm:$0xff] %v18250_v23 }
 0xd7b   :  { %10339 = vmatprep.subr.bf16.mxu0 %v18197_v14  ;;  %10380 = vmatprep.subr.bf16.mxu1 %v18199_v41 }
 0xd7c   :  { %10369 = vmatprep.mubr.bf16.mxu0 %v18781_v63  ;;  %10410 = vmatprep.mubr.bf16.mxu1 %v18781_v63 }
 0xd7e   :  { %10340 = vmatpush1.bf16.msra.mxu0 %v18203_v29  ;;  %10381 = vmatpush1.bf16.msra.mxu1 %v18205_v62 }
 0xd7f   :  { %10341 = vmatprep.subr.bf16.mxu0 %v18209_v22  ;;  %10382 = vmatprep.subr.bf16.mxu1 %v18211_v53 }
 0xd81   :  { %v15968_v15 = vpop.eup %15967 }
 0xd82   :  { %v15970_v40 = vpop.eup %15969  ;;  %10342 = vmatpush1.bf16.msra.mxu0 %v18217_v47  ;;  %10383 = vmatpush1.bf16.msra.mxu1 %v18219_v52 }
 0xd83   :  { %v15972_v4 = vpop.eup %15971  ;;  %10343 = vmatprep.subr.bf16.mxu0 %v18223_v33  ;;  %10384 = vmatprep.subr.bf16.mxu1 %v18225_v19  ;;  %v9848_v31 = vmul.f32 %v15970_v40, %v15968_v15  ;;  %v18257_v15 = vld [vmem:[#allocation12 + $0x40] ss:$16 sps:$4 sm:$0xff]   ;;  %v18259_v40 = vld [vmem:[#allocation12 + $0x48] ss:$16 sps:$4 sm:$0xff]  }
 0xd84   :  { %v9847_v20 = vmul.f32 %v15972_v4, %v9845_v17  ;;  %18857 = vst [vmem:[#allocation27_spill] sm:$0xff] %v18257_v15  ;;  %18858 = vst [vmem:[#allocation28_spill] sm:$0xff] %v18259_v40  ;;  %v18263_v17 = vld [vmem:[#allocation12 + $0x24] ss:$16 sps:$4 sm:$0xff]   ;;  %v18265_v4 = vld [vmem:[#allocation12 + $0x2c] ss:$16 sps:$4 sm:$0xff]  }
 0xd85   :  { %18859 = vst [vmem:[#allocation29_spill] sm:$0xff] %v18263_v17  ;;  %18860 = vst [vmem:[#allocation30_spill] sm:$0xff] %v18265_v4 }
 0xd86   :  { %v18240_v5 = vadd.f32 %v9848_v31, %v9847_v20  ;;  %10344 = vmatpush1.bf16.msra.mxu0 %v18230_v57  ;;  %10385 = vmatpush1.bf16.msra.mxu1 %v18232_v10  ;;  %v18271_v31 = vld [vmem:[#allocation12 + $0x28] ss:$16 sps:$4 sm:$0xff]   ;;  %v18275_v20 = vld [vmem:[#allocation12 + $0x4] ss:$16 sps:$4 sm:$0xff]  }
 0xd87   :  { %10345 = vmatprep.subr.bf16.mxu0 %v18236_v7  ;;  %10386 = vmatprep.subr.bf16.mxu1 %v18238_v38  ;;  %18861 = vst [vmem:[#allocation31_spill] sm:$0xff] %v18271_v31 }
 0xd88   :  { %15975 = vtanh.f32 %v18240_v5 }
 0xd8a   :  { %10346 = vmatpush1.bf16.msra.mxu0 %v18244_v18  ;;  %10387 = vmatpush1.bf16.msra.mxu1 %v18246_v43 }
 0xd8b   :  { %10347 = vmatprep.subr.bf16.mxu0 %v18250_v23  ;;  %10388 = vmatprep.subr.bf16.mxu1 %v18252_v11  ;;  %v18277_v23 = vld [vmem:[#allocation12 + $0xc] ss:$16 sps:$4 sm:$0xff]   ;;  %v18281_v11 = vld [vmem:[#allocation12] ss:$16 sps:$4 sm:$0xff]  }
 0xd8e   :  { %10348 = vmatpush1.bf16.msra.mxu0 %v18257_v15  ;;  %10389 = vmatpush1.bf16.msra.mxu1 %v18259_v40  ;;  %v18283_v15 = vld [vmem:[#allocation12 + $0x8] ss:$16 sps:$4 sm:$0xff]   ;;  %v15974_v40 = vpop.eup %15973 }
 0xd8f   :  { %10349 = vmatprep.subr.bf16.mxu0 %v18263_v17  ;;  %10390 = vmatprep.subr.bf16.mxu1 %v18265_v4 }
 0xd92   :  { %10350 = vmatpush1.bf16.msra.mxu0 %v18269_v55  ;;  %10391 = vmatpush1.bf16.msra.mxu1 %v18271_v31 }
 0xd93   :  { %10351 = vmatprep.subr.bf16.mxu0 %v18275_v20  ;;  %10392 = vmatprep.subr.bf16.mxu1 %v18277_v23 }
 0xd95   :  { %v15976_v17 = vpop.eup %15975 }
 0xd96   :  { %10352 = vmatpush1.bf16.msra.mxu0 %v18281_v11  ;;  %10393 = vmatpush1.bf16.msra.mxu1 %v18283_v15  ;;  %v9851_v4 = vmul.f32 %v15976_v17, %v15974_v40 }
 0xd97   :  { %10688 = vmatprep.subr.bf16.mxu0 %v18087_v1  ;;  %10729 = vmatprep.subr.bf16.mxu1 %v18089_v39  ;;  %v9854_v1 = vld [vmem:[#allocation2 + $0x40] sm:$0x3] }
 0xd98   :  { %9853 = vst [vmem:[#allocation3] sm:$0x3] %v9851_v4  ;;  %v10144_v31 = vpack.c.bf16 %v9851_v4, %v9851_v4 }
 0xd9a   :  { %10370 = vmatmul.mubr.bf16.vlgmr.msra.gmra.mxu0 %v10144_v31  ;;  %10411 = vmatmul.mubr.bf16.vlgmr.msra.gmra.mxu1 %v10144_v31 }
 0xd9b   :  { %10689 = vmatpush1.bf16.msra.mxu0 %v18091_v8  ;;  %10730 = vmatpush1.bf16.msra.mxu1 %v18093_v30 }
 0xd9c   :  { %10690 = vmatprep.subr.bf16.mxu0 %v18099_v28  ;;  %10731 = vmatprep.subr.bf16.mxu1 %v18101_v3  ;;  %v9855_v28 = vld [vmem:[#allocation2 + $0x20] sm:$0x3] }
 0xd9d   :  { %10720 = vmatprep.mubr.bf16.mxu0 %v18781_v63  ;;  %10761 = vmatprep.mubr.bf16.mxu1 %v18781_v63 }
 0xd9f   :  { %10691 = vmatpush1.bf16.msra.mxu0 %v18103_v16  ;;  %10732 = vmatpush1.bf16.msra.mxu1 %v18105_v27 }
 0xda0   :  { %10692 = vmatprep.subr.bf16.mxu0 %v18111_v50  ;;  %10733 = vmatprep.subr.bf16.mxu1 %v18113_v60 }
 0xda3   :  { %10693 = vmatpush1.bf16.msra.mxu0 %v18115_v21  ;;  %10734 = vmatpush1.bf16.msra.mxu1 %v18117_v24 }
 0xda4   :  { %10694 = vmatprep.subr.bf16.mxu0 %v18123_v9  ;;  %10735 = vmatprep.subr.bf16.mxu1 %v18125_v13 }
 0xda7   :  { %10695 = vmatpush1.bf16.msra.mxu0 %v18127_v45  ;;  %10736 = vmatpush1.bf16.msra.mxu1 %v18129_v32  ;;  %v9857_v45 = vld [vmem:[#allocation2 + $0x38] sm:$0x3] }
 0xda8   :  { %10696 = vmatprep.subr.bf16.mxu0 %v18135_v34  ;;  %10737 = vmatprep.subr.bf16.mxu1 %v18137_v35  ;;  %v9856_v35 = vld [vmem:[#allocation2 + $0x10] sm:$0x3] }
 0xdab   :  { %10697 = vmatpush1.bf16.msra.mxu0 %v18139_v36  ;;  %10738 = vmatpush1.bf16.msra.mxu1 %v18141_v48 }
 0xdac   :  { %10698 = vmatprep.subr.bf16.mxu0 %v18147_v44  ;;  %10739 = vmatprep.subr.bf16.mxu1 %v18149_v56 }
 0xdaf   :  { %10699 = vmatpush1.bf16.msra.mxu0 %v18151_v12  ;;  %10740 = vmatpush1.bf16.msra.mxu1 %v18153_v49 }
 0xdb0   :  { %10700 = vmatprep.subr.bf16.mxu0 %v18159_v0  ;;  %10741 = vmatprep.subr.bf16.mxu1 %v18161_v51 }
 0xdb3   :  { %10701 = vmatpush1.bf16.msra.mxu0 %v18163_v54  ;;  %10742 = vmatpush1.bf16.msra.mxu1 %v18165_v2 }
 0xdb4   :  { %10702 = vmatprep.subr.bf16.mxu0 %v18171_v58  ;;  %10743 = vmatprep.subr.bf16.mxu1 %v18173_v59  ;;  %v10455_v59 = vrot.slane %v18190_v61, 6 }
 0xdb7   :  { %10703 = vmatpush1.bf16.msra.mxu0 %v18175_v42  ;;  %10744 = vmatpush1.bf16.msra.mxu1 %v18177_v25  ;;  %v10140_v25 = vld [vmem:[#allocation2 + $0x50] sm:$0xc0] }
 0xdb8   :  { %10986 = vmatprep.subr.bf16.mxu0 %v18183_v26  ;;  %11027 = vmatprep.subr.bf16.mxu1 %v18185_v6 }
 0xe39   :  { %v10088_v39 = vpop.f32.mrf.mxu0  ;;  %v10129_v8 = vpop.f32.mrf.mxu1 }
 0xe3a   :  { %v10136_v30 = vadd.f32 %v10088_v39, %v9854_v1  ;;  %v10138_v48 = vadd.f32 %v10129_v8, %v9856_v35  ;;  %v10141_v39 = vld [vmem:[#allocation2 + $0x68] sm:$0xc0] }
 0xe3b   :  { %v10090_v3 = vpop.f32.mrf.mxu0  ;;  %v10131_v16 = vpop.f32.mrf.mxu1 }
 0xe3c   :  { %v14355_v27 = vmul.f32 -1.442695, %v10136_v30  ;;  %v10137_v50 = vadd.f32 %v10090_v3, %v9855_v28  ;;  %v10139_v32 = vadd.f32 %v10131_v16, %v9857_v45 }
 0xe3d   :  { %v10092_v60 = vpop.f32.mrf.mxu0  ;;  %v10133_v21 = vpop.f32.mrf.mxu1 }
 0xe3e   :  { %15977 = vpow2.f32 %v14355_v27  ;;  %v14356_v24 = vmul.f32 -1.442695, %v10137_v50  ;;  %v14357_v34 = vmul.f32 -1.442695, %v10139_v32  ;;  %v10143_v21 = vld [vmem:[#allocation2 + $0x48] sm:$0xc0] }
 0xe3f   :  { %v10093_v9 = vpop.f32.mrf.mxu0  ;;  %v10134_v13 = vpop.f32.mrf.mxu1  ;;  %v10142_v32 = vld [vmem:[#allocation2 + $0x8] sm:$0xc0] }
 0xe40   :  { %15979 = vpow2.f32 %v14356_v24 }
 0xe41   :  { %15981 = vpow2.f32 %v14357_v34 }
 0xe4b   :  { %v15978_v36 = vpop.eup %15977 }
 0xe4c   :  { %v10438_v44 = vadd.f32 1.0, %v15978_v36 }
 0xe4d   :  { %v15980_v56 = vpop.eup %15979 }
 0xe4e   :  { %15983 = vrcp.f32 %v10438_v44  ;;  %v10444_v12 = vadd.f32 1.0, %v15980_v56  ;;  %v15982_v49 = vpop.eup %15981 }
 0xe4f   :  { %15985 = vtanh.f32 %v10138_v48  ;;  %v10451_v42 = vadd.f32 1.0, %v15982_v49 }
 0xe50   :  { %15987 = vrcp.f32 %v10444_v12 }
 0xe51   :  { %15989 = vrcp.f32 %v10451_v42  ;;  %v18393_v42 = vld [vmem:[#allocation11 + $0xac] ss:$16 sps:$4 sm:$0xff]  }
 0xe5a   :  { %v10371_v0 = vpop.f32.mrf.mxu0  ;;  %v10412_v51 = vpop.f32.mrf.mxu1 }
 0xe5b   :  { %v15984_v54 = vpop.eup %15983  ;;  %v10423_v2 = vrot.slane %v10371_v0, 2  ;;  %v10425_v9 = vrot.slane %v10412_v51, 2 }
 0xe5c   :  { %v15986_v58 = vpop.eup %15985  ;;  %v10373_v26 = vpop.f32.mrf.mxu0 }
 0xe5d   :  { %v10414_v6 = vpop.f32.mrf.mxu1  ;;  %v15988_v40 = vpop.eup %15987  ;;  %v10431_v17 = vadd.f32 %v10423_v2, %v10140_v25  ;;  %v10424_v4 = vrot.slane %v10373_v26, 2  ;;  %v10458_v31 = vmul.f32 %v15986_v58, %v15984_v54  ;;  %v10433_v35 = vadd.f32 %v10425_v9, %v10142_v32  ;;  %v18381_v54 = vld [vmem:[#allocation11 + $0xcc] ss:$16 sps:$4 sm:$0xff]   ;;  %v18383_v2 = vld [vmem:[#allocation11 + $0xc0] ss:$16 sps:$4 sm:$0xff]  }
 0xe5e   :  { %v10457_v1 = vmul.f32 %v15988_v40, %v10455_v59  ;;  %v10375_v8 = vpop.f32.mrf.mxu0  ;;  %v10426_v60 = vrot.slane %v10414_v6, 2  ;;  %v15990_v45 = vpop.eup %15989  ;;  %v18385_v58 = vld [vmem:[#allocation11 + $0xc8] ss:$16 sps:$4 sm:$0xff]   ;;  %v18391_v59 = vld [vmem:[#allocation11 + $0xa4] ss:$16 sps:$4 sm:$0xff]  }
 0xe5f   :  { %v10416_v30 = vpop.f32.mrf.mxu1  ;;  %v14358_v28 = vmul.f32 -1.442695, %v10431_v17  ;;  %v10432_v3 = vadd.f32 %v10424_v4, %v10141_v39  ;;  %v18395_v25 = vld [vmem:[#allocation11 + $0xa0] ss:$16 sps:$4 sm:$0xff]   ;;  %v18397_v26 = vld [vmem:[#allocation11 + $0xa8] ss:$16 sps:$4 sm:$0xff]  }
 0xe60   :  { %v18326_v16 = vadd.f32 %v10458_v31, %v10457_v1  ;;  %v10376_v27 = vpop.f32.mrf.mxu0  ;;  %v10434_v24 = vadd.f32 %v10426_v60, %v10143_v21  ;;  %v18403_v6 = vld [vmem:[#allocation11 + $0x84] ss:$16 sps:$4 sm:$0xff]   ;;  %v18405_v40 = vld [vmem:[#allocation11 + $0x8c] ss:$16 sps:$4 sm:$0xff]   ;;  %v18407_v17 = vld [vmem:[#allocation11 + $0x80] ss:$16 sps:$4 sm:$0xff]  }
 0xe61   :  { %v10417_v50 = vpop.f32.mrf.mxu1  ;;  %15991 = vpow2.f32 %v14358_v28  ;;  %v14359_v61 = vmul.f32 -1.442695, %v10432_v3  ;;  %v18409_v4 = vld [vmem:[#allocation11 + $0x88] ss:$16 sps:$4 sm:$0xff]   ;;  %v18415_v31 = vld [vmem:[#allocation11 + $0x64] ss:$16 sps:$4 sm:$0xff]  }
 0xe62   :  { %15993 = vtanh.f32 %v18326_v16  ;;  %v14360_v13 = vmul.f32 -1.442695, %v10434_v24  ;;  %v18417_v1 = vld [vmem:[#allocation11 + $0x6c] ss:$16 sps:$4 sm:$0xff]   ;;  %v18419_v39 = vld [vmem:[#allocation11 + $0x60] ss:$16 sps:$4 sm:$0xff]  }
 0xe63   :  { %15995 = vpow2.f32 %v14359_v61  ;;  %v18421_v8 = vld [vmem:[#allocation11 + $0x68] ss:$16 sps:$4 sm:$0xff]   ;;  %v18427_v30 = vld [vmem:[#allocation11 + $0x44] ss:$16 sps:$4 sm:$0xff]   ;;  %v18429_v28 = vld [vmem:[#allocation11 + $0x4c] ss:$16 sps:$4 sm:$0xff]  }
 0xe64   :  { %15997 = vpow2.f32 %v14360_v13  ;;  %v18431_v3 = vld [vmem:[#allocation11 + $0x40] ss:$16 sps:$4 sm:$0xff]   ;;  %v18433_v27 = vld [vmem:[#allocation11 + $0x48] ss:$16 sps:$4 sm:$0xff]   ;;  %v18439_v50 = vld [vmem:[#allocation11 + $0x24] ss:$16 sps:$4 sm:$0xff]  }
 0xe65   :  { %v18441_v61 = vld [vmem:[#allocation11 + $0x2c] ss:$16 sps:$4 sm:$0xff]   ;;  %v18443_v60 = vld [vmem:[#allocation11 + $0x20] ss:$16 sps:$4 sm:$0xff]   ;;  %v18445_v21 = vld [vmem:[#allocation11 + $0x28] ss:$16 sps:$4 sm:$0xff]  }
 0xe66   :  { %v18451_v24 = vld [vmem:[#allocation11 + $0x4] ss:$16 sps:$4 sm:$0xff]   ;;  %v18453_v9 = vld [vmem:[#allocation11 + $0xc] ss:$16 sps:$4 sm:$0xff]   ;;  %v18455_v13 = vld [vmem:[#allocation11] ss:$16 sps:$4 sm:$0xff]  }
 0xe67   :  { %v18463_v32 = vld [vmem:[#allocation12 + $0xe4] ss:$16 sps:$4 sm:$0xff]  }
 0xe6e   :  { %v15992_v34 = vpop.eup %15991 }
 0xe6f   :  { %v15994_v36 = vpop.eup %15993  ;;  %v10465_v48 = vadd.f32 1.0, %v15992_v34  ;;  %v18465_v34 = vld [vmem:[#allocation12 + $0xec] ss:$16 sps:$4 sm:$0xff]  }
 0xe70   :  { %v15996_v44 = vpop.eup %15995  ;;  %v10461_v56 = vmul.f32 %v15994_v36, %v15990_v45  ;;  %v18457_v45 = vld [vmem:[#allocation11 + $0x8] ss:$16 sps:$4 sm:$0xff]  }
 0xe71   :  { %15999 = vrcp.f32 %v10465_v48  ;;  %v10471_v12 = vadd.f32 1.0, %v15996_v44  ;;  %v15998_v0 = vpop.eup %15997  ;;  %v10491_v44 = vld [vmem:[#allocation2 + $0x40] sm:$0xc] }
 0xe72   :  { %16001 = vtanh.f32 %v10433_v35  ;;  %10489 = vst [vmem:[#allocation3 + $0x10] sm:$0x3] %v10461_v56  ;;  %v10495_v49 = vpack.c.bf16 %v10461_v56, %v10461_v56 }
 0xe73   :  { %16003 = vrcp.f32 %v10471_v12 }
 0xe74   :  { %10721 = vmatmul.mubr.bf16.vlgmr.msra.gmra.mxu0 %v10495_v49  ;;  %10762 = vmatmul.mubr.bf16.vlgmr.msra.gmra.mxu1 %v10495_v49 }
 0xe75   :  { %10987 = vmatpush1.bf16.msra.mxu0 %v18193_v37  ;;  %11028 = vmatpush1.bf16.msra.mxu1 %v18195_v46 }
 0xe76   :  { %10988 = vmatprep.subr.bf16.mxu0 %v18197_v14  ;;  %11029 = vmatprep.subr.bf16.mxu1 %v18199_v41  ;;  %v10482_v14 = vrot.slane %v18240_v5, 2 }
 0xe77   :  { %11018 = vmatprep.mubr.bf16.mxu0 %v18781_v63  ;;  %11059 = vmatprep.mubr.bf16.mxu1 %v18781_v63 }
 0xe79   :  { %10989 = vmatpush1.bf16.msra.mxu0 %v18203_v29  ;;  %11030 = vmatpush1.bf16.msra.mxu1 %v18205_v62  ;;  %v10478_v29 = vadd.f32 1.0, %v15998_v0 }
 0xe7a   :  { %10990 = vmatprep.subr.bf16.mxu0 %v18209_v22  ;;  %11031 = vmatprep.subr.bf16.mxu1 %v18211_v53  ;;  %v18862_v53 = vld [vmem:[#allocation33_spill] sm:$0xff] }
 0xe7b   :  { %16005 = vrcp.f32 %v10478_v29 }
 0xe7d   :  { %10991 = vmatpush1.bf16.msra.mxu0 %v18217_v47  ;;  %11032 = vmatpush1.bf16.msra.mxu1 %v18219_v52  ;;  %v18863_v47 = vld [vmem:[#allocation26_spill] sm:$0xff]  ;;  %v18864_v52 = vld [vmem:[#allocation27_spill] sm:$0xff] }
 0xe7e   :  { %v16000_v37 = vpop.eup %15999  ;;  %10992 = vmatprep.subr.bf16.mxu0 %v18223_v33  ;;  %11033 = vmatprep.subr.bf16.mxu1 %v18225_v19  ;;  %v18865_v33 = vld [vmem:[#allocation28_spill] sm:$0xff]  ;;  %v18866_v19 = vld [vmem:[#allocation29_spill] sm:$0xff] }
 0xe7f   :  { %v16002_v46 = vpop.eup %16001 }
 0xe80   :  { %v16004_v41 = vpop.eup %16003  ;;  %v10485_v62 = vmul.f32 %v16002_v46, %v16000_v37  ;;  %v10492_v37 = vld [vmem:[#allocation2 + $0x20] sm:$0xc] }
 0xe81   :  { %v10484_v51 = vmul.f32 %v16004_v41, %v10482_v14  ;;  %10993 = vmatpush1.bf16.msra.mxu0 %v18230_v57  ;;  %11034 = vmatpush1.bf16.msra.mxu1 %v18232_v10  ;;  %v18867_v57 = vld [vmem:[#allocation30_spill] sm:$0xff]  ;;  %v18868_v10 = vld [vmem:[#allocation31_spill] sm:$0xff] }
 0xe82   :  { %10994 = vmatprep.subr.bf16.mxu0 %v18236_v7  ;;  %11035 = vmatprep.subr.bf16.mxu1 %v18238_v38 }
 0xe83   :  { %v18348_v22 = vadd.f32 %v10485_v62, %v10484_v51 }
 0xe85   :  { %16007 = vtanh.f32 %v18348_v22  ;;  %10995 = vmatpush1.bf16.msra.mxu0 %v18244_v18  ;;  %11036 = vmatpush1.bf16.msra.mxu1 %v18246_v43 }
 0xe86   :  { %10996 = vmatprep.subr.bf16.mxu0 %v18862_v53  ;;  %11037 = vmatprep.subr.bf16.mxu1 %v18863_v47 }
 0xe88   :  { %v16006_v7 = vpop.eup %16005 }
 0xe89   :  { %10997 = vmatpush1.bf16.msra.mxu0 %v18864_v52  ;;  %11038 = vmatpush1.bf16.msra.mxu1 %v18865_v33  ;;  %v10494_v52 = vld [vmem:[#allocation2 + $0x38] sm:$0xc] }
 0xe8a   :  { %10998 = vmatprep.subr.bf16.mxu0 %v18866_v19  ;;  %11039 = vmatprep.subr.bf16.mxu1 %v18867_v57 }
 0xe8d   :  { %10999 = vmatpush1.bf16.msra.mxu0 %v18269_v55  ;;  %11040 = vmatpush1.bf16.msra.mxu1 %v18868_v10  ;;  %v18367_v55 = vld [vmem:[#allocation11 + $0xe4] ss:$16 sps:$4 sm:$0xff]   ;;  %v10493_v10 = vld [vmem:[#allocation2 + $0x10] sm:$0xc] }
 0xe8e   :  { %11000 = vmatprep.subr.bf16.mxu0 %v18275_v20  ;;  %11041 = vmatprep.subr.bf16.mxu1 %v18277_v23  ;;  %v18369_v20 = vld [vmem:[#allocation11 + $0xec] ss:$16 sps:$4 sm:$0xff]   ;;  %v18371_v23 = vld [vmem:[#allocation11 + $0xe0] ss:$16 sps:$4 sm:$0xff]  }
 0xe91   :  { %11001 = vmatpush1.bf16.msra.mxu0 %v18281_v11  ;;  %11042 = vmatpush1.bf16.msra.mxu1 %v18283_v15  ;;  %v18373_v11 = vld [vmem:[#allocation11 + $0xe8] ss:$16 sps:$4 sm:$0xff]   ;;  %v18379_v15 = vld [vmem:[#allocation11 + $0xc4] ss:$16 sps:$4 sm:$0xff]  }
 0xe92   :  { %v16008_v38 = vpop.eup %16007  ;;  %11340 = vmatprep.subr.bf16.mxu0 %v18367_v55  ;;  %11381 = vmatprep.subr.bf16.mxu1 %v18369_v20 }
 0xe93   :  { %v10488_v5 = vmul.f32 %v16008_v38, %v16006_v7 }
 0xe95   :  { %10490 = vst [vmem:[#allocation3 + $0x8] sm:$0xc0] %v10488_v5  ;;  %v10790_v18 = vpack.c.bf16 %v10488_v5, %v10488_v5 }
 0xe97   :  { %v10824_v43 = vrot.slane %v10790_v18, 3 }
 0xe99   :  { %11019 = vmatmul.mubr.bf16.vlgmr.msra.gmra.mxu0 %v10824_v43  ;;  %11060 = vmatmul.mubr.bf16.vlgmr.msra.gmra.mxu1 %v10824_v43 }
 0xe9a   :  { %11372 = vmatprep.mubr.bf16.mxu0 %v18781_v63  ;;  %11413 = vmatprep.mubr.bf16.mxu1 %v18781_v63 }
 0xe9b   :  { %11341 = vmatpush1.bf16.msra.mxu0 %v18371_v23  ;;  %11382 = vmatpush1.bf16.msra.mxu1 %v18373_v11 }
 0xe9c   :  { %11342 = vmatprep.subr.bf16.mxu0 %v18379_v15  ;;  %11383 = vmatprep.subr.bf16.mxu1 %v18381_v54 }
 0xe9f   :  { %11343 = vmatpush1.bf16.msra.mxu0 %v18383_v2  ;;  %11384 = vmatpush1.bf16.msra.mxu1 %v18385_v58 }
 0xea0   :  { %11344 = vmatprep.subr.bf16.mxu0 %v18391_v59  ;;  %11385 = vmatprep.subr.bf16.mxu1 %v18393_v42 }
 0xea3   :  { %11345 = vmatpush1.bf16.msra.mxu0 %v18395_v25  ;;  %11386 = vmatpush1.bf16.msra.mxu1 %v18397_v26 }
 0xea4   :  { %11346 = vmatprep.subr.bf16.mxu0 %v18403_v6  ;;  %11387 = vmatprep.subr.bf16.mxu1 %v18405_v40 }
 0xea7   :  { %11347 = vmatpush1.bf16.msra.mxu0 %v18407_v17  ;;  %11388 = vmatpush1.bf16.msra.mxu1 %v18409_v4 }
 0xea8   :  { %11348 = vmatprep.subr.bf16.mxu0 %v18415_v31  ;;  %11389 = vmatprep.subr.bf16.mxu1 %v18417_v1 }
 0xeab   :  { %11349 = vmatpush1.bf16.msra.mxu0 %v18419_v39  ;;  %11390 = vmatpush1.bf16.msra.mxu1 %v18421_v8 }
 0xeac   :  { %11350 = vmatprep.subr.bf16.mxu0 %v18427_v30  ;;  %11391 = vmatprep.subr.bf16.mxu1 %v18429_v28 }
 0xeaf   :  { %11351 = vmatpush1.bf16.msra.mxu0 %v18431_v3  ;;  %11392 = vmatpush1.bf16.msra.mxu1 %v18433_v27 }
 0xeb0   :  { %11352 = vmatprep.subr.bf16.mxu0 %v18439_v50  ;;  %11393 = vmatprep.subr.bf16.mxu1 %v18441_v61 }
 0xeb3   :  { %11353 = vmatpush1.bf16.msra.mxu0 %v18443_v60  ;;  %11394 = vmatpush1.bf16.msra.mxu1 %v18445_v21 }
 0xeb4   :  { %11354 = vmatprep.subr.bf16.mxu0 %v18451_v24  ;;  %11395 = vmatprep.subr.bf16.mxu1 %v18453_v9 }
 0xeb7   :  { %11355 = vmatpush1.bf16.msra.mxu0 %v18455_v13  ;;  %11396 = vmatpush1.bf16.msra.mxu1 %v18457_v45 }
 0xeb8   :  { %11638 = vmatprep.subr.bf16.mxu0 %v18463_v32  ;;  %11679 = vmatprep.subr.bf16.mxu1 %v18465_v34 }
 0xf34   :  { %v10722_v35 = vpop.f32.mrf.mxu0  ;;  %v10763_v36 = vpop.f32.mrf.mxu1 }
 0xf35   :  { %v10774_v48 = vrot.slane %v10722_v35, 6  ;;  %v10776_v19 = vrot.slane %v10763_v36, 6 }
 0xf36   :  { %v10724_v56 = vpop.f32.mrf.mxu0  ;;  %v10765_v12 = vpop.f32.mrf.mxu1 }
 0xf37   :  { %v10782_v49 = vadd.f32 %v10774_v48, %v10491_v44  ;;  %v10775_v0 = vrot.slane %v10724_v56, 6  ;;  %v10777_v47 = vrot.slane %v10765_v12, 6  ;;  %v10784_v38 = vadd.f32 %v10776_v19, %v10493_v10 }
 0xf38   :  { %v10726_v46 = vpop.f32.mrf.mxu0  ;;  %v10767_v14 = vpop.f32.mrf.mxu1  ;;  %v11104_v56 = vrot.slane %v18326_v16, 6 }
 0xf39   :  { %v14425_v41 = vmul.f32 -1.442695, %v10782_v49  ;;  %v10783_v29 = vadd.f32 %v10775_v0, %v10492_v37  ;;  %v10785_v33 = vadd.f32 %v10777_v47, %v10494_v52  ;;  %v10787_v52 = vld [vmem:[#allocation2 + $0x68] sm:$0x30] }
 0xf3a   :  { %v10727_v62 = vpop.f32.mrf.mxu0  ;;  %v10768_v51 = vpop.f32.mrf.mxu1 }
 0xf3b   :  { %16009 = vpow2.f32 %v14425_v41  ;;  %v14426_v53 = vmul.f32 -1.442695, %v10783_v29  ;;  %v14427_v57 = vmul.f32 -1.442695, %v10785_v33  ;;  %v10786_v41 = vld [vmem:[#allocation2 + $0x50] sm:$0x30] }
 0xf3d   :  { %16011 = vpow2.f32 %v14426_v53 }
 0xf3e   :  { %16013 = vpow2.f32 %v14427_v57 }
 0xf48   :  { %v16010_v7 = vpop.eup %16009 }
 0xf49   :  { %v11087_v5 = vadd.f32 1.0, %v16010_v7 }
 0xf4a   :  { %v16012_v18 = vpop.eup %16011 }
 0xf4b   :  { %16015 = vrcp.f32 %v11087_v5  ;;  %v11093_v43 = vadd.f32 1.0, %v16012_v18  ;;  %v16014_v35 = vpop.eup %16013  ;;  %v10789_v18 = vld [vmem:[#allocation2 + $0x48] sm:$0x30] }
 0xf4c   :  { %16017 = vtanh.f32 %v10784_v38  ;;  %v11100_v36 = vadd.f32 1.0, %v16014_v35 }
 0xf4d   :  { %16019 = vrcp.f32 %v11093_v43 }
 0xf4e   :  { %16021 = vrcp.f32 %v11100_v36 }
 0xf58   :  { %v16016_v48 = vpop.eup %16015 }
 0xf59   :  { %v16018_v44 = vpop.eup %16017  ;;  %v11020_v12 = vpop.f32.mrf.mxu0 }
 0xf5a   :  { %v11061_v49 = vpop.f32.mrf.mxu1  ;;  %v16020_v0 = vpop.eup %16019  ;;  %v11072_v37 = vrot.slane %v11020_v12, 4  ;;  %v11107_v46 = vmul.f32 %v16018_v44, %v16016_v48  ;;  %v10788_v12 = vld [vmem:[#allocation2 + $0x8] sm:$0x30] }
 0xf5b   :  { %v11106_v14 = vmul.f32 %v16020_v0, %v11104_v56  ;;  %v11022_v29 = vpop.f32.mrf.mxu0  ;;  %v11074_v35 = vrot.slane %v11061_v49, 4  ;;  %v16022_v48 = vpop.eup %16021 }
 0xf5c   :  { %v11063_v62 = vpop.f32.mrf.mxu1  ;;  %v11080_v51 = vadd.f32 %v11072_v37, %v10786_v41  ;;  %v11073_v53 = vrot.slane %v11022_v29, 4 }
 0xf5d   :  { %v18470_v47 = vadd.f32 %v11107_v46, %v11106_v14  ;;  %v11024_v33 = vpop.f32.mrf.mxu0  ;;  %v11075_v5 = vrot.slane %v11063_v62, 4  ;;  %v11082_v37 = vadd.f32 %v11074_v35, %v10788_v12  ;;  %v18475_v62 = vld [vmem:[#allocation12 + $0xe8] ss:$16 sps:$4 sm:$0xff]  }
 0xf5e   :  { %v11065_v19 = vpop.f32.mrf.mxu1  ;;  %v14428_v57 = vmul.f32 -1.442695, %v11080_v51  ;;  %v11081_v16 = vadd.f32 %v11073_v53, %v10787_v52  ;;  %v18473_v51 = vld [vmem:[#allocation12 + $0xe0] ss:$16 sps:$4 sm:$0xff]   ;;  %v18477_v53 = vld [vmem:[#allocation12 + $0xc4] ss:$16 sps:$4 sm:$0xff]  }
 0xf5f   :  { %16023 = vtanh.f32 %v18470_v47  ;;  %v11025_v10 = vpop.f32.mrf.mxu0  ;;  %v11083_v43 = vadd.f32 %v11075_v5, %v10789_v18  ;;  %v18479_v52 = vld [vmem:[#allocation12 + $0xcc] ss:$16 sps:$4 sm:$0xff]   ;;  %v18483_v33 = vld [vmem:[#allocation12 + $0xc0] ss:$16 sps:$4 sm:$0xff]   ;;  %v18485_v19 = vld [vmem:[#allocation12 + $0xc8] ss:$16 sps:$4 sm:$0xff]  }
 0xf60   :  { %v11066_v7 = vpop.f32.mrf.mxu1  ;;  %16025 = vpow2.f32 %v14428_v57  ;;  %v14429_v38 = vmul.f32 -1.442695, %v11081_v16  ;;  %v18489_v57 = vld [vmem:[#allocation12 + $0xa4] ss:$16 sps:$4 sm:$0xff]   ;;  %v18491_v16 = vld [vmem:[#allocation12 + $0xac] ss:$16 sps:$4 sm:$0xff]  }
 0xf61   :  { %v14430_v44 = vmul.f32 -1.442695, %v11083_v43  ;;  %v18497_v10 = vld [vmem:[#allocation12 + $0xa0] ss:$16 sps:$4 sm:$0xff]   ;;  %v18499_v7 = vld [vmem:[#allocation12 + $0xa8] ss:$16 sps:$4 sm:$0xff]  }
 0xf62   :  { %16027 = vpow2.f32 %v14429_v38  ;;  %v18503_v38 = vld [vmem:[#allocation12 + $0x84] ss:$16 sps:$4 sm:$0xff]   ;;  %v18505_v5 = vld [vmem:[#allocation12 + $0x8c] ss:$16 sps:$4 sm:$0xff]   ;;  %v18509_v43 = vld [vmem:[#allocation12 + $0x80] ss:$16 sps:$4 sm:$0xff]  }
 0xf63   :  { %16029 = vpow2.f32 %v14430_v44  ;;  %18869 = vst [vmem:[#allocation32_spill] sm:$0xff] %v18505_v5  ;;  %v18511_v35 = vld [vmem:[#allocation12 + $0x88] ss:$16 sps:$4 sm:$0xff]   ;;  %v18515_v44 = vld [vmem:[#allocation12 + $0x64] ss:$16 sps:$4 sm:$0xff]  }
 0xf6c   :  { %v16024_v56 = vpop.eup %16023 }
 0xf6d   :  { %v16026_v0 = vpop.eup %16025  ;;  %v11110_v36 = vmul.f32 %v16024_v56, %v16022_v48  ;;  %v18517_v56 = vld [vmem:[#allocation12 + $0x6c] ss:$16 sps:$4 sm:$0xff]  }
 0xf6e   :  { %v11114_v46 = vadd.f32 1.0, %v16026_v0  ;;  %v11131_v0 = vrot.slane %v18348_v22, 2 }
 0xf6f   :  { %v16028_v14 = vpop.eup %16027  ;;  %11138 = vst [vmem:[#allocation3 + $0x10] sm:$0xc] %v11110_v36  ;;  %v11144_v41 = vpack.c.bf16 %v11110_v36, %v11110_v36 }
 0xf70   :  { %16031 = vrcp.f32 %v11114_v46  ;;  %v11120_v29 = vadd.f32 1.0, %v16028_v14  ;;  %v16030_v18 = vpop.eup %16029 }
 0xf71   :  { %16033 = vtanh.f32 %v11082_v37  ;;  %v11178_v49 = vrot.slane %v11144_v41, 1  ;;  %v11127_v36 = vadd.f32 1.0, %v16030_v18  ;;  %v18522_v41 = vld [vmem:[#allocation12 + $0x60] ss:$16 sps:$4 sm:$0xff]  }
 0xf72   :  { %16035 = vrcp.f32 %v11120_v29  ;;  %v18524_v29 = vld [vmem:[#allocation12 + $0x68] ss:$16 sps:$4 sm:$0xff]   ;;  %v18537_v18 = vld [vmem:[#allocation12 + $0x40] ss:$16 sps:$4 sm:$0xff]  }
 0xf73   :  { %11373 = vmatmul.mubr.bf16.vlgmr.msra.gmra.mxu0 %v11178_v49  ;;  %11414 = vmatmul.mubr.bf16.vlgmr.msra.gmra.mxu1 %v11178_v49  ;;  %v18528_v49 = vld [vmem:[#allocation12 + $0x44] ss:$16 sps:$4 sm:$0xff]   ;;  %16037 = vrcp.f32 %v11127_v36  ;;  %18871 = vst [vmem:[#allocation33_spill] sm:$0xff] %v18537_v18  ;;  %v18551_v36 = vld [vmem:[#allocation12 + $0x28] ss:$16 sps:$4 sm:$0xff]  }
 0xf74   :  { %11639 = vmatpush1.bf16.msra.mxu0 %v18473_v51  ;;  %11680 = vmatpush1.bf16.msra.mxu1 %v18475_v62  ;;  %18876 = vst [vmem:[#allocation30_spill] sm:$0xff] %v18551_v36 }
 0xf75   :  { %11640 = vmatprep.subr.bf16.mxu0 %v18477_v53  ;;  %11681 = vmatprep.subr.bf16.mxu1 %v18479_v52 }
 0xf76   :  { %11670 = vmatprep.mubr.bf16.mxu0 %v18781_v63  ;;  %11711 = vmatprep.mubr.bf16.mxu1 %v18781_v63 }
 0xf78   :  { %11641 = vmatpush1.bf16.msra.mxu0 %v18483_v33  ;;  %11682 = vmatpush1.bf16.msra.mxu1 %v18485_v19 }
 0xf79   :  { %11642 = vmatprep.subr.bf16.mxu0 %v18489_v57  ;;  %11683 = vmatprep.subr.bf16.mxu1 %v18491_v16 }
 0xf7c   :  { %11643 = vmatpush1.bf16.msra.mxu0 %v18497_v10  ;;  %11684 = vmatpush1.bf16.msra.mxu1 %v18499_v7 }
 0xf7d   :  { %v16032_v48 = vpop.eup %16031  ;;  %11644 = vmatprep.subr.bf16.mxu0 %v18503_v38  ;;  %11685 = vmatprep.subr.bf16.mxu1 %v18505_v5  ;;  %v18530_v5 = vld [vmem:[#allocation12 + $0x4c] ss:$16 sps:$4 sm:$0xff]  }
 0xf7e   :  { %v16034_v12 = vpop.eup %16033  ;;  %18870 = vst [vmem:[#allocation19_spill] sm:$0xff] %v18530_v5 }
 0xf7f   :  { %v16036_v37 = vpop.eup %16035  ;;  %v11134_v46 = vmul.f32 %v16034_v12, %v16032_v48  ;;  %v18539_v48 = vld [vmem:[#allocation12 + $0x48] ss:$16 sps:$4 sm:$0xff]   ;;  %v18543_v12 = vld [vmem:[#allocation12 + $0x24] ss:$16 sps:$4 sm:$0xff]  }
 0xf80   :  { %v11133_v14 = vmul.f32 %v16036_v37, %v11131_v0  ;;  %11645 = vmatpush1.bf16.msra.mxu0 %v18509_v43  ;;  %11686 = vmatpush1.bf16.msra.mxu1 %v18511_v35  ;;  %18872 = vst [vmem:[#allocation26_spill] sm:$0xff] %v18539_v48  ;;  %18873 = vst [vmem:[#allocation27_spill] sm:$0xff] %v18543_v12  ;;  %v18545_v0 = vld [vmem:[#allocation12 + $0x2c] ss:$16 sps:$4 sm:$0xff]   ;;  %v18549_v37 = vld [vmem:[#allocation12 + $0x20] ss:$16 sps:$4 sm:$0xff]  }
 0xf81   :  { %11646 = vmatprep.subr.bf16.mxu0 %v18515_v44  ;;  %11687 = vmatprep.subr.bf16.mxu1 %v18517_v56  ;;  %18874 = vst [vmem:[#allocation28_spill] sm:$0xff] %v18545_v0  ;;  %18875 = vst [vmem:[#allocation29_spill] sm:$0xff] %v18549_v37 }
 0xf82   :  { %v18532_v22 = vadd.f32 %v11134_v46, %v11133_v14  ;;  %v18555_v46 = vld [vmem:[#allocation12 + $0x4] ss:$16 sps:$4 sm:$0xff]   ;;  %v18557_v14 = vld [vmem:[#allocation12 + $0xc] ss:$16 sps:$4 sm:$0xff]  }
 0xf84   :  { %16039 = vtanh.f32 %v18532_v22  ;;  %11647 = vmatpush1.bf16.msra.mxu0 %v18522_v41  ;;  %11688 = vmatpush1.bf16.msra.mxu1 %v18524_v29 }
 0xf85   :  { %11648 = vmatprep.subr.bf16.mxu0 %v18528_v49  ;;  %11689 = vmatprep.subr.bf16.mxu1 %v18530_v5  ;;  %v18561_v5 = vld [vmem:[#allocation12] ss:$16 sps:$4 sm:$0xff]  }
 0xf88   :  { %11649 = vmatpush1.bf16.msra.mxu0 %v18537_v18  ;;  %11690 = vmatpush1.bf16.msra.mxu1 %v18539_v48  ;;  %v18563_v18 = vld [vmem:[#allocation12 + $0x8] ss:$16 sps:$4 sm:$0xff]   ;;  %v16038_v48 = vpop.eup %16037 }
 0xf89   :  { %11650 = vmatprep.subr.bf16.mxu0 %v18543_v12  ;;  %11691 = vmatprep.subr.bf16.mxu1 %v18545_v0 }
 0xf8c   :  { %11651 = vmatpush1.bf16.msra.mxu0 %v18549_v37  ;;  %11692 = vmatpush1.bf16.msra.mxu1 %v18551_v36 }
 0xf8d   :  { %11652 = vmatprep.subr.bf16.mxu0 %v18555_v46  ;;  %11693 = vmatprep.subr.bf16.mxu1 %v18557_v14 }
 0xf90   :  { %11653 = vmatpush1.bf16.msra.mxu0 %v18561_v5  ;;  %11694 = vmatpush1.bf16.msra.mxu1 %v18563_v18 }
 0xf91   :  { %v16040_v0 = vpop.eup %16039  ;;  %11992 = vmatprep.subr.bf16.mxu0 %v18367_v55  ;;  %12033 = vmatprep.subr.bf16.mxu1 %v18369_v20 }
 0xf92   :  { %v11137_v37 = vmul.f32 %v16040_v0, %v16038_v48 }
 0xf94   :  { %11139 = vst [vmem:[#allocation3 + $0x8] sm:$0x30] %v11137_v37  ;;  %v11442_v36 = vpack.c.bf16 %v11137_v37, %v11137_v37 }
 0xf96   :  { %v11476_v12 = vrot.slane %v11442_v36, 2  ;;  %v11438_v36 = vld [vmem:[#allocation2 + $0x50] sm:$0xc] }
 0xf98   :  { %11671 = vmatmul.mubr.bf16.vlgmr.msra.gmra.mxu0 %v11476_v12  ;;  %11712 = vmatmul.mubr.bf16.vlgmr.msra.gmra.mxu1 %v11476_v12 }
 0xf99   :  { %11993 = vmatpush1.bf16.msra.mxu0 %v18371_v23  ;;  %12034 = vmatpush1.bf16.msra.mxu1 %v18373_v11  ;;  %v11140_v11 = vld [vmem:[#allocation2 + $0x40] sm:$0x30] }
 0xf9a   :  { %11994 = vmatprep.subr.bf16.mxu0 %v18379_v15  ;;  %12035 = vmatprep.subr.bf16.mxu1 %v18381_v54 }
 0xf9b   :  { %12024 = vmatprep.mubr.bf16.mxu0 %v18781_v63  ;;  %12065 = vmatprep.mubr.bf16.mxu1 %v18781_v63 }
 0xf9d   :  { %11995 = vmatpush1.bf16.msra.mxu0 %v18383_v2  ;;  %12036 = vmatpush1.bf16.msra.mxu1 %v18385_v58 }
 0xf9e   :  { %11996 = vmatprep.subr.bf16.mxu0 %v18391_v59  ;;  %12037 = vmatprep.subr.bf16.mxu1 %v18393_v42  ;;  %v11141_v59 = vld [vmem:[#allocation2 + $0x20] sm:$0x30] }
 0xfa1   :  { %11997 = vmatpush1.bf16.msra.mxu0 %v18395_v25  ;;  %12038 = vmatpush1.bf16.msra.mxu1 %v18397_v26 }
 0xfa2   :  { %11998 = vmatprep.subr.bf16.mxu0 %v18403_v6  ;;  %12039 = vmatprep.subr.bf16.mxu1 %v18405_v40 }
 0xfa5   :  { %11999 = vmatpush1.bf16.msra.mxu0 %v18407_v17  ;;  %12040 = vmatpush1.bf16.msra.mxu1 %v18409_v4 }
 0xfa6   :  { %12000 = vmatprep.subr.bf16.mxu0 %v18415_v31  ;;  %12041 = vmatprep.subr.bf16.mxu1 %v18417_v1  ;;  %v11143_v1 = vld [vmem:[#allocation2 + $0x38] sm:$0x30] }
 0xfa9   :  { %12001 = vmatpush1.bf16.msra.mxu0 %v18419_v39  ;;  %12042 = vmatpush1.bf16.msra.mxu1 %v18421_v8 }
 0xfaa   :  { %12002 = vmatprep.subr.bf16.mxu0 %v18427_v30  ;;  %12043 = vmatprep.subr.bf16.mxu1 %v18429_v28  ;;  %v11142_v28 = vld [vmem:[#allocation2 + $0x10] sm:$0x30] }
 0xfad   :  { %12003 = vmatpush1.bf16.msra.mxu0 %v18431_v3  ;;  %12044 = vmatpush1.bf16.msra.mxu1 %v18433_v27 }
 0xfae   :  { %12004 = vmatprep.subr.bf16.mxu0 %v18439_v50  ;;  %12045 = vmatprep.subr.bf16.mxu1 %v18441_v61 }
 0xfb1   :  { %12005 = vmatpush1.bf16.msra.mxu0 %v18443_v60  ;;  %12046 = vmatpush1.bf16.msra.mxu1 %v18445_v21 }
 0xfb2   :  { %12006 = vmatprep.subr.bf16.mxu0 %v18451_v24  ;;  %12047 = vmatprep.subr.bf16.mxu1 %v18453_v9 }
 0xfb5   :  { %12007 = vmatpush1.bf16.msra.mxu0 %v18455_v13  ;;  %12048 = vmatpush1.bf16.msra.mxu1 %v18457_v45  ;;  %v11756_v13 = vrot.slane %v18470_v47, 6 }
 0xfb6   :  { %12290 = vmatprep.subr.bf16.mxu0 %v18463_v32  ;;  %12331 = vmatprep.subr.bf16.mxu1 %v18465_v34 }
0x1033   :  { %v11374_v55 = vpop.f32.mrf.mxu0  ;;  %v11415_v20 = vpop.f32.mrf.mxu1 }
0x1034   :  { %v11426_v23 = vrot.slane %v11374_v55, 4  ;;  %v11428_v8 = vrot.slane %v11415_v20, 4 }
0x1035   :  { %v11376_v15 = vpop.f32.mrf.mxu0  ;;  %v11417_v54 = vpop.f32.mrf.mxu1 }
0x1036   :  { %v11434_v2 = vadd.f32 %v11426_v23, %v11140_v11  ;;  %v11427_v58 = vrot.slane %v11376_v15, 4  ;;  %v11429_v31 = vrot.slane %v11417_v54, 4  ;;  %v11436_v27 = vadd.f32 %v11428_v8, %v11142_v28  ;;  %v11439_v54 = vld [vmem:[#allocation2 + $0x68] sm:$0xc] }
0x1037   :  { %v11378_v42 = vpop.f32.mrf.mxu0  ;;  %v11419_v25 = vpop.f32.mrf.mxu1  ;;  %v11440_v8 = vld [vmem:[#allocation2 + $0x8] sm:$0xc] }
0x1038   :  { %v14495_v26 = vmul.f32 -1.442695, %v11434_v2  ;;  %v11435_v6 = vadd.f32 %v11427_v58, %v11141_v59  ;;  %v11437_v39 = vadd.f32 %v11429_v31, %v11143_v1 }
0x1039   :  { %v11379_v40 = vpop.f32.mrf.mxu0  ;;  %v11420_v17 = vpop.f32.mrf.mxu1 }
0x103a   :  { %16041 = vpow2.f32 %v14495_v26  ;;  %v14496_v4 = vmul.f32 -1.442695, %v11435_v6  ;;  %v14497_v30 = vmul.f32 -1.442695, %v11437_v39  ;;  %v11441_v40 = vld [vmem:[#allocation2 + $0x48] sm:$0xc] }
0x103c   :  { %16043 = vpow2.f32 %v14496_v4 }
0x103d   :  { %16045 = vpow2.f32 %v14497_v30 }
0x1047   :  { %v16042_v3 = vpop.eup %16041 }
0x1048   :  { %v11739_v50 = vadd.f32 1.0, %v16042_v3 }
0x1049   :  { %v16044_v61 = vpop.eup %16043 }
0x104a   :  { %16047 = vrcp.f32 %v11739_v50  ;;  %v11745_v60 = vadd.f32 1.0, %v16044_v61  ;;  %v16046_v21 = vpop.eup %16045 }
0x104b   :  { %16049 = vtanh.f32 %v11436_v27  ;;  %v11752_v48 = vadd.f32 1.0, %v16046_v21 }
0x104c   :  { %16051 = vrcp.f32 %v11745_v60 }
0x104d   :  { %16053 = vrcp.f32 %v11752_v48  ;;  %v15463_v48 = vld [vmem:[#allocation14 + $0xf4] ss:$24 sps:$4 sm:$0xff]  }
0x1057   :  { %v16048_v24 = vpop.eup %16047 }
0x1058   :  { %v16050_v9 = vpop.eup %16049  ;;  %v11672_v45 = vpop.f32.mrf.mxu0 }
0x1059   :  { %v11713_v32 = vpop.f32.mrf.mxu1  ;;  %v16052_v34 = vpop.eup %16051  ;;  %v11724_v12 = vrot.slane %v11672_v45, 6  ;;  %v11759_v0 = vmul.f32 %v16050_v9, %v16048_v24  ;;  %v15449_v45 = vld [vmem:[#allocation14 + $0x150] ss:$24 sps:$4 sm:$0xff]  }
0x105a   :  { %v11758_v37 = vmul.f32 %v16052_v34, %v11756_v13  ;;  %v11674_v55 = vpop.f32.mrf.mxu0  ;;  %v11726_v4 = vrot.slane %v11713_v32, 6  ;;  %v16054_v31 = vpop.eup %16053  ;;  %v15451_v13 = vld [vmem:[#allocation14 + $0x154] ss:$24 sps:$4 sm:$0xff]   ;;  %v15452_v34 = vld [vmem:[#allocation14 + $0x158] ss:$24 sps:$4 sm:$0xff]  }
0x105b   :  { %v11715_v20 = vpop.f32.mrf.mxu1  ;;  %v11732_v23 = vadd.f32 %v11724_v12, %v11438_v36  ;;  %v11725_v11 = vrot.slane %v11674_v55, 6  ;;  %v15454_v32 = vld [vmem:[#allocation14 + $0x15c] ss:$24 sps:$4 sm:$0xff]   ;;  %v15461_v12 = vld [vmem:[#allocation14 + $0xf0] ss:$24 sps:$4 sm:$0xff]  }
0x105c   :  { %v18606_v15 = vadd.f32 %v11759_v0, %v11758_v37  ;;  %v11676_v2 = vpop.f32.mrf.mxu0  ;;  %v11727_v6 = vrot.slane %v11715_v20, 6  ;;  %v11734_v28 = vadd.f32 %v11726_v4, %v11440_v8  ;;  %v15466_v0 = vld [vmem:[#allocation14 + $0xfc] ss:$24 sps:$4 sm:$0xff]   ;;  %v15464_v37 = vld [vmem:[#allocation14 + $0xf8] ss:$24 sps:$4 sm:$0xff]  }
0x105d   :  { %v11717_v58 = vpop.f32.mrf.mxu1  ;;  %v14498_v59 = vmul.f32 -1.442695, %v11732_v23  ;;  %v11733_v47 = vadd.f32 %v11725_v11, %v11439_v54  ;;  %v15469_v36 = vld [vmem:[#allocation14 + $0xc4] ss:$24 sps:$4 sm:$0xff]   ;;  %v15467_v55 = vld [vmem:[#allocation14 + $0xc0] ss:$24 sps:$4 sm:$0xff]  }
0x105e   :  { %16055 = vtanh.f32 %v18606_v15  ;;  %v11677_v42 = vpop.f32.mrf.mxu0  ;;  %v11735_v17 = vadd.f32 %v11727_v6, %v11441_v40  ;;  %v15472_v20 = vld [vmem:[#allocation14 + $0xcc] ss:$24 sps:$4 sm:$0xff]   ;;  %v15470_v23 = vld [vmem:[#allocation14 + $0xc8] ss:$24 sps:$4 sm:$0xff]   ;;  %v15478_v2 = vld [vmem:[#allocation14 + $0x9c] ss:$24 sps:$4 sm:$0xff]  }
0x105f   :  { %v11718_v25 = vpop.f32.mrf.mxu1  ;;  %16057 = vpow2.f32 %v14498_v59  ;;  %v14499_v26 = vmul.f32 -1.442695, %v11733_v47  ;;  %v15475_v11 = vld [vmem:[#allocation14 + $0x94] ss:$24 sps:$4 sm:$0xff]   ;;  %v15473_v54 = vld [vmem:[#allocation14 + $0x90] ss:$24 sps:$4 sm:$0xff]  }
0x1060   :  { %v14500_v1 = vmul.f32 -1.442695, %v11735_v17  ;;  %v15476_v58 = vld [vmem:[#allocation14 + $0x98] ss:$24 sps:$4 sm:$0xff]   ;;  %v15481_v59 = vld [vmem:[#allocation14 + $0x64] ss:$24 sps:$4 sm:$0xff]  }
0x1061   :  { %16059 = vpow2.f32 %v14499_v26  ;;  %v15479_v47 = vld [vmem:[#allocation14 + $0x60] ss:$24 sps:$4 sm:$0xff]   ;;  %v15484_v42 = vld [vmem:[#allocation14 + $0x6c] ss:$24 sps:$4 sm:$0xff]   ;;  %v15485_v6 = vld [vmem:[#allocation14 + $0x30] ss:$24 sps:$4 sm:$0xff]  }
0x1062   :  { %16061 = vpow2.f32 %v14500_v1  ;;  %v15482_v25 = vld [vmem:[#allocation14 + $0x68] ss:$24 sps:$4 sm:$0xff]   ;;  %v15487_v26 = vld [vmem:[#allocation14 + $0x34] ss:$24 sps:$4 sm:$0xff]   ;;  %v15488_v17 = vld [vmem:[#allocation14 + $0x38] ss:$24 sps:$4 sm:$0xff]  }
0x1063   :  { %v15490_v40 = vld [vmem:[#allocation14 + $0x3c] ss:$24 sps:$4 sm:$0xff]   ;;  %v15496_v1 = vld [vmem:[#allocation14 + $0xc] ss:$24 sps:$4 sm:$0xff]  }
0x1064   :  { %v15493_v4 = vld [vmem:[#allocation14 + $0x4] ss:$24 sps:$4 sm:$0xff]   ;;  %v15499_v8 = vld [vmem:[#allocation14 + $0x2d4] ss:$24 sps:$4 sm:$0xff]  }
0x106b   :  { %v16056_v39 = vpop.eup %16055 }
0x106c   :  { %v16058_v30 = vpop.eup %16057  ;;  %v11762_v3 = vmul.f32 %v16056_v39, %v16054_v31  ;;  %v15491_v31 = vld [vmem:[#allocation14] ss:$24 sps:$4 sm:$0xff]  }
0x106d   :  { %v11766_v27 = vadd.f32 1.0, %v16058_v30  ;;  %v15494_v39 = vld [vmem:[#allocation14 + $0x8] ss:$24 sps:$4 sm:$0xff]  }
0x106e   :  { %v16060_v50 = vpop.eup %16059  ;;  %11790 = vst [vmem:[#allocation3 + $0x10] sm:$0x30] %v11762_v3  ;;  %v11796_v61 = vpack.c.bf16 %v11762_v3, %v11762_v3  ;;  %v15497_v30 = vld [vmem:[#allocation14 + $0x2d0] ss:$24 sps:$4 sm:$0xff]  }
0x106f   :  { %16063 = vrcp.f32 %v11766_v27  ;;  %v11772_v60 = vadd.f32 1.0, %v16060_v50  ;;  %v16062_v24 = vpop.eup %16061  ;;  %v15500_v3 = vld [vmem:[#allocation14 + $0x2d8] ss:$24 sps:$4 sm:$0xff]   ;;  %v15505_v27 = vld [vmem:[#allocation14 + $0x2a4] ss:$24 sps:$4 sm:$0xff]  }
0x1070   :  { %16065 = vtanh.f32 %v11734_v28  ;;  %v11830_v21 = vrot.slane %v11796_v61, 2  ;;  %v15502_v28 = vld [vmem:[#allocation14 + $0x2dc] ss:$24 sps:$4 sm:$0xff]   ;;  %v15503_v50 = vld [vmem:[#allocation14 + $0x2a0] ss:$24 sps:$4 sm:$0xff]  }
0x1071   :  { %16067 = vrcp.f32 %v11772_v60  ;;  %v15508_v61 = vld [vmem:[#allocation14 + $0x2ac] ss:$24 sps:$4 sm:$0xff]   ;;  %v15506_v60 = vld [vmem:[#allocation14 + $0x2a8] ss:$24 sps:$4 sm:$0xff]  }
0x1072   :  { %12025 = vmatmul.mubr.bf16.vlgmr.msra.gmra.mxu0 %v11830_v21  ;;  %12066 = vmatmul.mubr.bf16.vlgmr.msra.gmra.mxu1 %v11830_v21  ;;  %v15511_v21 = vld [vmem:[#allocation14 + $0x274] ss:$24 sps:$4 sm:$0xff]  }
0x1073   :  { %12291 = vmatpush1.bf16.msra.mxu0 %v18473_v51  ;;  %12332 = vmatpush1.bf16.msra.mxu1 %v18475_v62  ;;  %v18877_v62 = vld [vmem:[#allocation32_spill] sm:$0xff] }
0x1074   :  { %12292 = vmatprep.subr.bf16.mxu0 %v18477_v53  ;;  %12333 = vmatprep.subr.bf16.mxu1 %v18479_v52 }
0x1075   :  { %12322 = vmatprep.mubr.bf16.mxu0 %v18781_v63  ;;  %12363 = vmatprep.mubr.bf16.mxu1 %v18781_v63  ;;  %v11783_v63 = vrot.slane %v18532_v22, 2 }
0x1077   :  { %12293 = vmatpush1.bf16.msra.mxu0 %v18483_v33  ;;  %12334 = vmatpush1.bf16.msra.mxu1 %v18485_v19  ;;  %v11779_v33 = vadd.f32 1.0, %v16062_v24  ;;  %v15509_v24 = vld [vmem:[#allocation14 + $0x270] ss:$24 sps:$4 sm:$0xff]  }
0x1078   :  { %12294 = vmatprep.subr.bf16.mxu0 %v18489_v57  ;;  %12335 = vmatprep.subr.bf16.mxu1 %v18491_v16  ;;  %v18878_v16 = vld [vmem:[#allocation19_spill] sm:$0xff] }
0x1079   :  { %16069 = vrcp.f32 %v11779_v33  ;;  %v15518_v33 = vld [vmem:[#allocation14 + $0x248] ss:$24 sps:$4 sm:$0xff]  }
0x107b   :  { %12295 = vmatpush1.bf16.msra.mxu0 %v18497_v10  ;;  %12336 = vmatpush1.bf16.msra.mxu1 %v18499_v7  ;;  %v18879_v10 = vld [vmem:[#allocation33_spill] sm:$0xff]  ;;  %v18880_v7 = vld [vmem:[#allocation26_spill] sm:$0xff] }
0x107c   :  { %v16064_v51 = vpop.eup %16063  ;;  %12296 = vmatprep.subr.bf16.mxu0 %v18503_v38  ;;  %12337 = vmatprep.subr.bf16.mxu1 %v18877_v62  ;;  %v18881_v38 = vld [vmem:[#allocation27_spill] sm:$0xff]  ;;  %v15512_v62 = vld [vmem:[#allocation14 + $0x278] ss:$24 sps:$4 sm:$0xff]  }
0x107d   :  { %v16066_v53 = vpop.eup %16065 }
0x107e   :  { %v16068_v52 = vpop.eup %16067  ;;  %v11786_v19 = vmul.f32 %v16066_v53, %v16064_v51  ;;  %v15514_v51 = vld [vmem:[#allocation14 + $0x27c] ss:$24 sps:$4 sm:$0xff]  }
0x107f   :  { %v11785_v9 = vmul.f32 %v16068_v52, %v11783_v63  ;;  %12297 = vmatpush1.bf16.msra.mxu0 %v18509_v43  ;;  %12338 = vmatpush1.bf16.msra.mxu1 %v18511_v35  ;;  %v18882_v43 = vld [vmem:[#allocation28_spill] sm:$0xff]  ;;  %v18883_v35 = vld [vmem:[#allocation29_spill] sm:$0xff]  ;;  %v15517_v53 = vld [vmem:[#allocation14 + $0x244] ss:$24 sps:$4 sm:$0xff]  }
0x1080   :  { %12298 = vmatprep.subr.bf16.mxu0 %v18515_v44  ;;  %12339 = vmatprep.subr.bf16.mxu1 %v18517_v56  ;;  %v18884_v44 = vld [vmem:[#allocation30_spill] sm:$0xff]  ;;  %v15520_v52 = vld [vmem:[#allocation14 + $0x24c] ss:$24 sps:$4 sm:$0xff]  }
0x1081   :  { %v18628_v57 = vadd.f32 %v11786_v19, %v11785_v9  ;;  %v15515_v63 = vld [vmem:[#allocation14 + $0x240] ss:$24 sps:$4 sm:$0xff]   ;;  %v15521_v19 = vld [vmem:[#allocation14 + $0x210] ss:$24 sps:$4 sm:$0xff]   ;;  %v15523_v9 = vld [vmem:[#allocation14 + $0x214] ss:$24 sps:$4 sm:$0xff]  }
0x1083   :  { %16071 = vtanh.f32 %v18628_v57  ;;  %12299 = vmatpush1.bf16.msra.mxu0 %v18522_v41  ;;  %12340 = vmatpush1.bf16.msra.mxu1 %v18524_v29 }
0x1084   :  { %12300 = vmatprep.subr.bf16.mxu0 %v18528_v49  ;;  %12341 = vmatprep.subr.bf16.mxu1 %v18878_v16  ;;  %v15524_v16 = vld [vmem:[#allocation14 + $0x218] ss:$24 sps:$4 sm:$0xff]  }
0x1086   :  { %v16070_v56 = vpop.eup %16069 }
0x1087   :  { %12301 = vmatpush1.bf16.msra.mxu0 %v18879_v10  ;;  %12342 = vmatpush1.bf16.msra.mxu1 %v18880_v7  ;;  %v15526_v10 = vld [vmem:[#allocation14 + $0x21c] ss:$24 sps:$4 sm:$0xff]  }
0x1088   :  { %12302 = vmatprep.subr.bf16.mxu0 %v18881_v38  ;;  %12343 = vmatprep.subr.bf16.mxu1 %v18882_v43  ;;  %v15529_v7 = vld [vmem:[#allocation14 + $0x1e4] ss:$24 sps:$4 sm:$0xff]   ;;  %v15527_v43 = vld [vmem:[#allocation14 + $0x1e0] ss:$24 sps:$4 sm:$0xff]  }
0x1089   :  { %v15532_v38 = vld [vmem:[#allocation14 + $0x1ec] ss:$24 sps:$4 sm:$0xff]  }
0x108b   :  { %12303 = vmatpush1.bf16.msra.mxu0 %v18883_v35  ;;  %12344 = vmatpush1.bf16.msra.mxu1 %v18884_v44  ;;  %v15530_v35 = vld [vmem:[#allocation14 + $0x1e8] ss:$24 sps:$4 sm:$0xff]   ;;  %v15535_v44 = vld [vmem:[#allocation14 + $0x1b4] ss:$24 sps:$4 sm:$0xff]  }
0x108c   :  { %12304 = vmatprep.subr.bf16.mxu0 %v18555_v46  ;;  %12345 = vmatprep.subr.bf16.mxu1 %v18557_v14  ;;  %v15457_v46 = vld [vmem:[#allocation14 + $0x124] ss:$24 sps:$4 sm:$0xff]   ;;  %v15455_v14 = vld [vmem:[#allocation14 + $0x120] ss:$24 sps:$4 sm:$0xff]  }
0x108f   :  { %12305 = vmatpush1.bf16.msra.mxu0 %v18561_v5  ;;  %12346 = vmatpush1.bf16.msra.mxu1 %v18563_v18  ;;  %v15460_v5 = vld [vmem:[#allocation14 + $0x12c] ss:$24 sps:$4 sm:$0xff]   ;;  %v15458_v18 = vld [vmem:[#allocation14 + $0x128] ss:$24 sps:$4 sm:$0xff]  }
0x1090   :  { %v16072_v41 = vpop.eup %16071  ;;  %13046 = vmatprep.subr.bf16.mxu0 %v15451_v13  ;;  %13089 = vmatprep.subr.bf16.mxu1 %v15454_v32  ;;  %v15539_v13 = vld [vmem:[#allocation14 + $0x180] ss:$24 sps:$4 sm:$0xff]   ;;  %v15547_v32 = vld [vmem:[#allocation14 + $0x164] ss:$24 sps:$4 sm:$0xff]  }
0x1091   :  { %v11789_v29 = vmul.f32 %v16072_v41, %v16070_v56  ;;  %v15538_v56 = vld [vmem:[#allocation14 + $0x1bc] ss:$24 sps:$4 sm:$0xff]   ;;  %v15533_v41 = vld [vmem:[#allocation14 + $0x1b0] ss:$24 sps:$4 sm:$0xff]  }
0x1093   :  { %11791 = vst [vmem:[#allocation3 + $0x8] sm:$0xc] %v11789_v29  ;;  %v12094_v49 = vpack.c.bf16 %v11789_v29, %v11789_v29  ;;  %v15536_v29 = vld [vmem:[#allocation14 + $0x1b8] ss:$24 sps:$4 sm:$0xff]  }
0x1095   :  { %v12128_v22 = vrot.slane %v12094_v49, 1  ;;  %v15541_v49 = vld [vmem:[#allocation14 + $0x184] ss:$24 sps:$4 sm:$0xff]  }
0x1097   :  { %12323 = vmatmul.mubr.bf16.vlgmr.msra.gmra.mxu0 %v12128_v22  ;;  %12364 = vmatmul.mubr.bf16.vlgmr.msra.gmra.mxu1 %v12128_v22  ;;  %v15544_v22 = vld [vmem:[#allocation14 + $0x18c] ss:$24 sps:$4 sm:$0xff]  }
0x1098   :  { %13047 = vmatpush1.bf16.msra.mxu0 %v15449_v45  ;;  %13090 = vmatpush1.bf16.msra.mxu1 %v15452_v34  ;;  %v15542_v45 = vld [vmem:[#allocation14 + $0x188] ss:$24 sps:$4 sm:$0xff]  }
0x1099   :  { %13048 = vmatprep.subr.bf16.mxu0 %v15457_v46  ;;  %13091 = vmatprep.subr.bf16.mxu1 %v15460_v5  ;;  %v11792_v5 = vld [vmem:[#allocation2 + $0x40] sm:$0xc0] }
0x109c   :  { %13049 = vmatpush1.bf16.msra.mxu0 %v15455_v14  ;;  %13092 = vmatpush1.bf16.msra.mxu1 %v15458_v18 }
0x109d   :  { %13050 = vmatprep.subr.bf16.mxu0 %v15463_v48  ;;  %13093 = vmatprep.subr.bf16.mxu1 %v15466_v0 }
0x10a0   :  { %13051 = vmatpush1.bf16.msra.mxu0 %v15461_v12  ;;  %13094 = vmatpush1.bf16.msra.mxu1 %v15464_v37  ;;  %v11793_v37 = vld [vmem:[#allocation2 + $0x20] sm:$0xc0] }
0x10a1   :  { %13052 = vmatprep.subr.bf16.mxu0 %v15469_v36  ;;  %13095 = vmatprep.subr.bf16.mxu1 %v15472_v20 }
0x10a4   :  { %13053 = vmatpush1.bf16.msra.mxu0 %v15467_v55  ;;  %13096 = vmatpush1.bf16.msra.mxu1 %v15470_v23 }
0x10a5   :  { %13054 = vmatprep.subr.bf16.mxu0 %v15475_v11  ;;  %13097 = vmatprep.subr.bf16.mxu1 %v15478_v2 }
0x10a8   :  { %13055 = vmatpush1.bf16.msra.mxu0 %v15473_v54  ;;  %13098 = vmatpush1.bf16.msra.mxu1 %v15476_v58 }
0x10a9   :  { %13056 = vmatprep.subr.bf16.mxu0 %v15481_v59  ;;  %13099 = vmatprep.subr.bf16.mxu1 %v15484_v42  ;;  %v11795_v59 = vld [vmem:[#allocation2 + $0x38] sm:$0xc0] }
0x10ac   :  { %13057 = vmatpush1.bf16.msra.mxu0 %v15479_v47  ;;  %13100 = vmatpush1.bf16.msra.mxu1 %v15482_v25 }
0x10ad   :  { %13058 = vmatprep.subr.bf16.mxu0 %v15487_v26  ;;  %13101 = vmatprep.subr.bf16.mxu1 %v15490_v40  ;;  %v11794_v26 = vld [vmem:[#allocation2 + $0x10] sm:$0xc0] }
0x10b0   :  { %13059 = vmatpush1.bf16.msra.mxu0 %v15485_v6  ;;  %13102 = vmatpush1.bf16.msra.mxu1 %v15488_v17 }
0x10b1   :  { %13060 = vmatprep.subr.bf16.mxu0 %v15493_v4  ;;  %13103 = vmatprep.subr.bf16.mxu1 %v15496_v1 }
0x10b4   :  { %13061 = vmatpush1.bf16.msra.mxu0 %v15491_v31  ;;  %13104 = vmatpush1.bf16.msra.mxu1 %v15494_v39 }
0x10b5   :  { %13062 = vmatprep.subr.bf16.mxu0 %v15499_v8  ;;  %13105 = vmatprep.subr.bf16.mxu1 %v15502_v28 }
0x10b8   :  { %13063 = vmatpush2.bf16.msra.mxu0 %v15497_v30  ;;  %13106 = vmatpush2.bf16.msra.mxu1 %v15500_v3  ;;  %v12396_v30 = vrot.slane %v18606_v15, 6  ;;  %v12090_v3 = vld [vmem:[#allocation2 + $0x50] sm:$0x3] }
0x10b9   :  { %13064 = vmatprep.subr.bf16.mxu0 %v15505_v27  ;;  %13107 = vmatprep.subr.bf16.mxu1 %v15508_v61 }
0x10bc   :  { %13065 = vmatpush2.bf16.msra.mxu0 %v15503_v50  ;;  %13108 = vmatpush2.bf16.msra.mxu1 %v15506_v60 }
0x10bd   :  { %13066 = vmatprep.subr.bf16.mxu0 %v15511_v21  ;;  %13109 = vmatprep.subr.bf16.mxu1 %v15514_v51  ;;  %v12091_v51 = vld [vmem:[#allocation2 + $0x68] sm:$0x3] }
0x10c0   :  { %13067 = vmatpush2.bf16.msra.mxu0 %v15509_v24  ;;  %13110 = vmatpush2.bf16.msra.mxu1 %v15512_v62 }
0x10c1   :  { %13068 = vmatprep.subr.bf16.mxu0 %v15517_v53  ;;  %13111 = vmatprep.subr.bf16.mxu1 %v15520_v52 }
0x10c4   :  { %13069 = vmatpush2.bf16.msra.mxu0 %v15515_v63  ;;  %13112 = vmatpush2.bf16.msra.mxu1 %v15518_v33 }
0x10c5   :  { %13070 = vmatprep.subr.bf16.mxu0 %v15523_v9  ;;  %13113 = vmatprep.subr.bf16.mxu1 %v15526_v10 }
0x10c8   :  { %13071 = vmatpush2.bf16.msra.mxu0 %v15521_v19  ;;  %13114 = vmatpush2.bf16.msra.mxu1 %v15524_v16 }
0x10c9   :  { %13072 = vmatprep.subr.bf16.mxu0 %v15529_v7  ;;  %13115 = vmatprep.subr.bf16.mxu1 %v15532_v38  ;;  %v12093_v7 = vld [vmem:[#allocation2 + $0x48] sm:$0x3] }
0x10cc   :  { %13073 = vmatpush2.bf16.msra.mxu0 %v15527_v43  ;;  %13116 = vmatpush2.bf16.msra.mxu1 %v15530_v35 }
0x10cd   :  { %13074 = vmatprep.subr.bf16.mxu0 %v15535_v44  ;;  %13117 = vmatprep.subr.bf16.mxu1 %v15538_v56  ;;  %v12092_v44 = vld [vmem:[#allocation2 + $0x8] sm:$0x3] }
0x10d0   :  { %13075 = vmatpush2.bf16.msra.mxu0 %v15533_v41  ;;  %13118 = vmatpush2.bf16.msra.mxu1 %v15536_v29 }
0x10d1   :  { %13076 = vmatprep.subr.bf16.mxu0 %v15541_v49  ;;  %13119 = vmatprep.subr.bf16.mxu1 %v15544_v22 }
0x10d4   :  { %13077 = vmatpush2.bf16.msra.mxu0 %v15539_v13  ;;  %13120 = vmatpush2.bf16.msra.mxu1 %v15542_v45 }
0x10d5   :  { %13132 = vmatprep.subr.bf16.mxu0 %v15547_v32 }
0x1132   :  { %v12026_v34 = vpop.f32.mrf.mxu0  ;;  %v12067_v46 = vpop.f32.mrf.mxu1 }
0x1133   :  { %v12078_v14 = vrot.slane %v12026_v34, 2  ;;  %v12080_v42 = vrot.slane %v12067_v46, 2 }
0x1134   :  { %v12028_v18 = vpop.f32.mrf.mxu0  ;;  %v12069_v48 = vpop.f32.mrf.mxu1 }
0x1135   :  { %v12086_v12 = vadd.f32 %v12078_v14, %v11792_v5  ;;  %v12079_v0 = vrot.slane %v12028_v18, 2  ;;  %v12081_v58 = vrot.slane %v12069_v48, 2  ;;  %v12088_v40 = vadd.f32 %v12080_v42, %v11794_v26  ;;  %v15553_v42 = vld [vmem:[#allocation14 + $0x104] ss:$24 sps:$4 sm:$0xff]   ;;  %v15556_v26 = vld [vmem:[#allocation14 + $0xd4] ss:$24 sps:$4 sm:$0xff]  }
0x1136   :  { %v12030_v36 = vpop.f32.mrf.mxu0  ;;  %v12071_v55 = vpop.f32.mrf.mxu1  ;;  %v12423_v14 = vrot.slane %v18628_v57, 2  ;;  %v15550_v57 = vld [vmem:[#allocation14 + $0x134] ss:$24 sps:$4 sm:$0xff]  }
0x1137   :  { %v14565_v20 = vmul.f32 -1.442695, %v12086_v12  ;;  %v12087_v23 = vadd.f32 %v12079_v0, %v11793_v37  ;;  %v12089_v47 = vadd.f32 %v12081_v58, %v11795_v59  ;;  %v12432_v58 = vld [vmem:[#allocation3 + $0x18] sm:$0xff] }
0x1138   :  { %v12031_v11 = vpop.f32.mrf.mxu0  ;;  %v12072_v54 = vpop.f32.mrf.mxu1 }
0x1139   :  { %16073 = vpow2.f32 %v14565_v20  ;;  %v14566_v2 = vmul.f32 -1.442695, %v12087_v23  ;;  %v14567_v25 = vmul.f32 -1.442695, %v12089_v47  ;;  %v12435_v11 = vld [vmem:[#allocation3] sm:$0xff] }
0x113a   :  { %v15548_v47 = vld [vmem:[#allocation14 + $0x130] ss:$24 sps:$4 sm:$0xff]  }
0x113b   :  { %16075 = vpow2.f32 %v14566_v2  ;;  %v15545_v2 = vld [vmem:[#allocation14 + $0x160] ss:$24 sps:$4 sm:$0xff]  }
0x113c   :  { %16077 = vpow2.f32 %v14567_v25  ;;  %v15551_v25 = vld [vmem:[#allocation14 + $0x100] ss:$24 sps:$4 sm:$0xff]  }
0x1146   :  { %v16074_v6 = vpop.eup %16073 }
0x1147   :  { %v12379_v17 = vadd.f32 1.0, %v16074_v6  ;;  %v15554_v6 = vld [vmem:[#allocation14 + $0xd0] ss:$24 sps:$4 sm:$0xff]  }
0x1148   :  { %v16076_v4 = vpop.eup %16075 }
0x1149   :  { %16079 = vrcp.f32 %v12379_v17  ;;  %v12385_v31 = vadd.f32 1.0, %v16076_v4  ;;  %v16078_v1 = vpop.eup %16077  ;;  %v15557_v17 = vld [vmem:[#allocation14 + $0xa0] ss:$24 sps:$4 sm:$0xff]   ;;  %v15562_v4 = vld [vmem:[#allocation14 + $0x74] ss:$24 sps:$4 sm:$0xff]  }
0x114a   :  { %16081 = vtanh.f32 %v12088_v40  ;;  %v12392_v28 = vadd.f32 1.0, %v16078_v1  ;;  %v15559_v40 = vld [vmem:[#allocation14 + $0xa4] ss:$24 sps:$4 sm:$0xff]  }
0x114b   :  { %16083 = vrcp.f32 %v12385_v31  ;;  %v15560_v31 = vld [vmem:[#allocation14 + $0x70] ss:$24 sps:$4 sm:$0xff]   ;;  %v15565_v1 = vld [vmem:[#allocation14 + $0x44] ss:$24 sps:$4 sm:$0xff]  }
0x114c   :  { %16085 = vrcp.f32 %v12392_v28  ;;  %v15571_v28 = vld [vmem:[#allocation14 + $0x2e4] ss:$24 sps:$4 sm:$0xff]  }
0x1156   :  { %v16080_v39 = vpop.eup %16079 }
0x1157   :  { %v16082_v8 = vpop.eup %16081  ;;  %v12324_v27 = vpop.f32.mrf.mxu0 }
0x1158   :  { %v12365_v50 = vpop.f32.mrf.mxu1  ;;  %v16084_v61 = vpop.eup %16083  ;;  %v12372_v60 = vadd.f32 %v12324_v27, %v12090_v3  ;;  %v12399_v21 = vmul.f32 %v16082_v8, %v16080_v39  ;;  %v15563_v39 = vld [vmem:[#allocation14 + $0x40] ss:$24 sps:$4 sm:$0xff]   ;;  %v15568_v8 = vld [vmem:[#allocation14 + $0x14] ss:$24 sps:$4 sm:$0xff]  }
0x1159   :  { %v12398_v24 = vmul.f32 %v16084_v61, %v12396_v30  ;;  %v12326_v62 = vpop.f32.mrf.mxu0  ;;  %v16086_v35 = vpop.eup %16085  ;;  %v12374_v41 = vadd.f32 %v12365_v50, %v12092_v44  ;;  %v15566_v30 = vld [vmem:[#allocation14 + $0x10] ss:$24 sps:$4 sm:$0xff]   ;;  %v15569_v3 = vld [vmem:[#allocation14 + $0x2e0] ss:$24 sps:$4 sm:$0xff]   ;;  %v15574_v27 = vld [vmem:[#allocation14 + $0x2b4] ss:$24 sps:$4 sm:$0xff]  }
0x115a   :  { %v12367_v53 = vpop.f32.mrf.mxu1  ;;  %v14568_v63 = vmul.f32 -1.442695, %v12372_v60  ;;  %v12373_v52 = vadd.f32 %v12326_v62, %v12091_v51  ;;  %v15572_v50 = vld [vmem:[#allocation14 + $0x2b0] ss:$24 sps:$4 sm:$0xff]   ;;  %v15577_v61 = vld [vmem:[#allocation14 + $0x284] ss:$24 sps:$4 sm:$0xff]  }
0x115b   :  { %v12400_v33 = vadd.f32 %v12399_v21, %v12398_v24  ;;  %v12328_v19 = vpop.f32.mrf.mxu0  ;;  %v12375_v38 = vadd.f32 %v12367_v53, %v12093_v7  ;;  %v15575_v60 = vld [vmem:[#allocation14 + $0x280] ss:$24 sps:$4 sm:$0xff]   ;;  %v15580_v21 = vld [vmem:[#allocation14 + $0x254] ss:$24 sps:$4 sm:$0xff]   ;;  %v15578_v24 = vld [vmem:[#allocation14 + $0x250] ss:$24 sps:$4 sm:$0xff]  }
0x115c   :  { %v12369_v9 = vpop.f32.mrf.mxu1  ;;  %16087 = vpow2.f32 %v14568_v63  ;;  %v14569_v16 = vmul.f32 -1.442695, %v12373_v52  ;;  %v15583_v51 = vld [vmem:[#allocation14 + $0x224] ss:$24 sps:$4 sm:$0xff]   ;;  %v15581_v62 = vld [vmem:[#allocation14 + $0x220] ss:$24 sps:$4 sm:$0xff]  }
0x115d   :  { %16089 = vtanh.f32 %v12400_v33  ;;  %v12329_v15 = vpop.f32.mrf.mxu0  ;;  %v14570_v43 = vmul.f32 -1.442695, %v12375_v38  ;;  %v15586_v53 = vld [vmem:[#allocation14 + $0x1f4] ss:$24 sps:$4 sm:$0xff]   ;;  %v15584_v63 = vld [vmem:[#allocation14 + $0x1f0] ss:$24 sps:$4 sm:$0xff]  }
0x115e   :  { %v12370_v10 = vpop.f32.mrf.mxu1  ;;  %16091 = vpow2.f32 %v14569_v16  ;;  %v15589_v52 = vld [vmem:[#allocation14 + $0x1c4] ss:$24 sps:$4 sm:$0xff]   ;;  %v15587_v33 = vld [vmem:[#allocation14 + $0x1c0] ss:$24 sps:$4 sm:$0xff]   ;;  %v15592_v19 = vld [vmem:[#allocation14 + $0x194] ss:$24 sps:$4 sm:$0xff]  }
0x115f   :  { %16093 = vpow2.f32 %v14570_v43  ;;  %v15590_v9 = vld [vmem:[#allocation14 + $0x190] ss:$24 sps:$4 sm:$0xff]   ;;  %v12534_v16 = vld [vmem:[%s18707_s10] sm:$0x3f]  ;;  %v18885_v15 = vld [vmem:[#allocation22_spill] sm:$0xff] }
0x1160   :  { %v12539_v10 = vrot.slane %v12534_v16, %v18885_v15  ;;  %v18886_v7 = vld [vmem:[#allocation20_spill] sm:$0xff]  ;;  %v18887_v43 = vld [vmem:[#allocation23_spill] sm:$0xff]  ;;  %v18888_v44 = vld [vmem:[#allocation21_spill] sm:$0xff] }
0x1161   :  { %v12547_v38 = vrot.slane %v12534_v16, %v18886_v7 }
0x1169   :  { %v16088_v56 = vpop.eup %16087 }
0x116a   :  { %v16090_v29 = vpop.eup %16089  ;;  %v12406_v49 = vadd.f32 1.0, %v16088_v56  ;;  %v12551_v56 = vrot.slane %v12534_v16, %v18888_v44 }
0x116b   :  { %v16092_v22 = vpop.eup %16091  ;;  %v12402_v13 = vmul.f32 %v16090_v29, %v16086_v35  ;;  %v12543_v35 = vrot.slane %v12534_v16, %v18887_v43 }
0x116c   :  { %16095 = vrcp.f32 %v12406_v49  ;;  %v12412_v45 = vadd.f32 1.0, %v16092_v22  ;;  %v16094_v32 = vpop.eup %16093 }
0x116d   :  { %12430 = vst [vmem:[#allocation3 + $0x10] sm:$0xc0] %v12402_v13  ;;  %16097 = vtanh.f32 %v12374_v41  ;;  %v12419_v18 = vadd.f32 1.0, %v16094_v32 }
0x116e   :  { %16099 = vrcp.f32 %v12412_v45 }
0x116f   :  { %16101 = vrcp.f32 %v12419_v18 }
0x1174   :  { %v12434_v20 = vld [vmem:[#allocation3 + $0x10] sm:$0xff] }
0x1175   :  { %v18647_v59 = vpack.c.bf16 %v12434_v20, %v12432_v58  ;;  %v18890_v20 = vld [vmem:[#allocation25_spill] sm:$0xff] }
0x1179   :  { %v16096_v34 = vpop.eup %16095 }
0x117a   :  { %v16098_v46 = vpop.eup %16097 }
0x117b   :  { %v16100_v5 = vpop.eup %16099  ;;  %v12426_v48 = vmul.f32 %v16098_v46, %v16096_v34 }
0x117c   :  { %v12425_v12 = vmul.f32 %v16100_v5, %v12423_v14  ;;  %v16102_v37 = vpop.eup %16101 }
0x117e   :  { %v12427_v0 = vadd.f32 %v12426_v48, %v12425_v12 }
0x1180   :  { %16103 = vtanh.f32 %v12427_v0 }
0x118d   :  { %v16104_v36 = vpop.eup %16103 }
0x118e   :  { %v12429_v55 = vmul.f32 %v16104_v36, %v16102_v37  ;;  %v18889_v36 = vld [vmem:[#allocation24_spill] sm:$0xff] }
0x1190   :  { %12431 = vst [vmem:[#allocation3 + $0x8] sm:$0x3] %v12429_v55  ;;  %v12555_v55 = vrot.slane %v12534_v16, %v18889_v36 }
0x1197   :  { %v12433_v23 = vld [vmem:[#allocation3 + $0x8] sm:$0xff] }
0x1198   :  { %v12437_v54 = vpack.c.bf16 %v12435_v11, %v12433_v23  ;;  %v12559_v23 = vrot.slane %v12534_v16, %v18890_v20 }
0x119a   :  { %13078 = vmatprep.mubr.bf16.mxu0 %v12437_v54  ;;  %13121 = vmatprep.mubr.bf16.mxu1 %v12437_v54 }
0x119b   :  { %13079 = vmatmul.mubr.bf16.vlgmr.msra.gmra.mxu0 %v18647_v59  ;;  %13122 = vmatmul.mubr.bf16.vlgmr.msra.gmra.mxu1 %v18647_v59 }
0x119c   :  { %13133 = vmatpush1.bf16.msra.mxu0 %v15545_v2  ;;  %13164 = vmatprep.mubr.bf16.mxu0 %v12437_v54 }
0x119d   :  { %13134 = vmatprep.subr.bf16.mxu0 %v15550_v57 }
0x11a0   :  { %13135 = vmatpush1.bf16.msra.mxu0 %v15548_v47 }
0x11a1   :  { %13136 = vmatprep.subr.bf16.mxu0 %v15553_v42 }
0x11a4   :  { %13137 = vmatpush1.bf16.msra.mxu0 %v15551_v25 }
0x11a5   :  { %13138 = vmatprep.subr.bf16.mxu0 %v15556_v26 }
0x11a8   :  { %13139 = vmatpush1.bf16.msra.mxu0 %v15554_v6 }
0x11a9   :  { %13140 = vmatprep.subr.bf16.mxu0 %v15559_v40 }
0x11ac   :  { %13141 = vmatpush1.bf16.msra.mxu0 %v15557_v17 }
0x11ad   :  { %13142 = vmatprep.subr.bf16.mxu0 %v15562_v4 }
0x11b0   :  { %13143 = vmatpush1.bf16.msra.mxu0 %v15560_v31 }
0x11b1   :  { %13144 = vmatprep.subr.bf16.mxu0 %v15565_v1 }
0x11b4   :  { %13145 = vmatpush1.bf16.msra.mxu0 %v15563_v39 }
0x11b5   :  { %13146 = vmatprep.subr.bf16.mxu0 %v15568_v8 }
0x11b8   :  { %13147 = vmatpush1.bf16.msra.mxu0 %v15566_v30 }
0x11b9   :  { %13148 = vmatprep.subr.bf16.mxu0 %v15571_v28 }
0x11bc   :  { %13149 = vmatpush2.bf16.msra.mxu0 %v15569_v3 }
0x11bd   :  { %13150 = vmatprep.subr.bf16.mxu0 %v15574_v27 }
0x11c0   :  { %13151 = vmatpush2.bf16.msra.mxu0 %v15572_v50 }
0x11c1   :  { %13152 = vmatprep.subr.bf16.mxu0 %v15577_v61 }
0x11c4   :  { %13153 = vmatpush2.bf16.msra.mxu0 %v15575_v60 }
0x11c5   :  { %13154 = vmatprep.subr.bf16.mxu0 %v15580_v21 }
0x11c8   :  { %13155 = vmatpush2.bf16.msra.mxu0 %v15578_v24 }
0x11c9   :  { %13156 = vmatprep.subr.bf16.mxu0 %v15583_v51 }
0x11cc   :  { %13157 = vmatpush2.bf16.msra.mxu0 %v15581_v62 }
0x11cd   :  { %13158 = vmatprep.subr.bf16.mxu0 %v15586_v53 }
0x11d0   :  { %13159 = vmatpush2.bf16.msra.mxu0 %v15584_v63 }
0x11d1   :  { %13160 = vmatprep.subr.bf16.mxu0 %v15589_v52 }
0x11d4   :  { %13161 = vmatpush2.bf16.msra.mxu0 %v15587_v33 }
0x11d5   :  { %13162 = vmatprep.subr.bf16.mxu0 %v15592_v19 }
0x11d8   :  { %13163 = vmatpush2.bf16.msra.mxu0 %v15590_v9 }
0x11db   :  { %13165 = vmatmul.mubr.bf16.vlgmr.msra.gmra.mxu0 %v18647_v59 }
0x125b   :  { %v13080_v41 = vpop.f32.mrf.mxu0  ;;  %v13123_v29 = vpop.f32.mrf.mxu1 }
0x125c   :  { %v13081_v49 = vadd.f32 %v13080_v41, %v12539_v10  ;;  %v13124_v22 = vadd.f32 %v13123_v29, %v12547_v38 }
0x125d   :  { %v13082_v13 = vpop.f32.mrf.mxu0  ;;  %v13125_v45 = vpop.f32.mrf.mxu1 }
0x125e   :  { %13175 = vst [vmem:[%s18708_s11] sm:$0xff] %v13081_v49  ;;  %13177 = vst [vmem:[%s18708_s11 + $0x10] sm:$0xff] %v13124_v22  ;;  %v13083_v32 = vadd.f32 %v13082_v13, %v12543_v35  ;;  %v13126_v34 = vadd.f32 %v13125_v45, %v12551_v56 }
0x125f   :  { %v13084_v46 = vpop.f32.mrf.mxu0  ;;  %v13127_v14 = vpop.f32.mrf.mxu1 }
0x1260   :  { %13176 = vst [vmem:[%s18708_s11 + $0x8] sm:$0xff] %v13083_v32  ;;  %13178 = vst [vmem:[%s18708_s11 + $0x18] sm:$0xff] %v13126_v34  ;;  %v13085_v5 = vadd.f32 %v13084_v46, %v12539_v10  ;;  %v13128_v18 = vadd.f32 %v13127_v14, %v12547_v38 }
0x1261   :  { %v13086_v48 = vpop.f32.mrf.mxu0  ;;  %v13129_v12 = vpop.f32.mrf.mxu1 }
0x1262   :  { %13181 = vst [vmem:[%s18708_s11 + $0x30] sm:$0xff] %v13085_v5  ;;  %13183 = vst [vmem:[%s18708_s11 + $0x40] sm:$0xff] %v13128_v18  ;;  %v13087_v0 = vadd.f32 %v13086_v48, %v12543_v35  ;;  %v13130_v37 = vadd.f32 %v13129_v12, %v12551_v56 }
0x1264   :  { %13182 = vst [vmem:[%s18708_s11 + $0x38] sm:$0xff] %v13087_v0  ;;  %13184 = vst [vmem:[%s18708_s11 + $0x48] sm:$0xff] %v13130_v37 }
0x129b   :  { %v13166_v11 = vpop.f32.mrf.mxu0 }
0x129c   :  { %v13167_v54 = vadd.f32 %v13166_v11, %v12555_v55 }
0x129d   :  { %v13168_v2 = vpop.f32.mrf.mxu0 }
0x129e   :  { %13179 = vst [vmem:[%s18708_s11 + $0x20] sm:$0xff] %v13167_v54  ;;  %v13169_v58 = vadd.f32 %v13168_v2, %v12559_v23 }
0x129f   :  { %v13170_v59 = vpop.f32.mrf.mxu0 }
0x12a0   :  { %13180 = vst [vmem:[%s18708_s11 + $0x28] sm:$0xff] %v13169_v58  ;;  %v13171_v57 = vadd.f32 %v13170_v59, %v12555_v55 }
0x12a1   :  { %v13172_v47 = vpop.f32.mrf.mxu0 }
0x12a2   :  { %13185 = vst [vmem:[%s18708_s11 + $0x50] sm:$0xff] %v13171_v57  ;;  %v13173_v42 = vadd.f32 %v13172_v47, %v12559_v23 }
0x12a4   :  { %13186 = vst [vmem:[%s18708_s11 + $0x58] sm:$0xff] %v13173_v42 }
0x12a5   :  { %13191 = vsyncpa [#allocation5], 1 }
0x12a6   :  { %13192 = vsyncpa [#allocation7], 1 }
0x12a7   :  { %13193 = vsyncpa [#allocation10], 1 }
0x12a8   :  { %13194 = vsyncpa [#allocation13], 1 }

</bundles_post_ra>
